<compile_context>
chip_gen: v7x
topology: tpu7x:2x2x1
jax: 0.10.0
libtpu: 0.0.40
codegen_flags: <defaults>
</compile_context>

<pallas_src>
import functools

import jax
import jax.numpy as jnp
from jax import lax
from jax.experimental import pallas as pl
from jax.experimental.pallas import tpu as pltpu

_LANE = 128


def _round_up(x, m):
    return ((x + m - 1) // m) * m


def _pick_band(H, W):
    """Largest divisor of H giving a modest per-band matmul M (= band * W)."""
    if H <= 1:
        return max(H, 1)
    cap = max(1, min(H // 2, max(8, 512 // max(W, 1))))
    for b in range(cap, 0, -1):
        if H % b == 0:
            return b
    return 1


def _silu_f32(v, approx=True):
    # SiLU = v * sigmoid(v); exp and (approx) reciprocal both go to the EUP slot.
    return v * pl.reciprocal(1.0 + jnp.exp(-v), approx=approx)


# ---------------------------------------------------------------------------
# Fused Bottleneck kernel.  Grid = (batch, output row-band).
# ---------------------------------------------------------------------------
def _bottleneck_kernel(x_ref, w1_ref, b1_ref, w2_ref, b2_ref, o_ref, h_ref,
                       *, K1, K2, p1, p2, add, band, nbands, H, W, approx_silu):
    # x_ref : (1, H+2*p1, W+2*p1, C1p)   bf16, spatially pre-padded, channel-padded
    # w1_ref: (K1*K1, C1p, Cmp)          bf16, BN1 scale folded in
    # b1_ref: (1, Cmp)                   f32 folded BN1 bias
    # w2_ref: (K2*K2, Cmp, C2p)          bf16, BN2 scale folded in
    # b2_ref: (1, C2p)                   f32 folded BN2 bias
    # o_ref : (1, band, W, C2p)          output row band (lane-dense last dim)
    # h_ref : (H+2*p2, W+2*p2, Cmp)      bf16 VMEM scratch (zero-padded intermediate)
    r = pl.program_id(1)
    c1p = x_ref.shape[3]
    cmid = h_ref.shape[2]
    c2p = o_ref.shape[3]

    # ---- Phase 1 (once per batch element): cv1 + folded BN + SiLU -> VMEM scratch.
    @pl.when(r == 0)
    def _phase1():
        if p2 > 0:
            # Zero only the p2-wide halo frame; the interior is fully overwritten.
            Hh, Wh = h_ref.shape[0], h_ref.shape[1]
            h_ref[0:p2, :, :] = jnp.zeros((p2, Wh, cmid), h_ref.dtype)
            h_ref[Hh - p2:Hh, :, :] = jnp.zeros((p2, Wh, cmid), h_ref.dtype)
            h_ref[:, 0:p2, :] = jnp.zeros((Hh, p2, cmid), h_ref.dtype)
            h_ref[:, Wh - p2:Wh, :] = jnp.zeros((Hh, p2, cmid), h_ref.dtype)

        def band_body(i, carry):
            h0 = i * band
            if band % 8 == 0:
                h0 = pl.multiple_of(h0, 8)
            acc = jnp.zeros((band * W, cmid), jnp.float32)
            for kh in range(K1):
                for kw in range(K1):
                    tap = x_ref[0, pl.ds(h0 + kh, band), kw:kw + W, :]
                    acc = acc + jnp.dot(tap.reshape(band * W, c1p),
                                        w1_ref[kh * K1 + kw],
                                        preferred_element_type=jnp.float32)
            y = _silu_f32(acc + b1_ref[...], approx_silu)
            h_ref[pl.ds(p2 + h0, band), p2:p2 + W, :] = (
                y.reshape(band, W, cmid).astype(h_ref.dtype))
            return carry

        lax.fori_loop(0, nbands, band_body, 0, unroll=(nbands <= 8))

    # ---- Phase 2 (every band): cv2 + folded BN + SiLU (+ residual) -> output band.
    h0 = r * band
    if band % 8 == 0:
        h0 = pl.multiple_of(h0, 8)
    acc = jnp.zeros((band * W, c2p), jnp.float32)
    for kh in range(K2):
        for kw in range(K2):
            tap = h_ref[pl.ds(h0 + kh, band), kw:kw + W, :]
            acc = acc + jnp.dot(tap.reshape(band * W, cmid),
                                w2_ref[kh * K2 + kw],
                                preferred_element_type=jnp.float32)
    y = _silu_f32(acc + b2_ref[...], approx_silu)
    if add:
        res = x_ref[0, pl.ds(p1 + h0, band), p1:p1 + W, :]
        y = y + res.reshape(band * W, c2p).astype(jnp.float32)
    o_ref[0, :, :, :] = y.reshape(band, W, c2p).astype(o_ref.dtype)


# ---------------------------------------------------------------------------
# Parameter folding / wrapper
# ---------------------------------------------------------------------------
def _fold_bn(gamma, beta, mean, var, eps=1e-5):
    scale = gamma / jnp.sqrt(var + eps)
    bias = beta - mean * scale
    return scale, bias


def _prep_conv(w_hwio, gamma, beta, mean, var, cin_p, cout_p, eps=1e-5):
    """Fold BN scale into conv weights, pad channels to lane multiples and stack
    the KxK taps as (K*K, Cin_p, Cout_p) so each conv is K*K accumulated matmuls."""
    K = w_hwio.shape[0]
    cin, cout = w_hwio.shape[2], w_hwio.shape[3]
    scale, bias = _fold_bn(gamma, beta, mean, var, eps)
    w = w_hwio * scale.reshape(1, 1, 1, cout)
    w = jnp.pad(w, ((0, 0), (0, 0), (0, cin_p - cin), (0, cout_p - cout)))
    w = w.reshape(K * K, cin_p, cout_p).astype(jnp.bfloat16)
    b = jnp.pad(bias, (0, cout_p - cout)).reshape(1, cout_p).astype(jnp.float32)
    return w, b


def bottleneck_forward(params, x_nchw, shortcut=True, approx_silu=True):
    """Matches Bottleneck.forward: x + cv2(cv1(x)) if add else cv2(cv1(x))."""
    N, c1, H, W = x_nchw.shape
    K1 = params["w1"].shape[0]
    K2 = params["w2"].shape[0]
    c_ = params["w1"].shape[3]
    c2 = params["w2"].shape[3]
    add = bool(shortcut and c1 == c2)
    p1, p2 = K1 // 2, K2 // 2

    # TODO(synk): for tiny channel counts (< 128) a combined K*K*Cin contraction
    # padded once to 128 would avoid the per-tap channel-padding overhead.
    c1p = _round_up(c1, _LANE)
    cmid = _round_up(c_, _LANE)
    c2p = _round_up(c2, _LANE)

    w1, b1 = _prep_conv(params["w1"], params["bn1_gamma"], params["bn1_beta"],
                        params["bn1_mean"], params["bn1_var"], c1p, cmid)
    w2, b2 = _prep_conv(params["w2"], params["bn2_gamma"], params["bn2_beta"],
                        params["bn2_mean"], params["bn2_var"], cmid, c2p)

    # NHWC, 'same' spatial pad for cv1, channels padded to a lane multiple; bf16 so
    # the per-step input block (and its HBM DMA) is half the f32 size.
    x_nhwc = jnp.transpose(x_nchw, (0, 2, 3, 1))
    xp = jnp.pad(x_nhwc, ((0, 0), (p1, p1), (p1, p1), (0, c1p - c1)))
    xp = xp.astype(jnp.bfloat16)
    Hp, Wp = H + 2 * p1, W + 2 * p1

    band = _pick_band(H, W)
    nbands = H // band

    kernel = functools.partial(
        _bottleneck_kernel, K1=K1, K2=K2, p1=p1, p2=p2, add=add,
        band=band, nbands=nbands, H=H, W=W, approx_silu=approx_silu)

    # VMEM budget: double-buffered I/O blocks + weights + scratch + accumulators.
    x_blk = Hp * Wp * c1p * 2
    o_blk = band * W * c2p * 4
    w_bytes = (w1.size + w2.size) * 2 + (b1.size + b2.size) * 4
    h_scr = (H + 2 * p2) * (W + 2 * p2) * cmid * 2
    acc_bytes = band * W * max(cmid, c2p) * 4
    live = 2 * (x_blk + o_blk) + 2 * w_bytes + h_scr + 6 * acc_bytes

    try:
        vmem_cap = int(pltpu.get_tpu_info().vmem_capacity_bytes)
    except Exception:
        vmem_cap = 64 * 2**20          # conservative: v7x physical VMEM per core
    vmem_ceiling = vmem_cap - 8 * 2**20  # leave headroom for compiler scratch
    if live > vmem_ceiling:
        # TODO(synk): halo-based spatial tiling for feature maps that don't fit.
        raise ValueError(
            f"Bottleneck kernel needs ~{live} bytes of VMEM, exceeds {vmem_ceiling}.")
    vmem_limit = int(min(max(2 * live, 32 * 2**20), vmem_ceiling))

    flops = 2 * N * H * W * (K1 * K1 * c1p * cmid + K2 * K2 * cmid * c2p)
    transcendentals = 2 * N * H * W * (cmid + c2p)     # exp + reciprocal per SiLU
    bytes_accessed = (xp.size * 2 + (w1.size + w2.size) * 2
                      + (b1.size + b2.size) * 4 + N * H * W * c2p * 4)

    out = pl.pallas_call(
        kernel,
        out_shape=jax.ShapeDtypeStruct((N, H, W, c2p), x_nchw.dtype),
        grid=(N, nbands),
        in_specs=[
            pl.BlockSpec((1, Hp, Wp, c1p), lambda n, r: (n, 0, 0, 0)),
            pl.BlockSpec(w1.shape, lambda n, r: (0, 0, 0)),
            pl.BlockSpec(b1.shape, lambda n, r: (0, 0)),
            pl.BlockSpec(w2.shape, lambda n, r: (0, 0, 0)),
            pl.BlockSpec(b2.shape, lambda n, r: (0, 0)),
        ],
        out_specs=pl.BlockSpec((1, band, W, c2p), lambda n, r: (n, r, 0, 0)),
        scratch_shapes=[pltpu.VMEM((H + 2 * p2, W + 2 * p2, cmid), jnp.bfloat16)],
        compiler_params=pltpu.CompilerParams(
            dimension_semantics=("parallel", "arbitrary"),
            vmem_limit_bytes=vmem_limit),
        cost_estimate=pl.CostEstimate(
            flops=flops, transcendentals=transcendentals,
            bytes_accessed=bytes_accessed),
    )(xp, w1, b1, w2, b2)

    # Strip channel padding, back to NCHW to match the torch module.
    return jnp.transpose(out[..., :c2], (0, 3, 1, 2))


# ---------------------------------------------------------------------------
# Deterministic parameters
# ---------------------------------------------------------------------------
def make_bottleneck_params(key, c1, c2, k=(3, 3), e=0.5):
    c_ = int(c2 * e)
    k0, k1, k2, k3 = jax.random.split(key, 4)
    params = {}
    params["w1"] = 0.1 * jax.random.normal(k0, (k[0], k[0], c1, c_), jnp.float32)
    params["bn1_gamma"] = 1.0 + 0.05 * jax.random.normal(k1, (c_,), jnp.float32)
    params["bn1_beta"] = 0.05 * jax.random.normal(k1, (c_,), jnp.float32) + 0.01
    params["bn1_mean"] = 0.02 * jnp.arange(c_, dtype=jnp.float32)
    params["bn1_var"] = 1.0 + 0.1 * jnp.arange(c_, dtype=jnp.float32)
    params["w2"] = 0.1 * jax.random.normal(k2, (k[1], k[1], c_, c2), jnp.float32)
    params["bn2_gamma"] = 1.0 + 0.05 * jax.random.normal(k3, (c2,), jnp.float32)
    params["bn2_beta"] = 0.05 * jax.random.normal(k3, (c2,), jnp.float32) - 0.01
    params["bn2_mean"] = 0.03 * jnp.arange(c2, dtype=jnp.float32)
    params["bn2_var"] = 1.0 + 0.05 * jnp.arange(c2, dtype=jnp.float32)
    return params


# ---------------------------------------------------------------------------
# Pure-JAX reference (f32) for a light sanity check
# ---------------------------------------------------------------------------
def _ref_conv_bn_silu(x_nhwc, w, scale, bias):
    y = jax.lax.conv_general_dilated(
        x_nhwc, w, window_strides=(1, 1), padding="SAME",
        dimension_numbers=("NHWC", "HWIO", "NHWC"))
    y = y * scale + bias
    return y * jax.nn.sigmoid(y)


def _ref_bottleneck(params, x_nchw, shortcut=True):
    c1 = x_nchw.shape[1]
    c2 = params["w2"].shape[3]
    add = shortcut and (c1 == c2)
    x_nhwc = jnp.transpose(x_nchw, (0, 2, 3, 1))
    s1, b1 = _fold_bn(params["bn1_gamma"], params["bn1_beta"],
                      params["bn1_mean"], params["bn1_var"])
    s2, b2 = _fold_bn(params["bn2_gamma"], params["bn2_beta"],
                      params["bn2_mean"], params["bn2_var"])
    h = _ref_conv_bn_silu(x_nhwc, params["w1"], s1, b1)
    y = _ref_conv_bn_silu(h, params["w2"], s2, b2)
    if add:
        y = y + x_nhwc
    return jnp.transpose(y, (0, 3, 1, 2))


if __name__ == "__main__":
    # Small shapes consistent with the module: batch=2, c1=c2=4, 16x16 spatial, e=0.5 -> c_=2.
    N, C1, C2, H, W = 2, 4, 4, 16, 16
    key = jax.random.PRNGKey(0)
    kx, kp = jax.random.split(key)
    x = jax.random.normal(kx, (N, C1, H, W), jnp.float32)  # NCHW, like the torch module
    params = make_bottleneck_params(kp, C1, C2)

    out = bottleneck_forward(params, x, shortcut=True)
    out = jax.block_until_ready(out)

    ref = _ref_bottleneck(params, x, shortcut=True)
    assert out.shape == (N, C2, H, W)
    # bf16 x/weights/intermediate on the MXU + approx-reciprocal SiLU vs f32 reference.
    assert jnp.allclose(out, ref, atol=2e-2, rtol=2e-2), float(jnp.max(jnp.abs(out - ref)))

    print("KERNEL_OK")
</pallas_src>

<mosaic_0001>
module attributes {stable_mosaic.version = 11 : i64} {
  func.func @_bottleneck_kernel(%arg0: i32, %arg1: i32, %arg2: memref<1x18x18x128xbf16, #tpu.memory_space<vmem>>, %arg3: memref<9x128x128xbf16, #tpu.memory_space<vmem>>, %arg4: memref<1x128xf32, #tpu.memory_space<vmem>>, %arg5: memref<9x128x128xbf16, #tpu.memory_space<vmem>>, %arg6: memref<1x128xf32, #tpu.memory_space<vmem>>, %arg7: memref<1x8x16x128xf32, #tpu.memory_space<vmem>>, %arg8: memref<18x18x128xbf16, #tpu.memory_space<vmem>>) attributes {dimension_semantics = [#tpu.dimension_semantics<parallel>, #tpu.dimension_semantics<arbitrary>], iteration_bounds = array<i64: 2, 2>, scalar_prefetch = 0 : i64, scratch_operands = 1 : i64, tpu.core_type = #tpu.core_type<tc>, window_params = [{transform_indices = @transform_0, window_bounds = array<i64: 1, 18, 18, 128>}, {pipeline_mode = #tpu.pipeline_mode<synchronous>, transform_indices = @transform_1, window_bounds = array<i64: 9, 128, 128>}, {pipeline_mode = #tpu.pipeline_mode<synchronous>, transform_indices = @transform_2, window_bounds = array<i64: 1, 128>}, {pipeline_mode = #tpu.pipeline_mode<synchronous>, transform_indices = @transform_3, window_bounds = array<i64: 9, 128, 128>}, {pipeline_mode = #tpu.pipeline_mode<synchronous>, transform_indices = @transform_4, window_bounds = array<i64: 1, 128>}, {transform_indices = @transform_5, window_bounds = array<i64: 1, 8, 16, 128>}]} {
    %c0_i32 = arith.constant 0 : i32
    %0 = arith.cmpi eq, %arg1, %c0_i32 : i32
    %1 = arith.extui %0 : i1 to i32
    %c0_i32_0 = arith.constant 0 : i32
    %2 = arith.cmpi ne, %1, %c0_i32_0 : i32
    scf.if %2 {
      %cst_65 = arith.constant 0.000000e+00 : bf16
      %99 = vector.broadcast %cst_65 : bf16 to vector<1x18x128xbf16>
      %c0_66 = arith.constant 0 : index
      %c0_67 = arith.constant 0 : index
      %c0_68 = arith.constant 0 : index
      %100 = vector.load %arg8[%c0_66, %c0_67, %c0_68] : memref<18x18x128xbf16, #tpu.memory_space<vmem>>, vector<1x18x128xbf16>
      tpu.vector_store %arg8[%c0_66, %c0_67, %c0_68], %99 {strides = array<i32>} : memref<18x18x128xbf16, #tpu.memory_space<vmem>>, vector<1x18x128xbf16>,
      %cst_69 = arith.constant 0.000000e+00 : bf16
      %101 = vector.broadcast %cst_69 : bf16 to vector<1x18x128xbf16>
      %c17 = arith.constant 17 : index
      %c0_70 = arith.constant 0 : index
      %c0_71 = arith.constant 0 : index
      %102 = vector.load %arg8[%c17, %c0_70, %c0_71] : memref<18x18x128xbf16, #tpu.memory_space<vmem>>, vector<1x18x128xbf16>
      tpu.vector_store %arg8[%c17, %c0_70, %c0_71], %101 {strides = array<i32>} : memref<18x18x128xbf16, #tpu.memory_space<vmem>>, vector<1x18x128xbf16>,
      %cst_72 = arith.constant 0.000000e+00 : bf16
      %103 = vector.broadcast %cst_72 : bf16 to vector<18x1x128xbf16>
      %c0_73 = arith.constant 0 : index
      %c0_74 = arith.constant 0 : index
      %c0_75 = arith.constant 0 : index
      %104 = vector.load %arg8[%c0_73, %c0_74, %c0_75] : memref<18x18x128xbf16, #tpu.memory_space<vmem>>, vector<18x1x128xbf16>
      tpu.vector_store %arg8[%c0_73, %c0_74, %c0_75], %103 {strides = array<i32>} : memref<18x18x128xbf16, #tpu.memory_space<vmem>>, vector<18x1x128xbf16>,
      %cst_76 = arith.constant 0.000000e+00 : bf16
      %105 = vector.broadcast %cst_76 : bf16 to vector<18x1x128xbf16>
      %c0_77 = arith.constant 0 : index
      %c17_78 = arith.constant 17 : index
      %c0_79 = arith.constant 0 : index
      %106 = vector.load %arg8[%c0_77, %c17_78, %c0_79] : memref<18x18x128xbf16, #tpu.memory_space<vmem>>, vector<18x1x128xbf16>
      tpu.vector_store %arg8[%c0_77, %c17_78, %c0_79], %105 {strides = array<i32>} : memref<18x18x128xbf16, #tpu.memory_space<vmem>>, vector<18x1x128xbf16>,
      %c0_i32_80 = arith.constant 0 : i32
      %c8_i32_81 = arith.constant 8 : i32
      %107 = arith.muli %c0_i32_80, %c8_i32_81 : i32
      %108 = tpu.assume_multiple %107, 8 : i32
      %cst_82 = arith.constant 0.000000e+00 : f32
      %109 = vector.broadcast %cst_82 : f32 to vector<128x128xf32>
      %c0_i32_83 = arith.constant 0 : i32
      %110 = arith.addi %108, %c0_i32_83 : i32
      %c0_84 = arith.constant 0 : index
      %111 = arith.index_cast %110 : i32 to index
      %c0_85 = arith.constant 0 : index
      %c0_86 = arith.constant 0 : index
      %112 = vector.load %arg2[%c0_84, %111, %c0_85, %c0_86] : memref<1x18x18x128xbf16, #tpu.memory_space<vmem>>, vector<1x8x16x128xbf16>
      %113 = vector.shape_cast %112 : vector<1x8x16x128xbf16> to vector<8x16x128xbf16>
      %114 = vector.shape_cast %113 : vector<8x16x128xbf16> to vector<128x128xbf16>
      %c0_87 = arith.constant 0 : index
      %c0_88 = arith.constant 0 : index
      %c0_89 = arith.constant 0 : index
      %115 = vector.load %arg3[%c0_87, %c0_88, %c0_89] : memref<9x128x128xbf16, #tpu.memory_space<vmem>>, vector<1x128x128xbf16>
      %116 = vector.shape_cast %115 : vector<1x128x128xbf16> to vector<128x128xbf16>
      %cst_90 = arith.constant dense<0.000000e+00> : vector<128x128xf32>
      %117 = tpu.matmul %114, %116, %cst_90 {dimension_numbers = #tpu.dot_dimension_numbers<[1], [0], [0], [1], [0, 0, 1, 1], [], []>} : vector<128x128xbf16>, vector<128x128xbf16>, vector<128x128xf32> -> vector<128x128xf32>
      %118 = arith.addf %109, %117 : vector<128x128xf32>
      %c0_i32_91 = arith.constant 0 : i32
      %119 = arith.addi %108, %c0_i32_91 : i32
      %c0_92 = arith.constant 0 : index
      %120 = arith.index_cast %119 : i32 to index
      %c1_93 = arith.constant 1 : index
      %c0_94 = arith.constant 0 : index
      %121 = vector.load %arg2[%c0_92, %120, %c1_93, %c0_94] : memref<1x18x18x128xbf16, #tpu.memory_space<vmem>>, vector<1x8x16x128xbf16>
      %122 = vector.shape_cast %121 : vector<1x8x16x128xbf16> to vector<8x16x128xbf16>
      %123 = vector.shape_cast %122 : vector<8x16x128xbf16> to vector<128x128xbf16>
      %c1_95 = arith.constant 1 : index
      %c0_96 = arith.constant 0 : index
      %c0_97 = arith.constant 0 : index
      %124 = vector.load %arg3[%c1_95, %c0_96, %c0_97] : memref<9x128x128xbf16, #tpu.memory_space<vmem>>, vector<1x128x128xbf16>
      %125 = vector.shape_cast %124 : vector<1x128x128xbf16> to vector<128x128xbf16>
      %cst_98 = arith.constant dense<0.000000e+00> : vector<128x128xf32>
      %126 = tpu.matmul %123, %125, %cst_98 {dimension_numbers = #tpu.dot_dimension_numbers<[1], [0], [0], [1], [0, 0, 1, 1], [], []>} : vector<128x128xbf16>, vector<128x128xbf16>, vector<128x128xf32> -> vector<128x128xf32>
      %127 = arith.addf %118, %126 : vector<128x128xf32>
      %c0_i32_99 = arith.constant 0 : i32
      %128 = arith.addi %108, %c0_i32_99 : i32
      %c0_100 = arith.constant 0 : index
      %129 = arith.index_cast %128 : i32 to index
      %c2_101 = arith.constant 2 : index
      %c0_102 = arith.constant 0 : index
      %130 = vector.load %arg2[%c0_100, %129, %c2_101, %c0_102] : memref<1x18x18x128xbf16, #tpu.memory_space<vmem>>, vector<1x8x16x128xbf16>
      %131 = vector.shape_cast %130 : vector<1x8x16x128xbf16> to vector<8x16x128xbf16>
      %132 = vector.shape_cast %131 : vector<8x16x128xbf16> to vector<128x128xbf16>
      %c2_103 = arith.constant 2 : index
      %c0_104 = arith.constant 0 : index
      %c0_105 = arith.constant 0 : index
      %133 = vector.load %arg3[%c2_103, %c0_104, %c0_105] : memref<9x128x128xbf16, #tpu.memory_space<vmem>>, vector<1x128x128xbf16>
      %134 = vector.shape_cast %133 : vector<1x128x128xbf16> to vector<128x128xbf16>
      %cst_106 = arith.constant dense<0.000000e+00> : vector<128x128xf32>
      %135 = tpu.matmul %132, %134, %cst_106 {dimension_numbers = #tpu.dot_dimension_numbers<[1], [0], [0], [1], [0, 0, 1, 1], [], []>} : vector<128x128xbf16>, vector<128x128xbf16>, vector<128x128xf32> -> vector<128x128xf32>
      %136 = arith.addf %127, %135 : vector<128x128xf32>
      %c1_i32_107 = arith.constant 1 : i32
      %137 = arith.addi %108, %c1_i32_107 : i32
      %c0_108 = arith.constant 0 : index
      %138 = arith.index_cast %137 : i32 to index
      %c0_109 = arith.constant 0 : index
      %c0_110 = arith.constant 0 : index
      %139 = vector.load %arg2[%c0_108, %138, %c0_109, %c0_110] : memref<1x18x18x128xbf16, #tpu.memory_space<vmem>>, vector<1x8x16x128xbf16>
      %140 = vector.shape_cast %139 : vector<1x8x16x128xbf16> to vector<8x16x128xbf16>
      %141 = vector.shape_cast %140 : vector<8x16x128xbf16> to vector<128x128xbf16>
      %c3_111 = arith.constant 3 : index
      %c0_112 = arith.constant 0 : index
      %c0_113 = arith.constant 0 : index
      %142 = vector.load %arg3[%c3_111, %c0_112, %c0_113] : memref<9x128x128xbf16, #tpu.memory_space<vmem>>, vector<1x128x128xbf16>
      %143 = vector.shape_cast %142 : vector<1x128x128xbf16> to vector<128x128xbf16>
      %cst_114 = arith.constant dense<0.000000e+00> : vector<128x128xf32>
      %144 = tpu.matmul %141, %143, %cst_114 {dimension_numbers = #tpu.dot_dimension_numbers<[1], [0], [0], [1], [0, 0, 1, 1], [], []>} : vector<128x128xbf16>, vector<128x128xbf16>, vector<128x128xf32> -> vector<128x128xf32>
      %145 = arith.addf %136, %144 : vector<128x128xf32>
      %c1_i32_115 = arith.constant 1 : i32
      %146 = arith.addi %108, %c1_i32_115 : i32
      %c0_116 = arith.constant 0 : index
      %147 = arith.index_cast %146 : i32 to index
      %c1_117 = arith.constant 1 : index
      %c0_118 = arith.constant 0 : index
      %148 = vector.load %arg2[%c0_116, %147, %c1_117, %c0_118] : memref<1x18x18x128xbf16, #tpu.memory_space<vmem>>, vector<1x8x16x128xbf16>
      %149 = vector.shape_cast %148 : vector<1x8x16x128xbf16> to vector<8x16x128xbf16>
      %150 = vector.shape_cast %149 : vector<8x16x128xbf16> to vector<128x128xbf16>
      %c4_119 = arith.constant 4 : index
      %c0_120 = arith.constant 0 : index
      %c0_121 = arith.constant 0 : index
      %151 = vector.load %arg3[%c4_119, %c0_120, %c0_121] : memref<9x128x128xbf16, #tpu.memory_space<vmem>>, vector<1x128x128xbf16>
      %152 = vector.shape_cast %151 : vector<1x128x128xbf16> to vector<128x128xbf16>
      %cst_122 = arith.constant dense<0.000000e+00> : vector<128x128xf32>
      %153 = tpu.matmul %150, %152, %cst_122 {dimension_numbers = #tpu.dot_dimension_numbers<[1], [0], [0], [1], [0, 0, 1, 1], [], []>} : vector<128x128xbf16>, vector<128x128xbf16>, vector<128x128xf32> -> vector<128x128xf32>
      %154 = arith.addf %145, %153 : vector<128x128xf32>
      %c1_i32_123 = arith.constant 1 : i32
      %155 = arith.addi %108, %c1_i32_123 : i32
      %c0_124 = arith.constant 0 : index
      %156 = arith.index_cast %155 : i32 to index
      %c2_125 = arith.constant 2 : index
      %c0_126 = arith.constant 0 : index
      %157 = vector.load %arg2[%c0_124, %156, %c2_125, %c0_126] : memref<1x18x18x128xbf16, #tpu.memory_space<vmem>>, vector<1x8x16x128xbf16>
      %158 = vector.shape_cast %157 : vector<1x8x16x128xbf16> to vector<8x16x128xbf16>
      %159 = vector.shape_cast %158 : vector<8x16x128xbf16> to vector<128x128xbf16>
      %c5_127 = arith.constant 5 : index
      %c0_128 = arith.constant 0 : index
      %c0_129 = arith.constant 0 : index
      %160 = vector.load %arg3[%c5_127, %c0_128, %c0_129] : memref<9x128x128xbf16, #tpu.memory_space<vmem>>, vector<1x128x128xbf16>
      %161 = vector.shape_cast %160 : vector<1x128x128xbf16> to vector<128x128xbf16>
      %cst_130 = arith.constant dense<0.000000e+00> : vector<128x128xf32>
      %162 = tpu.matmul %159, %161, %cst_130 {dimension_numbers = #tpu.dot_dimension_numbers<[1], [0], [0], [1], [0, 0, 1, 1], [], []>} : vector<128x128xbf16>, vector<128x128xbf16>, vector<128x128xf32> -> vector<128x128xf32>
      %163 = arith.addf %154, %162 : vector<128x128xf32>
      %c2_i32_131 = arith.constant 2 : i32
      %164 = arith.addi %108, %c2_i32_131 : i32
      %c0_132 = arith.constant 0 : index
      %165 = arith.index_cast %164 : i32 to index
      %c0_133 = arith.constant 0 : index
      %c0_134 = arith.constant 0 : index
      %166 = vector.load %arg2[%c0_132, %165, %c0_133, %c0_134] : memref<1x18x18x128xbf16, #tpu.memory_space<vmem>>, vector<1x8x16x128xbf16>
      %167 = vector.shape_cast %166 : vector<1x8x16x128xbf16> to vector<8x16x128xbf16>
      %168 = vector.shape_cast %167 : vector<8x16x128xbf16> to vector<128x128xbf16>
      %c6_135 = arith.constant 6 : index
      %c0_136 = arith.constant 0 : index
      %c0_137 = arith.constant 0 : index
      %169 = vector.load %arg3[%c6_135, %c0_136, %c0_137] : memref<9x128x128xbf16, #tpu.memory_space<vmem>>, vector<1x128x128xbf16>
      %170 = vector.shape_cast %169 : vector<1x128x128xbf16> to vector<128x128xbf16>
      %cst_138 = arith.constant dense<0.000000e+00> : vector<128x128xf32>
      %171 = tpu.matmul %168, %170, %cst_138 {dimension_numbers = #tpu.dot_dimension_numbers<[1], [0], [0], [1], [0, 0, 1, 1], [], []>} : vector<128x128xbf16>, vector<128x128xbf16>, vector<128x128xf32> -> vector<128x128xf32>
      %172 = arith.addf %163, %171 : vector<128x128xf32>
      %c2_i32_139 = arith.constant 2 : i32
      %173 = arith.addi %108, %c2_i32_139 : i32
      %c0_140 = arith.constant 0 : index
      %174 = arith.index_cast %173 : i32 to index
      %c1_141 = arith.constant 1 : index
      %c0_142 = arith.constant 0 : index
      %175 = vector.load %arg2[%c0_140, %174, %c1_141, %c0_142] : memref<1x18x18x128xbf16, #tpu.memory_space<vmem>>, vector<1x8x16x128xbf16>
      %176 = vector.shape_cast %175 : vector<1x8x16x128xbf16> to vector<8x16x128xbf16>
      %177 = vector.shape_cast %176 : vector<8x16x128xbf16> to vector<128x128xbf16>
      %c7_143 = arith.constant 7 : index
      %c0_144 = arith.constant 0 : index
      %c0_145 = arith.constant 0 : index
      %178 = vector.load %arg3[%c7_143, %c0_144, %c0_145] : memref<9x128x128xbf16, #tpu.memory_space<vmem>>, vector<1x128x128xbf16>
      %179 = vector.shape_cast %178 : vector<1x128x128xbf16> to vector<128x128xbf16>
      %cst_146 = arith.constant dense<0.000000e+00> : vector<128x128xf32>
      %180 = tpu.matmul %177, %179, %cst_146 {dimension_numbers = #tpu.dot_dimension_numbers<[1], [0], [0], [1], [0, 0, 1, 1], [], []>} : vector<128x128xbf16>, vector<128x128xbf16>, vector<128x128xf32> -> vector<128x128xf32>
      %181 = arith.addf %172, %180 : vector<128x128xf32>
      %c2_i32_147 = arith.constant 2 : i32
      %182 = arith.addi %108, %c2_i32_147 : i32
      %c0_148 = arith.constant 0 : index
      %183 = arith.index_cast %182 : i32 to index
      %c2_149 = arith.constant 2 : index
      %c0_150 = arith.constant 0 : index
      %184 = vector.load %arg2[%c0_148, %183, %c2_149, %c0_150] : memref<1x18x18x128xbf16, #tpu.memory_space<vmem>>, vector<1x8x16x128xbf16>
      %185 = vector.shape_cast %184 : vector<1x8x16x128xbf16> to vector<8x16x128xbf16>
      %186 = vector.shape_cast %185 : vector<8x16x128xbf16> to vector<128x128xbf16>
      %c8_151 = arith.constant 8 : index
      %c0_152 = arith.constant 0 : index
      %c0_153 = arith.constant 0 : index
      %187 = vector.load %arg3[%c8_151, %c0_152, %c0_153] : memref<9x128x128xbf16, #tpu.memory_space<vmem>>, vector<1x128x128xbf16>
      %188 = vector.shape_cast %187 : vector<1x128x128xbf16> to vector<128x128xbf16>
      %cst_154 = arith.constant dense<0.000000e+00> : vector<128x128xf32>
      %189 = tpu.matmul %186, %188, %cst_154 {dimension_numbers = #tpu.dot_dimension_numbers<[1], [0], [0], [1], [0, 0, 1, 1], [], []>} : vector<128x128xbf16>, vector<128x128xbf16>, vector<128x128xf32> -> vector<128x128xf32>
      %190 = arith.addf %181, %189 : vector<128x128xf32>
      %c0_155 = arith.constant 0 : index
      %c0_156 = arith.constant 0 : index
      %191 = vector.load %arg4[%c0_155, %c0_156] : memref<1x128xf32, #tpu.memory_space<vmem>>, vector<1x128xf32>
      %192 = vector.broadcast %191 : vector<1x128xf32> to vector<128x128xf32>
      %193 = arith.addf %190, %192 : vector<128x128xf32>
      %cst_157 = arith.constant 0.000000e+00 : f32
      %194 = vector.broadcast %cst_157 : f32 to vector<128x128xf32>
      %195 = arith.subf %194, %193 : vector<128x128xf32>
      %196 = math.exp %195 : vector<128x128xf32>
      %cst_158 = arith.constant 1.000000e+00 : f32
      %197 = vector.broadcast %cst_158 : f32 to vector<128x128xf32>
      %198 = arith.addf %197, %196 : vector<128x128xf32>
      %199 = tpu.reciprocal %198 {approx = true} : vector<128x128xf32> -> vector<128x128xf32>
      %200 = arith.mulf %193, %199 : vector<128x128xf32>
      %201 = vector.shape_cast %200 : vector<128x128xf32> to vector<8x16x128xf32>
      %202 = arith.truncf %201 : vector<8x16x128xf32> to vector<8x16x128xbf16>
      %c1_i32_159 = arith.constant 1 : i32
      %203 = arith.addi %c1_i32_159, %108 : i32
      %204 = arith.index_cast %203 : i32 to index
      %c1_160 = arith.constant 1 : index
      %c0_161 = arith.constant 0 : index
      %205 = vector.load %arg8[%204, %c1_160, %c0_161] : memref<18x18x128xbf16, #tpu.memory_space<vmem>>, vector<8x16x128xbf16>
      tpu.vector_store %arg8[%204, %c1_160, %c0_161], %202 {strides = array<i32>} : memref<18x18x128xbf16, #tpu.memory_space<vmem>>, vector<8x16x128xbf16>,
      %c1_i32_162 = arith.constant 1 : i32
      %c8_i32_163 = arith.constant 8 : i32
      %206 = arith.muli %c1_i32_162, %c8_i32_163 : i32
      %207 = tpu.assume_multiple %206, 8 : i32
      %cst_164 = arith.constant 0.000000e+00 : f32
      %208 = vector.broadcast %cst_164 : f32 to vector<128x128xf32>
      %c0_i32_165 = arith.constant 0 : i32
      %209 = arith.addi %207, %c0_i32_165 : i32
      %c0_166 = arith.constant 0 : index
      %210 = arith.index_cast %209 : i32 to index
      %c0_167 = arith.constant 0 : index
      %c0_168 = arith.constant 0 : index
      %211 = vector.load %arg2[%c0_166, %210, %c0_167, %c0_168] : memref<1x18x18x128xbf16, #tpu.memory_space<vmem>>, vector<1x8x16x128xbf16>
      %212 = vector.shape_cast %211 : vector<1x8x16x128xbf16> to vector<8x16x128xbf16>
      %213 = vector.shape_cast %212 : vector<8x16x128xbf16> to vector<128x128xbf16>
      %c0_169 = arith.constant 0 : index
      %c0_170 = arith.constant 0 : index
      %c0_171 = arith.constant 0 : index
      %214 = vector.load %arg3[%c0_169, %c0_170, %c0_171] : memref<9x128x128xbf16, #tpu.memory_space<vmem>>, vector<1x128x128xbf16>
      %215 = vector.shape_cast %214 : vector<1x128x128xbf16> to vector<128x128xbf16>
      %cst_172 = arith.constant dense<0.000000e+00> : vector<128x128xf32>
      %216 = tpu.matmul %213, %215, %cst_172 {dimension_numbers = #tpu.dot_dimension_numbers<[1], [0], [0], [1], [0, 0, 1, 1], [], []>} : vector<128x128xbf16>, vector<128x128xbf16>, vector<128x128xf32> -> vector<128x128xf32>
      %217 = arith.addf %208, %216 : vector<128x128xf32>
      %c0_i32_173 = arith.constant 0 : i32
      %218 = arith.addi %207, %c0_i32_173 : i32
      %c0_174 = arith.constant 0 : index
      %219 = arith.index_cast %218 : i32 to index
      %c1_175 = arith.constant 1 : index
      %c0_176 = arith.constant 0 : index
      %220 = vector.load %arg2[%c0_174, %219, %c1_175, %c0_176] : memref<1x18x18x128xbf16, #tpu.memory_space<vmem>>, vector<1x8x16x128xbf16>
      %221 = vector.shape_cast %220 : vector<1x8x16x128xbf16> to vector<8x16x128xbf16>
      %222 = vector.shape_cast %221 : vector<8x16x128xbf16> to vector<128x128xbf16>
      %c1_177 = arith.constant 1 : index
      %c0_178 = arith.constant 0 : index
      %c0_179 = arith.constant 0 : index
      %223 = vector.load %arg3[%c1_177, %c0_178, %c0_179] : memref<9x128x128xbf16, #tpu.memory_space<vmem>>, vector<1x128x128xbf16>
      %224 = vector.shape_cast %223 : vector<1x128x128xbf16> to vector<128x128xbf16>
      %cst_180 = arith.constant dense<0.000000e+00> : vector<128x128xf32>
      %225 = tpu.matmul %222, %224, %cst_180 {dimension_numbers = #tpu.dot_dimension_numbers<[1], [0], [0], [1], [0, 0, 1, 1], [], []>} : vector<128x128xbf16>, vector<128x128xbf16>, vector<128x128xf32> -> vector<128x128xf32>
      %226 = arith.addf %217, %225 : vector<128x128xf32>
      %c0_i32_181 = arith.constant 0 : i32
      %227 = arith.addi %207, %c0_i32_181 : i32
      %c0_182 = arith.constant 0 : index
      %228 = arith.index_cast %227 : i32 to index
      %c2_183 = arith.constant 2 : index
      %c0_184 = arith.constant 0 : index
      %229 = vector.load %arg2[%c0_182, %228, %c2_183, %c0_184] : memref<1x18x18x128xbf16, #tpu.memory_space<vmem>>, vector<1x8x16x128xbf16>
      %230 = vector.shape_cast %229 : vector<1x8x16x128xbf16> to vector<8x16x128xbf16>
      %231 = vector.shape_cast %230 : vector<8x16x128xbf16> to vector<128x128xbf16>
      %c2_185 = arith.constant 2 : index
      %c0_186 = arith.constant 0 : index
      %c0_187 = arith.constant 0 : index
      %232 = vector.load %arg3[%c2_185, %c0_186, %c0_187] : memref<9x128x128xbf16, #tpu.memory_space<vmem>>, vector<1x128x128xbf16>
      %233 = vector.shape_cast %232 : vector<1x128x128xbf16> to vector<128x128xbf16>
      %cst_188 = arith.constant dense<0.000000e+00> : vector<128x128xf32>
      %234 = tpu.matmul %231, %233, %cst_188 {dimension_numbers = #tpu.dot_dimension_numbers<[1], [0], [0], [1], [0, 0, 1, 1], [], []>} : vector<128x128xbf16>, vector<128x128xbf16>, vector<128x128xf32> -> vector<128x128xf32>
      %235 = arith.addf %226, %234 : vector<128x128xf32>
      %c1_i32_189 = arith.constant 1 : i32
      %236 = arith.addi %207, %c1_i32_189 : i32
      %c0_190 = arith.constant 0 : index
      %237 = arith.index_cast %236 : i32 to index
      %c0_191 = arith.constant 0 : index
      %c0_192 = arith.constant 0 : index
      %238 = vector.load %arg2[%c0_190, %237, %c0_191, %c0_192] : memref<1x18x18x128xbf16, #tpu.memory_space<vmem>>, vector<1x8x16x128xbf16>
      %239 = vector.shape_cast %238 : vector<1x8x16x128xbf16> to vector<8x16x128xbf16>
      %240 = vector.shape_cast %239 : vector<8x16x128xbf16> to vector<128x128xbf16>
      %c3_193 = arith.constant 3 : index
      %c0_194 = arith.constant 0 : index
      %c0_195 = arith.constant 0 : index
      %241 = vector.load %arg3[%c3_193, %c0_194, %c0_195] : memref<9x128x128xbf16, #tpu.memory_space<vmem>>, vector<1x128x128xbf16>
      %242 = vector.shape_cast %241 : vector<1x128x128xbf16> to vector<128x128xbf16>
      %cst_196 = arith.constant dense<0.000000e+00> : vector<128x128xf32>
      %243 = tpu.matmul %240, %242, %cst_196 {dimension_numbers = #tpu.dot_dimension_numbers<[1], [0], [0], [1], [0, 0, 1, 1], [], []>} : vector<128x128xbf16>, vector<128x128xbf16>, vector<128x128xf32> -> vector<128x128xf32>
      %244 = arith.addf %235, %243 : vector<128x128xf32>
      %c1_i32_197 = arith.constant 1 : i32
      %245 = arith.addi %207, %c1_i32_197 : i32
      %c0_198 = arith.constant 0 : index
      %246 = arith.index_cast %245 : i32 to index
      %c1_199 = arith.constant 1 : index
      %c0_200 = arith.constant 0 : index
      %247 = vector.load %arg2[%c0_198, %246, %c1_199, %c0_200] : memref<1x18x18x128xbf16, #tpu.memory_space<vmem>>, vector<1x8x16x128xbf16>
      %248 = vector.shape_cast %247 : vector<1x8x16x128xbf16> to vector<8x16x128xbf16>
      %249 = vector.shape_cast %248 : vector<8x16x128xbf16> to vector<128x128xbf16>
      %c4_201 = arith.constant 4 : index
      %c0_202 = arith.constant 0 : index
      %c0_203 = arith.constant 0 : index
      %250 = vector.load %arg3[%c4_201, %c0_202, %c0_203] : memref<9x128x128xbf16, #tpu.memory_space<vmem>>, vector<1x128x128xbf16>
      %251 = vector.shape_cast %250 : vector<1x128x128xbf16> to vector<128x128xbf16>
      %cst_204 = arith.constant dense<0.000000e+00> : vector<128x128xf32>
      %252 = tpu.matmul %249, %251, %cst_204 {dimension_numbers = #tpu.dot_dimension_numbers<[1], [0], [0], [1], [0, 0, 1, 1], [], []>} : vector<128x128xbf16>, vector<128x128xbf16>, vector<128x128xf32> -> vector<128x128xf32>
      %253 = arith.addf %244, %252 : vector<128x128xf32>
      %c1_i32_205 = arith.constant 1 : i32
      %254 = arith.addi %207, %c1_i32_205 : i32
      %c0_206 = arith.constant 0 : index
      %255 = arith.index_cast %254 : i32 to index
      %c2_207 = arith.constant 2 : index
      %c0_208 = arith.constant 0 : index
      %256 = vector.load %arg2[%c0_206, %255, %c2_207, %c0_208] : memref<1x18x18x128xbf16, #tpu.memory_space<vmem>>, vector<1x8x16x128xbf16>
      %257 = vector.shape_cast %256 : vector<1x8x16x128xbf16> to vector<8x16x128xbf16>
      %258 = vector.shape_cast %257 : vector<8x16x128xbf16> to vector<128x128xbf16>
      %c5_209 = arith.constant 5 : index
      %c0_210 = arith.constant 0 : index
      %c0_211 = arith.constant 0 : index
      %259 = vector.load %arg3[%c5_209, %c0_210, %c0_211] : memref<9x128x128xbf16, #tpu.memory_space<vmem>>, vector<1x128x128xbf16>
      %260 = vector.shape_cast %259 : vector<1x128x128xbf16> to vector<128x128xbf16>
      %cst_212 = arith.constant dense<0.000000e+00> : vector<128x128xf32>
      %261 = tpu.matmul %258, %260, %cst_212 {dimension_numbers = #tpu.dot_dimension_numbers<[1], [0], [0], [1], [0, 0, 1, 1], [], []>} : vector<128x128xbf16>, vector<128x128xbf16>, vector<128x128xf32> -> vector<128x128xf32>
      %262 = arith.addf %253, %261 : vector<128x128xf32>
      %c2_i32_213 = arith.constant 2 : i32
      %263 = arith.addi %207, %c2_i32_213 : i32
      %c0_214 = arith.constant 0 : index
      %264 = arith.index_cast %263 : i32 to index
      %c0_215 = arith.constant 0 : index
      %c0_216 = arith.constant 0 : index
      %265 = vector.load %arg2[%c0_214, %264, %c0_215, %c0_216] : memref<1x18x18x128xbf16, #tpu.memory_space<vmem>>, vector<1x8x16x128xbf16>
      %266 = vector.shape_cast %265 : vector<1x8x16x128xbf16> to vector<8x16x128xbf16>
      %267 = vector.shape_cast %266 : vector<8x16x128xbf16> to vector<128x128xbf16>
      %c6_217 = arith.constant 6 : index
      %c0_218 = arith.constant 0 : index
      %c0_219 = arith.constant 0 : index
      %268 = vector.load %arg3[%c6_217, %c0_218, %c0_219] : memref<9x128x128xbf16, #tpu.memory_space<vmem>>, vector<1x128x128xbf16>
      %269 = vector.shape_cast %268 : vector<1x128x128xbf16> to vector<128x128xbf16>
      %cst_220 = arith.constant dense<0.000000e+00> : vector<128x128xf32>
      %270 = tpu.matmul %267, %269, %cst_220 {dimension_numbers = #tpu.dot_dimension_numbers<[1], [0], [0], [1], [0, 0, 1, 1], [], []>} : vector<128x128xbf16>, vector<128x128xbf16>, vector<128x128xf32> -> vector<128x128xf32>
      %271 = arith.addf %262, %270 : vector<128x128xf32>
      %c2_i32_221 = arith.constant 2 : i32
      %272 = arith.addi %207, %c2_i32_221 : i32
      %c0_222 = arith.constant 0 : index
      %273 = arith.index_cast %272 : i32 to index
      %c1_223 = arith.constant 1 : index
      %c0_224 = arith.constant 0 : index
      %274 = vector.load %arg2[%c0_222, %273, %c1_223, %c0_224] : memref<1x18x18x128xbf16, #tpu.memory_space<vmem>>, vector<1x8x16x128xbf16>
      %275 = vector.shape_cast %274 : vector<1x8x16x128xbf16> to vector<8x16x128xbf16>
      %276 = vector.shape_cast %275 : vector<8x16x128xbf16> to vector<128x128xbf16>
      %c7_225 = arith.constant 7 : index
      %c0_226 = arith.constant 0 : index
      %c0_227 = arith.constant 0 : index
      %277 = vector.load %arg3[%c7_225, %c0_226, %c0_227] : memref<9x128x128xbf16, #tpu.memory_space<vmem>>, vector<1x128x128xbf16>
      %278 = vector.shape_cast %277 : vector<1x128x128xbf16> to vector<128x128xbf16>
      %cst_228 = arith.constant dense<0.000000e+00> : vector<128x128xf32>
      %279 = tpu.matmul %276, %278, %cst_228 {dimension_numbers = #tpu.dot_dimension_numbers<[1], [0], [0], [1], [0, 0, 1, 1], [], []>} : vector<128x128xbf16>, vector<128x128xbf16>, vector<128x128xf32> -> vector<128x128xf32>
      %280 = arith.addf %271, %279 : vector<128x128xf32>
      %c2_i32_229 = arith.constant 2 : i32
      %281 = arith.addi %207, %c2_i32_229 : i32
      %c0_230 = arith.constant 0 : index
      %282 = arith.index_cast %281 : i32 to index
      %c2_231 = arith.constant 2 : index
      %c0_232 = arith.constant 0 : index
      %283 = vector.load %arg2[%c0_230, %282, %c2_231, %c0_232] : memref<1x18x18x128xbf16, #tpu.memory_space<vmem>>, vector<1x8x16x128xbf16>
      %284 = vector.shape_cast %283 : vector<1x8x16x128xbf16> to vector<8x16x128xbf16>
      %285 = vector.shape_cast %284 : vector<8x16x128xbf16> to vector<128x128xbf16>
      %c8_233 = arith.constant 8 : index
      %c0_234 = arith.constant 0 : index
      %c0_235 = arith.constant 0 : index
      %286 = vector.load %arg3[%c8_233, %c0_234, %c0_235] : memref<9x128x128xbf16, #tpu.memory_space<vmem>>, vector<1x128x128xbf16>
      %287 = vector.shape_cast %286 : vector<1x128x128xbf16> to vector<128x128xbf16>
      %cst_236 = arith.constant dense<0.000000e+00> : vector<128x128xf32>
      %288 = tpu.matmul %285, %287, %cst_236 {dimension_numbers = #tpu.dot_dimension_numbers<[1], [0], [0], [1], [0, 0, 1, 1], [], []>} : vector<128x128xbf16>, vector<128x128xbf16>, vector<128x128xf32> -> vector<128x128xf32>
      %289 = arith.addf %280, %288 : vector<128x128xf32>
      %c0_237 = arith.constant 0 : index
      %c0_238 = arith.constant 0 : index
      %290 = vector.load %arg4[%c0_237, %c0_238] : memref<1x128xf32, #tpu.memory_space<vmem>>, vector<1x128xf32>
      %291 = vector.broadcast %290 : vector<1x128xf32> to vector<128x128xf32>
      %292 = arith.addf %289, %291 : vector<128x128xf32>
      %cst_239 = arith.constant 0.000000e+00 : f32
      %293 = vector.broadcast %cst_239 : f32 to vector<128x128xf32>
      %294 = arith.subf %293, %292 : vector<128x128xf32>
      %295 = math.exp %294 : vector<128x128xf32>
      %cst_240 = arith.constant 1.000000e+00 : f32
      %296 = vector.broadcast %cst_240 : f32 to vector<128x128xf32>
      %297 = arith.addf %296, %295 : vector<128x128xf32>
      %298 = tpu.reciprocal %297 {approx = true} : vector<128x128xf32> -> vector<128x128xf32>
      %299 = arith.mulf %292, %298 : vector<128x128xf32>
      %300 = vector.shape_cast %299 : vector<128x128xf32> to vector<8x16x128xf32>
      %301 = arith.truncf %300 : vector<8x16x128xf32> to vector<8x16x128xbf16>
      %c1_i32_241 = arith.constant 1 : i32
      %302 = arith.addi %c1_i32_241, %207 : i32
      %303 = arith.index_cast %302 : i32 to index
      %c1_242 = arith.constant 1 : index
      %c0_243 = arith.constant 0 : index
      %304 = vector.load %arg8[%303, %c1_242, %c0_243] : memref<18x18x128xbf16, #tpu.memory_space<vmem>>, vector<8x16x128xbf16>
      tpu.vector_store %arg8[%303, %c1_242, %c0_243], %301 {strides = array<i32>} : memref<18x18x128xbf16, #tpu.memory_space<vmem>>, vector<8x16x128xbf16>,
      %c2_i32_244 = arith.constant 2 : i32
    } else {
    }
    %c8_i32 = arith.constant 8 : i32
    %3 = arith.muli %arg1, %c8_i32 : i32
    %4 = tpu.assume_multiple %3, 8 : i32
    %cst = arith.constant 0.000000e+00 : f32
    %5 = vector.broadcast %cst : f32 to vector<128x128xf32>
    %c0_i32_1 = arith.constant 0 : i32
    %6 = arith.addi %4, %c0_i32_1 : i32
    %7 = arith.index_cast %6 : i32 to index
    %c0 = arith.constant 0 : index
    %c0_2 = arith.constant 0 : index
    %8 = vector.load %arg8[%7, %c0, %c0_2] : memref<18x18x128xbf16, #tpu.memory_space<vmem>>, vector<8x16x128xbf16>
    %9 = vector.shape_cast %8 : vector<8x16x128xbf16> to vector<128x128xbf16>
    %c0_3 = arith.constant 0 : index
    %c0_4 = arith.constant 0 : index
    %c0_5 = arith.constant 0 : index
    %10 = vector.load %arg5[%c0_3, %c0_4, %c0_5] : memref<9x128x128xbf16, #tpu.memory_space<vmem>>, vector<1x128x128xbf16>
    %11 = vector.shape_cast %10 : vector<1x128x128xbf16> to vector<128x128xbf16>
    %cst_6 = arith.constant dense<0.000000e+00> : vector<128x128xf32>
    %12 = tpu.matmul %9, %11, %cst_6 {dimension_numbers = #tpu.dot_dimension_numbers<[1], [0], [0], [1], [0, 0, 1, 1], [], []>} : vector<128x128xbf16>, vector<128x128xbf16>, vector<128x128xf32> -> vector<128x128xf32>
    %13 = arith.addf %5, %12 : vector<128x128xf32>
    %c0_i32_7 = arith.constant 0 : i32
    %14 = arith.addi %4, %c0_i32_7 : i32
    %15 = arith.index_cast %14 : i32 to index
    %c1 = arith.constant 1 : index
    %c0_8 = arith.constant 0 : index
    %16 = vector.load %arg8[%15, %c1, %c0_8] : memref<18x18x128xbf16, #tpu.memory_space<vmem>>, vector<8x16x128xbf16>
    %17 = vector.shape_cast %16 : vector<8x16x128xbf16> to vector<128x128xbf16>
    %c1_9 = arith.constant 1 : index
    %c0_10 = arith.constant 0 : index
    %c0_11 = arith.constant 0 : index
    %18 = vector.load %arg5[%c1_9, %c0_10, %c0_11] : memref<9x128x128xbf16, #tpu.memory_space<vmem>>, vector<1x128x128xbf16>
    %19 = vector.shape_cast %18 : vector<1x128x128xbf16> to vector<128x128xbf16>
    %cst_12 = arith.constant dense<0.000000e+00> : vector<128x128xf32>
    %20 = tpu.matmul %17, %19, %cst_12 {dimension_numbers = #tpu.dot_dimension_numbers<[1], [0], [0], [1], [0, 0, 1, 1], [], []>} : vector<128x128xbf16>, vector<128x128xbf16>, vector<128x128xf32> -> vector<128x128xf32>
    %21 = arith.addf %13, %20 : vector<128x128xf32>
    %c0_i32_13 = arith.constant 0 : i32
    %22 = arith.addi %4, %c0_i32_13 : i32
    %23 = arith.index_cast %22 : i32 to index
    %c2 = arith.constant 2 : index
    %c0_14 = arith.constant 0 : index
    %24 = vector.load %arg8[%23, %c2, %c0_14] : memref<18x18x128xbf16, #tpu.memory_space<vmem>>, vector<8x16x128xbf16>
    %25 = vector.shape_cast %24 : vector<8x16x128xbf16> to vector<128x128xbf16>
    %c2_15 = arith.constant 2 : index
    %c0_16 = arith.constant 0 : index
    %c0_17 = arith.constant 0 : index
    %26 = vector.load %arg5[%c2_15, %c0_16, %c0_17] : memref<9x128x128xbf16, #tpu.memory_space<vmem>>, vector<1x128x128xbf16>
    %27 = vector.shape_cast %26 : vector<1x128x128xbf16> to vector<128x128xbf16>
    %cst_18 = arith.constant dense<0.000000e+00> : vector<128x128xf32>
    %28 = tpu.matmul %25, %27, %cst_18 {dimension_numbers = #tpu.dot_dimension_numbers<[1], [0], [0], [1], [0, 0, 1, 1], [], []>} : vector<128x128xbf16>, vector<128x128xbf16>, vector<128x128xf32> -> vector<128x128xf32>
    %29 = arith.addf %21, %28 : vector<128x128xf32>
    %c1_i32 = arith.constant 1 : i32
    %30 = arith.addi %4, %c1_i32 : i32
    %31 = arith.index_cast %30 : i32 to index
    %c0_19 = arith.constant 0 : index
    %c0_20 = arith.constant 0 : index
    %32 = vector.load %arg8[%31, %c0_19, %c0_20] : memref<18x18x128xbf16, #tpu.memory_space<vmem>>, vector<8x16x128xbf16>
    %33 = vector.shape_cast %32 : vector<8x16x128xbf16> to vector<128x128xbf16>
    %c3 = arith.constant 3 : index
    %c0_21 = arith.constant 0 : index
    %c0_22 = arith.constant 0 : index
    %34 = vector.load %arg5[%c3, %c0_21, %c0_22] : memref<9x128x128xbf16, #tpu.memory_space<vmem>>, vector<1x128x128xbf16>
    %35 = vector.shape_cast %34 : vector<1x128x128xbf16> to vector<128x128xbf16>
    %cst_23 = arith.constant dense<0.000000e+00> : vector<128x128xf32>
    %36 = tpu.matmul %33, %35, %cst_23 {dimension_numbers = #tpu.dot_dimension_numbers<[1], [0], [0], [1], [0, 0, 1, 1], [], []>} : vector<128x128xbf16>, vector<128x128xbf16>, vector<128x128xf32> -> vector<128x128xf32>
    %37 = arith.addf %29, %36 : vector<128x128xf32>
    %c1_i32_24 = arith.constant 1 : i32
    %38 = arith.addi %4, %c1_i32_24 : i32
    %39 = arith.index_cast %38 : i32 to index
    %c1_25 = arith.constant 1 : index
    %c0_26 = arith.constant 0 : index
    %40 = vector.load %arg8[%39, %c1_25, %c0_26] : memref<18x18x128xbf16, #tpu.memory_space<vmem>>, vector<8x16x128xbf16>
    %41 = vector.shape_cast %40 : vector<8x16x128xbf16> to vector<128x128xbf16>
    %c4 = arith.constant 4 : index
    %c0_27 = arith.constant 0 : index
    %c0_28 = arith.constant 0 : index
    %42 = vector.load %arg5[%c4, %c0_27, %c0_28] : memref<9x128x128xbf16, #tpu.memory_space<vmem>>, vector<1x128x128xbf16>
    %43 = vector.shape_cast %42 : vector<1x128x128xbf16> to vector<128x128xbf16>
    %cst_29 = arith.constant dense<0.000000e+00> : vector<128x128xf32>
    %44 = tpu.matmul %41, %43, %cst_29 {dimension_numbers = #tpu.dot_dimension_numbers<[1], [0], [0], [1], [0, 0, 1, 1], [], []>} : vector<128x128xbf16>, vector<128x128xbf16>, vector<128x128xf32> -> vector<128x128xf32>
    %45 = arith.addf %37, %44 : vector<128x128xf32>
    %c1_i32_30 = arith.constant 1 : i32
    %46 = arith.addi %4, %c1_i32_30 : i32
    %47 = arith.index_cast %46 : i32 to index
    %c2_31 = arith.constant 2 : index
    %c0_32 = arith.constant 0 : index
    %48 = vector.load %arg8[%47, %c2_31, %c0_32] : memref<18x18x128xbf16, #tpu.memory_space<vmem>>, vector<8x16x128xbf16>
    %49 = vector.shape_cast %48 : vector<8x16x128xbf16> to vector<128x128xbf16>
    %c5 = arith.constant 5 : index
    %c0_33 = arith.constant 0 : index
    %c0_34 = arith.constant 0 : index
    %50 = vector.load %arg5[%c5, %c0_33, %c0_34] : memref<9x128x128xbf16, #tpu.memory_space<vmem>>, vector<1x128x128xbf16>
    %51 = vector.shape_cast %50 : vector<1x128x128xbf16> to vector<128x128xbf16>
    %cst_35 = arith.constant dense<0.000000e+00> : vector<128x128xf32>
    %52 = tpu.matmul %49, %51, %cst_35 {dimension_numbers = #tpu.dot_dimension_numbers<[1], [0], [0], [1], [0, 0, 1, 1], [], []>} : vector<128x128xbf16>, vector<128x128xbf16>, vector<128x128xf32> -> vector<128x128xf32>
    %53 = arith.addf %45, %52 : vector<128x128xf32>
    %c2_i32 = arith.constant 2 : i32
    %54 = arith.addi %4, %c2_i32 : i32
    %55 = arith.index_cast %54 : i32 to index
    %c0_36 = arith.constant 0 : index
    %c0_37 = arith.constant 0 : index
    %56 = vector.load %arg8[%55, %c0_36, %c0_37] : memref<18x18x128xbf16, #tpu.memory_space<vmem>>, vector<8x16x128xbf16>
    %57 = vector.shape_cast %56 : vector<8x16x128xbf16> to vector<128x128xbf16>
    %c6 = arith.constant 6 : index
    %c0_38 = arith.constant 0 : index
    %c0_39 = arith.constant 0 : index
    %58 = vector.load %arg5[%c6, %c0_38, %c0_39] : memref<9x128x128xbf16, #tpu.memory_space<vmem>>, vector<1x128x128xbf16>
    %59 = vector.shape_cast %58 : vector<1x128x128xbf16> to vector<128x128xbf16>
    %cst_40 = arith.constant dense<0.000000e+00> : vector<128x128xf32>
    %60 = tpu.matmul %57, %59, %cst_40 {dimension_numbers = #tpu.dot_dimension_numbers<[1], [0], [0], [1], [0, 0, 1, 1], [], []>} : vector<128x128xbf16>, vector<128x128xbf16>, vector<128x128xf32> -> vector<128x128xf32>
    %61 = arith.addf %53, %60 : vector<128x128xf32>
    %c2_i32_41 = arith.constant 2 : i32
    %62 = arith.addi %4, %c2_i32_41 : i32
    %63 = arith.index_cast %62 : i32 to index
    %c1_42 = arith.constant 1 : index
    %c0_43 = arith.constant 0 : index
    %64 = vector.load %arg8[%63, %c1_42, %c0_43] : memref<18x18x128xbf16, #tpu.memory_space<vmem>>, vector<8x16x128xbf16>
    %65 = vector.shape_cast %64 : vector<8x16x128xbf16> to vector<128x128xbf16>
    %c7 = arith.constant 7 : index
    %c0_44 = arith.constant 0 : index
    %c0_45 = arith.constant 0 : index
    %66 = vector.load %arg5[%c7, %c0_44, %c0_45] : memref<9x128x128xbf16, #tpu.memory_space<vmem>>, vector<1x128x128xbf16>
    %67 = vector.shape_cast %66 : vector<1x128x128xbf16> to vector<128x128xbf16>
    %cst_46 = arith.constant dense<0.000000e+00> : vector<128x128xf32>
    %68 = tpu.matmul %65, %67, %cst_46 {dimension_numbers = #tpu.dot_dimension_numbers<[1], [0], [0], [1], [0, 0, 1, 1], [], []>} : vector<128x128xbf16>, vector<128x128xbf16>, vector<128x128xf32> -> vector<128x128xf32>
    %69 = arith.addf %61, %68 : vector<128x128xf32>
    %c2_i32_47 = arith.constant 2 : i32
    %70 = arith.addi %4, %c2_i32_47 : i32
    %71 = arith.index_cast %70 : i32 to index
    %c2_48 = arith.constant 2 : index
    %c0_49 = arith.constant 0 : index
    %72 = vector.load %arg8[%71, %c2_48, %c0_49] : memref<18x18x128xbf16, #tpu.memory_space<vmem>>, vector<8x16x128xbf16>
    %73 = vector.shape_cast %72 : vector<8x16x128xbf16> to vector<128x128xbf16>
    %c8 = arith.constant 8 : index
    %c0_50 = arith.constant 0 : index
    %c0_51 = arith.constant 0 : index
    %74 = vector.load %arg5[%c8, %c0_50, %c0_51] : memref<9x128x128xbf16, #tpu.memory_space<vmem>>, vector<1x128x128xbf16>
    %75 = vector.shape_cast %74 : vector<1x128x128xbf16> to vector<128x128xbf16>
    %cst_52 = arith.constant dense<0.000000e+00> : vector<128x128xf32>
    %76 = tpu.matmul %73, %75, %cst_52 {dimension_numbers = #tpu.dot_dimension_numbers<[1], [0], [0], [1], [0, 0, 1, 1], [], []>} : vector<128x128xbf16>, vector<128x128xbf16>, vector<128x128xf32> -> vector<128x128xf32>
    %77 = arith.addf %69, %76 : vector<128x128xf32>
    %c0_53 = arith.constant 0 : index
    %c0_54 = arith.constant 0 : index
    %78 = vector.load %arg6[%c0_53, %c0_54] : memref<1x128xf32, #tpu.memory_space<vmem>>, vector<1x128xf32>
    %79 = vector.broadcast %78 : vector<1x128xf32> to vector<128x128xf32>
    %80 = arith.addf %77, %79 : vector<128x128xf32>
    %cst_55 = arith.constant 0.000000e+00 : f32
    %81 = vector.broadcast %cst_55 : f32 to vector<128x128xf32>
    %82 = arith.subf %81, %80 : vector<128x128xf32>
    %83 = math.exp %82 : vector<128x128xf32>
    %cst_56 = arith.constant 1.000000e+00 : f32
    %84 = vector.broadcast %cst_56 : f32 to vector<128x128xf32>
    %85 = arith.addf %84, %83 : vector<128x128xf32>
    %86 = tpu.reciprocal %85 {approx = true} : vector<128x128xf32> -> vector<128x128xf32>
    %87 = arith.mulf %80, %86 : vector<128x128xf32>
    %c1_i32_57 = arith.constant 1 : i32
    %88 = arith.addi %c1_i32_57, %4 : i32
    %c0_58 = arith.constant 0 : index
    %89 = arith.index_cast %88 : i32 to index
    %c1_59 = arith.constant 1 : index
    %c0_60 = arith.constant 0 : index
    %90 = vector.load %arg2[%c0_58, %89, %c1_59, %c0_60] : memref<1x18x18x128xbf16, #tpu.memory_space<vmem>>, vector<1x8x16x128xbf16>
    %91 = vector.shape_cast %90 : vector<1x8x16x128xbf16> to vector<8x16x128xbf16>
    %92 = vector.shape_cast %91 : vector<8x16x128xbf16> to vector<128x128xbf16>
    %93 = arith.extf %92 : vector<128x128xbf16> to vector<128x128xf32>
    %94 = arith.addf %87, %93 : vector<128x128xf32>
    %95 = vector.shape_cast %94 : vector<128x128xf32> to vector<8x16x128xf32>
    %c0_61 = arith.constant 0 : index
    %c0_62 = arith.constant 0 : index
    %c0_63 = arith.constant 0 : index
    %c0_64 = arith.constant 0 : index
    %96 = vector.load %arg7[%c0_61, %c0_62, %c0_63, %c0_64] : memref<1x8x16x128xf32, #tpu.memory_space<vmem>>, vector<1x8x16x128xf32>
    %97 = vector.shape_cast %96 : vector<1x8x16x128xf32> to vector<8x16x128xf32>
    %98 = vector.shape_cast %95 : vector<8x16x128xf32> to vector<1x8x16x128xf32>
    tpu.vector_store %arg7[%c0_61, %c0_62, %c0_63, %c0_64], %98 {strides = array<i32>} : memref<1x8x16x128xf32, #tpu.memory_space<vmem>>, vector<1x8x16x128xf32>,
    return
  }
  func.func @transform_0(%arg0: i32, %arg1: i32) -> (i32, i32, i32, i32) {
    %c0_i32 = arith.constant 0 : i32
    %c0_i32_0 = arith.constant 0 : i32
    %c0_i32_1 = arith.constant 0 : i32
    %c0_i32_2 = arith.constant 0 : i32
    return %arg0, %c0_i32, %c0_i32_0, %c0_i32_1 : i32, i32, i32, i32
  }
  func.func @transform_1(%arg0: i32, %arg1: i32) -> (i32, i32, i32) {
    %c0_i32 = arith.constant 0 : i32
    %c0_i32_0 = arith.constant 0 : i32
    %c0_i32_1 = arith.constant 0 : i32
    %c0_i32_2 = arith.constant 0 : i32
    return %c0_i32, %c0_i32_0, %c0_i32_1 : i32, i32, i32
  }
  func.func @transform_2(%arg0: i32, %arg1: i32) -> (i32, i32) {
    %c0_i32 = arith.constant 0 : i32
    %c0_i32_0 = arith.constant 0 : i32
    %c0_i32_1 = arith.constant 0 : i32
    return %c0_i32, %c0_i32_0 : i32, i32
  }
  func.func @transform_3(%arg0: i32, %arg1: i32) -> (i32, i32, i32) {
    %c0_i32 = arith.constant 0 : i32
    %c0_i32_0 = arith.constant 0 : i32
    %c0_i32_1 = arith.constant 0 : i32
    %c0_i32_2 = arith.constant 0 : i32
    return %c0_i32, %c0_i32_0, %c0_i32_1 : i32, i32, i32
  }
  func.func @transform_4(%arg0: i32, %arg1: i32) -> (i32, i32) {
    %c0_i32 = arith.constant 0 : i32
    %c0_i32_0 = arith.constant 0 : i32
    %c0_i32_1 = arith.constant 0 : i32
    return %c0_i32, %c0_i32_0 : i32, i32
  }
  func.func @transform_5(%arg0: i32, %arg1: i32) -> (i32, i32, i32, i32) {
    %c0_i32 = arith.constant 0 : i32
    %c0_i32_0 = arith.constant 0 : i32
    %c0_i32_1 = arith.constant 0 : i32
    return %arg0, %arg1, %c0_i32, %c0_i32_0 : i32, i32, i32, i32
  }
}

</mosaic_0001>

<bundles_post_ra>
// kernel: tpu_custom_call.1
= control target key start
LH: loop header
LB: loop body
LE: loop exit
PB: predicated region body
PF: predicated region fallthrough
CT: control target
= control target key end

     0   :  { %10 = vsyncpa [#allocation4], 0  ;;  %s17427_s0 = inlined_call_operand.vmem [shape: bf16[2,18,18,128], index: 0, kind: input, shape index: {}]   ;;  %s17428_s1 = inlined_call_operand.vmem [shape: bf16[9,128,128], index: 1, kind: input, shape index: {}]   ;;  %s17429_s2 = inlined_call_operand.vmem [shape: f32[1,128], index: 2, kind: input, shape index: {}]   ;;  %s17430_s3 = inlined_call_operand.hbm [shape: bf16[9,128,128], index: 3, kind: input, shape index: {}]   ;;  %s17431_s4 = inlined_call_operand.vmem [shape: f32[1,128], index: 4, kind: input, shape index: {}]   ;;  %s17432_s5 = inlined_call_operand.hbm [shape: f32[2,16,16,128], index: 5, kind: output, shape index: {}]  }
   0x1   :  { %11 = vsyncpa [#allocation5], 0 }
   0x2   :  { %13 = vsyncpa [#allocation5 + $0x1], 0  ;;  %s13872_s18 = smov 0   ;;  %s13874_s19 = smov 0  }
   0x3   :  { %s13876_s20 = smov 0   ;;  %s13878_s21 = smov 0  }
   0x4   :  { %s13880_s22 = smov 0   ;;  %s13882_s23 = smov 0  }
   0x5   :  { %s13884_s24 = smov 0   ;;  %s13886_s25 = smov 0  }
   0x6 LB: > { %s10240_s26 = sadd.s32 4294967295, %s13833_s25   ;;  %s10241_s27 = sadd.s32 4294967294, %s13833_s25   ;;  %s13833_s25 = sphi %s13886_s25, %s19_s25   ;;  %s13829_s24 = sphi %s13884_s24, %s17550_s24   ;;  %s13825_s23 = sphi %s13882_s23, %s17549_s23   ;;  %s13821_s22 = sphi %s13880_s22, %s17548_s22   ;;  %s13817_s21 = sphi %s13878_s21, %s17547_s21   ;;  %s13813_s20 = sphi %s13876_s20, %s17546_s20   ;;  %s13809_s19 = sphi %s13874_s19, %s17545_s19   ;;  %s13805_s18 = sphi %s13872_s18, %s17544_s18  }
   0x7   : > { %s28_s28 = sadd.s32 1, %s13825_s23  ;;  %s31_s29 = sadd.s32 1, %s13829_s24 }
   0x8   : > { %p29_p0 = scmp.ge.s32.totalorder %s28_s28, 2  ;;  %s150_s30 = sadd.s32 1, %s13813_s20 }
   0x9   : > { %p160_p1 = scmp.ne.s32.totalorder %s13813_s20, %s13809_s19  ;;  %p161_p2 = scmp.eq.s32.totalorder %s10240_s26, 3 }
   0xa   : > { %s17552_s28 = smov (%p29_p0, %s28_s28), 0  ;;  %s17554_s29 = smov (!%p29_p0, %s31_s29), %s13829_s24 }
   0xb   : > { %s146_s6 = ssub.s32 %s13825_s23, %s17552_s28  ;;  %p13924_p3 = por %p161_p2, %p160_p1 }
   0xc   : > { %p33_p4 = scmp.ge.s32.totalorder %s17554_s29, 2  ;;  %p166_p5 = scmp.ne.s32.totalorder %s13809_s19, %s13805_s18 }
   0xd   : > { %s17458_s7 = scalar_select %p13924_p3, 1, 0 }
   0xe   : > { %p167_p6 = scmp.eq.s32.totalorder %s10241_s27, 3  ;;  %p10242_p7 = scmp.ge.s32.totalorder %s13833_s25, 1 }
   0xf   : > { %s17556_s29 = smov (%p33_p4, %s17554_s29), 0  ;;  %p174_p9 = scmp.lt.s32.totalorder %s13833_s25, 5 }
  0x10   : > { %p13933_p8 = por %p167_p6, %p166_p5  ;;  %s145_s9 = ssub.s32 %s13829_s24, %s17556_s29 }
  0x11   : > { %s147_s10 = sor.u32 %s146_s6, %s145_s9  ;;  %p13940_p10 = pnand %p10242_p7, %p174_p9 }
  0x12   : > { %s17459_s8 = scalar_select %p13933_p8, 1, 0 }
  0x13   : > { %s17460_s11 = scalar_select %p13940_p10, 1, 0 }
  0x14   : > { %p148_p11 = scmp.eq.s32.totalorder %s147_s10, 0  ;;  %p13944_p12 = scmp.eq.s32.totalorder %s10240_s26, 0 }
  0x15   : > { %p13142_p13 = pneg %p13940_p10  ;;  %s13835_s14 = smov [#allocation3]  }
  0x16   : > { %s17461_s12 = scalar_select %p13944_p12, 1, 0 }
  0x17   : > { %s13951_s13 = scalar_select %p148_p11, %s13813_s20, %s150_s30  }
  0x18   : > { %s192_s15 = sshll.u32 %s13835_s14, 4  ;;  %p13955_p0 = pnand %p13944_p12, %p13142_p13  ;;  %s193_s15 = int_to_ptr.vmem [resolvable:$true] %s192_s15 }
  0x19   : > { %s13707_s26 = scalar_lea.hbm %s17430_s3, 9216 }
  0x1a   : > { %p13708_p1 = scmp.ne.s32.totalorder %s17430_s3, %s13707_s26  ;;  %p13709_p2 = pneg %p13955_p0 }
  0x1b   : > { %p13714_p6 = scmp.lt.u32.totalorder %s13707_s26, %s17430_s3 }
  0x1c   : > { %p13710_p4 = pnand %p13709_p2, %p13708_p1 }
  0x1e   : > { %p13711_p5 = pneg %p13710_p4 }
  0x20   : > { %p13716_p7 = pnand %p13714_p6, %p13711_p5 }
  0x22   : > { %13719 = shalt.err (!%p13716_p7)
}
  0x23   : > { %s13720_s14 = scalar_lea.vmem %s193_s15, 9216  ;;  %p13728_p8 = scmp.lt.s32.totalorder %s193_s15, %s193_s15 }
  0x24   : > { %p13721_p9 = scmp.ne.s32.totalorder %s193_s15, %s13720_s14  ;;  %p13729_p3 = scmp.lt.s32.totalorder %s13720_s14, %s13720_s14 }
  0x26   : > { %p13723_p11 = pnand %p13721_p9, %p13709_p2  ;;  %p13730_p12 = por %p13729_p3, %p13728_p8 }
  0x28   : > { %p13724_p13 = pneg %p13723_p11 }
  0x2a   : > { %p13731_p10 = pnand %p13730_p12, %p13724_p13 }
  0x2c   : > { %13734 = shalt.err (!%p13731_p10)
}
  0x2d   : > { %s13836_s17 = smov 64   ;;  %s13837_s27 = smov 4  }
  0x2e   : > { %13145 = dma.hbm_to_vmem [thread:$0]  (!%p13955_p0), %s17430_s3, 9216, %s193_s15, [#allocation4], %s13836_s17, %s13836_s17, %s13837_s27  }
  0x2f   : > { %p17463_p1 = scmp.ne.s32.totalorder %s17460_s11, 0 }
  0x31   : > { %219 = sbr.rel (%p17463_p1) target bundleno = 1244 (0x4dc), region = 40 }
  0x38   : > { %p17464_p4 = scmp.ne.s32.totalorder %s17461_s12, 0 }
  0x3a   : > { %13796 = dma.done.wait (%p17464_p4), [#allocation4], 9216  }
  0x3b   : > { %13798 = vsyncadd (%p17464_p4), [#allocation4], 4294958080  ;;  %s244_s26 = sand.u32 1, %s13809_s19   ;;  %p247_p3 = scmp.lt.s32.totalorder %s13821_s22, 1 }
  0x3c   : > { %s10247_s16 = sshll.u32 %s244_s26, 7  ;;  %p10249_p8 = scmp.ne.s32.totalorder %s13817_s21, 0 }
  0x3d   : > { %s248_s30 = scalar_select %p247_p3, %s13821_s22, 1 }
  0x3e   : > { %s13991_s17 = scalar_lea.vmem [#allocation6], %s10247_s16  ;;  %257 = sbr.rel (%p10249_p8) target bundleno = 770 (0x302), region = 48 }
  0x3f   : > { %s13135_s10 = smul.u32 216, %s248_s30 }
  0x41   : > { %s13989_s11 = scalar_lea.vmem %s17427_s0, %s13135_s10 }
  0x45   : > { %v13223_v0 = vld [vmem:[%s17428_s1 + $0x40] sm:$0xff]   ;;  %v13838_v1 = vmov 0   ;;  %v13225_v3 = vld [vmem:[%s17428_s1 + $0x48] sm:$0xff]   ;;  %v13227_v5 = vld [vmem:[%s17428_s1 + $0x50] sm:$0xff]   ;;  %vm421_vm0 = vsmask.f32 3328 }
  0x46   : > { %258 = vst [vmem:[#allocation2] sm:$0xf] %v13838_v1  ;;  %259 = vst [vmem:[#allocation2 + $0x4] sm:$0xf] %v13838_v1  ;;  %v13224_v2 = vld [vmem:[%s17428_s1 + $0x40] sm:$0xff]   ;;  %11871 = vmatprep.subr.bf16.mxu0 %v13223_v0  ;;  %v13226_v4 = vld [vmem:[%s17428_s1 + $0x48] sm:$0xff]  }
  0x47   : > { %260 = vst [vmem:[#allocation2 + $0x8] sm:$0x1] %v13838_v1  ;;  %262 = vst [vmem:[#allocation2 + $0xcc] sm:$0xf] %v13838_v1  ;;  %12159 = vmatprep.subr.bf16.mxu1 %v13224_v2  ;;  %11872 = vmatpush3.bf16.msra.mxu0 %v13223_v0  ;;  %v13228_v6 = vld [vmem:[%s17428_s1 + $0x50] sm:$0xff]   ;;  %v13229_v7 = vld [vmem:[%s17428_s1 + $0x58] sm:$0xff]  }
  0x48   : > { %263 = vst [vmem:[#allocation2 + $0xd0] sm:$0xf] %v13838_v1  ;;  %264 = vst [vmem:[#allocation2 + $0xd4] sm:$0x1] %v13838_v1  ;;  %12160 = vmatpush3.bf16.msra.mxu1 %v13224_v2  ;;  %11873 = vmatprep.subr.bf16.mxu0 %v13225_v3  ;;  %v13230_v8 = vld [vmem:[%s17428_s1 + $0x58] sm:$0xff]   ;;  %v13231_v9 = vld [vmem:[%s17428_s1 + $0x60] sm:$0xff]  }
  0x49   : > { %12161 = vmatprep.subr.bf16.mxu1 %v13226_v4  ;;  %v13232_v10 = vld [vmem:[%s17428_s1 + $0x60] sm:$0xff]   ;;  %v13233_v11 = vld [vmem:[%s17428_s1 + $0x68] sm:$0xff]   ;;  %vm422_vm1 = vsmask.f32 7440  ;;  %v13235_v21 = vld [vmem:[%s17428_s1 + $0x70] sm:$0xff]   ;;  %vm1027_vm3 = vcmask 1042432  }
  0x4a   : > { %v13234_v12 = vld [vmem:[%s17428_s1 + $0x68] sm:$0xff]   ;;  %v14031_v13 = vld [vmem:[%s13989_s11] sm:$0xf]  ;;  %v14034_v14 = vld [vmem:[%s13989_s11 + $0x4] sm:$0xf]  ;;  %vm1028_vm4 = vcmask 1046532  }
  0x4b   : > { %11874 = vmatpush3.bf16.msra.mxu0 %v13225_v3  ;;  %v14037_v15 = vld [vmem:[%s13989_s11 + $0x8] sm:$0x1]  ;;  %v425_v16 = vshrl.u32 %v14031_v13, 16  ;;  %v428_v17 = vshll.u32 %v14031_v13, 16  ;;  %v434_v18 = vshll.u32 %v14034_v14, 16  ;;  %v438_v19 = vshrl.u32 %v14034_v14, 16  ;;  %vm14075_vm2 = vmor %vm421_vm0, %vm422_vm1 }
  0x4c   : > { %12162 = vmatpush3.bf16.msra.mxu1 %v13226_v4  ;;  %11875 = vmatprep.subr.bf16.mxu0 %v13227_v5  ;;  %v14044_v20 = vld [vmem:[%s13989_s11 + $0x60] sm:$0xf]  ;;  %v444_v22 = vshll.u32 %v14037_v15, 16  ;;  %v14051_v23 = vld [vmem:[%s13989_s11 + $0x64] sm:$0xf]  ;;  %v13236_v25 = vld [vmem:[%s17428_s1 + $0x70] sm:$0xff]  }
  0x4d   : > { %12163 = vmatprep.subr.bf16.mxu1 %v13228_v6  ;;  %v14054_v24 = vld [vmem:[%s13989_s11 + $0x68] sm:$0x1]  ;;  %v427_v26 = vrot.slane %v425_v16, 4  ;;  %v430_v27 = vrot.slane %v428_v17, 5  ;;  %v436_v28 = vrot.slane %v434_v18, 5  ;;  %v440_v29 = vrot.slane %v438_v19, 4  ;;  %vm14467_vm5 = vmor %vm1027_vm3, %vm1028_vm4 }
  0x4e   : > { %v446_v30 = vrot.slane %v444_v22, 5  ;;  %v3669_v31 = vshrl.u32 %v14044_v20, 16  ;;  %v3672_v32 = vshll.u32 %v14044_v20, 16  ;;  %v3678_v33 = vshll.u32 %v14051_v23, 16  ;;  %v14063_v34 = vld [vmem:[%s13989_s11 + $0xc] sm:$0xf] }
  0x4f   : > { %11876 = vmatpush3.bf16.msra.mxu0 %v13227_v5  ;;  %v431_v35 = vor.u32 %v430_v27, %v427_v26  ;;  %v441_v36 = vor.u32 %v440_v29, %v436_v28  ;;  %v3682_v37 = vshrl.u32 %v14051_v23, 16  ;;  %v3688_v38 = vshll.u32 %v14054_v24, 16  ;;  %v14068_v39 = vld [vmem:[%s13989_s11 + $0x10] sm:$0xf]  ;;  %v13237_v40 = vld [vmem:[%s17428_s1 + $0x78] sm:$0xff]   ;;  %v14096_v59 = vld [vmem:[%s17428_s1] sm:$0xff]  }
  0x50   : > { %12164 = vmatpush3.bf16.msra.mxu1 %v13228_v6  ;;  %11877 = vmatprep.subr.bf16.mxu0 %v13229_v7  ;;  %v3671_v42 = vrot.slane %v3669_v31, 4  ;;  %v3674_v43 = vrot.slane %v3672_v32, 5  ;;  %v3680_v44 = vrot.slane %v3678_v33, 5  ;;  %v13238_v45 = vld [vmem:[%s17428_s1 + $0x78] sm:$0xff]   ;;  %v14083_v51 = vld [vmem:[%s13989_s11 + $0x14] sm:$0x1] }
  0x51   : > { %12165 = vmatprep.subr.bf16.mxu1 %v13230_v8  ;;  %v432_v46 = vrot.slane %v431_v35, 4  ;;  %v442_v47 = vrot.slane %v441_v36, 4  ;;  %v3684_v48 = vrot.slane %v3682_v37, 4  ;;  %v3690_v49 = vrot.slane %v3688_v38, 5  ;;  %v14099_v60 = vld [vmem:[%s13989_s11 + $0x6c] sm:$0xf] }
  0x52   : > { %v3675_v50 = vor.u32 %v3674_v43, %v3671_v42  ;;  %v449_v52 = vshrl.u32 %v14063_v34, 16  ;;  %v452_v53 = vshll.u32 %v14063_v34, 16  ;;  %v458_v54 = vshll.u32 %v14068_v39, 16  ;;  %v14102_v61 = vld [vmem:[%s13989_s11 + $0x70] sm:$0xf]  ;;  %v14110_v3 = vld [vmem:[%s17428_s1] sm:$0xff]  }
  0x53   : > { %11878 = vmatpush3.bf16.msra.mxu0 %v13229_v7  ;;  %v437_v55 = vsel %vm14075_vm2, %v432_v46, %v436_v28  ;;  %v447_v56 = vsel %vm14075_vm2, %v442_v47, %v446_v30  ;;  %v3685_v57 = vor.u32 %v3684_v48, %v3680_v44  ;;  %v462_v58 = vshrl.u32 %v14068_v39, 16  ;;  %v14105_v2 = vld [vmem:[%s13989_s11 + $0x74] sm:$0x1]  ;;  %v14128_v30 = vld [vmem:[%s13989_s11 + $0x1c] sm:$0xf] }
  0x54   : > { %12166 = vmatpush3.bf16.msra.mxu1 %v13230_v8  ;;  %11879 = vmatprep.subr.bf16.mxu0 %v13231_v9  ;;  %v10266_v62 = vcombine.low %v437_v55, %v447_v56  ;;  %v3676_v63 = vrot.slane %v3675_v50, 4  ;;  %v451_v0 = vrot.slane %v449_v52, 4  ;;  %v454_v1 = vrot.slane %v452_v53, 5  ;;  %v14133_v33 = vld [vmem:[%s13989_s11 + $0x20] sm:$0x1] }
  0x55   : > { %12167 = vmatprep.subr.bf16.mxu1 %v13232_v10  ;;  %v3686_v4 = vrot.slane %v3685_v57, 4  ;;  %v460_v5 = vrot.slane %v458_v54, 5  ;;  %v464_v6 = vrot.slane %v462_v58, 4  ;;  %v468_v7 = vshll.u32 %v14083_v51, 16  ;;  %17467 = vst [vmem:[#allocation9_spill] sm:$0xff] %v14133_v33 }
  0x56   : > { %11887 = vmatprep.mubr.bf16.mxu0 %v10266_v62  ;;  %v3681_v8 = vsel %vm14075_vm2, %v3676_v63, %v3680_v44  ;;  %v3696_v17 = vshll.u32 %v14099_v60, 16  ;;  %v3702_v22 = vshll.u32 %v14102_v61, 16  ;;  %v3706_v28 = vshrl.u32 %v14102_v61, 16  ;;  %v14139_v42 = vld [vmem:[%s13989_s11 + $0x78] sm:$0xf]  ;;  %v13241_v44 = vld [vmem:[%s17428_s1 + $0x8] sm:$0xff]  }
  0x57   : > { %11880 = vmatpush3.bf16.msra.mxu0 %v13231_v9  ;;  %v455_v9 = vor.u32 %v454_v1, %v451_v0  ;;  %v470_v16 = vrot.slane %v468_v7, 5  ;;  %v3712_v29 = vshll.u32 %v14105_v2, 16  ;;  %v482_v47 = vshll.u32 %v14128_v30, 16  ;;  %v14149_v53 = vld [vmem:[%s13989_s11 + $0x7c] sm:$0xf] }
  0x58   : > { %12168 = vmatpush3.bf16.msra.mxu1 %v13232_v10  ;;  %11881 = vmatprep.subr.bf16.mxu0 %v13233_v11  ;;  %v3693_v10 = vshrl.u32 %v14099_v60, 16  ;;  %v3698_v27 = vrot.slane %v3696_v17, 5  ;;  %v3704_v32 = vrot.slane %v3702_v22, 5  ;;  %v3708_v38 = vrot.slane %v3706_v28, 4  ;;  %v14152_v56 = vld [vmem:[%s13989_s11 + $0x80] sm:$0x1] }
  0x59   : > { %12169 = vmatprep.subr.bf16.mxu1 %v13234_v12  ;;  %v456_v19 = vrot.slane %v455_v9, 4  ;;  %v486_v50 = vshrl.u32 %v14128_v30, 16  ;;  %v492_v52 = vshll.u32 %v14133_v33, 16  ;;  %v484_v55 = vrot.slane %v482_v47, 5  ;;  %17468 = vst [vmem:[#allocation10_spill] sm:$0xff] %v14152_v56 }
  0x5a   : > { %v3717_v57 = vshrl.u32 %v14139_v42, 16  ;;  %v3720_v58 = vshll.u32 %v14139_v42, 16  ;;  %v3726_v9 = vshll.u32 %v14149_v53, 16  ;;  %v14174_v17 = vld [vmem:[%s13989_s11 + $0x28] sm:$0xf]  ;;  %vm265_vm6 = vcmask 1040384  }
  0x5b   : > { %11882 = vmatpush3.bf16.msra.mxu0 %v13233_v11  ;;  %v3691_v11 = vsel %vm14075_vm2, %v3686_v4, %v3690_v49  ;;  %v461_v31 = vsel %vm14075_vm2, %v456_v19, %v460_v5  ;;  %v3709_v49 = vor.u32 %v3708_v38, %v3704_v32  ;;  %v488_v0 = vrot.slane %v486_v50, 4  ;;  %v14160_v4 = vld [vmem:[%s13989_s11 + $0x24] sm:$0xf] }
  0x5c   : > { %12170 = vmatpush3.bf16.msra.mxu1 %v13234_v12  ;;  %11883 = vmatprep.subr.bf16.mxu0 %v13235_v21  ;;  %v465_v12 = vor.u32 %v464_v6, %v460_v5  ;;  %v10699_v18 = vcombine.low %v3681_v8, %v3691_v11  ;;  %v494_v1 = vrot.slane %v492_v52, 5  ;;  %v13242_v5 = vld [vmem:[%s17428_s1 + $0x8] sm:$0xff]   ;;  %v3719_v7 = vrot.slane %v3717_v57, 4 }
  0x5d   : > { %12171 = vmatprep.subr.bf16.mxu1 %v13236_v25  ;;  %v3710_v63 = vrot.slane %v3709_v49, 4  ;;  %v3722_v8 = vrot.slane %v3720_v58, 5  ;;  %v489_v11 = vor.u32 %v488_v0, %v484_v55  ;;  %v3728_v22 = vrot.slane %v3726_v9, 5 }
  0x5e   : > { %v466_v26 = vrot.slane %v465_v12, 4  ;;  %12175 = vmatprep.mubr.bf16.mxu1 %v10699_v18  ;;  %v3730_v12 = vshrl.u32 %v14149_v53, 16  ;;  %v500_v38 = vshll.u32 %v14160_v4, 16  ;;  %vm266_vm7 = vsmask.f32 256 }
  0x5f   : > { %11884 = vmatpush3.bf16.msra.mxu0 %v13235_v21  ;;  %v3695_v21 = vrot.slane %v3693_v10, 4  ;;  %v490_v28 = vrot.slane %v489_v11, 4  ;;  %vm322_vm8 = vsmask.f32 7938  ;;  %vm15834_vm9 = vmand %vm265_vm6, %vm266_vm7  ;;  %vm3567_vm11 = vcmask 1043456  }
  0x60   : > { %12172 = vmatpush3.bf16.msra.mxu1 %v13236_v25  ;;  %11885 = vmatprep.subr.bf16.mxu0 %v13237_v40  ;;  %v14122_v25 = vld [vmem:[%s13989_s11 + $0x18] sm:$0xf]  ;;  %v471_v36 = vsel %vm14075_vm2, %v466_v26, %v470_v16  ;;  %v3736_v16 = vshll.u32 %v14152_v56, 16  ;;  %v14177_v26 = vld [vmem:[%s13989_s11 + $0x2c] sm:$0x1]  ;;  %v502_v52 = vrot.slane %v500_v38, 5  ;;  %vm15846_vm10 = vmand %vm265_vm6, %vm322_vm8 }
  0x61   : > { %12173 = vmatprep.subr.bf16.mxu1 %v13238_v45  ;;  %v473_v35 = vshrl.u32 %v14122_v25, 16  ;;  %v3699_v37 = vor.u32 %v3698_v27, %v3695_v21  ;;  %v10267_v43 = vcombine.low %v461_v31, %v471_v36  ;;  %v476_v46 = vshll.u32 %v14122_v25, 16  ;;  %17469 = vst [vmem:[#allocation11_spill] sm:$0xff] %v14177_v26  ;;  %v14180_v27 = vld [vmem:[%s13989_s11 + $0x84] sm:$0xf]  ;;  %vm16055_vm13 = vmand %vm3567_vm11, %vm322_vm8 }
  0x62   : > { %v3723_v21 = vor.u32 %v3722_v8, %v3719_v7  ;;  %v3738_v31 = vrot.slane %v3736_v16, 5  ;;  %v516_v58 = vshll.u32 %v14177_v26, 16  ;;  %v3744_v0 = vshll.u32 %v14180_v27, 16  ;;  %v14211_v7 = vld [vmem:[%s13989_s11 + $0x30] sm:$0xf]  ;;  %v13247_v8 = vld [vmem:[%s17428_s1 + $0x20] sm:$0xff]  }
  0x63   : > { %11886 = vmatpush3.bf16.msra.mxu0 %v13237_v40  ;;  %v3714_v40 = vrot.slane %v3712_v29, 5  ;;  %v3700_v48 = vrot.slane %v3699_v37, 4  ;;  %v478_v54 = vrot.slane %v476_v46, 5  ;;  %v3732_v29 = vrot.slane %v3730_v12, 4  ;;  %v14219_v12 = vld [vmem:[%s13989_s11 + $0x34] sm:$0xf] }
  0x64   : > { %12174 = vmatpush3.bf16.msra.mxu1 %v13238_v45  ;;  %11903 = vmatprep.subr.bf16.mxu0 %v14096_v59  ;;  %v475_v45 = vrot.slane %v473_v35, 4  ;;  %v14184_v35 = vld [vmem:[%s13989_s11 + $0x88] sm:$0xf]  ;;  %v3724_v37 = vrot.slane %v3723_v21, 4  ;;  %v14232_v38 = vld [vmem:[%s13989_s11 + $0x38] sm:$0x1] }
  0x65   : > { %12191 = vmatprep.subr.bf16.mxu1 %v14110_v3  ;;  %v3705_v62 = vsel %vm14075_vm2, %v3700_v48, %v3704_v32  ;;  %v3715_v10 = vsel %vm14075_vm2, %v3710_v63, %v3714_v40  ;;  %v497_v32 = vshrl.u32 %v14160_v4, 16  ;;  %v506_v40 = vshll.u32 %v14174_v17, 16  ;;  %17471 = vst [vmem:[#allocation13_spill] sm:$0xff] %v14232_v38 }
  0x66   : > { %11888 = vmatmul.mubr.bf16.vlgmr.msra.gmra.mrb[0].mxu0 %v10267_v43  ;;  %v479_v6 = vor.u32 %v478_v54, %v475_v45  ;;  %v10700_v18 = vcombine.low %v3705_v62, %v3715_v10  ;;  %v13244_v43 = vld [vmem:[%s17428_s1 + $0x10] sm:$0xff]   ;;  %v495_v45 = vsel %vm14075_vm2, %v490_v28, %v494_v1  ;;  %v3733_v46 = vor.u32 %v3732_v29, %v3728_v22 }
  0x67   : > { %11904 = vmatpush3.bf16.msra.mxu0 %v14096_v59  ;;  %v13243_v59 = vld [vmem:[%s17428_s1 + $0x10] sm:$0xff]   ;;  %v499_v47 = vrot.slane %v497_v32, 4  ;;  %v510_v48 = vshrl.u32 %v14174_v17, 16  ;;  %v3729_v50 = vsel %vm14075_vm2, %v3724_v37, %v3728_v22  ;;  %v508_v54 = vrot.slane %v506_v40, 5  ;;  %v13246_v22 = vld [vmem:[%s17428_s1 + $0x18] sm:$0xff]   ;;  %v13249_v32 = vld [vmem:[%s17428_s1 + $0x28] sm:$0xff]  }
  0x68   : > { %11905 = vmatprep.subr.bf16.mxu0 %v13241_v44  ;;  %v480_v19 = vrot.slane %v479_v6, 4  ;;  %12176 = vmatmul.mubr.bf16.vlgmr.msra.gmra.mrb[0].mxu1 %v10700_v18  ;;  %v3741_v62 = vshrl.u32 %v14180_v27, 16  ;;  %v3750_v1 = vshll.u32 %v14184_v35, 16  ;;  %v3754_v6 = vshrl.u32 %v14184_v35, 16 }
  0x69   : > { %12192 = vmatpush3.bf16.msra.mxu1 %v14110_v3  ;;  %v512_v57 = vrot.slane %v510_v48, 4  ;;  %v14204_v3 = vld [vmem:[%s13989_s11 + $0x8c] sm:$0x1]  ;;  %v503_v63 = vor.u32 %v502_v52, %v499_v47  ;;  %v518_v10 = vrot.slane %v516_v58, 5  ;;  %v524_v40 = vshll.u32 %v14211_v7, 16 }
  0x6a   : > { %v485_v36 = vsel %vm14075_vm2, %v480_v19, %v484_v55  ;;  %12193 = vmatprep.subr.bf16.mxu1 %v13242_v5  ;;  %v3734_v55 = vrot.slane %v3733_v46, 4  ;;  %17470 = vst [vmem:[#allocation12_spill] sm:$0xff] %v14204_v3  ;;  %v3743_v11 = vrot.slane %v3741_v62, 4  ;;  %v3746_v19 = vrot.slane %v3744_v0, 5  ;;  %v14237_v46 = vld [vmem:[%s13989_s11 + $0x90] sm:$0xf] }
  0x6b   : > { %11906 = vmatpush3.bf16.msra.mxu0 %v13241_v44  ;;  %v13245_v44 = vld [vmem:[%s17428_s1 + $0x18] sm:$0xff]   ;;  %v10268_v49 = vcombine.low %v485_v36, %v495_v45  ;;  %v504_v18 = vrot.slane %v503_v63, 4  ;;  %v3752_v21 = vrot.slane %v3750_v1, 5  ;;  %v3756_v28 = vrot.slane %v3754_v6, 4  ;;  %v14245_v52 = vld [vmem:[%s13989_s11 + $0x94] sm:$0xf] }
  0x6c   : > { %11907 = vmatprep.subr.bf16.mxu0 %v13243_v59  ;;  %v3739_v9 = vsel %vm14075_vm2, %v3734_v55, %v3738_v31  ;;  %v3760_v29 = vshll.u32 %v14204_v3, 16  ;;  %v521_v31 = vshrl.u32 %v14211_v7, 16  ;;  %v3747_v37 = vor.u32 %v3746_v19, %v3743_v11  ;;  %v13251_v62 = vld [vmem:[%s17428_s1 + $0x30] sm:$0xff]  }
  0x6d   : > { %11891 = vmatprep.mubr.bf16.mxu0 %v10268_v49  ;;  %12194 = vmatpush3.bf16.msra.mxu1 %v13242_v5  ;;  %v10701_v16 = vcombine.low %v3729_v50, %v3739_v9  ;;  %v509_v36 = vsel %vm14075_vm2, %v504_v18, %v508_v54  ;;  %v530_v45 = vshll.u32 %v14219_v12, 16  ;;  %v3757_v48 = vor.u32 %v3756_v28, %v3752_v21  ;;  %v14264_v18 = vld [vmem:[%s13989_s11 + $0x40] sm:$0xf] }
  0x6e   : > { %12195 = vmatprep.subr.bf16.mxu1 %v13244_v43  ;;  %v3762_v49 = vrot.slane %v3760_v29, 5  ;;  %v523_v50 = vrot.slane %v521_v31, 4  ;;  %v3748_v55 = vrot.slane %v3747_v37, 4  ;;  %v534_v0 = vshrl.u32 %v14219_v12, 16  ;;  %v14269_v37 = vld [vmem:[%s13989_s11 + $0x44] sm:$0x1] }
  0x6f   : > { %11908 = vmatpush3.bf16.msra.mxu0 %v13243_v59  ;;  %v513_v59 = vor.u32 %v512_v57, %v508_v54  ;;  %12179 = vmatprep.mubr.bf16.mxu1 %v10701_v16  ;;  %v526_v57 = vrot.slane %v524_v40, 5  ;;  %v532_v58 = vrot.slane %v530_v45, 5  ;;  %v3758_v63 = vrot.slane %v3757_v48, 4  ;;  %v14261_v16 = vld [vmem:[%s13989_s11 + $0x3c] sm:$0xf]  ;;  %17473 = vst [vmem:[#allocation15_spill] sm:$0xff] %v14269_v37 }
  0x70   : > { %11909 = vmatprep.subr.bf16.mxu0 %v13245_v44  ;;  %v540_v1 = vshll.u32 %v14232_v38, 16  ;;  %v3765_v6 = vshrl.u32 %v14237_v46, 16  ;;  %v3753_v9 = vsel %vm14075_vm2, %v3748_v55, %v3752_v21  ;;  %v3774_v11 = vshll.u32 %v14245_v52, 16  ;;  %v14272_v40 = vld [vmem:[%s13989_s11 + $0x9c] sm:$0xf]  ;;  %v13250_v45 = vld [vmem:[%s17428_s1 + $0x28] sm:$0xff]  }
  0x71   : > { %v514_v5 = vrot.slane %v513_v59, 4  ;;  %12196 = vmatpush3.bf16.msra.mxu1 %v13244_v43  ;;  %v14253_v43 = vld [vmem:[%s13989_s11 + $0x98] sm:$0x1]  ;;  %v527_v59 = vor.u32 %v526_v57, %v523_v50  ;;  %v3763_v19 = vsel %vm14075_vm2, %v3758_v63, %v3762_v49  ;;  %v3778_v48 = vshrl.u32 %v14245_v52, 16 }
  0x72   : > { %12197 = vmatprep.subr.bf16.mxu1 %v13246_v22  ;;  %17472 = vst [vmem:[#allocation14_spill] sm:$0xff] %v14253_v43  ;;  %v3767_v28 = vrot.slane %v3765_v6, 4  ;;  %v10702_v21 = vcombine.low %v3753_v9, %v3763_v19  ;;  %v545_v49 = vshrl.u32 %v14261_v16, 16  ;;  %v13253_v50 = vld [vmem:[%s17428_s1 + $0x38] sm:$0xff]   ;;  %v548_v57 = vshll.u32 %v14261_v16, 16 }
  0x73   : > { %11910 = vmatpush3.bf16.msra.mxu0 %v13245_v44  ;;  %v13248_v44 = vld [vmem:[%s17428_s1 + $0x20] sm:$0xff]   ;;  %v519_v47 = vsel %vm14075_vm2, %v514_v5, %v518_v10  ;;  %v3768_v10 = vshll.u32 %v14237_v46, 16  ;;  %v542_v5 = vrot.slane %v540_v1, 5  ;;  %v528_v29 = vrot.slane %v527_v59, 4 }
  0x74   : > { %11911 = vmatprep.subr.bf16.mxu0 %v13247_v8  ;;  %v10269_v54 = vcombine.low %v509_v36, %v519_v47  ;;  %v3776_v36 = vrot.slane %v3774_v11, 5  ;;  %12180 = vmatmul.mubr.bf16.gmra.mrb[4].mxu1 %v10702_v21  ;;  %v554_v63 = vshll.u32 %v14264_v18, 16  ;;  %v3780_v1 = vrot.slane %v3778_v48, 4  ;;  %v14295_v21 = vld [vmem:[%s13989_s11 + $0xa0] sm:$0xf] }
  0x75   : > { %12198 = vmatpush3.bf16.msra.mxu1 %v13246_v22  ;;  %v3770_v31 = vrot.slane %v3768_v10, 5  ;;  %v3784_v22 = vshll.u32 %v14253_v43, 16  ;;  %v547_v9 = vrot.slane %v545_v49, 4  ;;  %v550_v59 = vrot.slane %v548_v57, 5  ;;  %v14304_v49 = vld [vmem:[%s13989_s11 + $0x48] sm:$0xf] }
  0x76   : > { %11892 = vmatmul.mubr.bf16.gmra.mrb[4].mxu0 %v10269_v54  ;;  %12199 = vmatprep.subr.bf16.mxu1 %v13248_v44  ;;  %v533_v54 = vsel %vm14075_vm2, %v528_v29, %v532_v58  ;;  %v556_v10 = vrot.slane %v554_v63, 5  ;;  %v558_v11 = vshrl.u32 %v14264_v18, 16  ;;  %v3792_v57 = vshll.u32 %v14272_v40, 16 }
  0x77   : > { %11912 = vmatpush3.bf16.msra.mxu0 %v13247_v8  ;;  %v536_v8 = vrot.slane %v534_v0, 4  ;;  %v3771_v55 = vor.u32 %v3770_v31, %v3767_v28  ;;  %v3786_v6 = vrot.slane %v3784_v22, 5  ;;  %v564_v28 = vshll.u32 %v14269_v37, 16  ;;  %v14301_v22 = vld [vmem:[%s13989_s11 + $0xa4] sm:$0x1] }
  0x78   : > { %11913 = vmatprep.subr.bf16.mxu0 %v13249_v32  ;;  %v560_v48 = vrot.slane %v558_v11, 4  ;;  %17474 = vst [vmem:[#allocation16_spill] sm:$0xff] %v14301_v22  ;;  %v3794_v11 = vrot.slane %v3792_v57, 5  ;;  %vm3403_vm12 = vsmask.f32 4368 }
  0x79   : > { %v537_v47 = vor.u32 %v536_v8, %v532_v58  ;;  %12200 = vmatpush3.bf16.msra.mxu1 %v13248_v44  ;;  %v13252_v58 = vld [vmem:[%s17428_s1 + $0x30] sm:$0xff]   ;;  %v3781_v8 = vor.u32 %v3780_v1, %v3776_v36  ;;  %v3789_v44 = vshrl.u32 %v14272_v40, 16  ;;  %v3802_v1 = vshrl.u32 %v14295_v21, 16  ;;  %vm16069_vm14 = vmor %vm266_vm7, %vm3403_vm12 }
  0x7a   : > { %12201 = vmatprep.subr.bf16.mxu1 %v13250_v45  ;;  %v561_v63 = vor.u32 %v560_v48, %v556_v10  ;;  %v14330_v48 = vld [vmem:[%s13989_s11 + $0xa8] sm:$0xf] }
  0x7b   : > { %11914 = vmatpush3.bf16.msra.mxu0 %v13249_v32  ;;  %v538_v0 = vrot.slane %v537_v47, 4  ;;  %v3772_v32 = vrot.slane %v3771_v55, 4  ;;  %v551_v47 = vor.u32 %v550_v59, %v547_v9  ;;  %v3782_v55 = vrot.slane %v3781_v8, 4  ;;  %v14315_v9 = vld [vmem:[%s13989_s11 + $0x4c] sm:$0xf] }
  0x7c   : > { %11915 = vmatprep.subr.bf16.mxu0 %v13251_v62  ;;  %v569_v8 = vshrl.u32 %v14304_v49, 16 }
  0x7d   : > { %v543_v19 = vsel %vm14075_vm2, %v538_v0, %v542_v5  ;;  %v3777_v31 = vsel %vm14075_vm2, %v3772_v32, %v3776_v36  ;;  %v14309_v5 = vld [vmem:[%s17428_s1 + $0x80] sm:$0xff]   ;;  %12202 = vmatpush3.bf16.msra.mxu1 %v13250_v45  ;;  %v552_v36 = vrot.slane %v551_v47, 4  ;;  %v3798_v0 = vshll.u32 %v14295_v21, 16  ;;  %v13254_v32 = vld [vmem:[%s17428_s1 + $0x38] sm:$0xff]  }
  0x7e   : > { %v10270_v29 = vcombine.low %v533_v54, %v543_v19  ;;  %v3791_v54 = vrot.slane %v3789_v44, 4  ;;  %12203 = vmatprep.subr.bf16.mxu1 %v13252_v58  ;;  %v3787_v59 = vsel %vm14075_vm2, %v3782_v55, %v3786_v6  ;;  %v3808_v45 = vshll.u32 %v14301_v22, 16  ;;  %v14324_v19 = vld [vmem:[%s13989_s11 + $0x50] sm:$0x1] }
  0x7f   : > { %11916 = vmatpush3.bf16.msra.mxu0 %v13251_v62  ;;  %v566_v62 = vrot.slane %v564_v28, 5  ;;  %17475 = vst [vmem:[#allocation17_spill] sm:$0xff] %v14324_v19  ;;  %v10703_v28 = vcombine.low %v3777_v31, %v3787_v59  ;;  %v557_v44 = vsel %vm14075_vm2, %v552_v36, %v556_v10  ;;  %v3800_v47 = vrot.slane %v3798_v0, 5  ;;  %v14348_v59 = vld [vmem:[%s13989_s11 + $0xb0] sm:$0x1] }
  0x80   : > { %11917 = vmatprep.subr.bf16.mxu0 %v13253_v50  ;;  %11895 = vmatprep.mubr.bf16.mxu0 %v10270_v29  ;;  %v562_v29 = vrot.slane %v561_v63, 4  ;;  %v3795_v37 = vor.u32 %v3794_v11, %v3791_v54  ;;  %v3804_v6 = vrot.slane %v3802_v1, 4  ;;  %v3810_v55 = vrot.slane %v3808_v45, 5  ;;  %v14341_v54 = vld [vmem:[%s17428_s1 + $0x80] sm:$0xff]   ;;  %17477 = vst [vmem:[#allocation19_spill] sm:$0xff] %v14348_v59 }
  0x81   : > { %v571_v57 = vrot.slane %v569_v8, 4  ;;  %12204 = vmatpush3.bf16.msra.mxu1 %v13252_v58  ;;  %12183 = vmatprep.mubr.bf16.mxu1 %v10703_v28  ;;  %v572_v10 = vshll.u32 %v14304_v49, 16  ;;  %v578_v31 = vshll.u32 %v14315_v9, 16  ;;  %v582_v36 = vshrl.u32 %v14315_v9, 16  ;;  %17476 = vst [vmem:[#allocation18_spill] sm:$0xff] %v14341_v54 }
  0x82   : > { %12205 = vmatprep.subr.bf16.mxu1 %v13254_v32  ;;  %v3796_v58 = vrot.slane %v3795_v37, 4  ;;  %v3805_v0 = vor.u32 %v3804_v6, %v3800_v47  ;;  %v588_v1 = vshll.u32 %v14324_v19, 16  ;;  %v3813_v28 = vshrl.u32 %v14330_v48, 16  ;;  %v14358_v19 = vld [vmem:[%s13989_s11 + $0x58] sm:$0xf] }
  0x83   : > { %11918 = vmatpush3.bf16.msra.mxu0 %v13253_v50  ;;  %v567_v50 = vsel %vm14075_vm2, %v562_v29, %v566_v62  ;;  %v14345_v62 = vld [vmem:[%s13989_s11 + $0xac] sm:$0xf]  ;;  %v574_v11 = vrot.slane %v572_v10, 5  ;;  %v580_v45 = vrot.slane %v578_v31, 5  ;;  %v584_v8 = vrot.slane %v582_v36, 4 }
  0x84   : > { %11935 = vmatprep.subr.bf16.mxu0 %v14309_v5  ;;  %v10271_v63 = vcombine.low %v557_v44, %v567_v50  ;;  %v14352_v29 = vld [vmem:[%s13989_s11 + $0x54] sm:$0xf]  ;;  %v3801_v44 = vsel %vm14075_vm2, %v3796_v58, %v3800_v47  ;;  %v3806_v37 = vrot.slane %v3805_v0, 4  ;;  %v590_v6 = vrot.slane %v588_v1, 5  ;;  %v14367_v1 = vld [vmem:[%s13989_s11 + $0x5c] sm:$0x1] }
  0x85   : > { %v3816_v50 = vshll.u32 %v14330_v48, 16  ;;  %12206 = vmatpush3.bf16.msra.mxu1 %v13254_v32  ;;  %v575_v10 = vor.u32 %v574_v11, %v571_v57  ;;  %v585_v31 = vor.u32 %v584_v8, %v580_v45  ;;  %v3815_v36 = vrot.slane %v3813_v28, 4  ;;  %17478 = vst [vmem:[#allocation20_spill] sm:$0xff] %v14367_v1  ;;  %v14370_v8 = vld [vmem:[%s13989_s11 + $0xb4] sm:$0xf] }
  0x86   : > { %11896 = vmatmul.mubr.bf16.gmra.mrb[8].mxu0 %v10271_v63  ;;  %v3822_v22 = vshll.u32 %v14345_v62, 16  ;;  %12223 = vmatprep.subr.bf16.mxu1 %v14341_v54  ;;  %v3811_v63 = vsel %vm14075_vm2, %v3806_v37, %v3810_v55  ;;  %v3826_v58 = vshrl.u32 %v14345_v62, 16  ;;  %v3832_v0 = vshll.u32 %v14348_v59, 16  ;;  %v14374_v55 = vld [vmem:[%s13989_s11 + $0xb8] sm:$0xf] }
  0x87   : > { %v3818_v47 = vrot.slane %v3816_v50, 5  ;;  %v10704_v43 = vcombine.low %v3801_v44, %v3811_v63  ;;  %v576_v32 = vrot.slane %v575_v10, 4  ;;  %v586_v57 = vrot.slane %v585_v31, 4  ;;  %v14385_v59 = vld [vmem:[%s13989_s11 + $0xbc] sm:$0x1] }
  0x88   : > { %v3824_v11 = vrot.slane %v3822_v22, 5  ;;  %v3828_v38 = vrot.slane %v3826_v58, 4  ;;  %v3834_v3 = vrot.slane %v3832_v0, 5  ;;  %v593_v26 = vshrl.u32 %v14352_v29, 16 }
  0x89   : > { %v3819_v28 = vor.u32 %v3818_v47, %v3815_v36  ;;  %12184 = vmatmul.mubr.bf16.gmra.mrb[8].mxu1 %v10704_v43  ;;  %v581_v37 = vsel %vm14075_vm2, %v576_v32, %v580_v45  ;;  %v591_v44 = vsel %vm14075_vm2, %v586_v57, %v590_v6  ;;  %v596_v50 = vshll.u32 %v14352_v29, 16 }
  0x8a   : > { %v602_v22 = vshll.u32 %v14358_v19, 16  ;;  %v10272_v10 = vcombine.low %v581_v37, %v591_v44  ;;  %v3829_v36 = vor.u32 %v3828_v38, %v3824_v11  ;;  %v595_v63 = vrot.slane %v593_v26, 4 }
  0x8b   : > { %v3820_v31 = vrot.slane %v3819_v28, 4  ;;  %v598_v47 = vrot.slane %v596_v50, 5  ;;  %v606_v0 = vshrl.u32 %v14358_v19, 16  ;;  %v612_v43 = vshll.u32 %v14367_v1, 16 }
  0x8c   : > { %v604_v58 = vrot.slane %v602_v22, 5  ;;  %11899 = vmatprep.mubr.bf16.mxu0 %v10272_v10  ;;  %v3830_v6 = vrot.slane %v3829_v36, 4  ;;  %v3837_v32 = vshrl.u32 %v14370_v8, 16  ;;  %v3840_v57 = vshll.u32 %v14370_v8, 16 }
  0x8d   : > { %v3825_v45 = vsel %vm14075_vm2, %v3820_v31, %v3824_v11  ;;  %v599_v28 = vor.u32 %v598_v47, %v595_v63  ;;  %v608_v38 = vrot.slane %v606_v0, 4  ;;  %v614_v26 = vrot.slane %v612_v43, 5 }
  0x8e   : > { %v3846_v37 = vshll.u32 %v14374_v55, 16  ;;  %v3835_v44 = vsel %vm14075_vm2, %v3830_v6, %v3834_v3  ;;  %v3839_v50 = vrot.slane %v3837_v32, 4  ;;  %v3842_v22 = vrot.slane %v3840_v57, 5 }
  0x8f   : > { %v3850_v10 = vshrl.u32 %v14374_v55, 16  ;;  %v10705_v1 = vcombine.low %v3825_v45, %v3835_v44  ;;  %v600_v54 = vrot.slane %v599_v28, 4  ;;  %v609_v11 = vor.u32 %v608_v38, %v604_v58 }
  0x90   : > { %v3848_v31 = vrot.slane %v3846_v37, 5  ;;  %v3843_v36 = vor.u32 %v3842_v22, %v3839_v50  ;;  %v3856_v33 = vshll.u32 %v14385_v59, 16  ;;  %v10282_v45 = vcombine.low %v14031_v13, %v14034_v14  ;;  %v1003_v37 = vld [vmem:[%s13989_s11] sm:$0xe] }
  0x91   : > { %v3852_v56 = vrot.slane %v3850_v10, 4  ;;  %12187 = vmatprep.mubr.bf16.mxu1 %v10705_v1  ;;  %v605_v63 = vsel %vm14075_vm2, %v600_v54, %v604_v58  ;;  %v610_v47 = vrot.slane %v609_v11, 4  ;;  %v1035_v13 = vrot.slane %v14037_v15, 5  ;;  %v14426_v11 = vld [vmem:[%s13989_s11 + $0x60] sm:$0xe] }
  0x92   : > { %v3844_v0 = vrot.slane %v3843_v36, 4  ;;  %v3858_v3 = vrot.slane %v3856_v33, 5  ;;  %v1032_v38 = vrot.slane %v14034_v14, 5  ;;  %v17450_v44 = vrot.slane %v14051_v23, 5 }
  0x93   : > { %v3853_v43 = vor.u32 %v3852_v56, %v3848_v31  ;;  %v615_v6 = vsel %vm14075_vm2, %v610_v47, %v614_v26  ;;  %v10715_v56 = vcombine.low %v14044_v20, %v14051_v23  ;;  %v10283_v20 = vcombine.low %v14063_v34, %v14068_v39  ;;  %v13261_v34 = vld [vmem:[%s17428_s1 + $0x88] sm:$0xff]   ;;  %v17482_v47 = vld [vmem:[#allocation10_spill] sm:$0xff] }
  0x94   : > { %v10273_v32 = vcombine.low %v605_v63, %v615_v6  ;;  %v3849_v57 = vsel %vm14075_vm2, %v3844_v0, %v3848_v31  ;;  %v10716_v50 = vcombine.low %v14099_v60, %v14102_v61  ;;  %v10284_v22 = vcombine.low %v14122_v25, %v14128_v30  ;;  %v14429_v31 = vld [vmem:[%s13989_s11 + $0xc] sm:$0xe]  ;;  %v13266_v6 = vld [vmem:[%s17428_s1 + $0x90] sm:$0xff]   ;;  %v1006_v0 = vld [vmem:[%s13989_s11 + $0x24] sm:$0xe] }
  0x95   : > { %v3854_v28 = vrot.slane %v3853_v43, 4  ;;  %v10717_v10 = vcombine.low %v14139_v42, %v14149_v53  ;;  %v10285_v14 = vcombine.low %v14160_v4, %v14174_v17  ;;  %v10718_v60 = vcombine.low %v14180_v27, %v14184_v35  ;;  %v13262_v63 = vld [vmem:[%s17428_s1 + $0x88] sm:$0xff]   ;;  %v10734_v42 = vld [vmem:[%s13989_s11 + $0x84] sm:$0xe] }
  0x96   : > { %11900 = vmatmul.mubr.bf16.gmra.mrb[12].mxu0 %v10273_v32  ;;  %v10286_v25 = vcombine.low %v14211_v7, %v14219_v12  ;;  %v17449_v36 = vrot.slane %v14068_v39, 5  ;;  %v10298_v43 = vrot.slane %v1003_v37, 9  ;;  %v1046_v37 = vrot.slane %v14128_v30, 5  ;;  %v17481_v26 = vld [vmem:[#allocation9_spill] sm:$0xff]  ;;  %v10733_v32 = vld [vmem:[%s13989_s11 + $0x78] sm:$0xe] }
  0x97   : > { %v3859_v54 = vsel %vm14075_vm2, %v3854_v28, %v3858_v3  ;;  %11919 = vmatprep.mubr.bf16.mxu0 %v10282_v45  ;;  %v1034_v3 = vrot.slane %v1032_v38, 4  ;;  %v14458_v28 = vrot.slane %v17450_v44, 4  ;;  %v1049_v58 = vrot.slane %v17481_v26, 5  ;;  %v13268_v45 = vld [vmem:[%s17428_s1 + $0x90] sm:$0xff]   ;;  %v13276_v27 = vld [vmem:[%s17428_s1 + $0xa0] sm:$0xff]  }
  0x98   : > { %v10706_v33 = vcombine.low %v3849_v57, %v3859_v54  ;;  %v10741_v54 = vrot.slane %v10733_v32, 9  ;;  %v1048_v30 = vrot.slane %v1046_v37, 4  ;;  %v4286_v26 = vrot.slane %v14149_v53, 5  ;;  %v13269_v53 = vld [vmem:[%s17428_s1 + $0x98] sm:$0xff]  }
  0x99   : > { %v4289_v1 = vrot.slane %v17482_v47, 5  ;;  %v10301_v57 = vrot.slane %v1006_v0, 9  ;;  %v1053_v32 = vrot.slane %v14174_v17, 5 }
  0x9a   : > { %12188 = vmatmul.mubr.bf16.gmra.mrb[12].mxu1 %v10706_v33  ;;  %v14513_v47 = vsel %vm14467_vm5, %v10741_v54, %v4286_v26  ;;  %v4288_v0 = vrot.slane %v4286_v26, 4  ;;  %v1060_v26 = vrot.slane %v14219_v12, 5  ;;  %v1067_v12 = vrot.slane %v14264_v18, 5  ;;  %v330_v33 = vld [vmem:[#allocation2 + $0x20] sm:$0x1] }
  0x9b   : > { %12207 = vmatprep.mubr.bf16.mxu1 %v10715_v56  ;;  %v14519_v15 = vsel %vm14467_vm5, %v10301_v57, %v1053_v32 }
  0x9c   : > { %v14527_v54 = vsel %vm14467_vm5, %v4288_v0, %v4289_v1  ;;  %v10735_v0 = vld [vmem:[%s13989_s11 + $0x90] sm:$0xe] }
  0x9d   : > { %v10765_v57 = vcombine.low %v14513_v47, %v14527_v54  ;;  %v13294_v47 = vld [vmem:[%s17428_s1 + $0xd8] sm:$0xff]   ;;  %v13297_v54 = vld [vmem:[%s17428_s1 + $0xe8] sm:$0xff]  }
  0x9e   : > { %11920 = vmatmul.mubr.bf16.vlgmr.msra.gmra.mrb[0].mxu0 %v10283_v20  ;;  %v1005_v20 = vld [vmem:[%s13989_s11 + $0x18] sm:$0xe] }
  0x9f   : > { %11936 = vmatpush3.bf16.msra.mxu0 %v14309_v5  ;;  %11923 = vmatprep.mubr.bf16.mxu0 %v10284_v22  ;;  %v14478_v22 = vrot.slane %v17449_v36, 4  ;;  %v10300_v56 = vrot.slane %v1005_v20, 9  ;;  %v17483_v5 = vld [vmem:[#allocation18_spill] sm:$0xff]  ;;  %v14489_v36 = vsel %vm14467_vm5, %v10298_v43, %v1032_v38  ;;  %v17484_v20 = vld [vmem:[#allocation11_spill] sm:$0xff]  ;;  %v14505_v38 = vsel %vm14467_vm5, %v1034_v3, %v1035_v13 }
  0xa0   : > { %11937 = vmatprep.subr.bf16.mxu0 %v13261_v34  ;;  %v1056_v44 = vrot.slane %v17484_v20, 5  ;;  %v1055_v13 = vrot.slane %v1053_v32, 4  ;;  %v10742_v43 = vrot.slane %v10734_v42, 9  ;;  %v4279_v3 = vrot.slane %v14102_v61, 5  ;;  %v13274_v42 = vld [vmem:[%s17428_s1 + $0xa0] sm:$0xff]   ;;  %v17486_v32 = vld [vmem:[#allocation13_spill] sm:$0xff] }
  0xa2   : > { %12208 = vmatmul.mubr.bf16.vlgmr.msra.gmra.mrb[0].mxu1 %v10716_v50  ;;  %v14493_v50 = vsel %vm14467_vm5, %v10300_v56, %v1046_v37  ;;  %v4293_v56 = vrot.slane %v14184_v35, 5  ;;  %v17485_v37 = vld [vmem:[#allocation12_spill] sm:$0xff]  ;;  %v14541_v1 = vsel %vm14467_vm5, %v1055_v13, %v1056_v44  ;;  %v1062_v44 = vrot.slane %v1060_v26, 4 }
  0xa3   : > { %12224 = vmatpush3.bf16.msra.mxu1 %v17483_v5  ;;  %12211 = vmatprep.mubr.bf16.mxu1 %v10717_v10  ;;  %v14509_v10 = vsel %vm14467_vm5, %v1048_v30, %v1049_v58  ;;  %v13270_v58 = vld [vmem:[%s17428_s1 + $0x98] sm:$0xff]   ;;  %v4296_v5 = vrot.slane %v17485_v37, 5  ;;  %v1007_v30 = vld [vmem:[%s13989_s11 + $0x30] sm:$0xe]  ;;  %v10743_v13 = vrot.slane %v10735_v0, 9 }
  0xa4   : > { %12225 = vmatprep.subr.bf16.mxu1 %v13262_v63  ;;  %11938 = vmatpush3.bf16.msra.mxu0 %v13261_v34  ;;  %v10324_v34 = vcombine.low %v14493_v50, %v14509_v10  ;;  %v14550_v17 = vsel %vm14467_vm5, %v10742_v43, %v4293_v56  ;;  %v10302_v20 = vrot.slane %v1007_v30, 9  ;;  %v1008_v37 = vld [vmem:[%s13989_s11 + $0x3c] sm:$0xe]  ;;  %v17507_v10 = vcombine.low %v14519_v15, %v14541_v1  ;;  %v13296_v15 = vld [vmem:[%s17428_s1 + $0xe0] sm:$0xff]   ;;  %v13298_v1 = vld [vmem:[%s17428_s1 + $0xe8] sm:$0xff]  }
  0xa5   : > { %11939 = vmatprep.subr.bf16.mxu0 %v13266_v6  ;;  %v10303_v7 = vrot.slane %v1008_v37, 9  ;;  %v10736_v30 = vld [vmem:[%s13989_s11 + $0x9c] sm:$0xe]  ;;  %v4307_v37 = vrot.slane %v14295_v21, 5 }
  0xa6   : > { %11924 = vmatmul.mubr.bf16.gmra.mrb[4].mxu0 %v10285_v14  ;;  %v4295_v14 = vrot.slane %v4293_v56, 4  ;;  %v14568_v56 = vsel %vm14467_vm5, %v10302_v20, %v1060_v26  ;;  %v1069_v26 = vrot.slane %v1067_v12, 4  ;;  %v13277_v20 = vld [vmem:[%s17428_s1 + $0xa8] sm:$0xff]   ;;  %v13293_v50 = vld [vmem:[%s17428_s1 + $0xd8] sm:$0xff]  }
  0xa7   : > { %12226 = vmatpush3.bf16.msra.mxu1 %v13262_v63  ;;  %v1063_v63 = vrot.slane %v17486_v32, 5  ;;  %11927 = vmatprep.mubr.bf16.mxu0 %v10286_v25  ;;  %v17487_v32 = vld [vmem:[#allocation14_spill] sm:$0xff]  ;;  %v17488_v25 = vcombine.low %v14237_v46, %v14245_v52 }
  0xa8   : > { %12227 = vmatprep.subr.bf16.mxu1 %v13268_v45  ;;  %11940 = vmatpush3.bf16.msra.mxu0 %v13266_v6  ;;  %v4300_v6 = vrot.slane %v14245_v52, 5  ;;  %v4303_v4 = vrot.slane %v17487_v32, 5  ;;  %v14564_v43 = vsel %vm14467_vm5, %v4295_v14, %v4296_v5  ;;  %v14592_v52 = vsel %vm14467_vm5, %v10303_v7, %v1067_v12  ;;  %v17489_v14 = vld [vmem:[#allocation15_spill] sm:$0xff] }
  0xa9   : > { %11941 = vmatprep.subr.bf16.mxu0 %v13269_v53  ;;  %v10766_v35 = vcombine.low %v14550_v17, %v14564_v43  ;;  %v17491_v32 = vrot.slane %v14051_v23, 5  ;;  %v17492_v7 = vrot.slane %v14426_v11, 9  ;;  %v1009_v23 = vld [vmem:[%s13989_s11 + $0x48] sm:$0xe]  ;;  %v17494_v11 = vcombine.low %v14261_v16, %v14264_v18  ;;  %v13299_v17 = vld [vmem:[%s17428_s1 + $0xf0] sm:$0xff]  }
  0xaa   : > { %12212 = vmatmul.mubr.bf16.gmra.mrb[4].mxu1 %v10718_v60  ;;  %v14581_v60 = vsel %vm14467_vm5, %v1062_v44, %v1063_v63  ;;  %v14585_v5 = vsel %vm14467_vm5, %v10743_v13, %v4300_v6  ;;  %v1070_v63 = vrot.slane %v17489_v14, 5  ;;  %v17490_v44 = vld [vmem:[#allocation16_spill] sm:$0xff]  ;;  %v4309_v14 = vrot.slane %v4307_v37, 4  ;;  %v13300_v43 = vld [vmem:[%s17428_s1 + $0xf0] sm:$0xff]  }
  0xab   : > { %12228 = vmatpush3.bf16.msra.mxu1 %v13268_v45  ;;  %12215 = vmatprep.mubr.bf16.mxu1 %v17488_v25  ;;  %v4302_v45 = vrot.slane %v4300_v6, 4  ;;  %v10326_v46 = vcombine.low %v14568_v56, %v14581_v60  ;;  %v4310_v13 = vrot.slane %v17490_v44, 5  ;;  %v13278_v6 = vld [vmem:[%s17428_s1 + $0xa8] sm:$0xff]   ;;  %v14613_v12 = vsel %vm14467_vm5, %v17492_v7, %v17491_v32  ;;  %v1010_v7 = vld [vmem:[%s13989_s11 + $0x54] sm:$0xe]  ;;  %v13301_v56 = vld [vmem:[%s17428_s1 + $0xf8] sm:$0xff]  }
  0xac   : > { %12229 = vmatprep.subr.bf16.mxu1 %v13270_v58  ;;  %11942 = vmatpush3.bf16.msra.mxu0 %v13269_v53  ;;  %v10744_v53 = vrot.slane %v10736_v30, 9  ;;  %v14626_v30 = vsel %vm14467_vm5, %v1069_v26, %v1070_v63  ;;  %v10304_v44 = vrot.slane %v1009_v23, 9  ;;  %v10737_v32 = vld [vmem:[%s13989_s11 + $0xa8] sm:$0xe]  ;;  %v4314_v18 = vrot.slane %v14345_v62, 5  ;;  %v13304_v60 = vld [vmem:[%s13989_s11 + $0x6c] sm:$0xff]  }
  0xad   : > { %11943 = vmatprep.subr.bf16.mxu0 %v13274_v42  ;;  %v14600_v0 = vsel %vm14467_vm5, %v4302_v45, %v4303_v4  ;;  %v17493_v4 = vrot.slane %v14054_v24, 5  ;;  %v17495_v26 = vld [vmem:[#allocation17_spill] sm:$0xff]  ;;  %v10745_v16 = vrot.slane %v10737_v32, 9  ;;  %v1081_v32 = vrot.slane %v14358_v19, 5 }
  0xae   : > { %v10767_v45 = vcombine.low %v14585_v5, %v14600_v0  ;;  %11928 = vmatmul.mubr.bf16.gmra.mrb[8].mxu0 %v17494_v11  ;;  %v1077_v63 = vrot.slane %v17495_v26, 5  ;;  %v10305_v11 = vrot.slane %v1010_v7, 9  ;;  %v17498_v26 = vcombine.low %v14272_v40, %v14295_v21  ;;  %v10732_v24 = vld [vmem:[%s13989_s11 + $0x6c] sm:$0xe]  ;;  %v13284_v40 = vld [vmem:[%s17428_s1 + $0xb0] sm:$0xff]   ;;  %v13302_v5 = vld [vmem:[%s17428_s1 + $0xf8] sm:$0xff]  }
  0xaf   : > { %v14620_v25 = vsel %vm14467_vm5, %v14458_v28, %v17493_v4  ;;  %12230 = vmatpush3.bf16.msra.mxu1 %v13270_v58  ;;  %v14636_v28 = vsel %vm14467_vm5, %v10744_v53, %v4307_v37  ;;  %v1074_v58 = vrot.slane %v14315_v9, 5  ;;  %v17496_v53 = vcombine.low %v14304_v49, %v14315_v9  ;;  %v13282_v37 = vld [vmem:[%s17428_s1 + $0xb0] sm:$0xff]   ;;  %v17497_v4 = vld [vmem:[#allocation19_spill] sm:$0xff] }
  0xb0   : > { %12231 = vmatprep.subr.bf16.mxu1 %v13276_v27  ;;  %11944 = vmatpush3.bf16.msra.mxu0 %v13274_v42  ;;  %v14651_v42 = vsel %vm14467_vm5, %v4309_v14, %v4310_v13  ;;  %v4317_v23 = vrot.slane %v17497_v4, 5  ;;  %v14667_v13 = vsel %vm14467_vm5, %v10745_v16, %v4314_v18  ;;  %v10738_v14 = vld [vmem:[%s13989_s11 + $0xb4] sm:$0xe]  ;;  %v17499_v7 = vcombine.low %v14330_v48, %v14345_v62  ;;  %v17500_v4 = vld [vmem:[#allocation20_spill] sm:$0xff]  ;;  %v14833_v0 = vld [vmem:[%s13989_s11 + $0x14] sm:$0x1] }
  0xb1   : > { %11945 = vmatprep.subr.bf16.mxu0 %v13277_v20  ;;  %11931 = vmatprep.mubr.bf16.mxu0 %v17496_v53  ;;  %v10768_v49 = vcombine.low %v14636_v28, %v14651_v42  ;;  %v14663_v9 = vsel %vm14467_vm5, %v10304_v44, %v1074_v58  ;;  %v1076_v53 = vrot.slane %v1074_v58, 4  ;;  %v4316_v21 = vrot.slane %v4314_v18, 4 }
  0xb2   : > { %12216 = vmatmul.mubr.bf16.gmra.mrb[8].mxu1 %v17498_v26  ;;  %v14678_v44 = vsel %vm14467_vm5, %v10305_v11, %v1081_v32  ;;  %v1083_v58 = vrot.slane %v1081_v32, 4  ;;  %v1084_v26 = vrot.slane %v17500_v4, 5  ;;  %v10746_v62 = vrot.slane %v10738_v14, 9 }
  0xb3   : > { %12232 = vmatpush3.bf16.msra.mxu1 %v13276_v27  ;;  %12219 = vmatprep.mubr.bf16.mxu1 %v17499_v7  ;;  %v13285_v27 = vld [vmem:[%s17428_s1 + $0xb8] sm:$0xff]   ;;  %v14686_v48 = vsel %vm14467_vm5, %v1076_v53, %v1077_v63  ;;  %v4321_v16 = vrot.slane %v14374_v55, 5  ;;  %v4324_v18 = vrot.slane %v14385_v59, 5  ;;  %v10322_v11 = vcombine.low %v14489_v36, %v14505_v38 }
  0xb4   : > { %12233 = vmatprep.subr.bf16.mxu1 %v13278_v6  ;;  %11946 = vmatpush3.bf16.msra.mxu0 %v13277_v20  ;;  %v10328_v20 = vcombine.low %v14663_v9, %v14686_v48  ;;  %v14696_v32 = vsel %vm14467_vm5, %v4316_v21, %v4317_v23  ;;  %v14700_v63 = vsel %vm14467_vm5, %v1083_v58, %v1084_v26  ;;  %v10740_v7 = vrot.slane %v10732_v24, 9  ;;  %v13286_v58 = vld [vmem:[%s17428_s1 + $0xb8] sm:$0xff]   ;;  %v10827_v9 = vld [vmem:[%s13989_s11 + $0x6c] sm:$0xf] }
  0xb5   : > { %11947 = vmatprep.subr.bf16.mxu0 %v13282_v37  ;;  %v10769_v53 = vcombine.low %v14667_v13, %v14696_v32  ;;  %v10329_v59 = vcombine.low %v14678_v44, %v14700_v63  ;;  %v14708_v36 = vsel %vm14467_vm5, %v10746_v62, %v4321_v16  ;;  %v4323_v38 = vrot.slane %v4321_v16, 4  ;;  %v14848_v44 = vld [vmem:[%s13989_s11 + $0x70] sm:$0xf]  ;;  %v13305_v32 = vld [vmem:[%s13989_s11 + $0x18] sm:$0xff]   ;;  %v13308_v63 = vld [vmem:[%s17428_s1 + $0x100] sm:$0xff]  }
  0xb6   : > { %v17501_v23 = vcombine.low %v14352_v29, %v14358_v19  ;;  %v10763_v14 = vcombine.low %v14613_v12, %v14620_v25  ;;  %v4281_v21 = vrot.slane %v4279_v3, 4  ;;  %v17502_v4 = vrot.slane %v14068_v39, 5  ;;  %v13287_v39 = vld [vmem:[%s17428_s1 + $0xc0] sm:$0xff]  }
  0xb7   : > { %12234 = vmatpush3.bf16.msra.mxu1 %v13278_v6  ;;  %v17503_v6 = vrot.slane %v14429_v31, 9  ;;  %v17504_v29 = vrot.slane %v14083_v51, 5  ;;  %v14733_v25 = vsel %vm14467_vm5, %v4323_v38, %v4324_v18  ;;  %v17505_v51 = vcombine.low %v14370_v8, %v14374_v55  ;;  %v13288_v8 = vld [vmem:[%s17428_s1 + $0xc0] sm:$0xff]   ;;  %v13289_v55 = vld [vmem:[%s17428_s1 + $0xc8] sm:$0xff]  }
  0xb8   : > { %11932 = vmatmul.mubr.bf16.gmra.mrb[12].mxu0 %v17501_v23  ;;  %12235 = vmatprep.subr.bf16.mxu1 %v13284_v40  ;;  %v10770_v31 = vcombine.low %v14708_v36, %v14733_v25  ;;  %v4280_v24 = vsel %vm14467_vm5, %v10740_v7, %v4279_v3  ;;  %v13291_v3 = vld [vmem:[%s17428_s1 + $0xd0] sm:$0xff]   ;;  %v1586_v13 = vshll.u32 %v14833_v0, 16  ;;  %v4805_v48 = vshrl.u32 %v10827_v9, 16  ;;  %v13311_v36 = vld [vmem:[%s13989_s11 + $0x24] sm:$0xff]  }
  0xb9   : > { %11948 = vmatpush3.bf16.msra.mxu0 %v13282_v37  ;;  %v1040_v19 = vsel %vm14467_vm5, %v17503_v6, %v17502_v4  ;;  %v1043_v12 = vsel %vm14467_vm5, %v14478_v22, %v17504_v29  ;;  %11951 = vmatprep.mubr.bf16.mxu0 %v10322_v11  ;;  %v17506_v37 = vrot.slane %v14105_v2, 5  ;;  %v13290_v2 = vld [vmem:[%s17428_s1 + $0xc8] sm:$0xff]   ;;  %v4808_v38 = vshll.u32 %v10827_v9, 16  ;;  %v14871_v6 = vld [vmem:[%s13989_s11 + $0x1c] sm:$0xf] }
  0xba   : > { %11949 = vmatprep.subr.bf16.mxu0 %v13285_v27  ;;  %12220 = vmatmul.mubr.bf16.gmra.mrb[12].mxu1 %v17505_v51  ;;  %v10323_v22 = vcombine.low %v1040_v19, %v1043_v12  ;;  %v4814_v23 = vshll.u32 %v14848_v44, 16  ;;  %v13307_v19 = vld [vmem:[%s13989_s11 + $0x78] sm:$0xff]  }
  0xbb   : > { %12236 = vmatpush3.bf16.msra.mxu1 %v13284_v40  ;;  %12239 = vmatprep.mubr.bf16.mxu1 %v10763_v14  ;;  %v4283_v26 = vsel %vm14467_vm5, %v4281_v21, %v17506_v37  ;;  %v13292_v40 = vld [vmem:[%s17428_s1 + $0xd0] sm:$0xff]   ;;  %v14865_v14 = vld [vmem:[%s17428_s1 + $0x108] sm:$0xff]   ;;  %v4810_v29 = vrot.slane %v4808_v38, 5  ;;  %v14876_v37 = vld [vmem:[%s13989_s11 + $0x20] sm:$0x1] }
  0xbc   : > { %12237 = vmatprep.subr.bf16.mxu1 %v13286_v58  ;;  %v10764_v61 = vcombine.low %v4280_v24, %v4283_v26  ;;  %v4816_v12 = vrot.slane %v4814_v23, 5  ;;  %v13310_v26 = vld [vmem:[%s17428_s1 + $0x108] sm:$0xff]  }
  0xbd   : > { %11950 = vmatpush3.bf16.msra.mxu0 %v13285_v27  ;;  %v14851_v27 = vld [vmem:[%s13989_s11 + $0x74] sm:$0x1]  ;;  %v14929_v38 = vld [vmem:[%s13989_s11 + $0x28] sm:$0xf] }
  0xbe   : > { %11967 = vmatprep.subr.bf16.mxu0 %v13287_v39  ;;  %v4824_v4 = vshll.u32 %v14851_v27, 16 }
  0xbf   : > { %12238 = vmatpush3.bf16.msra.mxu1 %v13286_v58  ;;  %v4818_v58 = vshrl.u32 %v14848_v44, 16 }
  0xc0   : > { %11952 = vmatmul.mubr.bf16.vlgmr.msra.gmra.mrb[0].mxu0 %v10323_v22  ;;  %12255 = vmatprep.subr.bf16.mxu1 %v13288_v8  ;;  %v4826_v24 = vrot.slane %v4824_v4, 5 }
  0xc1   : > { %11968 = vmatpush3.bf16.msra.mxu0 %v13287_v39  ;;  %11955 = vmatprep.mubr.bf16.mxu0 %v10324_v34  ;;  %v13295_v34 = vld [vmem:[%s17428_s1 + $0xe0] sm:$0xff]   ;;  %v4820_v22 = vrot.slane %v4818_v58, 4  ;;  %v13315_v58 = vld [vmem:[%s13989_s11 + $0x90] sm:$0xff]  }
  0xc2   : > { %11969 = vmatprep.subr.bf16.mxu0 %v13289_v55  ;;  %12240 = vmatmul.mubr.bf16.vlgmr.msra.gmra.mrb[0].mxu1 %v10764_v61 }
  0xc3   : > { %12256 = vmatpush3.bf16.msra.mxu1 %v13288_v8  ;;  %12243 = vmatprep.mubr.bf16.mxu1 %v10765_v57  ;;  %v17508_v57 = vcombine.low %v14592_v52, %v14626_v30  ;;  %v14830_v52 = vld [vmem:[%s13989_s11 + $0x10] sm:$0xf] }
  0xc4   : > { %12257 = vmatprep.subr.bf16.mxu1 %v13290_v2  ;;  %v1576_v42 = vshll.u32 %v14830_v52, 16 }
  0xc5   : > { %11970 = vmatpush3.bf16.msra.mxu0 %v13289_v55 }
  0xc6   : > { %11971 = vmatprep.subr.bf16.mxu0 %v13291_v3  ;;  %v1578_v18 = vrot.slane %v1576_v42, 5 }
  0xc7   : > { %12258 = vmatpush3.bf16.msra.mxu1 %v13290_v2  ;;  %v1600_v2 = vshll.u32 %v14871_v6, 16 }
  0xc8   : > { %11956 = vmatmul.mubr.bf16.gmra.mrb[4].mxu0 %v17507_v10  ;;  %12259 = vmatprep.subr.bf16.mxu1 %v13292_v40 }
  0xc9   : > { %11972 = vmatpush3.bf16.msra.mxu0 %v13291_v3  ;;  %11959 = vmatprep.mubr.bf16.mxu0 %v10326_v46  ;;  %v10386_v46 = vld [vmem:[%s13989_s11 + $0xc] sm:$0xf]  ;;  %v10830_v3 = vld [vmem:[%s13989_s11 + $0x78] sm:$0xf] }
  0xca   : > { %11973 = vmatprep.subr.bf16.mxu0 %v13293_v50  ;;  %12244 = vmatmul.mubr.bf16.gmra.mrb[4].mxu1 %v10766_v35  ;;  %v13303_v35 = vld [vmem:[%s13989_s11 + $0xc] sm:$0xff]   ;;  %v1567_v30 = vshrl.u32 %v10386_v46, 16  ;;  %v1570_v28 = vshll.u32 %v10386_v46, 16  ;;  %v1610_v46 = vshll.u32 %v14876_v37, 16 }
  0xcb   : > { %12260 = vmatpush3.bf16.msra.mxu1 %v13292_v40  ;;  %12247 = vmatprep.mubr.bf16.mxu1 %v10767_v45  ;;  %v14841_v45 = vld [vmem:[%s17428_s1 + $0x100] sm:$0xff]  }
  0xcc   : > { %12261 = vmatprep.subr.bf16.mxu1 %v13294_v47  ;;  %v1569_v62 = vrot.slane %v1567_v30, 4  ;;  %v1572_v16 = vrot.slane %v1570_v28, 5  ;;  %v13312_v40 = vld [vmem:[%s13989_s11 + $0x84] sm:$0xff]   ;;  %v4829_v30 = vshrl.u32 %v10830_v3, 16 }
  0xcd   : > { %11974 = vmatpush3.bf16.msra.mxu0 %v13293_v50  ;;  %v13314_v50 = vld [vmem:[%s17428_s1 + $0x110] sm:$0xff]  }
  0xce   : > { %11975 = vmatprep.subr.bf16.mxu0 %v13295_v34  ;;  %v1573_v7 = vor.u32 %v1572_v16, %v1569_v62 }
  0xcf   : > { %12262 = vmatpush3.bf16.msra.mxu1 %v13294_v47 }
  0xd0   : > { %11960 = vmatmul.mubr.bf16.gmra.mrb[8].mxu0 %v17508_v57  ;;  %12263 = vmatprep.subr.bf16.mxu1 %v13296_v15 }
  0xd1   : > { %11976 = vmatpush3.bf16.msra.mxu0 %v13295_v34  ;;  %11963 = vmatprep.mubr.bf16.mxu0 %v10328_v20  ;;  %v10389_v20 = vld [vmem:[%s13989_s11 + $0x18] sm:$0xf]  ;;  %v4821_v34 = vor.u32 %v4820_v22, %v4816_v12 }
  0xd2   : > { %11977 = vmatprep.subr.bf16.mxu0 %v13297_v54  ;;  %12248 = vmatmul.mubr.bf16.gmra.mrb[8].mxu1 %v10768_v49  ;;  %v1580_v49 = vshrl.u32 %v14830_v52, 16  ;;  %v1591_v25 = vshrl.u32 %v10389_v20, 16  ;;  %v1594_v39 = vshll.u32 %v10389_v20, 16 }
  0xd3   : > { %12264 = vmatpush3.bf16.msra.mxu1 %v13296_v15  ;;  %12251 = vmatprep.mubr.bf16.mxu1 %v10769_v53  ;;  %v1588_v53 = vrot.slane %v1586_v13, 5  ;;  %v1604_v15 = vshrl.u32 %v14871_v6, 16  ;;  %v14915_v13 = vld [vmem:[%s17428_s1 + $0x118] sm:$0xff]  }
  0xd4   : > { %12265 = vmatprep.subr.bf16.mxu1 %v13298_v1  ;;  %v1582_v11 = vrot.slane %v1580_v49, 4  ;;  %v1593_v55 = vrot.slane %v1591_v25, 4  ;;  %v1596_v61 = vrot.slane %v1594_v39, 5  ;;  %v4832_v49 = vshll.u32 %v10830_v3, 16  ;;  %v10833_v25 = vld [vmem:[%s13989_s11 + $0x84] sm:$0xf] }
  0xd5   : > { %11978 = vmatpush3.bf16.msra.mxu0 %v13297_v54  ;;  %v14893_v54 = vld [vmem:[%s13989_s11 + $0x7c] sm:$0xf] }
  0xd6   : > { %11979 = vmatprep.subr.bf16.mxu0 %v13299_v17  ;;  %v1583_v21 = vor.u32 %v1582_v11, %v1578_v18  ;;  %v4838_v9 = vshll.u32 %v14893_v54, 16  ;;  %v4831_v11 = vrot.slane %v4829_v30, 4  ;;  %v13320_v39 = vld [vmem:[%s13989_s11 + $0x9c] sm:$0xff]   ;;  %v13325_v30 = vld [vmem:[%s17428_s1 + $0x128] sm:$0xff]  }
  0xd7   : > { %12266 = vmatpush3.bf16.msra.mxu1 %v13298_v1 }
  0xd8   : > { %11964 = vmatmul.mubr.bf16.gmra.mrb[12].mxu0 %v10329_v59  ;;  %12267 = vmatprep.subr.bf16.mxu1 %v13300_v43  ;;  %v4807_v59 = vrot.slane %v4805_v48, 4  ;;  %v1584_v51 = vrot.slane %v1583_v21, 4  ;;  %v13319_v48 = vld [vmem:[%s13989_s11 + $0x3c] sm:$0xff]  }
  0xd9   : > { %11980 = vmatpush3.bf16.msra.mxu0 %v13299_v17  ;;  %11983 = vmatprep.mubr.bf16.mxu0 %v13303_v35  ;;  %v1597_v17 = vor.u32 %v1596_v61, %v1593_v55  ;;  %v13313_v35 = vld [vmem:[%s13989_s11 + $0x30] sm:$0xff]   ;;  %v13318_v55 = vld [vmem:[%s17428_s1 + $0x118] sm:$0xff]  }
  0xda   : > { %11981 = vmatprep.subr.bf16.mxu0 %v13301_v56  ;;  %12252 = vmatmul.mubr.bf16.gmra.mrb[12].mxu1 %v10770_v31  ;;  %v1574_v31 = vrot.slane %v1573_v7, 4  ;;  %v4811_v8 = vor.u32 %v4810_v29, %v4807_v59  ;;  %v1589_v47 = vsel %vm14075_vm2, %v1584_v51, %v1588_v53  ;;  %v14925_v53 = vrot.slane %v4838_v9, 5  ;;  %v10392_v59 = vld [vmem:[%s13989_s11 + $0x24] sm:$0xf] }
  0xdb   : > { %12268 = vmatpush3.bf16.msra.mxu1 %v13300_v43  ;;  %12271 = vmatprep.mubr.bf16.mxu1 %v13304_v60  ;;  %v1602_v43 = vrot.slane %v1600_v2, 5  ;;  %v4822_v60 = vrot.slane %v4821_v34, 4  ;;  %v1598_v42 = vrot.slane %v1597_v17, 4  ;;  %v1615_v21 = vshrl.u32 %v10392_v59, 16 }
  0xdc   : > { %12269 = vmatprep.subr.bf16.mxu1 %v13302_v5  ;;  %v1579_v10 = vsel %vm14075_vm2, %v1574_v31, %v1578_v18  ;;  %v4812_v1 = vrot.slane %v4811_v8, 4  ;;  %v1612_v18 = vrot.slane %v1610_v46, 5  ;;  %v1624_v29 = vshll.u32 %v14929_v38, 16  ;;  %v14944_v8 = vld [vmem:[%s13989_s11 + $0x88] sm:$0xf] }
  0xdd   : > { %11982 = vmatpush3.bf16.msra.mxu0 %v13301_v56  ;;  %v14896_v57 = vcombine.low %v1579_v10, %v1589_v47  ;;  %v14899_v56 = vld [vmem:[%s13989_s11 + $0x80] sm:$0x1]  ;;  %v4827_v62 = vsel %vm14075_vm2, %v4822_v60, %v4826_v24  ;;  %v1617_v24 = vrot.slane %v1615_v21, 4  ;;  %v4856_v60 = vshll.u32 %v10833_v25, 16  ;;  %v10395_v46 = vld [vmem:[%s13989_s11 + $0x30] sm:$0xf] }
  0xde   : > { %11999 = vmatprep.subr.bf16.mxu0 %v14841_v45  ;;  %v4817_v28 = vsel %vm14075_vm2, %v4812_v1, %v4816_v12  ;;  %v4848_v7 = vshll.u32 %v14899_v56, 16  ;;  %v1628_v12 = vshrl.u32 %v14929_v38, 16  ;;  %v1626_v3 = vrot.slane %v1624_v29, 5  ;;  %v13322_v10 = vld [vmem:[%s17428_s1 + $0x120] sm:$0xff]   ;;  %v10836_v29 = vld [vmem:[%s13989_s11 + $0x90] sm:$0xf] }
  0xdf   : > { %12270 = vmatpush3.bf16.msra.mxu1 %v13302_v5  ;;  %v1606_v5 = vrot.slane %v1604_v15, 4  ;;  %v14921_v20 = vcombine.low %v4817_v28, %v4827_v62  ;;  %v4853_v15 = vshrl.u32 %v10833_v25, 16  ;;  %v13324_v1 = vld [vmem:[%s17428_s1 + $0x120] sm:$0xff]  }
  0xe0   : > { %11984 = vmatmul.mubr.bf16.vlgmr.msra.gmra.mrb[0].mxu0 %v13305_v32  ;;  %12287 = vmatprep.subr.bf16.mxu1 %v13308_v63  ;;  %v1603_v32 = vsel %vm14075_vm2, %v1598_v42, %v1602_v43  ;;  %v4850_v22 = vrot.slane %v4848_v7, 5  ;;  %v1630_v47 = vrot.slane %v1628_v12, 4  ;;  %v13330_v12 = vld [vmem:[%s17428_s1 + $0x130] sm:$0xff]  }
  0xe1   : > { %12000 = vmatpush3.bf16.msra.mxu0 %v14841_v45  ;;  %11987 = vmatprep.mubr.bf16.mxu0 %v13311_v36  ;;  %v14907_v45 = vld [vmem:[%s17428_s1 + $0x110] sm:$0xff]   ;;  %v1607_v16 = vor.u32 %v1606_v5, %v1602_v43  ;;  %v4842_v36 = vshrl.u32 %v14893_v54, 16  ;;  %v4862_v5 = vshll.u32 %v14944_v8, 16  ;;  %v4855_v9 = vrot.slane %v4853_v15, 4 }
  0xe2   : > { %12001 = vmatprep.subr.bf16.mxu0 %v14865_v14  ;;  %12272 = vmatmul.mubr.bf16.vlgmr.msra.gmra.mrb[0].mxu1 %v13307_v19  ;;  %v1618_v19 = vshll.u32 %v10392_v59, 16  ;;  %v1631_v42 = vor.u32 %v1630_v47, %v1626_v3  ;;  %v14982_v59 = vld [vmem:[%s13989_s11 + $0x34] sm:$0xf] }
  0xe3   : > { %12288 = vmatpush3.bf16.msra.mxu1 %v13308_v63  ;;  %12275 = vmatprep.mubr.bf16.mxu1 %v13312_v40  ;;  %v4834_v63 = vrot.slane %v4832_v49, 5  ;;  %v1608_v23 = vrot.slane %v1607_v16, 4  ;;  %v4844_v51 = vrot.slane %v4842_v36, 4  ;;  %v13321_v40 = vld [vmem:[%s13989_s11 + $0x48] sm:$0xff]   ;;  %v4858_v16 = vrot.slane %v4856_v60, 5  ;;  %v13328_v36 = vld [vmem:[%s13989_s11 + $0xb4] sm:$0xff]  }
  0xe4   : > { %12289 = vmatprep.subr.bf16.mxu1 %v13310_v26  ;;  %v1620_v2 = vrot.slane %v1618_v19, 5  ;;  %v14993_v19 = vld [vmem:[%s13989_s11 + $0x38] sm:$0x1]  ;;  %v13329_v60 = vld [vmem:[%s13989_s11 + $0x60] sm:$0xff]  }
  0xe5   : > { %12002 = vmatpush3.bf16.msra.mxu0 %v14865_v14  ;;  %v14934_v14 = vld [vmem:[%s13989_s11 + $0x2c] sm:$0x1]  ;;  %v4835_v4 = vor.u32 %v4834_v63, %v4831_v11  ;;  %v1613_v31 = vsel %vm14075_vm2, %v1608_v23, %v1612_v18  ;;  %v4864_v18 = vrot.slane %v4862_v5, 5  ;;  %v13327_v11 = vld [vmem:[%s13989_s11 + $0x54] sm:$0xff]   ;;  %v1632_v63 = vrot.slane %v1631_v42, 4 }
  0xe6   : > { %12003 = vmatprep.subr.bf16.mxu0 %v13314_v50  ;;  %v14950_v61 = vcombine.low %v1603_v32, %v1613_v31  ;;  %v1634_v34 = vshll.u32 %v14934_v14, 16  ;;  %v1621_v43 = vor.u32 %v1620_v2, %v1617_v24  ;;  %v1639_v23 = vshrl.u32 %v10395_v46, 16 }
  0xe7   : > { %12290 = vmatpush3.bf16.msra.mxu1 %v13310_v26  ;;  %v4836_v26 = vrot.slane %v4835_v4, 4  ;;  %v1658_v47 = vshll.u32 %v14993_v19, 16 }
  0xe8   : > { %11988 = vmatmul.mubr.bf16.gmra.mrb[4].mxu0 %v13313_v35  ;;  %12291 = vmatprep.subr.bf16.mxu1 %v14907_v45  ;;  %v14966_v35 = vld [vmem:[%s13989_s11 + $0x8c] sm:$0x1]  ;;  %v1636_v49 = vrot.slane %v1634_v34, 5  ;;  %v1622_v62 = vrot.slane %v1621_v43, 4  ;;  %v1641_v31 = vrot.slane %v1639_v23, 4  ;;  %v4877_v34 = vshrl.u32 %v10836_v29, 16 }
  0xe9   : > { %12004 = vmatpush3.bf16.msra.mxu0 %v13314_v50  ;;  %11991 = vmatprep.mubr.bf16.mxu0 %v13319_v48  ;;  %v4845_v50 = vor.u32 %v4844_v51, %v14925_v53  ;;  %v4841_v17 = vsel %vm14075_vm2, %v4836_v26, %v14925_v53  ;;  %v13323_v48 = vld [vmem:[%s13989_s11 + $0xa8] sm:$0xff]   ;;  %v4872_v53 = vshll.u32 %v14966_v35, 16  ;;  %v1642_v51 = vshll.u32 %v10395_v46, 16 }
  0xea   : > { %12005 = vmatprep.subr.bf16.mxu0 %v14915_v13  ;;  %12276 = vmatmul.mubr.bf16.gmra.mrb[4].mxu1 %v13315_v58  ;;  %v1627_v21 = vsel %vm14075_vm2, %v1622_v62, %v1626_v3  ;;  %v4859_v58 = vor.u32 %v4858_v16, %v4855_v9  ;;  %v1637_v25 = vsel %vm14075_vm2, %v1632_v63, %v1636_v49  ;;  %v15008_v3 = vld [vmem:[%s13989_s11 + $0x98] sm:$0x1]  ;;  %v4880_v43 = vshll.u32 %v10836_v29, 16  ;;  %v13332_v49 = vld [vmem:[%s17428_s1 + $0x130] sm:$0xff]   ;;  %v10398_v16 = vld [vmem:[%s13989_s11 + $0x3c] sm:$0xf] }
  0xeb   : > { %12292 = vmatpush3.bf16.msra.mxu1 %v14907_v45  ;;  %12279 = vmatprep.mubr.bf16.mxu1 %v13320_v39  ;;  %v4846_v28 = vrot.slane %v4845_v50, 4  ;;  %v4866_v45 = vshrl.u32 %v14944_v8, 16  ;;  %v4874_v39 = vrot.slane %v4872_v53, 5  ;;  %v15004_v24 = vcombine.low %v1627_v21, %v1637_v25  ;;  %v15030_v63 = vld [vmem:[%s13989_s11 + $0x40] sm:$0xf] }
  0xec   : > { %12293 = vmatprep.subr.bf16.mxu1 %v13318_v55  ;;  %v4860_v26 = vrot.slane %v4859_v58, 4  ;;  %v1652_v50 = vshrl.u32 %v14982_v59, 16  ;;  %v4879_v42 = vrot.slane %v4877_v34, 4  ;;  %v13331_v53 = vld [vmem:[%s13989_s11 + $0xc0] sm:$0xff]   ;;  %v1676_v34 = vshrl.u32 %v15030_v63, 16 }
  0xed   : > { %12006 = vmatpush3.bf16.msra.mxu0 %v14915_v13  ;;  %v4851_v32 = vsel %vm14075_vm2, %v4846_v28, %v4850_v22  ;;  %v13326_v13 = vld [vmem:[%s17428_s1 + $0x128] sm:$0xff]   ;;  %v4868_v4 = vrot.slane %v4866_v45, 4  ;;  %v15002_v22 = vld [vmem:[%s13989_s11 + $0x94] sm:$0xf]  ;;  %v1660_v28 = vrot.slane %v1658_v47, 5 }
  0xee   : > { %12007 = vmatprep.subr.bf16.mxu0 %v13322_v10  ;;  %v14988_v7 = vcombine.low %v4841_v17, %v4851_v32  ;;  %v1654_v46 = vrot.slane %v1652_v50, 4  ;;  %v4890_v62 = vshrl.u32 %v15002_v22, 16  ;;  %v4896_v32 = vshll.u32 %v15008_v3, 16  ;;  %v15034_v58 = vld [vmem:[%s13989_s11 + $0x44] sm:$0x1] }
  0xef   : > { %12294 = vmatpush3.bf16.msra.mxu1 %v13318_v55  ;;  %v4869_v2 = vor.u32 %v4868_v4, %v4864_v18  ;;  %v1648_v55 = vshll.u32 %v14982_v59, 16  ;;  %v1663_v4 = vshrl.u32 %v10398_v16, 16  ;;  %v13335_v50 = vld [vmem:[%s17428_s1 + $0x140] sm:$0xff]  }
  0xf0   : > { %11992 = vmatmul.mubr.bf16.gmra.mrb[8].mxu0 %v13321_v40  ;;  %12295 = vmatprep.subr.bf16.mxu1 %v13324_v1  ;;  %v1644_v40 = vrot.slane %v1642_v51, 5  ;;  %v4892_v21 = vrot.slane %v4890_v62, 4  ;;  %v13334_v51 = vld [vmem:[%s17428_s1 + $0x138] sm:$0xff]  }
  0xf1   : > { %12008 = vmatpush3.bf16.msra.mxu0 %v13322_v10  ;;  %11995 = vmatprep.mubr.bf16.mxu0 %v13327_v11  ;;  %v4865_v10 = vsel %vm14075_vm2, %v4860_v26, %v4864_v18  ;;  %v4870_v15 = vrot.slane %v4869_v2, 4  ;;  %v1650_v17 = vrot.slane %v1648_v55, 5  ;;  %v13333_v18 = vld [vmem:[%s17428_s1 + $0x138] sm:$0xff]   ;;  %v1665_v55 = vrot.slane %v1663_v4, 4 }
  0xf2   : > { %12009 = vmatprep.subr.bf16.mxu0 %v13325_v30  ;;  %12280 = vmatmul.mubr.bf16.gmra.mrb[8].mxu1 %v13323_v48  ;;  %v1645_v5 = vor.u32 %v1644_v40, %v1641_v31  ;;  %v4882_v48 = vrot.slane %v4880_v43, 5  ;;  %v1666_v31 = vshll.u32 %v10398_v16, 16  ;;  %v10839_v40 = vld [vmem:[%s13989_s11 + $0x9c] sm:$0xf] }
  0xf3   : > { %12296 = vmatpush3.bf16.msra.mxu1 %v13324_v1  ;;  %12283 = vmatprep.mubr.bf16.mxu1 %v13328_v36  ;;  %v4875_v9 = vsel %vm14075_vm2, %v4870_v15, %v4874_v39  ;;  %v4886_v1 = vshll.u32 %v15002_v22, 16  ;;  %v1655_v11 = vor.u32 %v1654_v46, %v1650_v17  ;;  %v4898_v39 = vrot.slane %v4896_v32, 5  ;;  %v15052_v15 = vld [vmem:[%s13989_s11 + $0xa0] sm:$0xf]  ;;  %v10401_v46 = vld [vmem:[%s13989_s11 + $0x48] sm:$0xf] }
  0xf4   : > { %12297 = vmatprep.subr.bf16.mxu1 %v13326_v13  ;;  %v1646_v45 = vrot.slane %v1645_v5, 4  ;;  %v4883_v23 = vor.u32 %v4882_v48, %v4879_v42  ;;  %v1668_v47 = vrot.slane %v1666_v31, 5  ;;  %v15059_v5 = vld [vmem:[%s13989_s11 + $0xa4] sm:$0x1]  ;;  %v1678_v42 = vrot.slane %v1676_v34, 4  ;;  %v13338_v31 = vld [vmem:[%s17428_s1 + $0x148] sm:$0xff]  }
  0xf5   : > { %12010 = vmatpush3.bf16.msra.mxu0 %v13325_v30  ;;  %v15026_v30 = vcombine.low %v4865_v10, %v4875_v9  ;;  %v4888_v36 = vrot.slane %v4886_v1, 5  ;;  %v1656_v25 = vrot.slane %v1655_v11, 4  ;;  %v1682_v10 = vshll.u32 %v15034_v58, 16  ;;  %v13336_v1 = vld [vmem:[%s17428_s1 + $0x140] sm:$0xff]  }
  0xf6   : > { %12011 = vmatprep.subr.bf16.mxu0 %v13330_v12  ;;  %v1651_v29 = vsel %vm14075_vm2, %v1646_v45, %v1650_v17  ;;  %v4884_v26 = vrot.slane %v4883_v23, 4  ;;  %v4901_v48 = vshrl.u32 %v10839_v40, 16  ;;  %v4904_v16 = vshll.u32 %v10839_v40, 16  ;;  %v13337_v45 = vld [vmem:[%s17428_s1 + $0x148] sm:$0xff]  }
  0xf7   : > { %12298 = vmatpush3.bf16.msra.mxu1 %v13326_v13  ;;  %v4893_v2 = vor.u32 %v4892_v21, %v4888_v36  ;;  %v1672_v13 = vshll.u32 %v15030_v63, 16  ;;  %v1684_v9 = vrot.slane %v1682_v10, 5  ;;  %v15076_v23 = vld [vmem:[%s13989_s11 + $0x4c] sm:$0xf] }
  0xf8   : > { %11996 = vmatmul.mubr.bf16.gmra.mrb[12].mxu0 %v13329_v60  ;;  %12299 = vmatprep.subr.bf16.mxu1 %v13332_v49  ;;  %v15090_v40 = vld [vmem:[%s13989_s11 + $0xac] sm:$0xf] }
  0xf9   : > { %12012 = vmatpush3.bf16.msra.mxu0 %v13330_v12  ;;  %12015 = vmatprep.mubr.bf16.mxu0 %v14896_v57  ;;  %v1661_v12 = vsel %vm14075_vm2, %v1656_v25, %v1660_v28  ;;  %v4889_v57 = vsel %vm14075_vm2, %v4884_v26, %v4888_v36  ;;  %v4894_v43 = vrot.slane %v4893_v2, 4  ;;  %v1674_v60 = vrot.slane %v1672_v13, 5  ;;  %v15080_v25 = vld [vmem:[%s13989_s11 + $0x50] sm:$0x1] }
  0xfa   : > { %12013 = vmatprep.subr.bf16.mxu0 %v13333_v18  ;;  %12284 = vmatmul.mubr.bf16.gmra.mrb[12].mxu1 %v13331_v53  ;;  %v15054_v17 = vcombine.low %v1651_v29, %v1661_v12  ;;  %v1669_v28 = vor.u32 %v1668_v47, %v1665_v55  ;;  %v4903_v53 = vrot.slane %v4901_v48, 4  ;;  %v4906_v36 = vrot.slane %v4904_v16, 5 }
  0xfb   : > { %12300 = vmatpush3.bf16.msra.mxu1 %v13332_v49  ;;  %12303 = vmatprep.mubr.bf16.mxu1 %v14921_v20  ;;  %v4899_v62 = vsel %vm14075_vm2, %v4894_v43, %v4898_v39  ;;  %v4910_v49 = vshll.u32 %v15052_v15, 16  ;;  %v4914_v20 = vshrl.u32 %v15052_v15, 16  ;;  %v1679_v32 = vor.u32 %v1678_v42, %v1674_v60  ;;  %v10842_v39 = vld [vmem:[%s13989_s11 + $0xa8] sm:$0xf] }
  0xfc   : > { %12301 = vmatprep.subr.bf16.mxu1 %v13334_v51  ;;  %v1670_v11 = vrot.slane %v1669_v28, 4  ;;  %v4920_v29 = vshll.u32 %v15059_v5, 16  ;;  %v1687_v55 = vshrl.u32 %v10401_v46, 16  ;;  %v1690_v13 = vshll.u32 %v10401_v46, 16 }
  0xfd   : > { %12014 = vmatpush3.bf16.msra.mxu0 %v13333_v18  ;;  %v15073_v18 = vcombine.low %v4889_v57, %v4899_v62  ;;  %v4912_v21 = vrot.slane %v4910_v49, 5  ;;  %v4916_v4 = vrot.slane %v4914_v20, 4  ;;  %v1680_v2 = vrot.slane %v1679_v32, 4  ;;  %v15111_v49 = vld [vmem:[%s13989_s11 + $0xb0] sm:$0x1]  ;;  %v13341_v32 = vld [vmem:[%s17428_s1 + $0x158] sm:$0xff]  }
  0xfe   : > { %12031 = vmatprep.subr.bf16.mxu0 %v13335_v50  ;;  %v1675_v26 = vsel %vm14075_vm2, %v1670_v11, %v1674_v60  ;;  %v4907_v12 = vor.u32 %v4906_v36, %v4903_v53  ;;  %v4922_v34 = vrot.slane %v4920_v29, 5  ;;  %v1689_v57 = vrot.slane %v1687_v55, 4  ;;  %v10404_v11 = vld [vmem:[%s13989_s11 + $0x54] sm:$0xf] }
  0xff   : > { %12302 = vmatpush3.bf16.msra.mxu1 %v13334_v51  ;;  %v4917_v47 = vor.u32 %v4916_v4, %v4912_v21  ;;  %v1696_v51 = vshll.u32 %v15076_v23, 16  ;;  %v1685_v10 = vsel %vm14075_vm2, %v1680_v2, %v1684_v9  ;;  %v1692_v43 = vrot.slane %v1690_v13, 5 }
 0x100   : > { %12016 = vmatmul.mubr.bf16.vlgmr.msra.gmra.mrb[0].mxu0 %v14950_v61  ;;  %12319 = vmatprep.subr.bf16.mxu1 %v13336_v1  ;;  %v13339_v61 = vld [vmem:[%s17428_s1 + $0x150] sm:$0xff]   ;;  %v1700_v60 = vshrl.u32 %v15076_v23, 16  ;;  %v4908_v46 = vrot.slane %v4907_v12, 4  ;;  %v1706_v62 = vshll.u32 %v15080_v25, 16  ;;  %v4925_v16 = vshrl.u32 %v10842_v39, 16 }
 0x101   : > { %12032 = vmatpush3.bf16.msra.mxu0 %v13335_v50  ;;  %12019 = vmatprep.mubr.bf16.mxu0 %v15004_v24  ;;  %v10430_v50 = vcombine.low %v1675_v26, %v1685_v10  ;;  %v4918_v28 = vrot.slane %v4917_v47, 4  ;;  %v1698_v42 = vrot.slane %v1696_v51, 5  ;;  %v13340_v24 = vld [vmem:[%s17428_s1 + $0x150] sm:$0xff]   ;;  %v1693_v9 = vor.u32 %v1692_v43, %v1689_v57  ;;  %v15127_v47 = vld [vmem:[%s13989_s11 + $0x5c] sm:$0x1] }
 0x102   : > { %12033 = vmatprep.subr.bf16.mxu0 %v13337_v45  ;;  %12304 = vmatmul.mubr.bf16.vlgmr.msra.gmra.mrb[0].mxu1 %v14988_v7  ;;  %v1702_v48 = vrot.slane %v1700_v60, 4  ;;  %v4913_v7 = vsel %vm14075_vm2, %v4908_v46, %v4912_v21  ;;  %v4934_v20 = vshll.u32 %v15090_v40, 16  ;;  %v1708_v4 = vrot.slane %v1706_v62, 5  ;;  %v15119_v21 = vld [vmem:[%s13989_s11 + $0x58] sm:$0xf] }
 0x103   : > { %12320 = vmatpush3.bf16.msra.mxu1 %v13336_v1  ;;  %12307 = vmatprep.mubr.bf16.mxu1 %v15026_v30  ;;  %v4923_v1 = vsel %vm14075_vm2, %v4918_v28, %v4922_v34  ;;  %v4928_v30 = vshll.u32 %v10842_v39, 16  ;;  %v4927_v29 = vrot.slane %v4925_v16, 4  ;;  %v4938_v39 = vshrl.u32 %v15090_v40, 16  ;;  %v13342_v51 = vld [vmem:[%s17428_s1 + $0x158] sm:$0xff]   ;;  %v10845_v43 = vld [vmem:[%s13989_s11 + $0xb4] sm:$0xf] }
 0x104   : > { %12321 = vmatprep.subr.bf16.mxu1 %v13338_v31  ;;  %v10871_v53 = vcombine.low %v4913_v7, %v4923_v1  ;;  %v1703_v36 = vor.u32 %v1702_v48, %v1698_v42  ;;  %v4936_v2 = vrot.slane %v4934_v20, 5  ;;  %v4944_v12 = vshll.u32 %v15111_v49, 16  ;;  %v15145_v7 = vld [vmem:[%s13989_s11 + $0xb8] sm:$0xf] }
 0x105   : > { %12034 = vmatpush3.bf16.msra.mxu0 %v13337_v45  ;;  %v1694_v45 = vrot.slane %v1693_v9, 4  ;;  %v4930_v26 = vrot.slane %v4928_v30, 5  ;;  %v1711_v34 = vshrl.u32 %v10404_v11, 16  ;;  %v4940_v57 = vrot.slane %v4938_v39, 4 }
 0x106   : > { %12035 = vmatprep.subr.bf16.mxu0 %v13339_v61  ;;  %v1704_v13 = vrot.slane %v1703_v36, 4  ;;  %v4946_v46 = vrot.slane %v4944_v12, 5  ;;  %v1730_v20 = vshll.u32 %v15127_v47, 16 }
 0x107   : > { %12322 = vmatpush3.bf16.msra.mxu1 %v13338_v31  ;;  %v1699_v55 = vsel %vm14075_vm2, %v1694_v45, %v1698_v42  ;;  %v4931_v10 = vor.u32 %v4930_v26, %v4927_v29  ;;  %v1714_v31 = vshll.u32 %v10404_v11, 16  ;;  %v1713_v28 = vrot.slane %v1711_v34, 4  ;;  %v10407_v26 = vld [vmem:[%s13989_s11 + $0x60] sm:$0xf] }
 0x108   : > { %12020 = vmatmul.mubr.bf16.gmra.mrb[4].mxu0 %v15054_v17  ;;  %12323 = vmatprep.subr.bf16.mxu1 %v13340_v24  ;;  %v1720_v17 = vshll.u32 %v15119_v21, 16  ;;  %v1709_v60 = vsel %vm14075_vm2, %v1704_v13, %v1708_v4  ;;  %v1724_v42 = vshrl.u32 %v15119_v21, 16  ;;  %v4941_v62 = vor.u32 %v4940_v57, %v4936_v2  ;;  %v15151_v4 = vld [vmem:[%s13989_s11 + $0xbc] sm:$0x1]  ;;  %v15159_v13 = vld [vmem:[%s13989_s11 + $0x64] sm:$0xf] }
 0x109   : > { %12036 = vmatpush3.bf16.msra.mxu0 %v13339_v61  ;;  %12023 = vmatprep.mubr.bf16.mxu0 %v10430_v50  ;;  %v13343_v61 = vld [vmem:[%s17428_s1 + $0x160] sm:$0xff]   ;;  %v10431_v9 = vcombine.low %v1699_v55, %v1709_v60  ;;  %v4932_v48 = vrot.slane %v4931_v10, 4  ;;  %v1716_v16 = vrot.slane %v1714_v31, 5  ;;  %v4952_v29 = vshll.u32 %v10845_v43, 16  ;;  %v15165_v57 = vld [vmem:[%s13989_s11 + $0x68] sm:$0x1] }
 0x10a   : > { %12037 = vmatprep.subr.bf16.mxu0 %v13341_v32  ;;  %12308 = vmatmul.mubr.bf16.gmra.mrb[4].mxu1 %v15073_v18  ;;  %v13344_v50 = vld [vmem:[%s17428_s1 + $0x160] sm:$0xff]   ;;  %v1722_v1 = vrot.slane %v1720_v17, 5  ;;  %v1726_v30 = vrot.slane %v1724_v42, 4  ;;  %v4949_v18 = vshrl.u32 %v10845_v43, 16  ;;  %v4942_v45 = vrot.slane %v4941_v62, 4  ;;  %v13346_v17 = vld [vmem:[%s17428_s1 + $0x168] sm:$0xff]  }
 0x10b   : > { %12324 = vmatpush3.bf16.msra.mxu1 %v13340_v24  ;;  %12311 = vmatprep.mubr.bf16.mxu1 %v10871_v53  ;;  %v4937_v11 = vsel %vm14075_vm2, %v4932_v48, %v4936_v2  ;;  %v1717_v36 = vor.u32 %v1716_v16, %v1713_v28  ;;  %v13345_v24 = vld [vmem:[%s17428_s1 + $0x168] sm:$0xff]   ;;  %v1732_v39 = vrot.slane %v1730_v20, 5  ;;  %v4954_v34 = vrot.slane %v4952_v29, 5  ;;  %v10848_v42 = vld [vmem:[%s13989_s11 + $0xc0] sm:$0xf] }
 0x10c   : > { %12325 = vmatprep.subr.bf16.mxu1 %v13342_v51  ;;  %v1727_v53 = vor.u32 %v1726_v30, %v1722_v1  ;;  %v4951_v55 = vrot.slane %v4949_v18, 4  ;;  %v4947_v2 = vsel %vm14075_vm2, %v4942_v45, %v4946_v46  ;;  %v4962_v10 = vshrl.u32 %v15145_v7, 16 }
 0x10d   : > { %12038 = vmatpush3.bf16.msra.mxu0 %v13341_v32  ;;  %v4958_v32 = vshll.u32 %v15145_v7, 16  ;;  %v1718_v12 = vrot.slane %v1717_v36, 4  ;;  %v10872_v31 = vcombine.low %v4937_v11, %v4947_v2  ;;  %v4968_v28 = vshll.u32 %v15151_v4, 16  ;;  %v15181_v36 = vld [vmem:[%s13989_s11 + $0xc4] sm:$0xf] }
 0x10e   : > { %12039 = vmatprep.subr.bf16.mxu0 %v13343_v61  ;;  %v1728_v43 = vrot.slane %v1727_v53, 4  ;;  %v4955_v48 = vor.u32 %v4954_v34, %v4951_v55  ;;  %v4964_v62 = vrot.slane %v4962_v10, 4  ;;  %v1738_v30 = vshll.u32 %v10407_v26, 16  ;;  %v15186_v55 = vld [vmem:[%s13989_s11 + $0xc8] sm:$0x1] }
 0x10f   : > { %12326 = vmatpush3.bf16.msra.mxu1 %v13342_v51  ;;  %v4960_v60 = vrot.slane %v4958_v32, 5  ;;  %v1723_v46 = vsel %vm14075_vm2, %v1718_v12, %v1722_v1  ;;  %v1735_v51 = vshrl.u32 %v10407_v26, 16  ;;  %v4970_v16 = vrot.slane %v4968_v28, 5  ;;  %v10442_v10 = vld [vmem:[%s13989_s11 + $0xc] sm:$0xe] }
 0x110   : > { %12024 = vmatmul.mubr.bf16.gmra.mrb[8].mxu0 %v10431_v9  ;;  %12327 = vmatprep.subr.bf16.mxu1 %v13344_v50  ;;  %v1733_v9 = vsel %vm14075_vm2, %v1728_v43, %v1732_v39  ;;  %v1744_v20 = vshll.u32 %v15159_v13, 16  ;;  %v4956_v11 = vrot.slane %v4955_v48, 4  ;;  %v1740_v29 = vrot.slane %v1738_v30, 5 }
 0x111   : > { %12040 = vmatpush3.bf16.msra.mxu0 %v13343_v61  ;;  %v13347_v61 = vld [vmem:[%s17428_s1 + $0x170] sm:$0xff]   ;;  %v10432_v18 = vcombine.low %v1723_v46, %v1733_v9  ;;  %v4965_v1 = vor.u32 %v4964_v62, %v4960_v60  ;;  %v1737_v45 = vrot.slane %v1735_v51, 4  ;;  %v1748_v39 = vshrl.u32 %v15159_v13, 16 }
 0x112   : > { %12041 = vmatprep.subr.bf16.mxu0 %v13345_v24  ;;  %12312 = vmatmul.mubr.bf16.gmra.mrb[8].mxu1 %v10872_v31  ;;  %v1746_v53 = vrot.slane %v1744_v20, 5  ;;  %v1754_v26 = vshll.u32 %v15165_v57, 16  ;;  %v4961_v32 = vsel %vm14075_vm2, %v4956_v11, %v4960_v60  ;;  %v4973_v12 = vshrl.u32 %v10848_v42, 16 }
 0x113   : > { %12328 = vmatpush3.bf16.msra.mxu1 %v13344_v50  ;;  %v4966_v2 = vrot.slane %v4965_v1, 4  ;;  %v4976_v34 = vshll.u32 %v10848_v42, 16  ;;  %v13348_v50 = vld [vmem:[%s17428_s1 + $0x170] sm:$0xff]   ;;  %12027 = vmatprep.mubr.bf16.mxu0 %v10432_v18  ;;  %v1741_v31 = vor.u32 %v1740_v29, %v1737_v45  ;;  %v1750_v43 = vrot.slane %v1748_v39, 4  ;;  %v10883_v18 = vld [vmem:[%s13989_s11 + $0x6c] sm:$0xe] }
 0x114   : > { %12329 = vmatprep.subr.bf16.mxu1 %v13346_v17  ;;  %v1756_v28 = vrot.slane %v1754_v26, 5  ;;  %v4982_v46 = vshll.u32 %v15181_v36, 16  ;;  %v4975_v42 = vrot.slane %v4973_v12, 4  ;;  %v4986_v62 = vshrl.u32 %v15181_v36, 16  ;;  %v10443_v39 = vld [vmem:[%s13989_s11 + $0x18] sm:$0xe] }
 0x115   : > { %12042 = vmatpush3.bf16.msra.mxu0 %v13345_v24  ;;  %v13349_v24 = vld [vmem:[%s17428_s1 + $0x178] sm:$0xff]   ;;  %v4971_v60 = vsel %vm14075_vm2, %v4966_v2, %v4970_v16  ;;  %v4978_v48 = vrot.slane %v4976_v34, 5  ;;  %v1742_v9 = vrot.slane %v1741_v31, 4  ;;  %v1751_v30 = vor.u32 %v1750_v43, %v1746_v53 }
 0x116   : > { %12043 = vmatprep.subr.bf16.mxu0 %v13347_v61  ;;  %v10873_v51 = vcombine.low %v4961_v32, %v4971_v60  ;;  %v4984_v20 = vrot.slane %v4982_v46, 5  ;;  %v4988_v1 = vrot.slane %v4986_v62, 4  ;;  %v4992_v45 = vshll.u32 %v15186_v55, 16  ;;  %v13350_v16 = vld [vmem:[%s17428_s1 + $0x178] sm:$0xff]  }
 0x117   : > { %12330 = vmatpush3.bf16.msra.mxu1 %v13346_v17  ;;  %v4979_v11 = vor.u32 %v4978_v48, %v4975_v42  ;;  %v10450_v29 = vrot.slane %v10442_v10, 9  ;;  %v1747_v17 = vsel %vm14075_vm2, %v1742_v9, %v1746_v53  ;;  %v1752_v26 = vrot.slane %v1751_v30, 4  ;;  %v10884_v62 = vld [vmem:[%s13989_s11 + $0x78] sm:$0xe]  ;;  %v10444_v30 = vld [vmem:[%s13989_s11 + $0x24] sm:$0xe] }
 0x118   : > { %12331 = vmatprep.subr.bf16.mxu1 %v13348_v50  ;;  %12315 = vmatprep.mubr.bf16.mxu1 %v10873_v51  ;;  %v2002_v32 = vrot.slane %v14830_v52, 5  ;;  %v2005_v2 = vrot.slane %v14833_v0, 5  ;;  %v4989_v34 = vor.u32 %v4988_v1, %v4984_v20  ;;  %v4994_v10 = vrot.slane %v4992_v45, 5 }
 0x119   : > { %12044 = vmatpush3.bf16.msra.mxu0 %v13347_v61  ;;  %v15214_v61 = vld [vmem:[%s17428_s1 + $0x180] sm:$0xff]   ;;  %v4980_v12 = vrot.slane %v4979_v11, 4  ;;  %v10891_v31 = vrot.slane %v10883_v18, 9  ;;  %v1757_v43 = vsel %vm14075_vm2, %v1752_v26, %v1756_v28  ;;  %v5239_v0 = vrot.slane %v14848_v44, 5 }
 0x11a   : > { %12045 = vmatprep.subr.bf16.mxu0 %v13349_v24  ;;  %v2003_v53 = vsel %vm14467_vm5, %v10450_v29, %v2002_v32  ;;  %v2004_v52 = vrot.slane %v2002_v32, 4  ;;  %v10433_v46 = vcombine.low %v1747_v17, %v1757_v43  ;;  %v4990_v42 = vrot.slane %v4989_v34, 4  ;;  %v10885_v11 = vld [vmem:[%s13989_s11 + $0x84] sm:$0xe] }
 0x11b   : > { %12332 = vmatpush3.bf16.msra.mxu1 %v13348_v50  ;;  %v4985_v60 = vsel %vm14075_vm2, %v4980_v12, %v4984_v20  ;;  %v5242_v48 = vrot.slane %v14851_v27, 5  ;;  %v15228_v50 = vld [vmem:[%s17428_s1 + $0x180] sm:$0xff]   ;;  %v5240_v44 = vsel %vm14467_vm5, %v10891_v31, %v5239_v0  ;;  %v5241_v51 = vrot.slane %v5239_v0, 4 }
 0x11c   : > { %12333 = vmatprep.subr.bf16.mxu1 %v13350_v16  ;;  %v2006_v28 = vsel %vm14467_vm5, %v2004_v52, %v2005_v2  ;;  %v10451_v9 = vrot.slane %v10443_v39, 9  ;;  %12028 = vmatmul.mubr.bf16.gmra.mrb[12].mxu0 %v10433_v46  ;;  %v4995_v27 = vsel %vm14075_vm2, %v4990_v42, %v4994_v10  ;;  %v2009_v20 = vrot.slane %v14871_v6, 5  ;;  %v10445_v6 = vld [vmem:[%s13989_s11 + $0x30] sm:$0xe]  ;;  %v13353_v52 = vld [vmem:[%s17428_s1 + $0x188] sm:$0xff]  }
 0x11d   : > { %12046 = vmatpush3.bf16.msra.mxu0 %v13349_v24  ;;  %v10474_v24 = vcombine.low %v2003_v53, %v2006_v28  ;;  %v2012_v18 = vrot.slane %v14876_v37, 5  ;;  %v10874_v1 = vcombine.low %v4985_v60, %v4995_v27  ;;  %v5243_v45 = vsel %vm14467_vm5, %v5241_v51, %v5242_v48  ;;  %v10886_v46 = vld [vmem:[%s13989_s11 + $0x90] sm:$0xe]  ;;  %v10446_v48 = vld [vmem:[%s13989_s11 + $0x3c] sm:$0xe] }
 0x11e   : > { %12063 = vmatprep.subr.bf16.mxu0 %v15214_v61  ;;  %v10892_v29 = vrot.slane %v10884_v62, 9  ;;  %v5246_v39 = vrot.slane %v14893_v54, 5  ;;  %v10915_v17 = vcombine.low %v5240_v44, %v5243_v45  ;;  %v2010_v26 = vsel %vm14467_vm5, %v10451_v9, %v2009_v20  ;;  %v13354_v62 = vld [vmem:[%s17428_s1 + $0x188] sm:$0xff]  }
 0x11f   : > { %12334 = vmatpush3.bf16.msra.mxu1 %v13350_v16  ;;  %12047 = vmatprep.mubr.bf16.mxu0 %v10474_v24  ;;  %v2011_v32 = vrot.slane %v2009_v20, 4  ;;  %v5249_v2 = vrot.slane %v14899_v56, 5  ;;  %v10452_v12 = vrot.slane %v10444_v30, 9  ;;  %v2016_v54 = vrot.slane %v14929_v38, 5  ;;  %v10887_v20 = vld [vmem:[%s13989_s11 + $0x9c] sm:$0xe] }
 0x120   : > { %12351 = vmatprep.subr.bf16.mxu1 %v15228_v50  ;;  %12316 = vmatmul.mubr.bf16.gmra.mrb[12].mxu1 %v10874_v1  ;;  %v5247_v37 = vsel %vm14467_vm5, %v10892_v29, %v5246_v39  ;;  %v5248_v16 = vrot.slane %v5246_v39, 4  ;;  %v2019_v10 = vrot.slane %v14934_v14, 5  ;;  %v10893_v56 = vrot.slane %v10885_v11, 9  ;;  %v10447_v45 = vld [vmem:[%s13989_s11 + $0x48] sm:$0xe] }
 0x121   : > { %12335 = vmatprep.mubr.bf16.mxu1 %v10915_v17  ;;  %v2013_v34 = vsel %vm14467_vm5, %v2011_v32, %v2012_v18  ;;  %v5253_v31 = vrot.slane %v14944_v8, 5  ;;  %v2017_v38 = vsel %vm14467_vm5, %v10452_v12, %v2016_v54  ;;  %v2018_v0 = vrot.slane %v2016_v54, 4 }
 0x122   : > { %v10475_v43 = vcombine.low %v2010_v26, %v2013_v34  ;;  %v5250_v53 = vsel %vm14467_vm5, %v5248_v16, %v5249_v2  ;;  %v5256_v8 = vrot.slane %v14966_v35, 5  ;;  %v10453_v44 = vrot.slane %v10445_v6, 9  ;;  %v10888_v16 = vld [vmem:[%s13989_s11 + $0xa8] sm:$0xe]  ;;  %v10448_v34 = vld [vmem:[%s13989_s11 + $0x54] sm:$0xe] }
 0x123   : > { %v10916_v60 = vcombine.low %v5247_v37, %v5250_v53  ;;  %v5254_v14 = vsel %vm14467_vm5, %v10893_v56, %v5253_v31  ;;  %v5255_v42 = vrot.slane %v5253_v31, 4  ;;  %v2020_v28 = vsel %vm14467_vm5, %v2018_v0, %v2019_v10  ;;  %v13357_v10 = vld [vmem:[%s17428_s1 + $0x198] sm:$0xff]  }
 0x124   : > { %v2023_v51 = vrot.slane %v14982_v59, 5  ;;  %v2026_v9 = vrot.slane %v14993_v19, 5  ;;  %12048 = vmatmul.mubr.bf16.vlgmr.msra.gmra.mrb[0].mxu0 %v10475_v43  ;;  %v10476_v30 = vcombine.low %v2017_v38, %v2020_v28  ;;  %v10894_v35 = vrot.slane %v10886_v46, 9  ;;  %v13355_v19 = vld [vmem:[%s17428_s1 + $0x190] sm:$0xff]  }
 0x125   : > { %v5257_v27 = vsel %vm14467_vm5, %v5255_v42, %v5256_v8  ;;  %v5260_v24 = vrot.slane %v15002_v22, 5  ;;  %12064 = vmatpush3.bf16.msra.mxu0 %v15214_v61  ;;  %v5263_v59 = vrot.slane %v15008_v3, 5  ;;  %v10454_v61 = vrot.slane %v10446_v48, 9  ;;  %v10889_v46 = vld [vmem:[%s13989_s11 + $0xb4] sm:$0xe] }
 0x126   : > { %v10917_v18 = vcombine.low %v5254_v14, %v5257_v27  ;;  %v2024_v11 = vsel %vm14467_vm5, %v10453_v44, %v2023_v51  ;;  %v2025_v1 = vrot.slane %v2023_v51, 4  ;;  %12065 = vmatprep.subr.bf16.mxu0 %v13353_v52  ;;  %12051 = vmatprep.mubr.bf16.mxu0 %v10476_v30  ;;  %v2030_v39 = vrot.slane %v15030_v63, 5  ;;  %v10449_v8 = vld [vmem:[%s13989_s11 + $0x60] sm:$0xe] }
 0x127   : > { %v5261_v22 = vsel %vm14467_vm5, %v10894_v35, %v5260_v24  ;;  %v5262_v29 = vrot.slane %v5260_v24, 4  ;;  %v2033_v3 = vrot.slane %v15034_v58, 5  ;;  %v10895_v26 = vrot.slane %v10887_v20, 9  ;;  %v13356_v58 = vld [vmem:[%s17428_s1 + $0x190] sm:$0xff]   ;;  %v10890_v30 = vld [vmem:[%s13989_s11 + $0xc0] sm:$0xe] }
 0x128   : > { %12336 = vmatmul.mubr.bf16.vlgmr.msra.gmra.mrb[0].mxu1 %v10916_v60  ;;  %v2027_v17 = vsel %vm14467_vm5, %v2025_v1, %v2026_v9  ;;  %v5267_v32 = vrot.slane %v15052_v15, 5  ;;  %v2031_v63 = vsel %vm14467_vm5, %v10454_v61, %v2030_v39  ;;  %v2032_v37 = vrot.slane %v2030_v39, 4 }
 0x129   : > { %12352 = vmatpush3.bf16.msra.mxu1 %v15228_v50  ;;  %12339 = vmatprep.mubr.bf16.mxu1 %v10917_v18  ;;  %v10477_v2 = vcombine.low %v2024_v11, %v2027_v17  ;;  %v5264_v6 = vsel %vm14467_vm5, %v5262_v29, %v5263_v59  ;;  %v5270_v54 = vrot.slane %v15059_v5, 5  ;;  %v10455_v31 = vrot.slane %v10447_v45, 9  ;;  %v13360_v11 = vld [vmem:[%s17428_s1 + $0x1a0] sm:$0xff]   ;;  %v13362_v17 = vld [vmem:[%s17428_s1 + $0x1a8] sm:$0xff]  }
 0x12a   : > { %12353 = vmatprep.subr.bf16.mxu1 %v13354_v62  ;;  %12066 = vmatpush3.bf16.msra.mxu0 %v13353_v52  ;;  %v10918_v12 = vcombine.low %v5261_v22, %v5264_v6  ;;  %v5268_v15 = vsel %vm14467_vm5, %v10895_v26, %v5267_v32  ;;  %v5269_v50 = vrot.slane %v5267_v32, 4  ;;  %v2034_v56 = vsel %vm14467_vm5, %v2032_v37, %v2033_v3  ;;  %v13361_v22 = vld [vmem:[%s17428_s1 + $0x1a8] sm:$0xff]   ;;  %v13363_v26 = vld [vmem:[%s17428_s1 + $0x1b0] sm:$0xff]  }
 0x12b   : > { %12067 = vmatprep.subr.bf16.mxu0 %v13355_v19  ;;  %v2037_v43 = vrot.slane %v15076_v23, 5  ;;  %v2040_v53 = vrot.slane %v15080_v25, 5  ;;  %v10478_v52 = vcombine.low %v2031_v63, %v2034_v56  ;;  %v10896_v5 = vrot.slane %v10888_v16, 9  ;;  %v13358_v25 = vld [vmem:[%s17428_s1 + $0x198] sm:$0xff]   ;;  %v13364_v63 = vld [vmem:[%s17428_s1 + $0x1b0] sm:$0xff]   ;;  %v13372_v56 = vld [vmem:[%s17428_s1 + $0x1c0] sm:$0xff]  }
 0x12c   : > { %v5271_v38 = vsel %vm14467_vm5, %v5269_v50, %v5270_v54  ;;  %v5274_v0 = vrot.slane %v15090_v40, 5  ;;  %12052 = vmatmul.mubr.bf16.gmra.mrb[4].mxu0 %v10477_v2  ;;  %v5277_v23 = vrot.slane %v15111_v49, 5  ;;  %v10456_v40 = vrot.slane %v10448_v34, 9  ;;  %v13359_v49 = vld [vmem:[%s17428_s1 + $0x1a0] sm:$0xff]   ;;  %v13366_v54 = vld [vmem:[%s17428_s1 + $0x1b8] sm:$0xff]  }
 0x12d   : > { %12354 = vmatpush3.bf16.msra.mxu1 %v13354_v62  ;;  %v10919_v60 = vcombine.low %v5268_v15, %v5271_v38  ;;  %v2038_v14 = vsel %vm14467_vm5, %v10455_v31, %v2037_v43  ;;  %v2039_v42 = vrot.slane %v2037_v43, 4  ;;  %v2044_v62 = vrot.slane %v15119_v21, 5  ;;  %12055 = vmatprep.mubr.bf16.mxu0 %v10478_v52  ;;  %v13368_v15 = vld [vmem:[%s13989_s11 + $0x78] sm:$0xff]   ;;  %v13370_v34 = vld [vmem:[%s17428_s1 + $0x1c0] sm:$0xff]   ;;  %v13373_v31 = vld [vmem:[%s17428_s1 + $0x1c8] sm:$0xff]  }
 0x12e   : > { %12355 = vmatprep.subr.bf16.mxu1 %v13356_v58  ;;  %12068 = vmatpush3.bf16.msra.mxu0 %v13355_v19  ;;  %v5276_v48 = vrot.slane %v5274_v0, 4  ;;  %v2047_v44 = vrot.slane %v15127_v47, 5  ;;  %v10897_v51 = vrot.slane %v10889_v46, 9  ;;  %v5281_v9 = vrot.slane %v15145_v7, 5  ;;  %v13375_v43 = vld [vmem:[%s13989_s11 + $0x30] sm:$0xff]   ;;  %v13374_v38 = vld [vmem:[%s17428_s1 + $0x1c8] sm:$0xff]  }
 0x12f   : > { %12069 = vmatprep.subr.bf16.mxu0 %v13357_v10  ;;  %v2041_v28 = vsel %vm14467_vm5, %v2039_v42, %v2040_v53  ;;  %v5275_v21 = vsel %vm14467_vm5, %v10896_v5, %v5274_v0  ;;  %v2045_v35 = vsel %vm14467_vm5, %v10456_v40, %v2044_v62  ;;  %v2046_v24 = vrot.slane %v2044_v62, 4  ;;  %v13371_v53 = vld [vmem:[%s13989_s11 + $0x84] sm:$0xff]   ;;  %v13376_v52 = vld [vmem:[%s13989_s11 + $0x90] sm:$0xff]   ;;  %v13377_v0 = vld [vmem:[%s13989_s11 + $0x3c] sm:$0xff]  }
 0x130   : > { %12340 = vmatmul.mubr.bf16.gmra.mrb[4].mxu1 %v10918_v12  ;;  %v10479_v27 = vcombine.low %v2038_v14, %v2041_v28  ;;  %v5278_v20 = vsel %vm14467_vm5, %v5276_v48, %v5277_v23  ;;  %v5282_v47 = vsel %vm14467_vm5, %v10897_v51, %v5281_v9  ;;  %v5283_v18 = vrot.slane %v5281_v9, 4  ;;  %v13365_v12 = vld [vmem:[%s17428_s1 + $0x1b8] sm:$0xff]   ;;  %v13378_v5 = vld [vmem:[%s17428_s1 + $0x1d0] sm:$0xff]   ;;  %v13383_v42 = vld [vmem:[%s13989_s11 + $0x48] sm:$0xff]  }
 0x131   : > { %12356 = vmatpush3.bf16.msra.mxu1 %v13356_v58  ;;  %12343 = vmatprep.mubr.bf16.mxu1 %v10919_v60  ;;  %v5284_v7 = vrot.slane %v15151_v4, 5  ;;  %v2048_v1 = vsel %vm14467_vm5, %v2046_v24, %v2047_v44  ;;  %v10457_v59 = vrot.slane %v10449_v8, 9  ;;  %v2051_v45 = vrot.slane %v15159_v13, 5  ;;  %v13367_v58 = vld [vmem:[%s13989_s11 + $0x18] sm:$0xff]   ;;  %v13380_v46 = vld [vmem:[%s17428_s1 + $0x1d0] sm:$0xff]   ;;  %v13384_v8 = vld [vmem:[%s13989_s11 + $0xa8] sm:$0xff]  }
 0x132   : > { %12357 = vmatprep.subr.bf16.mxu1 %v13358_v25  ;;  %12070 = vmatpush3.bf16.msra.mxu0 %v13357_v10  ;;  %v2054_v19 = vrot.slane %v15165_v57, 5  ;;  %v10480_v4 = vcombine.low %v2045_v35, %v2048_v1  ;;  %v5288_v61 = vrot.slane %v15181_v36, 5  ;;  %v10920_v39 = vcombine.low %v5275_v21, %v5278_v20  ;;  %v13369_v10 = vld [vmem:[%s13989_s11 + $0x24] sm:$0xff]   ;;  %v13379_v60 = vld [vmem:[%s13989_s11 + $0x9c] sm:$0xff]   ;;  %v13385_v21 = vld [vmem:[%s13989_s11 + $0x54] sm:$0xff]  }
 0x133   : > { %12071 = vmatprep.subr.bf16.mxu0 %v13359_v49  ;;  %v5285_v29 = vsel %vm14467_vm5, %v5283_v18, %v5284_v7  ;;  %v2053_v3 = vrot.slane %v2051_v45, 4  ;;  %v10898_v13 = vrot.slane %v10890_v30, 9  ;;  %v5291_v2 = vrot.slane %v15186_v55, 5  ;;  %v13381_v14 = vld [vmem:[%s17428_s1 + $0x1d8] sm:$0xff]   ;;  %v15419_v40 = vld [vmem:[%s13989_s11 + $0x20] sm:$0x1] }
 0x134   : > { %12056 = vmatmul.mubr.bf16.gmra.mrb[8].mxu0 %v10479_v27  ;;  %v10921_v57 = vcombine.low %v5282_v47, %v5285_v29  ;;  %v5290_v32 = vrot.slane %v5288_v61, 4  ;;  %v2052_v36 = vsel %vm14467_vm5, %v10457_v59, %v2051_v45  ;;  %v13382_v23 = vld [vmem:[%s17428_s1 + $0x1d8] sm:$0xff]   ;;  %v13386_v51 = vld [vmem:[%s17428_s1 + $0x1e0] sm:$0xff]   ;;  %v2556_v9 = vshll.u32 %v15419_v40, 16 }
 0x135   : > { %12358 = vmatpush3.bf16.msra.mxu1 %v13358_v25  ;;  %v2055_v6 = vsel %vm14467_vm5, %v2053_v3, %v2054_v19  ;;  %12059 = vmatprep.mubr.bf16.mxu0 %v10480_v4  ;;  %v5289_v55 = vsel %vm14467_vm5, %v10898_v13, %v5288_v61  ;;  %v10538_v25 = vld [vmem:[%s13989_s11 + $0x18] sm:$0xf]  ;;  %v15416_v48 = vld [vmem:[%s13989_s11 + $0x1c] sm:$0xf]  ;;  %v15433_v18 = vld [vmem:[%s13989_s11 + $0x80] sm:$0x1] }
 0x136   : > { %12359 = vmatprep.subr.bf16.mxu1 %v13360_v11  ;;  %12072 = vmatpush3.bf16.msra.mxu0 %v13359_v49  ;;  %v10481_v37 = vcombine.low %v2052_v36, %v2055_v6  ;;  %v5292_v16 = vsel %vm14467_vm5, %v5290_v32, %v5291_v2  ;;  %v2537_v62 = vshrl.u32 %v10538_v25, 16  ;;  %v2540_v28 = vshll.u32 %v10538_v25, 16  ;;  %v10979_v30 = vld [vmem:[%s13989_s11 + $0x78] sm:$0xf]  ;;  %v15429_v27 = vld [vmem:[%s13989_s11 + $0x7c] sm:$0xf] }
 0x137   : > { %12073 = vmatprep.subr.bf16.mxu0 %v13361_v22  ;;  %v10922_v50 = vcombine.low %v5289_v55, %v5292_v16  ;;  %v2546_v49 = vshll.u32 %v15416_v48, 16  ;;  %v2550_v44 = vshrl.u32 %v15416_v48, 16  ;;  %v13388_v7 = vld [vmem:[%s17428_s1 + $0x1e0] sm:$0xff]   ;;  %v5772_v1 = vshrl.u32 %v10979_v30, 16  ;;  %v15447_v3 = vld [vmem:[%s13989_s11 + $0x28] sm:$0xf] }
 0x138   : > { %12344 = vmatmul.mubr.bf16.gmra.mrb[8].mxu1 %v10920_v39  ;;  %v2539_v35 = vrot.slane %v2537_v62, 4  ;;  %v2542_v24 = vrot.slane %v2540_v28, 5  ;;  %v5775_v59 = vshll.u32 %v10979_v30, 16  ;;  %v5781_v45 = vshll.u32 %v15429_v27, 16  ;;  %v10541_v19 = vld [vmem:[%s13989_s11 + $0x24] sm:$0xf] }
 0x139   : > { %12360 = vmatpush3.bf16.msra.mxu1 %v13360_v11  ;;  %12347 = vmatprep.mubr.bf16.mxu1 %v10921_v57  ;;  %v2548_v20 = vrot.slane %v2546_v49, 5  ;;  %v2552_v47 = vrot.slane %v2550_v44, 4  ;;  %v2558_v11 = vrot.slane %v2556_v9, 5  ;;  %v13391_v4 = vld [vmem:[%s13989_s11 + $0x60] sm:$0xff]   ;;  %v5785_v39 = vshrl.u32 %v15429_v27, 16  ;;  %v13387_v55 = vld [vmem:[%s13989_s11 + $0xb4] sm:$0xff]  }
 0x13a   : > { %12361 = vmatprep.subr.bf16.mxu1 %v13362_v17  ;;  %12074 = vmatpush3.bf16.msra.mxu0 %v13361_v22  ;;  %v13389_v22 = vld [vmem:[%s17428_s1 + $0x1e8] sm:$0xff]   ;;  %v2543_v29 = vor.u32 %v2542_v24, %v2539_v35  ;;  %v5774_v13 = vrot.slane %v5772_v1, 4  ;;  %v5777_v57 = vrot.slane %v5775_v59, 5  ;;  %v2561_v2 = vshrl.u32 %v10541_v19, 16  ;;  %v13396_v62 = vld [vmem:[%s17428_s1 + $0x1f0] sm:$0xff]  }
 0x13b   : > { %12075 = vmatprep.subr.bf16.mxu0 %v13363_v26  ;;  %v2553_v61 = vor.u32 %v2552_v47, %v2548_v20  ;;  %v15450_v32 = vld [vmem:[%s13989_s11 + $0x2c] sm:$0x1]  ;;  %v10544_v59 = vld [vmem:[%s13989_s11 + $0x30] sm:$0xf] }
 0x13c   : > { %12060 = vmatmul.mubr.bf16.gmra.mrb[12].mxu0 %v10481_v37  ;;  %v2544_v36 = vrot.slane %v2543_v29, 4  ;;  %v5778_v16 = vor.u32 %v5777_v57, %v5774_v13  ;;  %v13395_v24 = vld [vmem:[%s13989_s11 + $0xcc] sm:$0xff]   ;;  %v2585_v29 = vshrl.u32 %v10544_v59, 16  ;;  %v2588_v13 = vshll.u32 %v10544_v59, 16 }
 0x13d   : > { %12362 = vmatpush3.bf16.msra.mxu1 %v13362_v17  ;;  %12079 = vmatprep.mubr.bf16.mxu0 %v13367_v58  ;;  %v5791_v17 = vshll.u32 %v15433_v18, 16  ;;  %v2554_v6 = vrot.slane %v2553_v61, 4  ;;  %v2564_v58 = vshll.u32 %v10541_v19, 16 }
 0x13e   : > { %12363 = vmatprep.subr.bf16.mxu1 %v13364_v63  ;;  %12076 = vmatpush3.bf16.msra.mxu0 %v13363_v26  ;;  %v5783_v26 = vrot.slane %v5781_v45, 5 }
 0x13f   : > { %12077 = vmatprep.subr.bf16.mxu0 %v13365_v12  ;;  %v5793_v37 = vrot.slane %v5791_v17, 5  ;;  %v15498_v17 = vld [vmem:[%s13989_s11 + $0x38] sm:$0x1] }
 0x140   : > { %12348 = vmatmul.mubr.bf16.gmra.mrb[12].mxu1 %v10922_v50  ;;  %v10982_v50 = vld [vmem:[%s13989_s11 + $0x84] sm:$0xf] }
 0x141   : > { %12364 = vmatpush3.bf16.msra.mxu1 %v13364_v63  ;;  %12367 = vmatprep.mubr.bf16.mxu1 %v13368_v15  ;;  %v5787_v63 = vrot.slane %v5785_v39, 4  ;;  %v2570_v15 = vshll.u32 %v15447_v3, 16  ;;  %v5796_v25 = vshrl.u32 %v10982_v50, 16  ;;  %v5799_v44 = vshll.u32 %v10982_v50, 16  ;;  %v13399_v50 = vld [vmem:[%s17428_s1 + $0x200] sm:$0xff]  }
 0x142   : > { %12365 = vmatprep.subr.bf16.mxu1 %v13366_v54  ;;  %12078 = vmatpush3.bf16.msra.mxu0 %v13365_v12  ;;  %v2563_v12 = vrot.slane %v2561_v2, 4 }
 0x143   : > { %12095 = vmatprep.subr.bf16.mxu0 %v13370_v34  ;;  %v5798_v35 = vrot.slane %v5796_v25, 4 }
 0x145   : > { %12366 = vmatpush3.bf16.msra.mxu1 %v13366_v54  ;;  %12080 = vmatmul.mubr.bf16.vlgmr.msra.gmra.mrb[0].mxu0 %v13369_v10  ;;  %v13390_v54 = vld [vmem:[%s17428_s1 + $0x1e8] sm:$0xff]   ;;  %v2549_v10 = vsel %vm14075_vm2, %v2544_v36, %v2548_v20  ;;  %v13397_v20 = vld [vmem:[%s17428_s1 + $0x1f8] sm:$0xff]  }
 0x146   : > { %12383 = vmatprep.subr.bf16.mxu1 %v13372_v56  ;;  %12096 = vmatpush3.bf16.msra.mxu0 %v13370_v34  ;;  %v13392_v34 = vld [vmem:[%s13989_s11 + $0xc0] sm:$0xff]  }
 0x147   : > { %12097 = vmatprep.subr.bf16.mxu0 %v13373_v31  ;;  %12083 = vmatprep.mubr.bf16.mxu0 %v13375_v43  ;;  %v2574_v43 = vshrl.u32 %v15447_v3, 16 }
 0x148   : > { %12368 = vmatmul.mubr.bf16.vlgmr.msra.gmra.mrb[0].mxu1 %v13371_v53  ;;  %v15465_v53 = vld [vmem:[%s13989_s11 + $0x88] sm:$0xf] }
 0x149   : > { %12384 = vmatpush3.bf16.msra.mxu1 %v13372_v56  ;;  %12371 = vmatprep.mubr.bf16.mxu1 %v13376_v52  ;;  %v2559_v56 = vsel %vm14075_vm2, %v2554_v6, %v2558_v11  ;;  %v13394_v52 = vld [vmem:[%s17428_s1 + $0x1f0] sm:$0xff]   ;;  %v5809_v19 = vshrl.u32 %v15465_v53, 16 }
 0x14a   : > { %12385 = vmatprep.subr.bf16.mxu1 %v13374_v38  ;;  %12098 = vmatpush3.bf16.msra.mxu0 %v13373_v31  ;;  %v5788_v31 = vor.u32 %v5787_v63, %v5783_v26  ;;  %v2587_v63 = vrot.slane %v2585_v29, 4  ;;  %v15548_v29 = vld [vmem:[%s13989_s11 + $0xa0] sm:$0xf] }
 0x14b   : > { %12099 = vmatprep.subr.bf16.mxu0 %v13378_v5  ;;  %v5811_v36 = vrot.slane %v5809_v19, 4 }
 0x14d   : > { %12386 = vmatpush3.bf16.msra.mxu1 %v13374_v38  ;;  %12084 = vmatmul.mubr.bf16.gmra.mrb[4].mxu0 %v13377_v0  ;;  %v10578_v38 = vcombine.low %v2549_v10, %v2559_v56  ;;  %v2566_v0 = vrot.slane %v2564_v58, 5  ;;  %v2590_v58 = vrot.slane %v2588_v13, 5  ;;  %v2604_v10 = vshll.u32 %v15498_v17, 16 }
 0x14e   : > { %12387 = vmatprep.subr.bf16.mxu1 %v13380_v46  ;;  %12100 = vmatpush3.bf16.msra.mxu0 %v13378_v5  ;;  %v5779_v5 = vrot.slane %v5778_v16, 4 }
 0x14f   : > { %12101 = vmatprep.subr.bf16.mxu0 %v13381_v14  ;;  %12087 = vmatprep.mubr.bf16.mxu0 %v13383_v42  ;;  %v5789_v42 = vrot.slane %v5788_v31, 4  ;;  %v2567_v49 = vor.u32 %v2566_v0, %v2563_v12 }
 0x150   : > { %12372 = vmatmul.mubr.bf16.gmra.mrb[4].mxu1 %v13379_v60  ;;  %v15471_v60 = vld [vmem:[%s13989_s11 + $0x8c] sm:$0x1]  ;;  %v5784_v28 = vsel %vm14075_vm2, %v5779_v5, %v5783_v26  ;;  %v10985_v26 = vld [vmem:[%s13989_s11 + $0x90] sm:$0xf] }
 0x151   : > { %12388 = vmatpush3.bf16.msra.mxu1 %v13380_v46  ;;  %12375 = vmatprep.mubr.bf16.mxu1 %v13384_v8  ;;  %v2572_v46 = vrot.slane %v2570_v15, 5  ;;  %v2580_v8 = vshll.u32 %v15450_v32, 16  ;;  %v5794_v9 = vsel %vm14075_vm2, %v5789_v42, %v5793_v37  ;;  %v2568_v11 = vrot.slane %v2567_v49, 4  ;;  %v15505_v37 = vld [vmem:[%s13989_s11 + $0x94] sm:$0xf]  ;;  %v13401_v42 = vld [vmem:[%s17428_s1 + $0x208] sm:$0xff]  }
 0x152   : > { %12389 = vmatprep.subr.bf16.mxu1 %v13382_v23  ;;  %12102 = vmatpush3.bf16.msra.mxu0 %v13381_v14  ;;  %v13393_v14 = vld [vmem:[%s13989_s11 + $0x6c] sm:$0xff]   ;;  %v11019_v47 = vcombine.low %v5784_v28, %v5794_v9  ;;  %v5820_v56 = vshrl.u32 %v10985_v26, 16  ;;  %v5823_v5 = vshll.u32 %v10985_v26, 16  ;;  %v5829_v0 = vshll.u32 %v15505_v37, 16 }
 0x153   : > { %12103 = vmatprep.subr.bf16.mxu0 %v13386_v51  ;;  %v2573_v61 = vsel %vm14075_vm2, %v2568_v11, %v2572_v46 }
 0x154   : > { %v5822_v25 = vrot.slane %v5820_v56, 4  ;;  %v5825_v49 = vrot.slane %v5823_v5, 5 }
 0x155   : > { %12390 = vmatpush3.bf16.msra.mxu1 %v13382_v23  ;;  %12088 = vmatmul.mubr.bf16.gmra.mrb[8].mxu0 %v13385_v21  ;;  %v2576_v23 = vrot.slane %v2574_v43, 4  ;;  %v2582_v21 = vrot.slane %v2580_v8, 5  ;;  %v13400_v43 = vld [vmem:[%s17428_s1 + $0x200] sm:$0xff]   ;;  %v2606_v8 = vrot.slane %v2604_v10, 5 }
 0x156   : > { %12391 = vmatprep.subr.bf16.mxu1 %v13388_v7  ;;  %12104 = vmatpush3.bf16.msra.mxu0 %v13386_v51  ;;  %v5805_v51 = vshll.u32 %v15465_v53, 16  ;;  %v5826_v11 = vor.u32 %v5825_v49, %v5822_v25  ;;  %v13405_v25 = vld [vmem:[%s17428_s1 + $0x218] sm:$0xff]  }
 0x157   : > { %12105 = vmatprep.subr.bf16.mxu0 %v13389_v22  ;;  %12091 = vmatprep.mubr.bf16.mxu0 %v13391_v4  ;;  %v2577_v30 = vor.u32 %v2576_v23, %v2572_v46  ;;  %v15493_v4 = vld [vmem:[%s13989_s11 + $0x34] sm:$0xf]  ;;  %v10547_v46 = vld [vmem:[%s13989_s11 + $0x3c] sm:$0xf] }
 0x158   : > { %12376 = vmatmul.mubr.bf16.gmra.mrb[8].mxu1 %v13387_v55  ;;  %v15487_v1 = vrot.slane %v5805_v51, 5  ;;  %v2594_v57 = vshll.u32 %v15493_v4, 16  ;;  %v13398_v55 = vld [vmem:[%s17428_s1 + $0x1f8] sm:$0xff]   ;;  %v5833_v51 = vshrl.u32 %v15505_v37, 16 }
 0x159   : > { %12392 = vmatpush3.bf16.msra.mxu1 %v13388_v7  ;;  %12379 = vmatprep.mubr.bf16.mxu1 %v13392_v34  ;;  %v5801_v7 = vrot.slane %v5799_v44, 5  ;;  %v2578_v45 = vrot.slane %v2577_v30, 4  ;;  %v2598_v34 = vshrl.u32 %v15493_v4, 16  ;;  %v5831_v44 = vrot.slane %v5829_v0, 5 }
 0x15a   : > { %12393 = vmatprep.subr.bf16.mxu1 %v13390_v54  ;;  %12106 = vmatpush3.bf16.msra.mxu0 %v13389_v22  ;;  %v5815_v22 = vshll.u32 %v15471_v60, 16  ;;  %v15510_v15 = vrot.slane %v2594_v57, 5  ;;  %v5853_v0 = vshll.u32 %v15548_v29, 16 }
 0x15b   : > { %12107 = vmatprep.subr.bf16.mxu0 %v13394_v52  ;;  %v5802_v39 = vor.u32 %v5801_v7, %v5798_v35  ;;  %v2583_v2 = vsel %vm14075_vm2, %v2578_v45, %v2582_v21  ;;  %v2600_v23 = vrot.slane %v2598_v34, 4  ;;  %v15538_v21 = vld [vmem:[%s13989_s11 + $0x40] sm:$0xf]  ;;  %v15541_v35 = vld [vmem:[%s13989_s11 + $0x44] sm:$0x1]  ;;  %v5835_v7 = vrot.slane %v5833_v51, 4 }
 0x15c   : > { %v5817_v6 = vrot.slane %v5815_v22, 5  ;;  %v10579_v16 = vcombine.low %v2573_v61, %v2583_v2  ;;  %v2612_v22 = vshll.u32 %v10547_v46, 16  ;;  %v13402_v61 = vld [vmem:[%s17428_s1 + $0x208] sm:$0xff]   ;;  %v2618_v57 = vshll.u32 %v15538_v21, 16  ;;  %v15556_v2 = vld [vmem:[%s13989_s11 + $0xa4] sm:$0x1] }
 0x15d   : > { %12394 = vmatpush3.bf16.msra.mxu1 %v13390_v54  ;;  %12092 = vmatmul.mubr.bf16.gmra.mrb[12].mxu0 %v13393_v14  ;;  %v5803_v12 = vrot.slane %v5802_v39, 4  ;;  %v5812_v54 = vor.u32 %v5811_v36, %v15487_v1  ;;  %v2601_v9 = vor.u32 %v2600_v23, %v15510_v15  ;;  %v5827_v39 = vrot.slane %v5826_v11, 4 }
 0x15e   : > { %12395 = vmatprep.subr.bf16.mxu1 %v13396_v62  ;;  %12108 = vmatpush3.bf16.msra.mxu0 %v13394_v52  ;;  %v2591_v52 = vor.u32 %v2590_v58, %v2587_v63  ;;  %v5836_v13 = vor.u32 %v5835_v7, %v5831_v44  ;;  %v2622_v26 = vshrl.u32 %v15538_v21, 16  ;;  %v2628_v63 = vshll.u32 %v15541_v35, 16 }
 0x15f   : > { %12109 = vmatprep.subr.bf16.mxu0 %v13397_v20  ;;  %12111 = vmatprep.mubr.bf16.mxu0 %v10578_v38  ;;  %v5808_v31 = vsel %vm14075_vm2, %v5803_v12, %v15487_v1  ;;  %v15525_v38 = vld [vmem:[%s13989_s11 + $0x98] sm:$0x1]  ;;  %v5813_v14 = vrot.slane %v5812_v54, 4  ;;  %v10988_v1 = vld [vmem:[%s13989_s11 + $0x9c] sm:$0xf]  ;;  %v2602_v59 = vrot.slane %v2601_v9, 4  ;;  %v5832_v58 = vsel %vm14075_vm2, %v5827_v39, %v5831_v44 }
 0x160   : > { %12380 = vmatmul.mubr.bf16.gmra.mrb[12].mxu1 %v13395_v24  ;;  %v2592_v28 = vrot.slane %v2591_v52, 4  ;;  %v5839_v30 = vshll.u32 %v15525_v38, 16  ;;  %v2609_v24 = vshrl.u32 %v10547_v46, 16  ;;  %v2624_v34 = vrot.slane %v2622_v26, 4  ;;  %v15599_v26 = vld [vmem:[%s13989_s11 + $0xb0] sm:$0x1] }
 0x161   : > { %12396 = vmatpush3.bf16.msra.mxu1 %v13396_v62  ;;  %12399 = vmatprep.mubr.bf16.mxu1 %v11019_v47  ;;  %v5818_v62 = vsel %vm14075_vm2, %v5813_v14, %v5817_v6  ;;  %v2607_v36 = vsel %vm14075_vm2, %v2602_v59, %v2606_v8  ;;  %v2614_v6 = vrot.slane %v2612_v22, 5  ;;  %v2630_v10 = vrot.slane %v2628_v63, 5  ;;  %v15592_v22 = vld [vmem:[%s13989_s11 + $0xac] sm:$0xf] }
 0x162   : > { %12397 = vmatprep.subr.bf16.mxu1 %v13398_v55  ;;  %12110 = vmatpush3.bf16.msra.mxu0 %v13397_v20  ;;  %v11020_v20 = vcombine.low %v5808_v31, %v5818_v62  ;;  %v2597_v47 = vsel %vm14075_vm2, %v2592_v28, %v15510_v15  ;;  %v5841_v45 = vrot.slane %v5839_v30, 5  ;;  %v2611_v19 = vrot.slane %v2609_v24, 4  ;;  %v10550_v31 = vld [vmem:[%s13989_s11 + $0x48] sm:$0xf]  ;;  %v15579_v28 = vld [vmem:[%s13989_s11 + $0x4c] sm:$0xf] }
 0x163   : > { %12127 = vmatprep.subr.bf16.mxu0 %v13399_v50  ;;  %v10580_v12 = vcombine.low %v2597_v47, %v2607_v36  ;;  %v5837_v15 = vrot.slane %v5836_v13, 4  ;;  %v5847_v5 = vshll.u32 %v10988_v1, 16  ;;  %v5857_v46 = vshrl.u32 %v15548_v29, 16  ;;  %v15582_v62 = vld [vmem:[%s13989_s11 + $0x50] sm:$0x1]  ;;  %v13406_v47 = vld [vmem:[%s17428_s1 + $0x218] sm:$0xff]  }
 0x164   : > { %v2615_v54 = vor.u32 %v2614_v6, %v2611_v19  ;;  %v5855_v44 = vrot.slane %v5853_v0, 5  ;;  %v2633_v9 = vshrl.u32 %v10550_v31, 16  ;;  %v2636_v11 = vshll.u32 %v10550_v31, 16  ;;  %v10991_v19 = vld [vmem:[%s13989_s11 + $0xa8] sm:$0xf] }
 0x165   : > { %12398 = vmatpush3.bf16.msra.mxu1 %v13398_v55  ;;  %12112 = vmatmul.mubr.bf16.vlgmr.msra.gmra.mrb[0].mxu0 %v10579_v16  ;;  %v13403_v55 = vld [vmem:[%s17428_s1 + $0x210] sm:$0xff]   ;;  %v5844_v16 = vshrl.u32 %v10988_v1, 16  ;;  %v5842_v52 = vsel %vm14075_vm2, %v5837_v15, %v5841_v45  ;;  %v5849_v49 = vrot.slane %v5847_v5, 5  ;;  %v5859_v51 = vrot.slane %v5857_v46, 4  ;;  %v13409_v5 = vld [vmem:[%s17428_s1 + $0x228] sm:$0xff]  }
 0x166   : > { %12415 = vmatprep.subr.bf16.mxu1 %v13400_v43  ;;  %12128 = vmatpush3.bf16.msra.mxu0 %v13399_v50  ;;  %v2620_v50 = vrot.slane %v2618_v57, 5  ;;  %v11021_v14 = vcombine.low %v5832_v58, %v5842_v52  ;;  %v2616_v23 = vrot.slane %v2615_v54, 4  ;;  %v2635_v59 = vrot.slane %v2633_v9, 4  ;;  %v10553_v31 = vld [vmem:[%s13989_s11 + $0x54] sm:$0xf]  ;;  %v13408_v52 = vld [vmem:[%s17428_s1 + $0x220] sm:$0xff]  }
 0x167   : > { %12129 = vmatprep.subr.bf16.mxu0 %v13401_v42  ;;  %v5846_v56 = vrot.slane %v5844_v16, 4  ;;  %12115 = vmatprep.mubr.bf16.mxu0 %v10580_v12  ;;  %v5860_v1 = vor.u32 %v5859_v51, %v5855_v44  ;;  %v2642_v45 = vshll.u32 %v15579_v28, 16  ;;  %v2638_v39 = vrot.slane %v2636_v11, 5  ;;  %v13407_v16 = vld [vmem:[%s17428_s1 + $0x220] sm:$0xff]   ;;  %v15622_v51 = vld [vmem:[%s13989_s11 + $0x5c] sm:$0x1] }
 0x168   : > { %12400 = vmatmul.mubr.bf16.vlgmr.msra.gmra.mrb[0].mxu1 %v11020_v20  ;;  %v2625_v8 = vor.u32 %v2624_v34, %v2620_v50  ;;  %v2621_v30 = vsel %vm14075_vm2, %v2616_v23, %v2620_v50  ;;  %v2646_v13 = vshrl.u32 %v15579_v28, 16  ;;  %v2652_v57 = vshll.u32 %v15582_v62, 16  ;;  %v15617_v23 = vld [vmem:[%s13989_s11 + $0x58] sm:$0xf]  ;;  %v10994_v9 = vld [vmem:[%s13989_s11 + $0xb4] sm:$0xf] }
 0x169   : > { %12416 = vmatpush3.bf16.msra.mxu1 %v13400_v43  ;;  %v13404_v43 = vld [vmem:[%s17428_s1 + $0x210] sm:$0xff]   ;;  %12403 = vmatprep.mubr.bf16.mxu1 %v11021_v14  ;;  %v5850_v7 = vor.u32 %v5849_v49, %v5846_v56  ;;  %v5861_v63 = vrot.slane %v5860_v1, 4  ;;  %v2639_v12 = vor.u32 %v2638_v39, %v2635_v59  ;;  %v5868_v50 = vshrl.u32 %v10991_v19, 16  ;;  %v15628_v11 = vld [vmem:[%s13989_s11 + $0xb8] sm:$0xf] }
 0x16a   : > { %12417 = vmatprep.subr.bf16.mxu1 %v13402_v61  ;;  %12130 = vmatpush3.bf16.msra.mxu0 %v13401_v42  ;;  %v5863_v42 = vshll.u32 %v15556_v2, 16  ;;  %v2626_v24 = vrot.slane %v2625_v8, 4  ;;  %v2648_v58 = vrot.slane %v2646_v13, 4  ;;  %v2654_v15 = vrot.slane %v2652_v57, 5  ;;  %v13410_v57 = vld [vmem:[%s17428_s1 + $0x228] sm:$0xff]  }
 0x16b   : > { %12131 = vmatprep.subr.bf16.mxu0 %v13403_v55  ;;  %v5851_v6 = vrot.slane %v5850_v7, 4  ;;  %v5877_v56 = vshll.u32 %v15592_v22, 16  ;;  %v2640_v46 = vrot.slane %v2639_v12, 4  ;;  %v5870_v14 = vrot.slane %v5868_v50, 4 }
 0x16c   : > { %v5865_v20 = vrot.slane %v5863_v42, 5  ;;  %v5881_v49 = vshrl.u32 %v15592_v22, 16  ;;  %v2670_v13 = vshrl.u32 %v15617_v23, 16  ;;  %v5892_v50 = vshrl.u32 %v10994_v9, 16 }
 0x16d   : > { %12418 = vmatpush3.bf16.msra.mxu1 %v13402_v61  ;;  %v2631_v61 = vsel %vm14075_vm2, %v2626_v24, %v2630_v10  ;;  %v5856_v54 = vsel %vm14075_vm2, %v5851_v6, %v5855_v44  ;;  %v5871_v10 = vshll.u32 %v10991_v19, 16  ;;  %v5879_v42 = vrot.slane %v5877_v56, 5 }
 0x16e   : > { %12419 = vmatprep.subr.bf16.mxu1 %v13404_v43  ;;  %12132 = vmatpush3.bf16.msra.mxu0 %v13403_v55  ;;  %v10581_v36 = vcombine.low %v2621_v30, %v2631_v61  ;;  %v2644_v55 = vrot.slane %v2642_v45, 5  ;;  %v5866_v34 = vsel %vm14075_vm2, %v5861_v63, %v5865_v20  ;;  %v5887_v44 = vshll.u32 %v15599_v26, 16 }
 0x16f   : > { %12133 = vmatprep.subr.bf16.mxu0 %v13405_v25  ;;  %v11022_v0 = vcombine.low %v5856_v54, %v5866_v34  ;;  %v5873_v8 = vrot.slane %v5871_v10, 5  ;;  %v2657_v24 = vshrl.u32 %v10553_v31, 16  ;;  %v2660_v20 = vshll.u32 %v10553_v31, 16  ;;  %v15644_v34 = vld [vmem:[%s13989_s11 + $0xbc] sm:$0x1] }
 0x170   : > { %12116 = vmatmul.mubr.bf16.gmra.mrb[4].mxu0 %v10581_v36  ;;  %v5883_v1 = vrot.slane %v5881_v49, 4  ;;  %v5889_v59 = vrot.slane %v5887_v44, 5  ;;  %v2666_v45 = vshll.u32 %v15617_v23, 16  ;;  %v5895_v10 = vshll.u32 %v10994_v9, 16  ;;  %v15655_v9 = vld [vmem:[%s13989_s11 + $0x64] sm:$0xf] }
 0x171   : > { %12420 = vmatpush3.bf16.msra.mxu1 %v13404_v43  ;;  %v2649_v43 = vor.u32 %v2648_v58, %v2644_v55  ;;  %v5874_v7 = vor.u32 %v5873_v8, %v5870_v14  ;;  %v2659_v61 = vrot.slane %v2657_v24, 4  ;;  %v2662_v39 = vrot.slane %v2660_v20, 5  ;;  %v10556_v14 = vld [vmem:[%s13989_s11 + $0x60] sm:$0xf]  ;;  %v13412_v8 = vld [vmem:[%s17428_s1 + $0x230] sm:$0xff]  }
 0x172   : > { %12421 = vmatprep.subr.bf16.mxu1 %v13406_v47  ;;  %12134 = vmatpush3.bf16.msra.mxu0 %v13405_v25  ;;  %v2645_v25 = vsel %vm14075_vm2, %v2640_v46, %v2644_v55  ;;  %v5884_v6 = vor.u32 %v5883_v1, %v5879_v42  ;;  %v2668_v63 = vrot.slane %v2666_v45, 5  ;;  %v13411_v55 = vld [vmem:[%s17428_s1 + $0x230] sm:$0xff]   ;;  %v2672_v58 = vrot.slane %v2670_v13, 4  ;;  %v15661_v20 = vld [vmem:[%s13989_s11 + $0x68] sm:$0x1] }
 0x173   : > { %12135 = vmatprep.subr.bf16.mxu0 %v13407_v16  ;;  %12404 = vmatmul.mubr.bf16.gmra.mrb[4].mxu1 %v11022_v0  ;;  %v2650_v30 = vrot.slane %v2649_v43, 4  ;;  %v5875_v36 = vrot.slane %v5874_v7, 4  ;;  %v2663_v12 = vor.u32 %v2662_v39, %v2659_v61  ;;  %v5901_v56 = vshll.u32 %v15628_v11, 16  ;;  %v13413_v7 = vld [vmem:[%s17428_s1 + $0x238] sm:$0xff]   ;;  %v10997_v61 = vld [vmem:[%s13989_s11 + $0xc0] sm:$0xf] }
 0x174   : > { %v5885_v54 = vrot.slane %v5884_v6, 4  ;;  %v2673_v0 = vor.u32 %v2672_v58, %v2668_v63  ;;  %v5894_v43 = vrot.slane %v5892_v50, 4  ;;  %v5897_v49 = vrot.slane %v5895_v10, 5  ;;  %v15672_v6 = vld [vmem:[%s13989_s11 + $0xc4] sm:$0xf] }
 0x175   : > { %12422 = vmatpush3.bf16.msra.mxu1 %v13406_v47  ;;  %v2655_v19 = vsel %vm14075_vm2, %v2650_v30, %v2654_v15  ;;  %v2676_v15 = vshll.u32 %v15622_v51, 16  ;;  %v2664_v31 = vrot.slane %v2663_v12, 4  ;;  %v5903_v44 = vrot.slane %v5901_v56, 5  ;;  %v15679_v56 = vld [vmem:[%s13989_s11 + $0xc8] sm:$0x1] }
 0x176   : > { %12423 = vmatprep.subr.bf16.mxu1 %v13408_v52  ;;  %12136 = vmatpush3.bf16.msra.mxu0 %v13407_v16  ;;  %v10582_v47 = vcombine.low %v2645_v25, %v2655_v19  ;;  %v5880_v16 = vsel %vm14075_vm2, %v5875_v36, %v5879_v42  ;;  %v5890_v42 = vsel %vm14075_vm2, %v5885_v54, %v5889_v59  ;;  %v2674_v30 = vrot.slane %v2673_v0, 4 }
 0x177   : > { %12137 = vmatprep.subr.bf16.mxu0 %v13409_v5  ;;  %v2678_v46 = vrot.slane %v2676_v15, 5  ;;  %v11023_v25 = vcombine.low %v5880_v16, %v5890_v42  ;;  %v5911_v24 = vshll.u32 %v15644_v34, 16  ;;  %v5898_v1 = vor.u32 %v5897_v49, %v5894_v43 }
 0x178   : > { %12119 = vmatprep.mubr.bf16.mxu0 %v10582_v47  ;;  %v2681_v45 = vshrl.u32 %v10556_v14, 16  ;;  %v2684_v19 = vshll.u32 %v10556_v14, 16  ;;  %v2690_v47 = vshll.u32 %v15655_v9, 16  ;;  %v2694_v36 = vshrl.u32 %v15655_v9, 16  ;;  %v10559_v14 = vld [vmem:[%s13989_s11 + $0x6c] sm:$0xf] }
 0x179   : > { %12424 = vmatpush3.bf16.msra.mxu1 %v13408_v52  ;;  %v5905_v52 = vshrl.u32 %v15628_v11, 16  ;;  %12407 = vmatprep.mubr.bf16.mxu1 %v11023_v25  ;;  %v2679_v39 = vsel %vm14075_vm2, %v2674_v30, %v2678_v46  ;;  %v5913_v13 = vrot.slane %v5911_v24, 5  ;;  %v5899_v12 = vrot.slane %v5898_v1, 4  ;;  %v15686_v25 = vld [vmem:[%s13989_s11 + $0x70] sm:$0xf] }
 0x17a   : > { %12425 = vmatprep.subr.bf16.mxu1 %v13410_v57  ;;  %12138 = vmatpush3.bf16.msra.mxu0 %v13409_v5  ;;  %v2669_v5 = vsel %vm14075_vm2, %v2664_v31, %v2668_v63  ;;  %v2683_v15 = vrot.slane %v2681_v45, 4  ;;  %v2686_v50 = vrot.slane %v2684_v19, 5  ;;  %v2692_v16 = vrot.slane %v2690_v47, 5  ;;  %v15692_v19 = vld [vmem:[%s13989_s11 + $0x74] sm:$0x1] }
 0x17b   : > { %12139 = vmatprep.subr.bf16.mxu0 %v13411_v55  ;;  %v5907_v59 = vrot.slane %v5905_v52, 4  ;;  %v10583_v63 = vcombine.low %v2669_v5, %v2679_v39  ;;  %v2696_v54 = vrot.slane %v2694_v36, 4  ;;  %v2700_v10 = vshll.u32 %v15661_v20, 16 }
 0x17c   : > { %v5904_v31 = vsel %vm14075_vm2, %v5899_v12, %v5903_v44  ;;  %v5916_v46 = vshrl.u32 %v10997_v61, 16  ;;  %v5919_v43 = vshll.u32 %v10997_v61, 16  ;;  %v5925_v52 = vshll.u32 %v15672_v6, 16  ;;  %v11000_v61 = vld [vmem:[%s13989_s11 + $0xcc] sm:$0xf] }
 0x17d   : > { %12426 = vmatpush3.bf16.msra.mxu1 %v13410_v57  ;;  %v13414_v57 = vld [vmem:[%s17428_s1 + $0x238] sm:$0xff]   ;;  %v5908_v58 = vor.u32 %v5907_v59, %v5903_v44  ;;  %12120 = vmatmul.mubr.bf16.gmra.mrb[8].mxu0 %v10583_v63  ;;  %v2697_v42 = vor.u32 %v2696_v54, %v2692_v16  ;;  %v2702_v49 = vrot.slane %v2700_v10, 5  ;;  %v5929_v24 = vshrl.u32 %v15672_v6, 16 }
 0x17e   : > { %12427 = vmatprep.subr.bf16.mxu1 %v13412_v8  ;;  %12140 = vmatpush3.bf16.msra.mxu0 %v13411_v55  ;;  %v2687_v55 = vor.u32 %v2686_v50, %v2683_v15  ;;  %v5918_v30 = vrot.slane %v5916_v46, 4  ;;  %v5921_v44 = vrot.slane %v5919_v43, 5  ;;  %v5927_v45 = vrot.slane %v5925_v52, 5 }
 0x17f   : > { %12141 = vmatprep.subr.bf16.mxu0 %v13413_v7  ;;  %v5909_v0 = vrot.slane %v5908_v58, 4  ;;  %v2698_v59 = vrot.slane %v2697_v42, 4  ;;  %v5931_v47 = vrot.slane %v5929_v24, 4  ;;  %v5935_v36 = vshll.u32 %v15679_v56, 16  ;;  %v15709_v42 = vld [vmem:[%s13989_s11 + $0xd4] sm:$0x1] }
 0x180   : > { %v5922_v39 = vor.u32 %v5921_v44, %v5918_v30  ;;  %v2705_v63 = vshrl.u32 %v10559_v14, 16  ;;  %v2708_v12 = vshll.u32 %v10559_v14, 16  ;;  %v2714_v58 = vshll.u32 %v15686_v25, 16  ;;  %v10594_v24 = vld [vmem:[%s13989_s11 + $0x18] sm:$0xe] }
 0x181   : > { %12428 = vmatpush3.bf16.msra.mxu1 %v13412_v8  ;;  %v5914_v5 = vsel %vm14075_vm2, %v5909_v0, %v5913_v13  ;;  %v2688_v8 = vrot.slane %v2687_v55, 4  ;;  %v5932_v54 = vor.u32 %v5931_v47, %v5927_v45  ;;  %v5937_v10 = vrot.slane %v5935_v36, 5 }
 0x182   : > { %12429 = vmatprep.subr.bf16.mxu1 %v13414_v57  ;;  %12142 = vmatpush3.bf16.msra.mxu0 %v13413_v7  ;;  %v11024_v1 = vcombine.low %v5904_v31, %v5914_v5  ;;  %v2703_v7 = vsel %vm14075_vm2, %v2698_v59, %v2702_v49  ;;  %v5923_v50 = vrot.slane %v5922_v39, 4  ;;  %v15702_v31 = vld [vmem:[%s13989_s11 + $0xd0] sm:$0xf]  ;;  %v2707_v0 = vrot.slane %v2705_v63, 4 }
 0x183   : > { %v2693_v13 = vsel %vm14075_vm2, %v2688_v8, %v2692_v16  ;;  %v2716_v46 = vrot.slane %v2714_v58, 5  ;;  %v2718_v43 = vshrl.u32 %v15686_v25, 16  ;;  %v5933_v55 = vrot.slane %v5932_v54, 4 }
 0x184   : > { %12408 = vmatmul.mubr.bf16.gmra.mrb[8].mxu1 %v11024_v1  ;;  %v10584_v15 = vcombine.low %v2693_v13, %v2703_v7  ;;  %v5928_v16 = vsel %vm14075_vm2, %v5923_v50, %v5927_v45  ;;  %v2724_v14 = vshll.u32 %v15692_v19, 16  ;;  %v5940_v49 = vshrl.u32 %v11000_v61, 16  ;;  %v11035_v13 = vld [vmem:[%s13989_s11 + $0x78] sm:$0xe] }
 0x185   : > { %12430 = vmatpush3.bf16.msra.mxu1 %v13414_v57  ;;  %v2710_v57 = vrot.slane %v2708_v12, 5  ;;  %v2720_v5 = vrot.slane %v2718_v43, 4  ;;  %v5943_v30 = vshll.u32 %v11000_v61, 16  ;;  %v5949_v44 = vshll.u32 %v15702_v31, 16 }
 0x186   : > { %12123 = vmatprep.mubr.bf16.mxu0 %v10584_v15  ;;  %v5938_v1 = vsel %vm14075_vm2, %v5933_v55, %v5937_v10  ;;  %v2726_v8 = vrot.slane %v2724_v14, 5  ;;  %v5942_v59 = vrot.slane %v5940_v49, 4  ;;  %v5953_v45 = vshrl.u32 %v15702_v31, 16  ;;  %v10595_v55 = vld [vmem:[%s13989_s11 + $0x24] sm:$0xe] }
 0x187   : > { %v2711_v52 = vor.u32 %v2710_v57, %v2707_v0  ;;  %v11025_v39 = vcombine.low %v5928_v16, %v5938_v1  ;;  %v2721_v36 = vor.u32 %v2720_v5, %v2716_v46  ;;  %v5945_v63 = vrot.slane %v5943_v30, 5 }
 0x188   : > { %v5951_v7 = vrot.slane %v5949_v44, 5  ;;  %v5955_v12 = vrot.slane %v5953_v45, 4  ;;  %v5959_v61 = vshll.u32 %v15709_v42, 16  ;;  %v10602_v58 = vrot.slane %v10594_v24, 9 }
 0x189   : > { %v2712_v47 = vrot.slane %v2711_v52, 4  ;;  %12411 = vmatprep.mubr.bf16.mxu1 %v11025_v39  ;;  %v2722_v50 = vrot.slane %v2721_v36, 4  ;;  %v5946_v54 = vor.u32 %v5945_v63, %v5942_v59  ;;  %v2972_v10 = vrot.slane %v15416_v48, 5  ;;  %v11036_v59 = vld [vmem:[%s13989_s11 + $0x84] sm:$0xe] }
 0x18a   : > { %v5956_v0 = vor.u32 %v5955_v12, %v5951_v7  ;;  %v5961_v57 = vrot.slane %v5959_v61, 5  ;;  %v2975_v43 = vrot.slane %v15419_v40, 5  ;;  %v11043_v16 = vrot.slane %v11035_v13, 9 }
 0x18b   : > { %v2717_v15 = vsel %vm14075_vm2, %v2712_v47, %v2716_v46  ;;  %v2727_v14 = vsel %vm14075_vm2, %v2722_v50, %v2726_v8  ;;  %v5947_v49 = vrot.slane %v5946_v54, 4  ;;  %v2973_v52 = vsel %vm14467_vm5, %v10602_v58, %v2972_v10  ;;  %v10596_v47 = vld [vmem:[%s13989_s11 + $0x30] sm:$0xe] }
 0x18c   : > { %v2974_v46 = vrot.slane %v2972_v10, 4  ;;  %v10585_v5 = vcombine.low %v2717_v15, %v2727_v14  ;;  %v5957_v30 = vrot.slane %v5956_v0, 4  ;;  %v6206_v48 = vrot.slane %v15429_v27, 5  ;;  %v11037_v58 = vld [vmem:[%s13989_s11 + $0x90] sm:$0xe] }
 0x18d   : > { %v6209_v44 = vrot.slane %v15433_v18, 5  ;;  %v5952_v40 = vsel %vm14075_vm2, %v5947_v49, %v5951_v7  ;;  %v10603_v1 = vrot.slane %v10595_v55, 9  ;;  %v2979_v8 = vrot.slane %v15447_v3, 5 }
 0x18e   : > { %v2976_v24 = vsel %vm14467_vm5, %v2974_v46, %v2975_v43  ;;  %12124 = vmatmul.mubr.bf16.gmra.mrb[12].mxu0 %v10585_v5  ;;  %v5962_v45 = vsel %vm14075_vm2, %v5957_v30, %v5961_v57  ;;  %v6207_v27 = vsel %vm14467_vm5, %v11043_v16, %v6206_v48  ;;  %v6208_v18 = vrot.slane %v6206_v48, 4  ;;  %v11038_v5 = vld [vmem:[%s13989_s11 + $0x9c] sm:$0xe] }
 0x18f   : > { %v10626_v39 = vcombine.low %v2973_v52, %v2976_v24  ;;  %v11026_v36 = vcombine.low %v5952_v40, %v5962_v45  ;;  %v2980_v63 = vsel %vm14467_vm5, %v10603_v1, %v2979_v8  ;;  %v2981_v13 = vrot.slane %v2979_v8, 4  ;;  %v10598_v40 = vld [vmem:[%s13989_s11 + $0x48] sm:$0xe] }
 0x190   : > { %v2982_v3 = vrot.slane %v15450_v32, 5  ;;  %v6210_v7 = vsel %vm14467_vm5, %v6208_v18, %v6209_v44  ;;  %v11044_v41 = vrot.slane %v11036_v59, 9  ;;  %v6213_v12 = vrot.slane %v15465_v53, 5  ;;  %v10597_v32 = vld [vmem:[%s13989_s11 + $0x3c] sm:$0xe] }
 0x191   : > { %12143 = vmatprep.mubr.bf16.mxu0 %v10626_v39  ;;  %v6216_v61 = vrot.slane %v15471_v60, 5  ;;  %12412 = vmatmul.mubr.bf16.gmra.mrb[12].mxu1 %v11026_v36  ;;  %v11067_v15 = vcombine.low %v6207_v27, %v6210_v7  ;;  %v10604_v54 = vrot.slane %v10596_v47, 9  ;;  %v2986_v10 = vrot.slane %v15493_v4, 5  ;;  %v11039_v39 = vld [vmem:[%s13989_s11 + $0xa8] sm:$0xe] }
 0x192   : > { %v2983_v50 = vsel %vm14467_vm5, %v2981_v13, %v2982_v3  ;;  %v6214_v57 = vsel %vm14467_vm5, %v11044_v41, %v6213_v12  ;;  %v6215_v43 = vrot.slane %v6213_v12, 4  ;;  %v2989_v53 = vrot.slane %v15498_v17, 5 }
 0x193   : > { %v10627_v0 = vcombine.low %v2980_v63, %v2983_v50  ;;  %12431 = vmatprep.mubr.bf16.mxu1 %v11067_v15  ;;  %v2987_v60 = vsel %vm14467_vm5, %v10604_v54, %v2986_v10  ;;  %v2988_v16 = vrot.slane %v2986_v10, 4  ;;  %v11045_v55 = vrot.slane %v11037_v58, 9  ;;  %v10599_v63 = vld [vmem:[%s13989_s11 + $0x54] sm:$0xe] }
 0x194   : > { %v6220_v14 = vrot.slane %v15505_v37, 5  ;;  %v6217_v4 = vsel %vm14467_vm5, %v6215_v43, %v6216_v61  ;;  %v6223_v49 = vrot.slane %v15525_v38, 5  ;;  %v10605_v52 = vrot.slane %v10597_v32, 9  ;;  %v11040_v50 = vld [vmem:[%s13989_s11 + $0xb4] sm:$0xe] }
 0x195   : > { %v2993_v46 = vrot.slane %v15538_v21, 5  ;;  %v11068_v30 = vcombine.low %v6214_v57, %v6217_v4  ;;  %v2990_v17 = vsel %vm14467_vm5, %v2988_v16, %v2989_v53  ;;  %v2996_v21 = vrot.slane %v15541_v35, 5 }
 0x196   : > { %v6221_v48 = vsel %vm14467_vm5, %v11045_v55, %v6220_v14  ;;  %v6222_v44 = vrot.slane %v6220_v14, 4  ;;  %12144 = vmatmul.mubr.bf16.vlgmr.msra.gmra.mrb[0].mxu0 %v10627_v0  ;;  %v10628_v37 = vcombine.low %v2987_v60, %v2990_v17  ;;  %v11046_v8 = vrot.slane %v11038_v5, 9  ;;  %v10600_v0 = vld [vmem:[%s13989_s11 + $0x60] sm:$0xe] }
 0x197   : > { %v2994_v38 = vsel %vm14467_vm5, %v10605_v52, %v2993_v46  ;;  %v2995_v24 = vrot.slane %v2993_v46, 4  ;;  %v6227_v59 = vrot.slane %v15548_v29, 5  ;;  %v6230_v45 = vrot.slane %v15556_v2, 5  ;;  %v11041_v55 = vld [vmem:[%s13989_s11 + $0xc0] sm:$0xe] }
 0x198   : > { %v6224_v1 = vsel %vm14467_vm5, %v6222_v44, %v6223_v49  ;;  %12147 = vmatprep.mubr.bf16.mxu0 %v10628_v37  ;;  %v10606_v47 = vrot.slane %v10598_v40, 9  ;;  %v3000_v36 = vrot.slane %v15579_v28, 5  ;;  %v3003_v29 = vrot.slane %v15582_v62, 5  ;;  %v11042_v37 = vld [vmem:[%s13989_s11 + $0xcc] sm:$0xe] }
 0x199   : > { %v11069_v27 = vcombine.low %v6221_v48, %v6224_v1  ;;  %v2997_v18 = vsel %vm14467_vm5, %v2995_v24, %v2996_v21  ;;  %12432 = vmatmul.mubr.bf16.vlgmr.msra.gmra.mrb[0].mxu1 %v11068_v30  ;;  %v6228_v13 = vsel %vm14467_vm5, %v11046_v8, %v6227_v59  ;;  %v6229_v3 = vrot.slane %v6227_v59, 4  ;;  %v10601_v30 = vld [vmem:[%s13989_s11 + $0x6c] sm:$0xe]  ;;  %v319_v24 = vld [vmem:[#allocation2 + $0xcc] sm:$0x1] }
 0x19a   : > { %v10629_v35 = vcombine.low %v2994_v38, %v2997_v18  ;;  %v3001_v2 = vsel %vm14467_vm5, %v10606_v47, %v3000_v36  ;;  %v3002_v7 = vrot.slane %v3000_v36, 4  ;;  %v11047_v41 = vrot.slane %v11039_v39, 9  ;;  %v268_v38 = vld [vmem:[#allocation2] sm:$0x1]  ;;  %v324_v59 = vld [vmem:[#allocation2 + $0x8] sm:$0x1] }
 0x19b   : > { %12435 = vmatprep.mubr.bf16.mxu1 %v11069_v27  ;;  %v6234_v12 = vrot.slane %v15592_v22, 5  ;;  %v6231_v28 = vsel %vm14467_vm5, %v6229_v3, %v6230_v45  ;;  %v6237_v61 = vrot.slane %v15599_v26, 5  ;;  %v10607_v58 = vrot.slane %v10599_v63, 9  ;;  %v274_v63 = vld [vmem:[#allocation2 + $0x18] sm:$0x1] }
 0x19c   : > { %v3007_v15 = vrot.slane %v15617_v23, 5  ;;  %v11070_v54 = vcombine.low %v6228_v13, %v6231_v28  ;;  %v3004_v62 = vsel %vm14467_vm5, %v3002_v7, %v3003_v29  ;;  %v3010_v26 = vrot.slane %v15622_v51, 5 }
 0x19d   : > { %v6235_v10 = vsel %vm14467_vm5, %v11047_v41, %v6234_v12  ;;  %v6236_v32 = vrot.slane %v6234_v12, 4  ;;  %v10630_v22 = vcombine.low %v3001_v2, %v3004_v62  ;;  %v11048_v53 = vrot.slane %v11040_v50, 9 }
 0x19e   : > { %v3008_v57 = vsel %vm14467_vm5, %v10607_v58, %v3007_v15  ;;  %v3009_v43 = vrot.slane %v3007_v15, 4  ;;  %12148 = vmatmul.mubr.bf16.gmra.mrb[4].mxu0 %v10629_v35  ;;  %v6241_v60 = vrot.slane %v15628_v11, 5  ;;  %v6244_v16 = vrot.slane %v15644_v34, 5 }
 0x19f   : > { %v6238_v23 = vsel %vm14467_vm5, %v6236_v32, %v6237_v61  ;;  %12151 = vmatprep.mubr.bf16.mxu0 %v10630_v22  ;;  %v10608_v49 = vrot.slane %v10600_v0, 9  ;;  %v3014_v52 = vrot.slane %v15655_v9, 5  ;;  %v3017_v5 = vrot.slane %v15661_v20, 5  ;;  %v295_v32 = vld [vmem:[#allocation2 + $0x6c] sm:$0x1] }
 0x1a0   : > { %v11071_v14 = vcombine.low %v6235_v10, %v6238_v23  ;;  %v3011_v4 = vsel %vm14467_vm5, %v3009_v43, %v3010_v26  ;;  %v6243_v46 = vrot.slane %v6241_v60, 4  ;;  %v11049_v17 = vrot.slane %v11041_v55, 9  ;;  %v271_v10 = vld [vmem:[#allocation2 + $0xc] sm:$0x1]  ;;  %v327_v23 = vld [vmem:[#allocation2 + $0x14] sm:$0x1] }
 0x1a1   : > { %v10631_v51 = vcombine.low %v3008_v57, %v3011_v4  ;;  %12436 = vmatmul.mubr.bf16.gmra.mrb[4].mxu1 %v11070_v54  ;;  %v3015_v11 = vsel %vm14467_vm5, %v10608_v49, %v3014_v52  ;;  %v3016_v34 = vrot.slane %v3014_v52, 4  ;;  %v6248_v48 = vrot.slane %v15672_v6, 5  ;;  %v298_v54 = vld [vmem:[#allocation2 + $0x78] sm:$0x1]  ;;  %v354_v57 = vld [vmem:[#allocation2 + $0x80] sm:$0x1] }
 0x1a2   : > { %12439 = vmatprep.mubr.bf16.mxu1 %v11071_v14  ;;  %v6242_v44 = vsel %vm14467_vm5, %v11048_v53, %v6241_v60  ;;  %v6245_v9 = vsel %vm14467_vm5, %v6243_v46, %v6244_v16  ;;  %v6251_v40 = vrot.slane %v15679_v56, 5  ;;  %v3021_v20 = vrot.slane %v15686_v25, 5  ;;  %v375_v56 = vld [vmem:[#allocation2 + $0xd4] sm:$0x1]  ;;  %v280_v55 = vld [vmem:[#allocation2 + $0x30] sm:$0x1] }
 0x1a3   : > { %v3018_v21 = vsel %vm14467_vm5, %v3016_v34, %v3017_v5  ;;  %v6249_v6 = vsel %vm14467_vm5, %v11049_v17, %v6248_v48  ;;  %v6250_v1 = vrot.slane %v6248_v48, 4  ;;  %v10609_v8 = vrot.slane %v10601_v30, 9  ;;  %v351_v60 = vld [vmem:[#allocation2 + $0x74] sm:$0x1]  ;;  %v304_v14 = vld [vmem:[#allocation2 + $0x90] sm:$0x1] }
 0x1a4   : > { %v10632_v45 = vcombine.low %v3015_v11, %v3018_v21  ;;  %v3023_v39 = vrot.slane %v3021_v20, 4  ;;  %v3024_v27 = vrot.slane %v15692_v19, 5  ;;  %v11072_v18 = vcombine.low %v6242_v44, %v6245_v9  ;;  %v277_v52 = vld [vmem:[#allocation2 + $0x24] sm:$0x1]  ;;  %v336_v30 = vld [vmem:[#allocation2 + $0x38] sm:$0x1] }
 0x1a5   : > { %v6252_v25 = vsel %vm14467_vm5, %v6250_v1, %v6251_v40  ;;  %v11050_v47 = vrot.slane %v11042_v37, 9  ;;  %v6255_v36 = vrot.slane %v15702_v31, 5  ;;  %v6258_v13 = vrot.slane %v15709_v42, 5  ;;  %v360_v34 = vld [vmem:[#allocation2 + $0x98] sm:$0x1] }
 0x1a6   : > { %12152 = vmatmul.mubr.bf16.gmra.mrb[8].mxu0 %v10631_v51  ;;  %v11073_v35 = vcombine.low %v6249_v6, %v6252_v25  ;;  %v3022_v19 = vsel %vm14467_vm5, %v10609_v8, %v3021_v20  ;;  %v3025_v3 = vsel %vm14467_vm5, %v3023_v39, %v3024_v27  ;;  %v269_v31 = vsel %vm15834_vm9, 0, %v268_v38  ;;  %v301_v51 = vld [vmem:[#allocation2 + $0x84] sm:$0x1]  ;;  %v333_v48 = vld [vmem:[#allocation2 + $0x2c] sm:$0x1] }
 0x1a7   : > { %12155 = vmatprep.mubr.bf16.mxu0 %v10632_v45  ;;  %v6257_v29 = vrot.slane %v6255_v36, 4  ;;  %v275_v42 = vsel %vm15834_vm9, 0, %v274_v63  ;;  %v320_v7 = vsel %vm15834_vm9, 0, %v319_v24  ;;  %270 = vst [vmem:[#allocation2] sm:$0x1] %v269_v31  ;;  %v325_v12 = vsel %vm15846_vm10, 0, %v324_v59 }
 0x1a8   : > { %276 = vst [vmem:[#allocation2 + $0x18] sm:$0x1] %v275_v42  ;;  %321 = vst [vmem:[#allocation2 + $0xcc] sm:$0x1] %v320_v7  ;;  %v376_v28 = vsel %vm15846_vm10, 0, %v375_v56  ;;  %v10633_v61 = vcombine.low %v3022_v19, %v3025_v3  ;;  %v6256_v58 = vsel %vm14467_vm5, %v11050_v47, %v6255_v36  ;;  %v299_v62 = vsel %vm15834_vm9, 0, %v298_v54 }
 0x1a9   : > { %12440 = vmatmul.mubr.bf16.gmra.mrb[8].mxu1 %v11072_v18  ;;  %v6259_v15 = vsel %vm14467_vm5, %v6257_v29, %v6258_v13  ;;  %326 = vst [vmem:[#allocation2 + $0x8] sm:$0x1] %v325_v12  ;;  %377 = vst [vmem:[#allocation2 + $0xd4] sm:$0x1] %v376_v28  ;;  %v272_v0 = vsel %vm15834_vm9, 0, %v271_v10  ;;  %v296_v22 = vsel %vm15834_vm9, 0, %v295_v32 }
 0x1aa   : > { %12443 = vmatprep.mubr.bf16.mxu1 %v11073_v35  ;;  %v11074_v50 = vcombine.low %v6256_v58, %v6259_v15  ;;  %300 = vst [vmem:[#allocation2 + $0x78] sm:$0x1] %v299_v62  ;;  %273 = vst [vmem:[#allocation2 + $0xc] sm:$0x1] %v272_v0  ;;  %v331_v43 = vsel %vm15846_vm10, 0, %v330_v33  ;;  %v355_v26 = vsel %vm15846_vm10, 0, %v354_v57 }
 0x1ab   : > { %297 = vst [vmem:[#allocation2 + $0x6c] sm:$0x1] %v296_v22  ;;  %332 = vst [vmem:[#allocation2 + $0x20] sm:$0x1] %v331_v43  ;;  %v328_v53 = vsel %vm15846_vm10, 0, %v327_v23  ;;  %v352_v16 = vsel %vm15846_vm10, 0, %v351_v60 }
 0x1ac   : > { %356 = vst [vmem:[#allocation2 + $0x80] sm:$0x1] %v355_v26  ;;  %329 = vst [vmem:[#allocation2 + $0x14] sm:$0x1] %v328_v53  ;;  %v281_v4 = vsel %vm15834_vm9, 0, %v280_v55  ;;  %v305_v49 = vsel %vm15834_vm9, 0, %v304_v14 }
 0x1ad   : > { %353 = vst [vmem:[#allocation2 + $0x74] sm:$0x1] %v352_v16  ;;  %282 = vst [vmem:[#allocation2 + $0x30] sm:$0x1] %v281_v4  ;;  %v278_v46 = vsel %vm15834_vm9, 0, %v277_v52  ;;  %v302_v5 = vsel %vm15834_vm9, 0, %v301_v51 }
 0x1ae   : > { %12156 = vmatmul.mubr.bf16.gmra.mrb[12].mxu0 %v10633_v61  ;;  %306 = vst [vmem:[#allocation2 + $0x90] sm:$0x1] %v305_v49  ;;  %279 = vst [vmem:[#allocation2 + $0x24] sm:$0x1] %v278_v46  ;;  %v337_v11 = vsel %vm15846_vm10, 0, %v336_v30  ;;  %v361_v17 = vsel %vm15846_vm10, 0, %v360_v34 }
 0x1af   : > { %303 = vst [vmem:[#allocation2 + $0x84] sm:$0x1] %v302_v5  ;;  %338 = vst [vmem:[#allocation2 + $0x38] sm:$0x1] %v337_v11  ;;  %v334_v44 = vsel %vm15846_vm10, 0, %v333_v48 }
 0x1b0   : > { %362 = vst [vmem:[#allocation2 + $0x98] sm:$0x1] %v361_v17  ;;  %v357_v9 = vld [vmem:[#allocation2 + $0x8c] sm:$0x1]  ;;  %335 = vst [vmem:[#allocation2 + $0x2c] sm:$0x1] %v334_v44 }
 0x1b1   : > { %12444 = vmatmul.mubr.bf16.gmra.mrb[12].mxu1 %v11074_v50  ;;  %v358_v40 = vsel %vm15846_vm10, 0, %v357_v9  ;;  %v286_v20 = vld [vmem:[#allocation2 + $0x48] sm:$0x1]  ;;  %v283_v21 = vld [vmem:[#allocation2 + $0x3c] sm:$0x1] }
 0x1b2   : > { %359 = vst [vmem:[#allocation2 + $0x8c] sm:$0x1] %v358_v40  ;;  %v310_v37 = vld [vmem:[#allocation2 + $0xa8] sm:$0x1]  ;;  %v287_v38 = vsel %vm15834_vm9, 0, %v286_v20  ;;  %v284_v1 = vsel %vm15834_vm9, 0, %v283_v21 }
 0x1b3   : > { %v311_v24 = vsel %vm15834_vm9, 0, %v310_v37  ;;  %v307_v6 = vld [vmem:[#allocation2 + $0x9c] sm:$0x1]  ;;  %288 = vst [vmem:[#allocation2 + $0x48] sm:$0x1] %v287_v38 }
 0x1b4   : > { %312 = vst [vmem:[#allocation2 + $0xa8] sm:$0x1] %v311_v24  ;;  %v308_v8 = vsel %vm15834_vm9, 0, %v307_v6  ;;  %285 = vst [vmem:[#allocation2 + $0x3c] sm:$0x1] %v284_v1 }
 0x1b5   : > { %309 = vst [vmem:[#allocation2 + $0x9c] sm:$0x1] %v308_v8  ;;  %v342_v59 = vld [vmem:[#allocation2 + $0x50] sm:$0x1]  ;;  %v339_v56 = vld [vmem:[#allocation2 + $0x44] sm:$0x1] }
 0x1b6   : > { %v343_v45 = vsel %vm15846_vm10, 0, %v342_v59  ;;  %v366_v39 = vld [vmem:[#allocation2 + $0xb0] sm:$0x1]  ;;  %v340_v18 = vsel %vm15846_vm10, 0, %v339_v56  ;;  %v363_v25 = vld [vmem:[#allocation2 + $0xa4] sm:$0x1] }
 0x1b7   : > { %344 = vst [vmem:[#allocation2 + $0x50] sm:$0x1] %v343_v45  ;;  %v367_v27 = vsel %vm15846_vm10, 0, %v366_v39  ;;  %341 = vst [vmem:[#allocation2 + $0x44] sm:$0x1] %v340_v18  ;;  %v364_v47 = vsel %vm15846_vm10, 0, %v363_v25 }
 0x1b8   : > { %368 = vst [vmem:[#allocation2 + $0xb0] sm:$0x1] %v367_v27  ;;  %365 = vst [vmem:[#allocation2 + $0xa4] sm:$0x1] %v364_v47  ;;  %v292_v36 = vld [vmem:[#allocation2 + $0x60] sm:$0x1] }
 0x1b9   : > { %v316_v63 = vld [vmem:[#allocation2 + $0xc0] sm:$0x1]  ;;  %v293_v35 = vsel %vm15834_vm9, 0, %v292_v36  ;;  %v289_v19 = vld [vmem:[#allocation2 + $0x54] sm:$0x1] }
 0x1ba   : > { %v317_v13 = vsel %vm15834_vm9, 0, %v316_v63  ;;  %294 = vst [vmem:[#allocation2 + $0x60] sm:$0x1] %v293_v35  ;;  %v290_v3 = vsel %vm15834_vm9, 0, %v289_v19  ;;  %v313_v29 = vld [vmem:[#allocation2 + $0xb4] sm:$0x1] }
 0x1bb   : > { %318 = vst [vmem:[#allocation2 + $0xc0] sm:$0x1] %v317_v13  ;;  %291 = vst [vmem:[#allocation2 + $0x54] sm:$0x1] %v290_v3  ;;  %v314_v31 = vsel %vm15834_vm9, 0, %v313_v29 }
 0x1bc   : > { %315 = vst [vmem:[#allocation2 + $0xb4] sm:$0x1] %v314_v31  ;;  %v348_v42 = vld [vmem:[#allocation2 + $0x68] sm:$0x1]  ;;  %v15915_v12 = vld [vmem:[%s17429_s2] ss:$0 sm:$0xff] }
 0x1bd   : > { %v372_v7 = vld [vmem:[#allocation2 + $0xc8] sm:$0x1]  ;;  %v349_v28 = vsel %vm15846_vm10, 0, %v348_v42  ;;  %v345_v58 = vld [vmem:[#allocation2 + $0x5c] sm:$0x1] }
 0x1be   : > { %v373_v61 = vsel %vm15846_vm10, 0, %v372_v7  ;;  %350 = vst [vmem:[#allocation2 + $0x68] sm:$0x1] %v349_v28  ;;  %v346_v50 = vsel %vm15846_vm10, 0, %v345_v58 }
 0x1bf   : > { %374 = vst [vmem:[#allocation2 + $0xc8] sm:$0x1] %v373_v61  ;;  %347 = vst [vmem:[#allocation2 + $0x5c] sm:$0x1] %v346_v50 }
 0x269   : > { %v12145_v15 = vpop.f32.mrb[0].mxu0 }
 0x26a   : > { %v15924_v54 = vadd.f32 %v12145_v15, %v15915_v12  ;;  %v3157_v62 = vpop.f32.mrb[1].mxu0 }
 0x26b   : > { %v15927_v10 = vadd.f32 %v15915_v12, %v3157_v62  ;;  %v12146_v32 = vpop.f32.mrb[2].mxu0 }
 0x26c   : > { %v3261_v0 = vsub.f32 0.0, %v15924_v54  ;;  %v12433_v22 = vpop.f32.mrb[0].mxu1  ;;  %v15931_v33 = vadd.f32 %v12146_v32, %v15915_v12  ;;  %v3160_v57 = vpop.f32.mrb[3].mxu0 }
 0x26d   : > { %v15934_v43 = vadd.f32 %v12433_v22, %v15915_v12  ;;  %v3259_v26 = vsub.f32 0.0, %v15927_v10  ;;  %v6390_v23 = vpop.f32.mrb[1].mxu1  ;;  %v15938_v53 = vadd.f32 %v15915_v12, %v3160_v57 }
 0x26e   : > { %v3279_v60 = vmul.f32 1.442695, %v3261_v0  ;;  %v15941_v16 = vadd.f32 %v15915_v12, %v6390_v23  ;;  %v3262_v55 = vsub.f32 0.0, %v15931_v33  ;;  %v12434_v14 = vpop.f32.mrb[2].mxu1 }
 0x26f   : > { %v6494_v4 = vsub.f32 0.0, %v15934_v43  ;;  %v3275_v49 = vmul.f32 1.442695, %v3259_v26  ;;  %v15946_v52 = vadd.f32 %v12434_v14, %v15915_v12  ;;  %v3260_v51 = vsub.f32 0.0, %v15938_v53  ;;  %v6393_v46 = vpop.f32.mrb[3].mxu1 }
 0x270   : > { %13415 = vpow2.f32 %v3279_v60  ;;  %v6492_v5 = vsub.f32 0.0, %v15941_v16  ;;  %v3281_v30 = vmul.f32 1.442695, %v3262_v55  ;;  %v15951_v11 = vadd.f32 %v15915_v12, %v6393_v46 }
 0x271   : > { %v6512_v34 = vmul.f32 1.442695, %v6494_v4  ;;  %13417 = vpow2.f32 %v3275_v49  ;;  %v6495_v17 = vsub.f32 0.0, %v15946_v52  ;;  %v3277_v48 = vmul.f32 1.442695, %v3260_v51  ;;  %v12149_v44 = vpop.f32.mrb[4].mxu0 }
 0x272   : > { %v6508_v9 = vmul.f32 1.442695, %v6492_v5  ;;  %13419 = vpow2.f32 %v3281_v30  ;;  %v6493_v40 = vsub.f32 0.0, %v15951_v11  ;;  %v15956_v20 = vadd.f32 %v12149_v44, %v15915_v12  ;;  %v3173_v37 = vpop.f32.mrb[5].mxu0 }
 0x273   : > { %13421 = vpow2.f32 %v6512_v34  ;;  %v6514_v38 = vmul.f32 1.442695, %v6495_v17  ;;  %v15959_v24 = vadd.f32 %v15915_v12, %v3173_v37  ;;  %v12150_v21 = vpop.f32.mrb[6].mxu0 }
 0x274   : > { %13423 = vpow2.f32 %v6508_v9  ;;  %v6510_v6 = vmul.f32 1.442695, %v6493_v40  ;;  %v3265_v1 = vsub.f32 0.0, %v15956_v20  ;;  %v12437_v8 = vpop.f32.mrb[4].mxu1  ;;  %v15963_v59 = vadd.f32 %v12150_v21, %v15915_v12  ;;  %v3176_v45 = vpop.f32.mrb[7].mxu0 }
 0x275   : > { %13425 = vpow2.f32 %v6514_v38  ;;  %v15966_v39 = vadd.f32 %v12437_v8, %v15915_v12  ;;  %v3263_v27 = vsub.f32 0.0, %v15959_v24  ;;  %v6406_v56 = vpop.f32.mrb[5].mxu1  ;;  %v15976_v15 = vadd.f32 %v15915_v12, %v3176_v45 }
 0x276   : > { %13427 = vpow2.f32 %v3277_v48  ;;  %v3287_v18 = vmul.f32 1.442695, %v3265_v1  ;;  %v15970_v25 = vadd.f32 %v15915_v12, %v6406_v56  ;;  %v3266_v47 = vsub.f32 0.0, %v15963_v59  ;;  %v12438_v36 = vpop.f32.mrb[6].mxu1 }
 0x277   : > { %13429 = vpow2.f32 %v6510_v6  ;;  %v6498_v63 = vsub.f32 0.0, %v15966_v39  ;;  %v3283_v35 = vmul.f32 1.442695, %v3263_v27  ;;  %v6409_v13 = vpop.f32.mrb[7].mxu1  ;;  %v15981_v23 = vadd.f32 %v12438_v36, %v15915_v12 }
 0x278   : > { %13431 = vpow2.f32 %v3287_v18  ;;  %v6496_v19 = vsub.f32 0.0, %v15970_v25  ;;  %v3289_v3 = vmul.f32 1.442695, %v3266_v47  ;;  %v15984_v4 = vadd.f32 %v15915_v12, %v6409_v13 }
 0x279   : > { %v6520_v29 = vmul.f32 1.442695, %v6498_v63  ;;  %13433 = vpow2.f32 %v3283_v35  ;;  %v12153_v31 = vpop.f32.mrb[8].mxu0  ;;  %v3264_v5 = vsub.f32 0.0, %v15976_v15  ;;  %v6499_v38 = vsub.f32 0.0, %v15981_v23 }
 0x27a   : > { %v13416_v42 = vpop.eup %13415  ;;  %v6516_v7 = vmul.f32 1.442695, %v6496_v19  ;;  %13435 = vpow2.f32 %v3289_v3  ;;  %v3189_v28 = vpop.f32.mrb[9].mxu0  ;;  %v15988_v30 = vadd.f32 %v12153_v31, %v15915_v12  ;;  %v6497_v45 = vsub.f32 0.0, %v15984_v4 }
 0x27b   : > { %v13418_v61 = vpop.eup %13417  ;;  %v3309_v58 = vadd.f32 1.0, %v13416_v42  ;;  %13437 = vpow2.f32 %v6520_v29  ;;  %v12154_v50 = vpop.f32.mrb[10].mxu0  ;;  %v15996_v9 = vadd.f32 %v15915_v12, %v3189_v28  ;;  %v3285_v36 = vmul.f32 1.442695, %v3264_v5 }
 0x27c   : > { %v13420_v62 = vpop.eup %13419  ;;  %v3307_v32 = vadd.f32 1.0, %v13418_v61  ;;  %13439 = vpow2.f32 %v6516_v7  ;;  %v12441_v0 = vpop.f32.mrb[8].mxu1  ;;  %17513 = vst [vmem:[#allocation9_spill] sm:$0xff] %v15988_v30  ;;  %v16006_v27 = vadd.f32 %v12154_v50, %v15915_v12  ;;  %v3269_v63 = vsub.f32 0.0, %v15988_v30 }
 0x27d   : > { %v15978_v22 = vpop.f32.mrb[11].mxu0  ;;  %v13422_v57 = vpop.eup %13421  ;;  %13441 = vrcp.f32 %v3309_v58  ;;  %v3310_v26 = vadd.f32 1.0, %v13420_v62  ;;  %v15993_v44 = vadd.f32 %v12441_v0, %v15915_v12  ;;  %17515 = vst [vmem:[#allocation18_spill] sm:$0xff] %v15996_v9  ;;  %v3267_v29 = vsub.f32 0.0, %v15996_v9 }
 0x27e   : > { %v6422_v60 = vpop.f32.mrb[9].mxu1  ;;  %v13424_v55 = vpop.eup %13423  ;;  %v6542_v14 = vadd.f32 1.0, %v13422_v57  ;;  %13443 = vrcp.f32 %v3307_v32  ;;  %17517 = vst [vmem:[#allocation12_spill] sm:$0xff] %v16006_v27  ;;  %v6522_v61 = vmul.f32 1.442695, %v6499_v38  ;;  %v3270_v57 = vsub.f32 0.0, %v16006_v27 }
 0x27f   : > { %v12442_v49 = vpop.f32.mrb[10].mxu1  ;;  %v13426_v51 = vpop.eup %13425  ;;  %v6540_v46 = vadd.f32 1.0, %v13424_v55  ;;  %13445 = vrcp.f32 %v3310_v26  ;;  %17514 = vst [vmem:[#allocation10_spill] sm:$0xff] %v15993_v44  ;;  %v16000_v21 = vadd.f32 %v15915_v12, %v6422_v60  ;;  %v6502_v3 = vsub.f32 0.0, %v15993_v44 }
 0x280   : > { %v15990_v34 = vpop.f32.mrb[11].mxu1  ;;  %v13428_v17 = vpop.eup %13427  ;;  %13447 = vrcp.f32 %v6542_v14  ;;  %v6543_v48 = vadd.f32 1.0, %v13426_v51  ;;  %v16022_v0 = vmul.f32 1.442695, %v6497_v45  ;;  %v16027_v14 = vmul.f32 1.442695, %v3269_v63 }
 0x281   : > { %v13430_v40 = vpop.eup %13429  ;;  %13449 = vrcp.f32 %v6540_v46  ;;  %v3308_v37 = vadd.f32 1.0, %v13428_v17  ;;  %17516 = vst [vmem:[#allocation11_spill] sm:$0xff] %v16000_v21  ;;  %v16002_v6 = vpop.f32.mrb[12].mxu0  ;;  %v6500_v58 = vsub.f32 0.0, %v16000_v21  ;;  %v16030_v51 = vadd.f32 %v12442_v49, %v15915_v12 }
 0x282   : > { %v13432_v1 = vpop.eup %13431  ;;  %13451 = vrcp.f32 %v6543_v48  ;;  %v6541_v8 = vadd.f32 1.0, %v13430_v40  ;;  %v16008_v56 = vpop.f32.mrb[13].mxu0  ;;  %v16035_v48 = vmul.f32 1.442695, %v6502_v3  ;;  %v16037_v40 = vmul.f32 1.442695, %v3267_v29 }
 0x283   : > { %v13434_v18 = vpop.eup %13433  ;;  %v3313_v47 = vadd.f32 1.0, %v13432_v1  ;;  %v16011_v35 = vpop.f32.mrb[14].mxu0  ;;  %13453 = vrcp.f32 %v3308_v37  ;;  %v16040_v1 = vmul.f32 1.442695, %v6500_v58  ;;  %v16044_v49 = vadd.f32 %v15915_v12, %v15978_v22 }
 0x284   : > { %v13436_v13 = vpop.eup %13435  ;;  %v3311_v19 = vadd.f32 1.0, %v13434_v18  ;;  %v16015_v31 = vpop.f32.mrb[12].mxu1  ;;  %13455 = vrcp.f32 %v6541_v8 }
 0x285   : > { %v16017_v42 = vpop.f32.mrb[15].mxu0  ;;  %v13438_v7 = vpop.eup %13437  ;;  %v3314_v28 = vadd.f32 1.0, %v13436_v13  ;;  %13457 = vrcp.f32 %v3313_v47 }
 0x286   : > { %v16020_v50 = vpop.f32.mrb[13].mxu1  ;;  %v13440_v62 = vpop.eup %13439  ;;  %v6546_v32 = vadd.f32 1.0, %v13438_v7  ;;  %13459 = vrcp.f32 %v3311_v19 }
 0x287   : > { %v16025_v26 = vpop.f32.mrb[14].mxu1  ;;  %v13442_v60 = vpop.eup %13441  ;;  %v6544_v55 = vadd.f32 1.0, %v13440_v62  ;;  %13461 = vrcp.f32 %v3314_v28 }
 0x288   : > { %v16032_v46 = vpop.f32.mrb[15].mxu1  ;;  %v13444_v5 = vpop.eup %13443  ;;  %v3341_v17 = vmul.f32 %v13442_v60, %v15924_v54  ;;  %13463 = vrcp.f32 %v6546_v32  ;;  %v16047_v54 = vmul.f32 1.442695, %v3270_v57 }
 0x289   : > { %17518 = vst [vmem:[#allocation13_spill] sm:$0xff] %v16032_v46  ;;  %v13446_v37 = vpop.eup %13445  ;;  %v3339_v38 = vmul.f32 %v13444_v5, %v15927_v10  ;;  %13465 = vrcp.f32 %v6544_v55 }
 0x28a   : > { %v13448_v8 = vpop.eup %13447  ;;  %v11407_v45 = vpack.c.bf16 %v3341_v17, %v3341_v17  ;;  %v3342_v18 = vmul.f32 %v13446_v37, %v15931_v33  ;;  %13467 = vpow2.f32 %v6522_v61 }
 0x28b   : > { %v13450_v47 = vpop.eup %13449  ;;  %v6574_v63 = vmul.f32 %v13448_v8, %v15934_v43  ;;  %v11405_v13 = vpack.c.bf16 %v3339_v38, %v3339_v38  ;;  %13469 = vpow2.f32 %v3285_v36 }
 0x28c   : > { %v13452_v19 = vpop.eup %13451  ;;  %v3423_v3 = vshrl.u32 %v11407_v45, 16  ;;  %v6572_v29 = vmul.f32 %v13450_v47, %v15941_v16  ;;  %v11408_v22 = vpack.c.bf16 %v3342_v18, %v3342_v18  ;;  %v3426_v7 = vshll.u32 %v11407_v45, 16  ;;  %v3576_v16 = vld [vmem:[#allocation2 + $0x18] sm:$0xf]  ;;  %v3569_v18 = vld [vmem:[#allocation2 + $0xc] sm:$0xf] }
 0x28d   : > { %v11423_v28 = vpack.c.bf16 %v6574_v63, %v6574_v63  ;;  %v3406_v58 = vshrl.u32 %v11405_v13, 16  ;;  %v6575_v33 = vmul.f32 %v13452_v19, %v15946_v52  ;;  %v13454_v62 = vpop.eup %13453  ;;  %v3409_v57 = vshll.u32 %v11405_v13, 16 }
 0x28e   : > { %v3425_v32 = vrot.slane %v3423_v3, 7  ;;  %v11421_v60 = vpack.c.bf16 %v6572_v29, %v6572_v29  ;;  %v3431_v43 = vshrl.u32 %v11408_v22, 16  ;;  %v13456_v55 = vpop.eup %13455  ;;  %v3434_v17 = vshll.u32 %v11408_v22, 16 }
 0x28f   : > { %v6654_v5 = vshrl.u32 %v11423_v28, 16  ;;  %v16059_v36 = vrot.slane %v3406_v58, 7  ;;  %v11424_v37 = vpack.c.bf16 %v6575_v33, %v6575_v33  ;;  %v13458_v38 = vpop.eup %13457  ;;  %v6657_v45 = vshll.u32 %v11423_v28, 16  ;;  %v6805_v58 = vld [vmem:[#allocation2 + $0x78] sm:$0xf] }
 0x290   : > { %v3428_v52 = vor.u32 %v3426_v7, %v3425_v32  ;;  %v3429_v8 = vrot.slane %v3425_v32, 4  ;;  %v6637_v47 = vshrl.u32 %v11421_v60, 16  ;;  %v13460_v63 = vpop.eup %13459  ;;  %v6640_v3 = vshll.u32 %v11421_v60, 16 }
 0x291   : > { %v6656_v13 = vrot.slane %v6654_v5, 7  ;;  %v3411_v19 = vor.u32 %v3409_v57, %v16059_v36  ;;  %v3433_v29 = vrot.slane %v3431_v43, 7  ;;  %v13462_v10 = vpop.eup %13461  ;;  %v6662_v28 = vshrl.u32 %v11424_v37, 16  ;;  %v6798_v43 = vld [vmem:[#allocation2 + $0x6c] sm:$0xf] }
 0x292   : > { %v3577_v27 = vsel %vm16055_vm13, %v3428_v52, %v3576_v16  ;;  %v16065_v33 = vrot.slane %v6637_v47, 7  ;;  %v13464_v32 = vpop.eup %13463  ;;  %v3580_v5 = vld [vmem:[#allocation2 + $0x20] sm:$0x1]  ;;  %v6665_v52 = vshll.u32 %v11424_v37, 16 }
 0x293   : > { %3578 = vst [vmem:[#allocation2 + $0x18] sm:$0xf] %v3577_v27  ;;  %v6659_v57 = vor.u32 %v6657_v45, %v6656_v13  ;;  %v3570_v60 = vsel %vm16055_vm13, %v3411_v19, %v3569_v18  ;;  %v3436_v16 = vor.u32 %v3434_v17, %v3433_v29  ;;  %v13466_v22 = vpop.eup %13465  ;;  %v6660_v47 = vrot.slane %v6656_v13, 4  ;;  %v6809_v45 = vld [vmem:[#allocation2 + $0x80] sm:$0x1] }
 0x294   : > { %3571 = vst [vmem:[#allocation2 + $0xc] sm:$0xf] %v3570_v60  ;;  %v6642_v21 = vor.u32 %v6640_v3, %v16065_v33  ;;  %v3438_v9 = vrot.slane %v3433_v29, 4  ;;  %v6664_v44 = vrot.slane %v6662_v28, 7  ;;  %v13468_v30 = vpop.eup %13467  ;;  %v3340_v18 = vmul.f32 %v13454_v62, %v15938_v53 }
 0x295   : > { %v6806_v46 = vsel %vm16055_vm13, %v6659_v57, %v6805_v58  ;;  %v3437_v27 = vsel %vm16069_vm14, %v3429_v8, %v3436_v16  ;;  %v6573_v17 = vmul.f32 %v13456_v55, %v15951_v11  ;;  %v16082_v37 = vpop.eup %13469  ;;  %v3345_v53 = vmul.f32 %v13458_v38, %v15956_v20 }
 0x296   : > { %6807 = vst [vmem:[#allocation2 + $0x78] sm:$0xf] %v6806_v46  ;;  %v6799_v13 = vsel %vm16055_vm13, %v6642_v21, %v6798_v43  ;;  %3579 = vst [vmem:[#allocation2 + $0x1c] sm:$0xf] %v3437_v27  ;;  %v3581_v19 = vsel %vm15834_vm9, %v3438_v9, %v3580_v5  ;;  %v6667_v3 = vor.u32 %v6665_v52, %v6664_v44  ;;  %v6669_v29 = vrot.slane %v6664_v44, 4 }
 0x297   : > { %6800 = vst [vmem:[#allocation2 + $0x6c] sm:$0xf] %v6799_v13  ;;  %3582 = vst [vmem:[#allocation2 + $0x20] sm:$0x1] %v3581_v19  ;;  %v11406_v8 = vpack.c.bf16 %v3340_v18, %v3340_v18  ;;  %v11422_v58 = vpack.c.bf16 %v6573_v17, %v6573_v17  ;;  %v6578_v11 = vmul.f32 %v13464_v32, %v15966_v39  ;;  %v6643_v44 = vrot.slane %v16065_v33, 4 }
 0x298   : > { %v6668_v46 = vsel %vm16069_vm14, %v6660_v47, %v6667_v3  ;;  %v6810_v21 = vsel %vm15834_vm9, %v6669_v29, %v6809_v45  ;;  %v3343_v62 = vmul.f32 %v13460_v63, %v15959_v24  ;;  %v6576_v9 = vmul.f32 %v13466_v22, %v15970_v25  ;;  %v3573_v43 = vld [vmem:[#allocation2 + $0x14] sm:$0x1] }
 0x299   : > { %6808 = vst [vmem:[#allocation2 + $0x7c] sm:$0xf] %v6668_v46  ;;  %6811 = vst [vmem:[#allocation2 + $0x80] sm:$0x1] %v6810_v21  ;;  %v3414_v55 = vshrl.u32 %v11406_v8, 16  ;;  %v3417_v28 = vshll.u32 %v11406_v8, 16  ;;  %v11411_v38 = vpack.c.bf16 %v3345_v53, %v3345_v53  ;;  %v11427_v39 = vpack.c.bf16 %v6578_v11, %v6578_v11 }
 0x29a   : > { %v6645_v57 = vshrl.u32 %v11422_v58, 16  ;;  %v6648_v20 = vshll.u32 %v11422_v58, 16  ;;  %v11409_v32 = vpack.c.bf16 %v3343_v62, %v3343_v62  ;;  %v11425_v5 = vpack.c.bf16 %v6576_v9, %v6576_v9  ;;  %v6802_v24 = vld [vmem:[#allocation2 + $0x74] sm:$0x1]  ;;  %v3590_v58 = vld [vmem:[#allocation2 + $0x30] sm:$0xf] }
 0x29b   : > { %v3416_v60 = vrot.slane %v3414_v55, 7  ;;  %v3346_v52 = vmul.f32 %v13462_v10, %v15963_v59  ;;  %v3457_v63 = vshrl.u32 %v11411_v38, 16  ;;  %v3460_v25 = vshll.u32 %v11411_v38, 16  ;;  %v6819_v53 = vld [vmem:[#allocation2 + $0x90] sm:$0xf] }
 0x29c   : > { %v6647_v16 = vrot.slane %v6645_v57, 7  ;;  %v6688_v22 = vshrl.u32 %v11427_v39, 16  ;;  %v6547_v33 = vadd.f32 1.0, %v13468_v30  ;;  %v6691_v19 = vshll.u32 %v11427_v39, 16 }
 0x29d   : > { %v3419_v47 = vor.u32 %v3417_v28, %v3416_v60  ;;  %v3421_v27 = vrot.slane %v3416_v60, 4  ;;  %v3459_v17 = vrot.slane %v3457_v63, 7  ;;  %v3440_v3 = vshrl.u32 %v11409_v32, 16  ;;  %v6812_v60 = vld [vmem:[#allocation2 + $0x84] sm:$0xf] }
 0x29e   : > { %v6650_v45 = vor.u32 %v6648_v20, %v6647_v16  ;;  %v6652_v18 = vrot.slane %v6647_v16, 4  ;;  %v16098_v13 = vrot.slane %v6688_v22, 7  ;;  %v17523_v29 = vrot.slane %v16059_v36, 4  ;;  %v3583_v20 = vld [vmem:[#allocation2 + $0x24] sm:$0xf] }
 0x29f   : > { %v3574_v59 = vsel %vm15834_vm9, %v3421_v27, %v3573_v43  ;;  %v3462_v11 = vor.u32 %v3460_v25, %v3459_v17  ;;  %v16113_v46 = vadd.f32 %v15915_v12, %v15990_v34  ;;  %v16117_v21 = vadd.f32 %v16002_v6, %v15915_v12 }
 0x2a0   : > { %v3420_v8 = vsel %vm16069_vm14, %v17523_v29, %v3419_v47  ;;  %v6651_v30 = vsel %vm16069_vm14, %v6643_v44, %v6650_v45  ;;  %v6803_v10 = vsel %vm15834_vm9, %v6652_v18, %v6802_v24  ;;  %3575 = vst [vmem:[#allocation2 + $0x14] sm:$0x1] %v3574_v59  ;;  %v6693_v36 = vor.u32 %v6691_v19, %v16098_v13  ;;  %v369_v19 = vld [vmem:[#allocation2 + $0xbc] sm:$0x1] }
 0x2a1   : > { %3572 = vst [vmem:[#allocation2 + $0x10] sm:$0xf] %v3420_v8  ;;  %6801 = vst [vmem:[#allocation2 + $0x70] sm:$0xf] %v6651_v30  ;;  %v16119_v62 = vrot.slane %v3440_v3, 7  ;;  %v3443_v9 = vshll.u32 %v11409_v32, 16  ;;  %v11412_v55 = vpack.c.bf16 %v3346_v52, %v3346_v52  ;;  %v3591_v28 = vsel %vm16055_vm13, %v3462_v11, %v3590_v58 }
 0x2a2   : > { %6804 = vst [vmem:[#allocation2 + $0x74] sm:$0x1] %v6803_v10  ;;  %v6671_v44 = vshrl.u32 %v11425_v5, 16  ;;  %v6820_v57 = vsel %vm16055_vm13, %v6693_v36, %v6819_v53  ;;  %13471 = vrcp.f32 %v6547_v33  ;;  %v3312_v34 = vadd.f32 1.0, %v16082_v37  ;;  %3592 = vst [vmem:[#allocation2 + $0x30] sm:$0xf] %v3591_v28 }
 0x2a3   : > { %6821 = vst [vmem:[#allocation2 + $0x90] sm:$0xf] %v6820_v57  ;;  %v3445_v6 = vor.u32 %v3443_v9, %v16119_v62  ;;  %v6674_v39 = vshll.u32 %v11425_v5, 16  ;;  %v3465_v32 = vshrl.u32 %v11412_v55, 16  ;;  %v3268_v43 = vsub.f32 0.0, %v16044_v49 }
 0x2a4   : > { %v16127_v38 = vrot.slane %v6671_v44, 7  ;;  %13473 = vrcp.f32 %v3312_v34  ;;  %v6501_v16 = vsub.f32 0.0, %v16113_v46  ;;  %v16133_v52 = vadd.f32 %v16015_v31, %v15915_v12  ;;  %v3594_v5 = vld [vmem:[#allocation2 + $0x38] sm:$0x1] }
 0x2a5   : > { %v3584_v37 = vsel %vm16055_vm13, %v3445_v6, %v3583_v20  ;;  %v3467_v63 = vrot.slane %v3465_v32, 7  ;;  %v3468_v25 = vshll.u32 %v11412_v55, 16  ;;  %v3463_v22 = vrot.slane %v3459_v17, 4  ;;  %v6823_v32 = vld [vmem:[#allocation2 + $0x98] sm:$0x1] }
 0x2a6   : > { %v6676_v24 = vor.u32 %v6674_v39, %v16127_v38  ;;  %3585 = vst [vmem:[#allocation2 + $0x24] sm:$0xf] %v3584_v37  ;;  %13475 = vpow2.f32 %v16022_v0  ;;  %v3273_v33 = vsub.f32 0.0, %v16117_v21  ;;  %v16142_v47 = vadd.f32 %v15915_v12, %v16008_v56 }
 0x2a7   : > { %v3470_v27 = vor.u32 %v3468_v25, %v3467_v63  ;;  %v3472_v45 = vrot.slane %v3467_v63, 4  ;;  %13477 = vpow2.f32 %v16027_v14  ;;  %v17524_v18 = vsub.f32 0.0, %v16030_v51 }
 0x2a8   : > { %v6813_v31 = vsel %vm16055_vm13, %v6676_v24, %v6812_v60  ;;  %13479 = vpow2.f32 %v16035_v48  ;;  %v6506_v0 = vsub.f32 0.0, %v16133_v52  ;;  %v3293_v29 = vmul.f32 1.442695, %v3268_v43 }
 0x2a9   : > { %6814 = vst [vmem:[#allocation2 + $0x84] sm:$0xf] %v6813_v31  ;;  %v6530_v17 = vmul.f32 1.442695, %v17524_v18  ;;  %v3471_v56 = vsel %vm16069_vm14, %v3463_v22, %v3470_v27  ;;  %v3595_v3 = vsel %vm15834_vm9, %v3472_v45, %v3594_v5  ;;  %13481 = vpow2.f32 %v16037_v40 }
 0x2aa   : > { %3593 = vst [vmem:[#allocation2 + $0x34] sm:$0xf] %v3471_v56  ;;  %3596 = vst [vmem:[#allocation2 + $0x38] sm:$0x1] %v3595_v3  ;;  %13483 = vpow2.f32 %v16040_v1  ;;  %v6526_v14 = vmul.f32 1.442695, %v6501_v16  ;;  %v16171_v31 = vadd.f32 %v16011_v35, %v15915_v12 }
 0x2ab   : > { %v3271_v48 = vsub.f32 0.0, %v16142_v47  ;;  %13485 = vpow2.f32 %v16047_v54  ;;  %v3303_v8 = vmul.f32 1.442695, %v3273_v33  ;;  %v370_v59 = vsel %vm15846_vm10, 0, %v369_v19 }
 0x2ac   : > { %v13472_v30 = vpop.eup %13471  ;;  %13487 = vpow2.f32 %v6530_v17  ;;  %v6536_v10 = vmul.f32 1.442695, %v6506_v0  ;;  %371 = vst [vmem:[#allocation2 + $0xbc] sm:$0x1] %v370_v59  ;;  %v6694_v28 = vrot.slane %v16098_v13, 4  ;;  %v3446_v57 = vrot.slane %v16119_v62, 4 }
 0x2ad   : > { %v6579_v40 = vmul.f32 %v13472_v30, %v15981_v23  ;;  %13489 = vpow2.f32 %v3293_v29  ;;  %v3299_v53 = vmul.f32 1.442695, %v3271_v48  ;;  %v3587_v62 = vld [vmem:[#allocation2 + $0x2c] sm:$0x1]  ;;  %v16167_v33 = vadd.f32 %v15915_v12, %v16020_v50 }
 0x2ae   : > { %v13474_v58 = vpop.eup %13473  ;;  %13491 = vpow2.f32 %v6526_v14  ;;  %v16179_v50 = vadd.f32 %v16025_v26, %v15915_v12  ;;  %v3274_v26 = vsub.f32 0.0, %v16171_v31 }
 0x2af   : > { %v11428_v1 = vpack.c.bf16 %v6579_v40, %v6579_v40  ;;  %v3344_v11 = vmul.f32 %v13474_v58, %v15976_v15  ;;  %13493 = vpow2.f32 %v3303_v8  ;;  %v6504_v59 = vsub.f32 0.0, %v16167_v33 }
 0x2b0   : > { %v13476_v36 = vpop.eup %13475  ;;  %13495 = vpow2.f32 %v6536_v10  ;;  %v6507_v58 = vsub.f32 0.0, %v16179_v50 }
 0x2b1   : > { %v13478_v54 = vpop.eup %13477  ;;  %v6696_v9 = vshrl.u32 %v11428_v1, 16  ;;  %v11410_v41 = vpack.c.bf16 %v3344_v11, %v3344_v11  ;;  %v6545_v44 = vadd.f32 1.0, %v13476_v36  ;;  %13497 = vpow2.f32 %v3299_v53 }
 0x2b2   : > { %v13480_v55 = vpop.eup %13479  ;;  %v3317_v23 = vadd.f32 1.0, %v13478_v54  ;;  %v6699_v6 = vshll.u32 %v11428_v1, 16  ;;  %v16190_v11 = vadd.f32 %v15915_v12, %v16017_v42  ;;  %v6538_v42 = vmul.f32 1.442695, %v6507_v58 }
 0x2b3   : > { %v13482_v20 = vpop.eup %13481  ;;  %v6698_v34 = vrot.slane %v6696_v9, 7  ;;  %v3448_v39 = vshrl.u32 %v11410_v41, 16  ;;  %13499 = vrcp.f32 %v6545_v44  ;;  %v3451_v60 = vshll.u32 %v11410_v41, 16  ;;  %v17525_v41 = vld [vmem:[#allocation13_spill] sm:$0xff] }
 0x2b4   : > { %v13484_v15 = vpop.eup %13483  ;;  %13501 = vrcp.f32 %v3317_v23  ;;  %v6550_v43 = vadd.f32 1.0, %v13480_v55  ;;  %v3315_v16 = vadd.f32 1.0, %v13482_v20  ;;  %v6532_v9 = vmul.f32 1.442695, %v6504_v59  ;;  %v17526_v55 = vld [vmem:[#allocation9_spill] sm:$0xff] }
 0x2b5   : > { %v13486_v37 = vpop.eup %13485  ;;  %v6701_v24 = vor.u32 %v6699_v6, %v6698_v34  ;;  %v6703_v63 = vrot.slane %v6698_v34, 4  ;;  %v3450_v25 = vrot.slane %v3448_v39, 7  ;;  %v6548_v13 = vadd.f32 1.0, %v13484_v15  ;;  %v17527_v39 = vld [vmem:[#allocation10_spill] sm:$0xff] }
 0x2b6   : > { %v13488_v22 = vpop.eup %13487  ;;  %13503 = vrcp.f32 %v6550_v43  ;;  %v3318_v5 = vadd.f32 1.0, %v13486_v37  ;;  %v16195_v44 = vadd.f32 %v15915_v12, %v17525_v41  ;;  %v6677_v20 = vrot.slane %v16127_v38, 4 }
 0x2b7   : > { %v13490_v27 = vpop.eup %13489  ;;  %v6702_v45 = vsel %vm16069_vm14, %v6694_v28, %v6701_v24  ;;  %v6824_v18 = vsel %vm15834_vm9, %v6703_v63, %v6823_v32  ;;  %v3453_v17 = vor.u32 %v3451_v60, %v3450_v25  ;;  %v3455_v0 = vrot.slane %v3450_v25, 4  ;;  %v17528_v63 = vld [vmem:[#allocation18_spill] sm:$0xff] }
 0x2b8   : > { %v13492_v19 = vpop.eup %13491  ;;  %6822 = vst [vmem:[#allocation2 + $0x94] sm:$0xf] %v6702_v45  ;;  %6825 = vst [vmem:[#allocation2 + $0x98] sm:$0x1] %v6824_v18  ;;  %13505 = vrcp.f32 %v3315_v16  ;;  %v6551_v56 = vadd.f32 1.0, %v13488_v22  ;;  %v3316_v14 = vadd.f32 1.0, %v13490_v27 }
 0x2b9   : > { %v13494_v35 = vpop.eup %13493  ;;  %v3454_v3 = vsel %vm16069_vm14, %v3446_v57, %v3453_v17  ;;  %v3588_v29 = vsel %vm15834_vm9, %v3455_v0, %v3587_v62  ;;  %13507 = vrcp.f32 %v6548_v13  ;;  %v6549_v8 = vadd.f32 1.0, %v13492_v19  ;;  %v17529_v62 = vld [vmem:[#allocation11_spill] sm:$0xff]  ;;  %v6816_v27 = vld [vmem:[#allocation2 + $0x8c] sm:$0x1] }
 0x2ba   : > { %v13496_v48 = vpop.eup %13495  ;;  %3586 = vst [vmem:[#allocation2 + $0x28] sm:$0xf] %v3454_v3  ;;  %3589 = vst [vmem:[#allocation2 + $0x2c] sm:$0x1] %v3588_v29  ;;  %13509 = vrcp.f32 %v3318_v5  ;;  %v3321_v30 = vadd.f32 1.0, %v13494_v35  ;;  %v6505_v43 = vsub.f32 0.0, %v16195_v44 }
 0x2bb   : > { %v13498_v10 = vpop.eup %13497  ;;  %13511 = vrcp.f32 %v6551_v56  ;;  %v6554_v40 = vadd.f32 1.0, %v13496_v48  ;;  %v3305_v57 = vmul.f32 1.442695, %v3274_v26  ;;  %v3604_v3 = vld [vmem:[#allocation2 + $0x48] sm:$0xf] }
 0x2bc   : > { %13513 = vrcp.f32 %v3316_v14  ;;  %v3319_v1 = vadd.f32 1.0, %v13498_v10  ;;  %v17530_v14 = vld [vmem:[#allocation12_spill] sm:$0xff] }
 0x2bd   : > { %v13500_v53 = vpop.eup %13499  ;;  %13515 = vrcp.f32 %v6549_v8 }
 0x2be   : > { %v13502_v36 = vpop.eup %13501  ;;  %v6577_v54 = vmul.f32 %v13500_v53, %v15984_v4  ;;  %13517 = vrcp.f32 %v3321_v30  ;;  %v3272_v4 = vsub.f32 0.0, %v16190_v11 }
 0x2bf   : > { %v3349_v28 = vmul.f32 %v13502_v36, %v17526_v55  ;;  %13519 = vrcp.f32 %v6554_v40 }
 0x2c0   : > { %v13504_v23 = vpop.eup %13503  ;;  %v11426_v34 = vpack.c.bf16 %v6577_v54, %v6577_v54  ;;  %13521 = vrcp.f32 %v3319_v1  ;;  %v6833_v1 = vld [vmem:[#allocation2 + $0xa8] sm:$0xf] }
 0x2c1   : > { %v11415_v6 = vpack.c.bf16 %v3349_v28, %v3349_v28  ;;  %v6582_v15 = vmul.f32 %v13504_v23, %v17527_v39  ;;  %13523 = vpow2.f32 %v6532_v9 }
 0x2c2   : > { %v13506_v32 = vpop.eup %13505  ;;  %v6679_v60 = vshrl.u32 %v11426_v34, 16  ;;  %v6682_v12 = vshll.u32 %v11426_v34, 16  ;;  %13525 = vpow2.f32 %v3305_v57 }
 0x2c3   : > { %v13508_v16 = vpop.eup %13507  ;;  %v3491_v37 = vshrl.u32 %v11415_v6, 16  ;;  %v11431_v24 = vpack.c.bf16 %v6582_v15, %v6582_v15  ;;  %v3347_v38 = vmul.f32 %v13506_v32, %v17528_v63  ;;  %v3494_v22 = vshll.u32 %v11415_v6, 16 }
 0x2c4   : > { %v13510_v25 = vpop.eup %13509  ;;  %v6681_v13 = vrot.slane %v6679_v60, 7  ;;  %v6580_v5 = vmul.f32 %v13508_v16, %v17529_v62  ;;  %13527 = vpow2.f32 %v6538_v42  ;;  %v6826_v16 = vld [vmem:[#allocation2 + $0x9c] sm:$0xf] }
 0x2c5   : > { %v16204_v45 = vrot.slane %v3491_v37, 7  ;;  %v6722_v18 = vshrl.u32 %v11431_v24, 16  ;;  %v6725_v17 = vshll.u32 %v11431_v24, 16  ;;  %v11413_v0 = vpack.c.bf16 %v3347_v38, %v3347_v38  ;;  %v13512_v19 = vpop.eup %13511 }
 0x2c6   : > { %v6684_v56 = vor.u32 %v6682_v12, %v6681_v13  ;;  %v6686_v35 = vrot.slane %v6681_v13, 4  ;;  %v11429_v29 = vpack.c.bf16 %v6580_v5, %v6580_v5  ;;  %v3350_v48 = vmul.f32 %v13510_v25, %v17530_v14  ;;  %v13514_v8 = vpop.eup %13513 }
 0x2c7   : > { %v3496_v59 = vor.u32 %v3494_v22, %v16204_v45  ;;  %v3497_v30 = vrot.slane %v16204_v45, 4  ;;  %v16209_v26 = vrot.slane %v6722_v18, 7  ;;  %v3474_v10 = vshrl.u32 %v11413_v0, 16  ;;  %v13516_v40 = vpop.eup %13515 }
 0x2c8   : > { %v6685_v58 = vsel %vm16069_vm14, %v6677_v20, %v6684_v56  ;;  %v6817_v53 = vsel %vm15834_vm9, %v6686_v35, %v6816_v27  ;;  %v3477_v36 = vshll.u32 %v11413_v0, 16  ;;  %v6705_v54 = vshrl.u32 %v11429_v29, 16  ;;  %v13518_v9 = vpop.eup %13517  ;;  %v3597_v20 = vld [vmem:[#allocation2 + $0x3c] sm:$0xf] }
 0x2c9   : > { %6815 = vst [vmem:[#allocation2 + $0x88] sm:$0xf] %v6685_v58  ;;  %6818 = vst [vmem:[#allocation2 + $0x8c] sm:$0x1] %v6817_v53  ;;  %v3605_v41 = vsel %vm16055_vm13, %v3496_v59, %v3604_v3  ;;  %v6727_v55 = vor.u32 %v6725_v17, %v16209_v26  ;;  %v6728_v28 = vrot.slane %v16209_v26, 4  ;;  %v16219_v57 = vrot.slane %v3474_v10, 7  ;;  %v13520_v23 = vpop.eup %13519 }
 0x2ca   : > { %3606 = vst [vmem:[#allocation2 + $0x48] sm:$0xf] %v3605_v41  ;;  %v16221_v34 = vrot.slane %v6705_v54, 7  ;;  %v6708_v42 = vshll.u32 %v11429_v29, 16  ;;  %v11416_v6 = vpack.c.bf16 %v3350_v48, %v3350_v48  ;;  %v6583_v39 = vmul.f32 %v13512_v19, %v16030_v51  ;;  %v13522_v15 = vpop.eup %13521  ;;  %v3608_v19 = vld [vmem:[#allocation2 + $0x50] sm:$0x1] }
 0x2cb   : > { %v6834_v32 = vsel %vm16055_vm13, %v6727_v55, %v6833_v1  ;;  %v3479_v60 = vor.u32 %v3477_v36, %v16219_v57  ;;  %v3480_v12 = vrot.slane %v16219_v57, 4  ;;  %v3348_v37 = vmul.f32 %v13514_v8, %v16044_v49  ;;  %v16229_v24 = vpop.eup %13523  ;;  %v6837_v53 = vld [vmem:[#allocation2 + $0xb0] sm:$0x1]  ;;  %v3601_v1 = vld [vmem:[#allocation2 + $0x44] sm:$0x1] }
 0x2cc   : > { %6835 = vst [vmem:[#allocation2 + $0xa8] sm:$0xf] %v6834_v32  ;;  %v6710_v63 = vor.u32 %v6708_v42, %v16221_v34  ;;  %v6711_v38 = vrot.slane %v16221_v34, 4  ;;  %v3499_v25 = vshrl.u32 %v11416_v6, 16  ;;  %v3502_v51 = vshll.u32 %v11416_v6, 16  ;;  %v13526_v13 = vpop.eup %13525 }
 0x2cd   : > { %v3598_v22 = vsel %vm16055_vm13, %v3479_v60, %v3597_v20  ;;  %v11432_v62 = vpack.c.bf16 %v6583_v39, %v6583_v39  ;;  %v11414_v5 = vpack.c.bf16 %v3348_v37, %v3348_v37  ;;  %v6581_v27 = vmul.f32 %v13516_v40, %v16113_v46  ;;  %v6830_v32 = vld [vmem:[#allocation2 + $0xa4] sm:$0x1] }
 0x2ce   : > { %v16236_v45 = vpop.eup %13527  ;;  %3599 = vst [vmem:[#allocation2 + $0x3c] sm:$0xf] %v3598_v22  ;;  %v6827_v49 = vsel %vm16055_vm13, %v6710_v63, %v6826_v16  ;;  %v3501_v18 = vrot.slane %v3499_v25, 7  ;;  %v3353_v17 = vmul.f32 %v13518_v9, %v16117_v21  ;;  %v6586_v0 = vmul.f32 %v13520_v23, %v16133_v52 }
 0x2cf   : > { %6828 = vst [vmem:[#allocation2 + $0x9c] sm:$0xf] %v6827_v49  ;;  %v6730_v56 = vshrl.u32 %v11432_v62, 16  ;;  %v6733_v35 = vshll.u32 %v11432_v62, 16  ;;  %v3482_v3 = vshrl.u32 %v11414_v5, 16  ;;  %v3485_v29 = vshll.u32 %v11414_v5, 16 }
 0x2d0   : > { %v3504_v14 = vor.u32 %v3502_v51, %v3501_v18  ;;  %v3506_v48 = vrot.slane %v3501_v18, 4  ;;  %v11430_v46 = vpack.c.bf16 %v6581_v27, %v6581_v27  ;;  %v11419_v8 = vpack.c.bf16 %v3353_v17, %v3353_v17  ;;  %v6847_v27 = vld [vmem:[#allocation2 + $0xc0] sm:$0xf] }
 0x2d1   : > { %v6732_v59 = vrot.slane %v6730_v56, 7  ;;  %v3484_v10 = vrot.slane %v3482_v3, 7  ;;  %v11435_v40 = vpack.c.bf16 %v6586_v0, %v6586_v0  ;;  %v3351_v58 = vmul.f32 %v13522_v15, %v16142_v47  ;;  %v3611_v56 = vld [vmem:[#allocation2 + $0x54] sm:$0xf] }
 0x2d2   : > { %v3505_v21 = vsel %vm16069_vm14, %v3497_v30, %v3504_v14  ;;  %v3609_v52 = vsel %vm15834_vm9, %v3506_v48, %v3608_v19  ;;  %v6713_v36 = vshrl.u32 %v11430_v46, 16  ;;  %v6716_v54 = vshll.u32 %v11430_v46, 16 }
 0x2d3   : > { %3607 = vst [vmem:[#allocation2 + $0x4c] sm:$0xf] %v3505_v21  ;;  %3610 = vst [vmem:[#allocation2 + $0x50] sm:$0x1] %v3609_v52  ;;  %v6735_v9 = vor.u32 %v6733_v35, %v6732_v59  ;;  %v6737_v41 = vrot.slane %v6732_v59, 4  ;;  %v3487_v55 = vor.u32 %v3485_v29, %v3484_v10  ;;  %v3489_v57 = vrot.slane %v3484_v10, 4 }
 0x2d4   : > { %v6715_v23 = vrot.slane %v6713_v36, 7  ;;  %v3525_v20 = vshrl.u32 %v11419_v8, 16  ;;  %v3528_v42 = vshll.u32 %v11419_v8, 16  ;;  %v6756_v47 = vshrl.u32 %v11435_v40, 16 }
 0x2d5   : > { %v6736_v30 = vsel %vm16069_vm14, %v6728_v28, %v6735_v9  ;;  %v6838_v6 = vsel %vm15834_vm9, %v6737_v41, %v6837_v53  ;;  %v3488_v39 = vsel %vm16069_vm14, %v3480_v12, %v3487_v55  ;;  %v3602_v15 = vsel %vm15834_vm9, %v3489_v57, %v3601_v1  ;;  %v3618_v28 = vld [vmem:[#allocation2 + $0x60] sm:$0xf]  ;;  %v3622_v55 = vld [vmem:[#allocation2 + $0x68] sm:$0x1] }
 0x2d6   : > { %6836 = vst [vmem:[#allocation2 + $0xac] sm:$0xf] %v6736_v30  ;;  %6839 = vst [vmem:[#allocation2 + $0xb0] sm:$0x1] %v6838_v6  ;;  %v6718_v60 = vor.u32 %v6716_v54, %v6715_v23  ;;  %v6720_v16 = vrot.slane %v6715_v23, 4  ;;  %v16257_v26 = vrot.slane %v3525_v20, 7  ;;  %v11417_v25 = vpack.c.bf16 %v3351_v58, %v3351_v58 }
 0x2d7   : > { %3600 = vst [vmem:[#allocation2 + $0x40] sm:$0xf] %v3488_v39  ;;  %3603 = vst [vmem:[#allocation2 + $0x44] sm:$0x1] %v3602_v15  ;;  %v16259_v37 = vrot.slane %v6756_v47, 7  ;;  %v6759_v63 = vshll.u32 %v11435_v40, 16 }
 0x2d8   : > { %v6552_v51 = vadd.f32 1.0, %v16229_v24  ;;  %v3322_v12 = vadd.f32 1.0, %v13526_v13  ;;  %v6719_v22 = vsel %vm16069_vm14, %v6711_v38, %v6718_v60  ;;  %v6831_v62 = vsel %vm15834_vm9, %v6720_v16, %v6830_v32  ;;  %v6851_v47 = vld [vmem:[#allocation2 + $0xc8] sm:$0x1] }
 0x2d9   : > { %v3530_v5 = vor.u32 %v3528_v42, %v16257_v26  ;;  %6829 = vst [vmem:[#allocation2 + $0xa0] sm:$0xf] %v6719_v22  ;;  %6832 = vst [vmem:[#allocation2 + $0xa4] sm:$0x1] %v6831_v62  ;;  %v6761_v49 = vor.u32 %v6759_v63, %v16259_v37  ;;  %v3508_v18 = vshrl.u32 %v11417_v25, 16  ;;  %v6555_v38 = vadd.f32 1.0, %v16236_v45 }
 0x2da   : > { %v3301_v24 = vmul.f32 1.442695, %v3272_v4  ;;  %13529 = vrcp.f32 %v6552_v51  ;;  %v6534_v13 = vmul.f32 1.442695, %v6505_v43  ;;  %v3511_v19 = vshll.u32 %v11417_v25, 16 }
 0x2db   : > { %v3619_v34 = vsel %vm16055_vm13, %v3530_v5, %v3618_v28  ;;  %v6848_v17 = vsel %vm16055_vm13, %v6761_v49, %v6847_v27  ;;  %v16279_v0 = vrot.slane %v3508_v18, 7  ;;  %13531 = vrcp.f32 %v3322_v12  ;;  %v3615_v27 = vld [vmem:[#allocation2 + $0x5c] sm:$0x1] }
 0x2dc   : > { %3620 = vst [vmem:[#allocation2 + $0x60] sm:$0xf] %v3619_v34  ;;  %6849 = vst [vmem:[#allocation2 + $0xc0] sm:$0xf] %v6848_v17  ;;  %13533 = vrcp.f32 %v6555_v38  ;;  %v6762_v30 = vrot.slane %v16259_v37, 4 }
 0x2dd   : > { %v3513_v4 = vor.u32 %v3511_v19, %v16279_v0  ;;  %13535 = vpow2.f32 %v3301_v24  ;;  %v3514_v24 = vrot.slane %v16279_v0, 4 }
 0x2de   : > { %13537 = vpow2.f32 %v6534_v13  ;;  %v6844_v13 = vld [vmem:[#allocation2 + $0xbc] sm:$0x1] }
 0x2df   : > { %v3612_v45 = vsel %vm16055_vm13, %v3513_v4, %v3611_v56 }
 0x2e0   : > { %3613 = vst [vmem:[#allocation2 + $0x54] sm:$0xf] %v3612_v45 }
 0x2e4   : > { %v13530_v43 = vpop.eup %13529 }
 0x2e5   : > { %v13532_v35 = vpop.eup %13531  ;;  %v6584_v3 = vmul.f32 %v13530_v43, %v16167_v33  ;;  %v6840_v33 = vld [vmem:[#allocation2 + $0xb4] sm:$0xf] }
 0x2e6   : > { %v13534_v29 = vpop.eup %13533  ;;  %v3354_v14 = vmul.f32 %v13532_v35, %v16171_v31 }
 0x2e7   : > { %v13536_v48 = vpop.eup %13535  ;;  %v11433_v46 = vpack.c.bf16 %v6584_v3, %v6584_v3  ;;  %v6587_v8 = vmul.f32 %v13534_v29, %v16179_v50  ;;  %v3531_v50 = vrot.slane %v16257_v26, 4 }
 0x2e8   : > { %v13538_v59 = vpop.eup %13537  ;;  %v11420_v10 = vpack.c.bf16 %v3354_v14, %v3354_v14  ;;  %v3320_v40 = vadd.f32 1.0, %v13536_v48 }
 0x2e9   : > { %v6739_v58 = vshrl.u32 %v11433_v46, 16  ;;  %v11436_v21 = vpack.c.bf16 %v6587_v8, %v6587_v8  ;;  %v6553_v52 = vadd.f32 1.0, %v13538_v59  ;;  %v6742_v36 = vshll.u32 %v11433_v46, 16 }
 0x2ea   : > { %v3533_v53 = vshrl.u32 %v11420_v10, 16  ;;  %13539 = vrcp.f32 %v3320_v40  ;;  %v3536_v41 = vshll.u32 %v11420_v10, 16 }
 0x2eb   : > { %v6741_v1 = vrot.slane %v6739_v58, 7  ;;  %v6764_v54 = vshrl.u32 %v11436_v21, 16  ;;  %13541 = vrcp.f32 %v6553_v52  ;;  %v6767_v23 = vshll.u32 %v11436_v21, 16 }
 0x2ec   : > { %v3535_v9 = vrot.slane %v3533_v53, 7 }
 0x2ed   : > { %v6744_v31 = vor.u32 %v6742_v36, %v6741_v1  ;;  %v6766_v57 = vrot.slane %v6764_v54, 7  ;;  %v6745_v17 = vrot.slane %v6741_v1, 4 }
 0x2ee   : > { %v3538_v20 = vor.u32 %v3536_v41, %v3535_v9  ;;  %v3540_v42 = vrot.slane %v3535_v9, 4 }
 0x2ef   : > { %v6841_v6 = vsel %vm16055_vm13, %v6744_v31, %v6840_v33  ;;  %v6769_v39 = vor.u32 %v6767_v23, %v6766_v57  ;;  %v6771_v15 = vrot.slane %v6766_v57, 4 }
 0x2f0   : > { %6842 = vst [vmem:[#allocation2 + $0xb4] sm:$0xf] %v6841_v6  ;;  %v3539_v32 = vsel %vm16069_vm14, %v3531_v50, %v3538_v20  ;;  %v3623_v60 = vsel %vm15834_vm9, %v3540_v42, %v3622_v55 }
 0x2f1   : > { %3621 = vst [vmem:[#allocation2 + $0x64] sm:$0xf] %v3539_v32  ;;  %3624 = vst [vmem:[#allocation2 + $0x68] sm:$0x1] %v3623_v60  ;;  %v6770_v16 = vsel %vm16069_vm14, %v6762_v30, %v6769_v39  ;;  %v6852_v26 = vsel %vm15834_vm9, %v6771_v15, %v6851_v47 }
 0x2f2   : > { %6850 = vst [vmem:[#allocation2 + $0xc4] sm:$0xf] %v6770_v16  ;;  %6853 = vst [vmem:[#allocation2 + $0xc8] sm:$0x1] %v6852_v26 }
 0x2f4   : > { %v13540_v61 = vpop.eup %13539 }
 0x2f5   : > { %v13542_v37 = vpop.eup %13541  ;;  %v3352_v28 = vmul.f32 %v13540_v61, %v16190_v11 }
 0x2f6   : > { %v6585_v63 = vmul.f32 %v13542_v37, %v16195_v44 }
 0x2f7   : > { %v11418_v25 = vpack.c.bf16 %v3352_v28, %v3352_v28 }
 0x2f8   : > { %v11434_v51 = vpack.c.bf16 %v6585_v63, %v6585_v63 }
 0x2f9   : > { %v3516_v12 = vshrl.u32 %v11418_v25, 16  ;;  %v3519_v5 = vshll.u32 %v11418_v25, 16 }
 0x2fa   : > { %v6747_v22 = vshrl.u32 %v11434_v51, 16  ;;  %v6750_v18 = vshll.u32 %v11434_v51, 16 }
 0x2fb   : > { %v3518_v62 = vrot.slane %v3516_v12, 7 }
 0x2fc   : > { %v6749_v49 = vrot.slane %v6747_v22, 7 }
 0x2fd   : > { %v3521_v34 = vor.u32 %v3519_v5, %v3518_v62  ;;  %v3523_v38 = vrot.slane %v3518_v62, 4 }
 0x2fe   : > { %v6752_v19 = vor.u32 %v6750_v18, %v6749_v49  ;;  %v6754_v56 = vrot.slane %v6749_v49, 4 }
 0x2ff   : > { %v3522_v11 = vsel %vm16069_vm14, %v3514_v24, %v3521_v34  ;;  %v3616_v44 = vsel %vm15834_vm9, %v3523_v38, %v3615_v27 }
 0x300   : > { %3614 = vst [vmem:[#allocation2 + $0x58] sm:$0xf] %v3522_v11  ;;  %3617 = vst [vmem:[#allocation2 + $0x5c] sm:$0x1] %v3616_v44  ;;  %v6753_v4 = vsel %vm16069_vm14, %v6745_v17, %v6752_v19  ;;  %v6845_v0 = vsel %vm15834_vm9, %v6754_v56, %v6844_v13 }
 0x301   : > { %6843 = vst [vmem:[#allocation2 + $0xb8] sm:$0xf] %v6753_v4  ;;  %6846 = vst [vmem:[#allocation2 + $0xbc] sm:$0x1] %v6845_v0 }
 0x302 PF: > { %v13543_v45 = vld [vmem:[#allocation3 + $0x40] sm:$0xff]   ;;  %v13545_v35 = vld [vmem:[#allocation3 + $0x48] sm:$0xff]   ;;  %v13547_v29 = vld [vmem:[#allocation3 + $0x50] sm:$0xff]   ;;  %s11437_s6 = smul.u32 96, %s13817_s21  ;;  %vm6898_vm15 = vsmask.f32 3328 }
 0x303   : > { %v13544_v43 = vld [vmem:[#allocation3 + $0x100] sm:$0xff]   ;;  %12447 = vmatprep.subr.bf16.mxu1 %v13543_v45  ;;  %v13546_v3 = vld [vmem:[#allocation3 + $0x108] sm:$0xff]   ;;  %v13548_v7 = vld [vmem:[#allocation3 + $0x110] sm:$0xff]   ;;  %vm6899_vm0 = vsmask.f32 7440  ;;  %vm7504_vm2 = vcmask 1042432  }
 0x304   : > { %12575 = vmatprep.subr.bf16.mxu0 %v13544_v43  ;;  %12448 = vmatpush3.bf16.msra.mxu1 %v13543_v45  ;;  %v13549_v2 = vld [vmem:[#allocation3 + $0x58] sm:$0xff]   ;;  %v13551_v48 = vld [vmem:[#allocation3 + $0x60] sm:$0xff]   ;;  %v13553_v8 = vld [vmem:[#allocation3 + $0x68] sm:$0xff]   ;;  %s16313_s9 = scalar_lea.vmem [#allocation2], %s11437_s6  ;;  %vm7505_vm3 = vcmask 1046532   ;;  %s17094_s16 = scalar_lea.vmem %s13989_s11, %s11437_s6 }
 0x305   : > { %12576 = vmatpush3.bf16.msra.mxu0 %v13544_v43  ;;  %12449 = vmatprep.subr.bf16.mxu1 %v13545_v35  ;;  %v13550_v14 = vld [vmem:[#allocation3 + $0x118] sm:$0xff]   ;;  %v13552_v46 = vld [vmem:[#allocation3 + $0x120] sm:$0xff]   ;;  %v13554_v59 = vld [vmem:[#allocation3 + $0x128] sm:$0xff]   ;;  %s11438_s10 = sshll.u32 %s13817_s21, 4  ;;  %s11401_s15 = sshll.u32 %s13821_s22, 5 }
 0x306   : > { %12577 = vmatprep.subr.bf16.mxu0 %v13546_v3  ;;  %v13555_v55 = vld [vmem:[#allocation3 + $0x70] sm:$0xff]   ;;  %v13557_v15 = vld [vmem:[#allocation3 + $0x78] sm:$0xff]   ;;  %vm16343_vm1 = vmor %vm6898_vm15, %vm6899_vm0  ;;  %s10128_s14 = sadd.s32 %s11438_s10, %s11401_s15  ;;  %s10131_s22 = sshll.u32 %s13991_s17, 4  ;;  %s17368_s22 = int_to_ptr.vmem [resolvable:$true] %s10131_s22 }
 0x307   : > { %v13556_v20 = vld [vmem:[#allocation3 + $0x130] sm:$0xff]   ;;  %v13558_v27 = vld [vmem:[#allocation3 + $0x138] sm:$0xff]   ;;  %vm16583_vm4 = vmor %vm7504_vm2, %vm7505_vm3  ;;  %s11402_s21 = sshll.u32 %s10128_s14, 7  ;;  %p17542_p12 = scmp.ne.s32.totalorder %s17458_s7, 0 }
 0x308   : > { %12450 = vmatpush3.bf16.msra.mxu1 %v13545_v35  ;;  %v16316_v10 = vld [vmem:[%s16313_s9] sm:$0xf]  ;;  %v16319_v40 = vld [vmem:[%s16313_s9 + $0x4] sm:$0xf]  ;;  %v16322_v58 = vld [vmem:[%s16313_s9 + $0x8] sm:$0x1]  ;;  %s17366_s6 = scalar_lea.hbm %s17432_s5, %s11402_s21 }
 0x309   : > { %12578 = vmatpush3.bf16.msra.mxu0 %v13546_v3  ;;  %12451 = vmatprep.subr.bf16.mxu1 %v13547_v29  ;;  %v6902_v21 = vshrl.u32 %v16316_v10, 16  ;;  %v6905_v52 = vshll.u32 %v16316_v10, 16  ;;  %v6911_v53 = vshll.u32 %v16319_v40, 16  ;;  %v6915_v1 = vshrl.u32 %v16319_v40, 16  ;;  %v11193_v54 = vld [vmem:[%s16313_s9 + $0xc] sm:$0xf] }
 0x30a   : > { %12579 = vmatprep.subr.bf16.mxu0 %v13548_v7  ;;  %v6921_v36 = vshll.u32 %v16322_v58, 16  ;;  %v16331_v41 = vld [vmem:[%s16313_s9 + $0x10] sm:$0xf]  ;;  %v16334_v31 = vld [vmem:[%s16313_s9 + $0x14] sm:$0x1]  ;;  %v8044_v50 = vshrl.u32 %v11193_v54, 16 }
 0x30b   : > { %v6904_v33 = vrot.slane %v6902_v21, 4  ;;  %v6907_v9 = vrot.slane %v6905_v52, 5  ;;  %v6913_v57 = vrot.slane %v6911_v53, 5  ;;  %v6917_v23 = vrot.slane %v6915_v1, 4  ;;  %v16339_v39 = vld [vmem:[%s16313_s9 + $0xc] sm:$0xf] }
 0x30c   : > { %12452 = vmatpush3.bf16.msra.mxu1 %v13547_v29  ;;  %v8047_v47 = vshll.u32 %v11193_v54, 16  ;;  %v8053_v30 = vshll.u32 %v16331_v41, 16  ;;  %v8057_v6 = vshrl.u32 %v16331_v41, 16  ;;  %v6923_v16 = vrot.slane %v6921_v36, 5  ;;  %v16349_v37 = vld [vmem:[%s16313_s9 + $0x10] sm:$0xf] }
 0x30d   : > { %12580 = vmatpush3.bf16.msra.mxu0 %v13548_v7  ;;  %12453 = vmatprep.subr.bf16.mxu1 %v13549_v2  ;;  %v6908_v42 = vor.u32 %v6907_v9, %v6904_v33  ;;  %v6918_v60 = vor.u32 %v6917_v23, %v6913_v57  ;;  %v8046_v26 = vrot.slane %v8044_v50, 4  ;;  %v8063_v61 = vshll.u32 %v16334_v31, 16  ;;  %v16356_v34 = vld [vmem:[%s16313_s9 + $0x14] sm:$0x1]  ;;  %v11196_v13 = vld [vmem:[%s16313_s9 + $0x18] sm:$0xf] }
 0x30e   : > { %12581 = vmatprep.subr.bf16.mxu0 %v13550_v14  ;;  %v8049_v63 = vrot.slane %v8047_v47, 5  ;;  %v8055_v25 = vrot.slane %v8053_v30, 5  ;;  %v8059_v51 = vrot.slane %v8057_v6, 4  ;;  %v6926_v62 = vshrl.u32 %v16339_v39, 16  ;;  %v16364_v44 = vld [vmem:[%s16313_s9 + $0x1c] sm:$0xf] }
 0x30f   : > { %v6909_v28 = vrot.slane %v6908_v42, 4  ;;  %v6919_v12 = vrot.slane %v6918_v60, 4  ;;  %v8065_v22 = vrot.slane %v8063_v61, 5  ;;  %v6929_v5 = vshll.u32 %v16339_v39, 16  ;;  %v13559_v35 = vld [vmem:[#allocation3] sm:$0xff]   ;;  %s13839_s11 = smov [#allocation6]  }
 0x310   : > { %12454 = vmatpush3.bf16.msra.mxu1 %v13549_v2  ;;  %v8050_v18 = vor.u32 %v8049_v63, %v8046_v26  ;;  %v8060_v24 = vor.u32 %v8059_v51, %v8055_v25  ;;  %v6935_v38 = vshll.u32 %v16349_v37, 16  ;;  %v6928_v19 = vrot.slane %v6926_v62, 4  ;;  %v16366_v3 = vld [vmem:[#allocation3 + $0x140] sm:$0xff]   ;;  %s13739_s30 = sshll.u32 %s13839_s11, 4  ;;  %s13740_s30 = int_to_ptr.vmem [resolvable:$false] %s13739_s30 }
 0x311   : > { %12582 = vmatpush3.bf16.msra.mxu0 %v13550_v14  ;;  %12455 = vmatprep.subr.bf16.mxu1 %v13551_v48  ;;  %v6914_v49 = vsel %vm16343_vm1, %v6909_v28, %v6913_v57  ;;  %v6924_v17 = vsel %vm16343_vm1, %v6919_v12, %v6923_v16  ;;  %v6931_v56 = vrot.slane %v6929_v5, 5  ;;  %v6939_v11 = vshrl.u32 %v16349_v37, 16  ;;  %v16370_v14 = vld [vmem:[%s16313_s9 + $0x20] sm:$0x1]  ;;  %v16387_v6 = vld [vmem:[%s16313_s9 + $0x1c] sm:$0xf]  ;;  %p13742_p5 = scmp.lt.s32.totalorder %s17368_s22, %s13740_s30 }
 0x312   : > { %12583 = vmatprep.subr.bf16.mxu0 %v13552_v46  ;;  %v11103_v4 = vcombine.low %v6914_v49, %v6924_v17  ;;  %v8051_v0 = vrot.slane %v8050_v18, 4  ;;  %v8061_v45 = vrot.slane %v8060_v24, 4  ;;  %v6937_v43 = vrot.slane %v6935_v38, 5  ;;  %v11199_v28 = vld [vmem:[%s16313_s9 + $0x24] sm:$0xf]  ;;  %s13741_s10 = scalar_lea.vmem %s13740_s30, 4096 }
 0x313   : > { %v6932_v29 = vor.u32 %v6931_v56, %v6928_v19  ;;  %v6941_v7 = vrot.slane %v6939_v11, 4  ;;  %v6945_v2 = vshll.u32 %v16356_v34, 16  ;;  %v8077_v33 = vshll.u32 %v16364_v44, 16  ;;  %v13561_v12 = vld [vmem:[#allocation3 + $0x8] sm:$0xff]   ;;  %v16399_v18 = vld [vmem:[%s16313_s9 + $0x28] sm:$0xf] }
 0x314   : > { %12456 = vmatpush3.bf16.msra.mxu1 %v13551_v48  ;;  %12463 = vmatprep.mubr.bf16.mxu1 %v11103_v4  ;;  %v8056_v48 = vsel %vm16343_vm1, %v8051_v0, %v8055_v25  ;;  %v8081_v9 = vshrl.u32 %v16364_v44, 16  ;;  %v6959_v5 = vshll.u32 %v16387_v6, 16  ;;  %v16404_v17 = vld [vmem:[%s16313_s9 + $0x2c] sm:$0x1]  ;;  %v8092_v19 = vshrl.u32 %v11199_v28, 16  ;;  %v13562_v11 = vld [vmem:[#allocation3 + $0x148] sm:$0xff]  }
 0x315   : > { %12584 = vmatpush3.bf16.msra.mxu0 %v13552_v46  ;;  %12457 = vmatprep.subr.bf16.mxu1 %v13553_v8  ;;  %v8066_v46 = vsel %vm16343_vm1, %v8061_v45, %v8065_v22  ;;  %v6933_v52 = vrot.slane %v6932_v29, 4  ;;  %v6942_v53 = vor.u32 %v6941_v7, %v6937_v43  ;;  %v6947_v1 = vrot.slane %v6945_v2, 5  ;;  %v13563_v56 = vld [vmem:[#allocation3 + $0x10] sm:$0xff]   ;;  %v16407_v29 = vld [vmem:[%s16313_s9 + $0x24] sm:$0xf] }
 0x316   : > { %12585 = vmatprep.subr.bf16.mxu0 %v13554_v59  ;;  %v11217_v21 = vcombine.low %v8056_v48, %v8066_v46  ;;  %v8079_v47 = vrot.slane %v8077_v33, 5  ;;  %v8083_v30 = vrot.slane %v8081_v9, 4  ;;  %v6961_v4 = vrot.slane %v6959_v5, 5  ;;  %v11202_v9 = vld [vmem:[%s16313_s9 + $0x30] sm:$0xf] }
 0x317   : > { %v6938_v23 = vsel %vm16343_vm1, %v6933_v52, %v6937_v43  ;;  %v6943_v50 = vrot.slane %v6942_v53, 4  ;;  %v8095_v43 = vshll.u32 %v11199_v28, 16  ;;  %v8094_v48 = vrot.slane %v8092_v19, 4  ;;  %v16414_v52 = vld [vmem:[%s16313_s9 + $0x28] sm:$0xf]  ;;  %v13565_v28 = vld [vmem:[#allocation3 + $0x18] sm:$0xff]  }
 0x318   : > { %12458 = vmatpush3.bf16.msra.mxu1 %v13553_v8  ;;  %v8068_v8 = vshrl.u32 %v11196_v13, 16  ;;  %12591 = vmatprep.mubr.bf16.mxu0 %v11217_v21  ;;  %v8084_v51 = vor.u32 %v8083_v30, %v8079_v47  ;;  %v8101_v46 = vshll.u32 %v16399_v18, 16  ;;  %v8105_v21 = vshrl.u32 %v16399_v18, 16  ;;  %v16417_v53 = vld [vmem:[%s16313_s9 + $0x2c] sm:$0x1]  ;;  %v13566_v19 = vld [vmem:[#allocation3 + $0x158] sm:$0xff]  }
 0x319   : > { %12586 = vmatpush3.bf16.msra.mxu0 %v13554_v59  ;;  %12459 = vmatprep.subr.bf16.mxu1 %v13555_v55  ;;  %v8071_v59 = vshll.u32 %v11196_v13, 16  ;;  %v6948_v60 = vsel %vm16343_vm1, %v6943_v50, %v6947_v1  ;;  %v6974_v33 = vshrl.u32 %v16407_v29, 16  ;;  %v13564_v30 = vld [vmem:[#allocation3 + $0x150] sm:$0xff]   ;;  %v6993_v5 = vshll.u32 %v16417_v53, 16 }
 0x31a   : > { %12587 = vmatprep.subr.bf16.mxu0 %v13556_v20  ;;  %v8070_v36 = vrot.slane %v8068_v8, 4  ;;  %v11104_v63 = vcombine.low %v6938_v23, %v6948_v60  ;;  %v8085_v38 = vrot.slane %v8084_v51, 4 }
 0x31b   : > { %v8073_v54 = vrot.slane %v8071_v59, 5  ;;  %v8097_v59 = vrot.slane %v8095_v43, 5 }
 0x31c   : > { %12460 = vmatpush3.bf16.msra.mxu1 %v13555_v55  ;;  %v16379_v55 = vld [vmem:[%s16313_s9 + $0x18] sm:$0xf] }
 0x31d   : > { %12588 = vmatpush3.bf16.msra.mxu0 %v13556_v20  ;;  %12461 = vmatprep.subr.bf16.mxu1 %v13557_v15  ;;  %v8087_v20 = vshll.u32 %v16370_v14, 16  ;;  %v8074_v42 = vor.u32 %v8073_v54, %v8070_v36  ;;  %v6950_v61 = vshrl.u32 %v16379_v55, 16  ;;  %v6953_v22 = vshll.u32 %v16379_v55, 16 }
 0x31e   : > { %12589 = vmatprep.subr.bf16.mxu0 %v13558_v27  ;;  %v8103_v36 = vrot.slane %v8101_v46, 5  ;;  %v8111_v54 = vshll.u32 %v16404_v17, 16  ;;  %v8098_v50 = vor.u32 %v8097_v59, %v8094_v48 }
 0x31f   : > { %v8089_v16 = vrot.slane %v8087_v20, 5  ;;  %v8075_v25 = vrot.slane %v8074_v42, 4  ;;  %v6952_v62 = vrot.slane %v6950_v61, 4  ;;  %v6955_v13 = vrot.slane %v6953_v22, 5 }
 0x320   : > { %12462 = vmatpush3.bf16.msra.mxu1 %v13557_v15  ;;  %v6892_v15 = vld [vmem:[%s16313_s9 + $0x20] sm:$0x1]  ;;  %v8107_v20 = vrot.slane %v8105_v21, 4  ;;  %v6977_v42 = vshll.u32 %v16407_v29, 16  ;;  %v8113_v60 = vrot.slane %v8111_v54, 5  ;;  %v6983_v61 = vshll.u32 %v16414_v52, 16 }
 0x321   : > { %12590 = vmatpush3.bf16.msra.mxu0 %v13558_v27  ;;  %12479 = vmatprep.subr.bf16.mxu1 %v13559_v35  ;;  %v6963_v27 = vshrl.u32 %v16387_v6, 16  ;;  %v6969_v49 = vshll.u32 %v6892_v15, 16  ;;  %v8080_v24 = vsel %vm16343_vm1, %v8075_v25, %v8079_v47  ;;  %v8090_v7 = vsel %vm16343_vm1, %v8085_v38, %v8089_v16  ;;  %v16424_v47 = vld [vmem:[%s16313_s9 + $0x34] sm:$0xf]  ;;  %v16437_v38 = vld [vmem:[%s16313_s9 + $0x38] sm:$0x1] }
 0x322   : > { %12607 = vmatprep.subr.bf16.mxu0 %v16366_v3  ;;  %v6956_v2 = vor.u32 %v6955_v13, %v6952_v62  ;;  %v11218_v8 = vcombine.low %v8080_v24, %v8090_v7  ;;  %v6976_v16 = vrot.slane %v6974_v33, 4  ;;  %v8099_v25 = vrot.slane %v8098_v50, 4  ;;  %v16441_v7 = vld [vmem:[%s16313_s9 + $0x30] sm:$0xf] }
 0x323   : > { %12464 = vmatmul.mubr.bf16.vlgmr.msra.gmra.mrb[0].mxu1 %v11104_v63  ;;  %v6965_v0 = vrot.slane %v6963_v27, 4  ;;  %v6971_v45 = vrot.slane %v6969_v49, 5  ;;  %v8108_v51 = vor.u32 %v8107_v20, %v8103_v36  ;;  %v6985_v62 = vrot.slane %v6983_v61, 5  ;;  %v16454_v20 = vld [vmem:[%s16313_s9 + $0x38] sm:$0x1] }
 0x324   : > { %12480 = vmatpush3.bf16.msra.mxu1 %v13559_v35  ;;  %v6957_v1 = vrot.slane %v6956_v2, 4  ;;  %12592 = vmatmul.mubr.bf16.vlgmr.msra.gmra.mrb[0].mxu0 %v11218_v8  ;;  %v8104_v27 = vsel %vm16343_vm1, %v8099_v25, %v8103_v36  ;;  %v8116_v13 = vshrl.u32 %v11202_v9, 16  ;;  %v8125_v43 = vshll.u32 %v16424_v47, 16  ;;  %v11205_v25 = vld [vmem:[%s16313_s9 + $0x3c] sm:$0xf] }
 0x325   : > { %12481 = vmatprep.subr.bf16.mxu1 %v13561_v12  ;;  %v6966_v35 = vor.u32 %v6965_v0, %v6961_v4  ;;  %12608 = vmatpush3.bf16.msra.mxu0 %v16366_v3  ;;  %v6987_v3 = vshrl.u32 %v16414_v52, 16  ;;  %v8109_v49 = vrot.slane %v8108_v51, 4  ;;  %v6995_v0 = vrot.slane %v6993_v5, 5  ;;  %v13568_v51 = vld [vmem:[#allocation3 + $0x160] sm:$0xff]  }
 0x326   : > { %v6962_v15 = vsel %vm16343_vm1, %v6957_v1, %v6961_v4  ;;  %12609 = vmatprep.subr.bf16.mxu0 %v13562_v11  ;;  %v8118_v46 = vrot.slane %v8116_v13, 4  ;;  %v8129_v8 = vshrl.u32 %v16424_v47, 16  ;;  %v8127_v1 = vrot.slane %v8125_v43, 5  ;;  %v13571_v13 = vld [vmem:[#allocation3 + $0x30] sm:$0xff]  }
 0x327   : > { %v6967_v23 = vrot.slane %v6966_v35, 4  ;;  %v6989_v4 = vrot.slane %v6987_v3, 4  ;;  %v8114_v2 = vsel %vm16343_vm1, %v8109_v49, %v8113_v60  ;;  %v8135_v33 = vshll.u32 %v16437_v38, 16  ;;  %v13569_v60 = vld [vmem:[#allocation3 + $0x28] sm:$0xff]  }
 0x328   : > { %12482 = vmatpush3.bf16.msra.mxu1 %v13561_v12  ;;  %v6979_v12 = vrot.slane %v6977_v42, 5  ;;  %v11219_v35 = vcombine.low %v8104_v27, %v8114_v2  ;;  %v8131_v54 = vrot.slane %v8129_v8, 4  ;;  %v7001_v42 = vshll.u32 %v16441_v7, 16  ;;  %v16463_v3 = vld [vmem:[%s16313_s9 + $0x40] sm:$0xf] }
 0x329   : > { %12483 = vmatprep.subr.bf16.mxu1 %v13563_v56  ;;  %v6972_v63 = vsel %vm16343_vm1, %v6967_v23, %v6971_v45  ;;  %12610 = vmatpush3.bf16.msra.mxu0 %v13562_v11  ;;  %v8119_v45 = vshll.u32 %v11202_v9, 16  ;;  %v13567_v11 = vld [vmem:[#allocation3 + $0x20] sm:$0xff]   ;;  %v6990_v59 = vor.u32 %v6989_v4, %v6985_v62  ;;  %v6998_v9 = vshrl.u32 %v16441_v7, 16 }
 0x32a   : > { %v11105_v22 = vcombine.low %v6962_v15, %v6972_v63  ;;  %v6980_v24 = vor.u32 %v6979_v12, %v6976_v16  ;;  %12611 = vmatprep.subr.bf16.mxu0 %v13564_v30  ;;  %12595 = vmatprep.mubr.bf16.mxu0 %v11219_v35  ;;  %v8132_v16 = vor.u32 %v8131_v54, %v8127_v1  ;;  %v8137_v61 = vrot.slane %v8135_v33, 5  ;;  %v16481_v33 = vld [vmem:[%s16313_s9 + $0x44] sm:$0x1] }
 0x32b   : > { %v8121_v21 = vrot.slane %v8119_v45, 5  ;;  %v6991_v23 = vrot.slane %v6990_v59, 4  ;;  %v7000_v63 = vrot.slane %v6998_v9, 4  ;;  %v8140_v43 = vshrl.u32 %v11205_v25, 16  ;;  %v16475_v59 = vld [vmem:[%s16313_s9 + $0x3c] sm:$0xf] }
 0x32c   : > { %12484 = vmatpush3.bf16.msra.mxu1 %v13563_v56  ;;  %12467 = vmatprep.mubr.bf16.mxu1 %v11105_v22  ;;  %v6981_v48 = vrot.slane %v6980_v24, 4  ;;  %v16447_v56 = vld [vmem:[%s16313_s9 + $0x34] sm:$0xf]  ;;  %v7003_v22 = vrot.slane %v7001_v42, 5  ;;  %v8133_v27 = vrot.slane %v8132_v16, 4  ;;  %v7017_v24 = vshll.u32 %v16454_v20, 16 }
 0x32d   : > { %12485 = vmatprep.subr.bf16.mxu1 %v13565_v28  ;;  %v8122_v50 = vor.u32 %v8121_v21, %v8118_v46  ;;  %12612 = vmatpush3.bf16.msra.mxu0 %v13564_v30  ;;  %v7007_v15 = vshll.u32 %v16447_v56, 16  ;;  %v6996_v30 = vsel %vm16343_vm1, %v6991_v23, %v6995_v0  ;;  %v16469_v0 = vld [vmem:[%s16313_s9 + $0x44] sm:$0x1]  ;;  %v8143_v2 = vshll.u32 %v11205_v25, 16  ;;  %17533 = vst [vmem:[#allocation21_spill] sm:$0xff] %v16481_v33  ;;  %v13573_v9 = vld [vmem:[#allocation3 + $0x38] sm:$0xff]  }
 0x32e   : > { %v6986_v36 = vsel %vm16343_vm1, %v6981_v48, %v6985_v62  ;;  %12613 = vmatprep.subr.bf16.mxu0 %v13566_v19  ;;  %v7004_v45 = vor.u32 %v7003_v22, %v7000_v63  ;;  %v13570_v48 = vld [vmem:[#allocation3 + $0x168] sm:$0xff]   ;;  %v8138_v46 = vsel %vm16343_vm1, %v8133_v27, %v8137_v61  ;;  %v8149_v35 = vshll.u32 %v16463_v3, 16  ;;  %v11208_v16 = vld [vmem:[%s16313_s9 + $0x48] sm:$0xf] }
 0x32f   : > { %v8123_v12 = vrot.slane %v8122_v50, 4  ;;  %v7009_v62 = vrot.slane %v7007_v15, 5  ;;  %v11106_v5 = vcombine.low %v6986_v36, %v6996_v30  ;;  %v8142_v36 = vrot.slane %v8140_v43, 4  ;;  %v16491_v30 = vld [vmem:[%s16313_s9 + $0x4c] sm:$0xf] }
 0x330   : > { %12486 = vmatpush3.bf16.msra.mxu1 %v13565_v28  ;;  %v7011_v28 = vshrl.u32 %v16447_v56, 16  ;;  %v8145_v54 = vrot.slane %v8143_v2, 5  ;;  %v8151_v50 = vrot.slane %v8149_v35, 5  ;;  %v8153_v42 = vshrl.u32 %v16463_v3, 16 }
 0x331   : > { %12487 = vmatprep.subr.bf16.mxu1 %v13567_v11  ;;  %v8128_v4 = vsel %vm16343_vm1, %v8123_v12, %v8127_v1  ;;  %12614 = vmatpush3.bf16.msra.mxu0 %v13566_v19  ;;  %v16478_v19 = vld [vmem:[%s16313_s9 + $0x40] sm:$0xf]  ;;  %v7005_v1 = vrot.slane %v7004_v45, 4  ;;  %v8159_v15 = vshll.u32 %v16469_v0, 16  ;;  %v7025_v25 = vshll.u32 %v16475_v59, 16 }
 0x332   : > { %v7013_v49 = vrot.slane %v7011_v28, 4  ;;  %12468 = vmatmul.mubr.bf16.gmra.mrb[4].mxu1 %v11106_v5  ;;  %12615 = vmatprep.subr.bf16.mxu0 %v13568_v51  ;;  %v11220_v21 = vcombine.low %v8128_v4, %v8138_v46  ;;  %v8146_v63 = vor.u32 %v8145_v54, %v8142_v36  ;;  %v7022_v28 = vshrl.u32 %v16475_v59, 16  ;;  %v13572_v4 = vld [vmem:[#allocation3 + $0x170] sm:$0xff]  }
 0x333   : > { %v7010_v61 = vsel %vm16343_vm1, %v7005_v1, %v7009_v62  ;;  %v8155_v22 = vrot.slane %v8153_v42, 4  ;;  %v8161_v5 = vrot.slane %v8159_v15, 5  ;;  %v7031_v27 = vshll.u32 %v16478_v19, 16  ;;  %v16503_v1 = vld [vmem:[#allocation3 + $0x80] sm:$0xff]  }
 0x334   : > { %12488 = vmatpush3.bf16.msra.mxu1 %v13567_v11  ;;  %v7014_v8 = vor.u32 %v7013_v49, %v7009_v62  ;;  %v7019_v11 = vrot.slane %v7017_v24, 5  ;;  %12596 = vmatmul.mubr.bf16.gmra.mrb[4].mxu0 %v11220_v21  ;;  %v8147_v49 = vrot.slane %v8146_v63, 4  ;;  %v7024_v62 = vrot.slane %v7022_v28, 4  ;;  %v16508_v28 = vld [vmem:[%s16313_s9 + $0x48] sm:$0xf] }
 0x335   : > { %12489 = vmatprep.subr.bf16.mxu1 %v13569_v60  ;;  %12616 = vmatpush3.bf16.msra.mxu0 %v13568_v51  ;;  %v7027_v24 = vrot.slane %v7025_v25, 5  ;;  %v8156_v45 = vor.u32 %v8155_v22, %v8151_v50  ;;  %v7033_v43 = vrot.slane %v7031_v27, 5  ;;  %v7035_v2 = vshrl.u32 %v16478_v19, 16  ;;  %v16501_v51 = vld [vmem:[%s16313_s9 + $0x50] sm:$0x1] }
 0x336   : > { %v7015_v23 = vrot.slane %v7014_v8, 4  ;;  %12617 = vmatprep.subr.bf16.mxu0 %v13570_v48  ;;  %v7041_v46 = vshll.u32 %v16481_v33, 16  ;;  %v8152_v8 = vsel %vm16343_vm1, %v8147_v49, %v8151_v50  ;;  %v8164_v35 = vshrl.u32 %v11208_v16, 16  ;;  %v16514_v27 = vld [vmem:[%s16313_s9 + $0x4c] sm:$0xf] }
 0x337   : > { %v8167_v21 = vshll.u32 %v11208_v16, 16  ;;  %v8157_v36 = vrot.slane %v8156_v45, 4  ;;  %v7037_v54 = vrot.slane %v7035_v2, 4  ;;  %v8173_v42 = vshll.u32 %v16491_v30, 16  ;;  %v11211_v45 = vld [vmem:[%s16313_s9 + $0x54] sm:$0xf] }
 0x338   : > { %12490 = vmatpush3.bf16.msra.mxu1 %v13569_v60  ;;  %v7020_v12 = vsel %vm16343_vm1, %v7015_v23, %v7019_v11  ;;  %v7028_v11 = vor.u32 %v7027_v24, %v7024_v62  ;;  %v7043_v23 = vrot.slane %v7041_v46, 5  ;;  %v8166_v50 = vrot.slane %v8164_v35, 4  ;;  %v16519_v24 = vld [vmem:[%s16313_s9 + $0x50] sm:$0x1] }
 0x339   : > { %12491 = vmatprep.subr.bf16.mxu1 %v13571_v13  ;;  %v11107_v60 = vcombine.low %v7010_v61, %v7020_v12  ;;  %12618 = vmatpush3.bf16.msra.mxu0 %v13570_v48  ;;  %v8169_v61 = vrot.slane %v8167_v21, 5  ;;  %v8177_v63 = vshrl.u32 %v16491_v30, 16  ;;  %v8162_v16 = vsel %vm16343_vm1, %v8157_v36, %v8161_v5  ;;  %17534 = vst [vmem:[#allocation22_spill] sm:$0xff] %v16519_v24  ;;  %v16527_v21 = vld [vmem:[#allocation3 + $0x180] sm:$0xff]  }
 0x33a   : > { %v7029_v15 = vrot.slane %v7028_v11, 4  ;;  %12619 = vmatprep.subr.bf16.mxu0 %v13572_v4  ;;  %v7038_v25 = vor.u32 %v7037_v54, %v7033_v43  ;;  %v8175_v12 = vrot.slane %v8173_v42, 5  ;;  %v8183_v22 = vshll.u32 %v16501_v51, 16 }
 0x33b   : > { %12471 = vmatprep.mubr.bf16.mxu1 %v11107_v60  ;;  %v11221_v48 = vcombine.low %v8152_v8, %v8162_v16  ;;  %v8170_v49 = vor.u32 %v8169_v61, %v8166_v50  ;;  %v8179_v62 = vrot.slane %v8177_v63, 4  ;;  %v7046_v46 = vshrl.u32 %v16508_v28, 16 }
 0x33c   : > { %12492 = vmatpush3.bf16.msra.mxu1 %v13571_v13  ;;  %v13574_v13 = vld [vmem:[#allocation3 + $0x178] sm:$0xff]   ;;  %v7034_v60 = vsel %vm16343_vm1, %v7029_v15, %v7033_v43  ;;  %v7039_v2 = vrot.slane %v7038_v25, 4  ;;  %v8185_v5 = vrot.slane %v8183_v22, 5  ;;  %v7049_v11 = vshll.u32 %v16508_v28, 16  ;;  %v16533_v15 = vld [vmem:[%s16313_s9 + $0x58] sm:$0xf] }
 0x33d   : > { %12493 = vmatprep.subr.bf16.mxu1 %v13573_v9  ;;  %12620 = vmatpush3.bf16.msra.mxu0 %v13572_v4  ;;  %v8180_v43 = vor.u32 %v8179_v62, %v8175_v12  ;;  %v7055_v8 = vshll.u32 %v16514_v27, 16  ;;  %v7059_v35 = vshrl.u32 %v16514_v27, 16  ;;  %v7048_v54 = vrot.slane %v7046_v46, 4  ;;  %v16538_v25 = vld [vmem:[%s16313_s9 + $0x5c] sm:$0x1] }
 0x33e   : > { %12599 = vmatprep.mubr.bf16.mxu0 %v11221_v48  ;;  %12621 = vmatprep.subr.bf16.mxu0 %v13574_v13  ;;  %v7044_v36 = vsel %vm16343_vm1, %v7039_v2, %v7043_v23  ;;  %v7051_v42 = vrot.slane %v7049_v11, 5  ;;  %v7065_v4 = vshll.u32 %v16519_v24, 16  ;;  %v16541_v22 = vld [vmem:[%s16313_s9 + $0x54] sm:$0xf]  ;;  %v8188_v23 = vshrl.u32 %v11211_v45, 16 }
 0x33f   : > { %v11108_v50 = vcombine.low %v7034_v60, %v7044_v36  ;;  %v8181_v63 = vrot.slane %v8180_v43, 4  ;;  %v7057_v16 = vrot.slane %v7055_v8, 5  ;;  %v16544_v2 = vld [vmem:[%s16313_s9 + $0x58] sm:$0xf]  ;;  %v8197_v46 = vshll.u32 %v16533_v15, 16 }
 0x340   : > { %12494 = vmatpush3.bf16.msra.mxu1 %v13573_v9  ;;  %v8171_v9 = vrot.slane %v8170_v49, 4  ;;  %v7052_v48 = vor.u32 %v7051_v42, %v7048_v54  ;;  %v7061_v49 = vrot.slane %v7059_v35, 4  ;;  %v7067_v62 = vrot.slane %v7065_v4, 5  ;;  %v16553_v42 = vld [vmem:[%s16313_s9 + $0x5c] sm:$0x1] }
 0x341   : > { %12511 = vmatprep.subr.bf16.mxu1 %v16503_v1  ;;  %12622 = vmatpush3.bf16.msra.mxu0 %v13574_v13  ;;  %v8186_v60 = vsel %vm16343_vm1, %v8181_v63, %v8185_v5  ;;  %v8201_v11 = vshrl.u32 %v16533_v15, 16  ;;  %v8190_v35 = vrot.slane %v8188_v23, 4  ;;  %v8199_v36 = vrot.slane %v8197_v46, 5  ;;  %v16568_v24 = vld [vmem:[%s16313_s9 + $0x68] sm:$0x1] }
 0x342   : > { %v8176_v61 = vsel %vm16343_vm1, %v8171_v9, %v8175_v12  ;;  %12472 = vmatmul.mubr.bf16.gmra.mrb[8].mxu1 %v11108_v50  ;;  %v8191_v12 = vshll.u32 %v11211_v45, 16  ;;  %12639 = vmatprep.subr.bf16.mxu0 %v16527_v21  ;;  %v7053_v43 = vrot.slane %v7052_v48, 4  ;;  %v7062_v8 = vor.u32 %v7061_v49, %v7057_v16  ;;  %v11214_v45 = vld [vmem:[%s16313_s9 + $0x60] sm:$0xf] }
 0x343   : > { %v11222_v9 = vcombine.low %v8176_v61, %v8186_v60  ;;  %v8203_v54 = vrot.slane %v8201_v11, 4  ;;  %v8207_v5 = vshll.u32 %v16538_v25, 16  ;;  %v7070_v61 = vshrl.u32 %v16541_v22, 16 }
 0x344   : > { %v8193_v13 = vrot.slane %v8191_v12, 5  ;;  %v7058_v4 = vsel %vm16343_vm1, %v7053_v43, %v7057_v16  ;;  %v7063_v50 = vrot.slane %v7062_v8, 4  ;;  %v7073_v63 = vshll.u32 %v16541_v22, 16  ;;  %v16562_v12 = vld [vmem:[%s16313_s9 + $0x64] sm:$0xf] }
 0x345   : > { %12600 = vmatmul.mubr.bf16.gmra.mrb[8].mxu0 %v11222_v9  ;;  %v8204_v49 = vor.u32 %v8203_v54, %v8199_v36  ;;  %v8209_v23 = vrot.slane %v8207_v5, 5  ;;  %v7079_v60 = vshll.u32 %v16544_v2, 16  ;;  %v7072_v11 = vrot.slane %v7070_v61, 4 }
 0x346   : > { %v8194_v48 = vor.u32 %v8193_v13, %v8190_v35  ;;  %v7068_v46 = vsel %vm16343_vm1, %v7063_v50, %v7067_v62  ;;  %v7075_v9 = vrot.slane %v7073_v63, 5  ;;  %v7083_v16 = vshrl.u32 %v16544_v2, 16  ;;  %v11233_v35 = vld [vmem:[%s16313_s9 + $0xc] sm:$0xe] }
 0x347   : > { %v11109_v43 = vcombine.low %v7058_v4, %v7068_v46  ;;  %v8205_v57 = vrot.slane %v8204_v49, 4  ;;  %v7081_v26 = vrot.slane %v7079_v60, 5  ;;  %v7089_v5 = vshll.u32 %v16553_v42, 16 }
 0x348   : > { %v8195_v8 = vrot.slane %v8194_v48, 4  ;;  %v7076_v13 = vor.u32 %v7075_v9, %v7072_v11  ;;  %v7085_v54 = vrot.slane %v7083_v16, 4  ;;  %v8212_v33 = vshrl.u32 %v11214_v45, 16 }
 0x349   : > { %12475 = vmatprep.mubr.bf16.mxu1 %v11109_v43  ;;  %v8210_v50 = vsel %vm16343_vm1, %v8205_v57, %v8209_v23  ;;  %v8215_v61 = vshll.u32 %v11214_v45, 16  ;;  %v8221_v4 = vshll.u32 %v16562_v12, 16  ;;  %v7091_v60 = vrot.slane %v7089_v5, 5  ;;  %v11234_v5 = vld [vmem:[%s16313_s9 + $0x18] sm:$0xe] }
 0x34a   : > { %v8200_v62 = vsel %vm16343_vm1, %v8195_v8, %v8199_v36  ;;  %v7077_v48 = vrot.slane %v7076_v13, 4  ;;  %v7086_v49 = vor.u32 %v7085_v54, %v7081_v26  ;;  %v8214_v46 = vrot.slane %v8212_v33, 4  ;;  %v11377_v13 = vld [vmem:[%s17094_s16 + $0x18] sm:$0xf] }
 0x34b   : > { %v11223_v63 = vcombine.low %v8200_v62, %v8210_v50  ;;  %v8217_v11 = vrot.slane %v8215_v61, 5  ;;  %v8223_v9 = vrot.slane %v8221_v4, 5  ;;  %v8225_v16 = vshrl.u32 %v16562_v12, 16  ;;  %v11235_v62 = vld [vmem:[%s16313_s9 + $0x24] sm:$0xe] }
 0x34c   : > { %v7082_v36 = vsel %vm16343_vm1, %v7077_v48, %v7081_v26  ;;  %v7087_v43 = vrot.slane %v7086_v49, 4  ;;  %v8231_v57 = vshll.u32 %v16568_v24, 16  ;;  %v11241_v45 = vrot.slane %v11233_v35, 9 }
 0x34d   : > { %12603 = vmatprep.mubr.bf16.mxu0 %v11223_v63  ;;  %v8218_v23 = vor.u32 %v8217_v11, %v8214_v46  ;;  %v8227_v8 = vrot.slane %v8225_v16, 4  ;;  %v8479_v33 = vrot.slane %v16331_v41, 5  ;;  %v11119_v26 = vcombine.low %v16316_v10, %v16319_v40 }
 0x34e   : > { %v7092_v54 = vsel %vm16343_vm1, %v7087_v43, %v7091_v60  ;;  %v8233_v4 = vrot.slane %v8231_v57, 5  ;;  %v8493_v60 = vrot.slane %v16399_v18, 5  ;;  %v17537_v10 = vrot.slane %v16364_v44, 5 }
 0x34f   : > { %v11110_v50 = vcombine.low %v7082_v36, %v7092_v54  ;;  %v8219_v35 = vrot.slane %v8218_v23, 4  ;;  %v8228_v61 = vor.u32 %v8227_v8, %v8223_v9  ;;  %v8480_v63 = vsel %vm16583_vm4, %v11241_v45, %v8479_v33  ;;  %v11236_v45 = vld [vmem:[%s16313_s9 + $0x30] sm:$0xe] }
 0x350   : > { %v8481_v48 = vrot.slane %v8479_v33, 4  ;;  %v8488_v40 = vrot.slane %v17537_v10, 4  ;;  %v8489_v46 = vrot.slane %v16370_v14, 5  ;;  %v17538_v11 = vrot.slane %v16334_v31, 5 }
 0x351   : > { %12476 = vmatmul.mubr.bf16.gmra.mrb[12].mxu1 %v11110_v50  ;;  %v8224_v41 = vsel %vm16343_vm1, %v8219_v35, %v8223_v9  ;;  %v8229_v49 = vrot.slane %v8228_v61, 4  ;;  %v11242_v9 = vrot.slane %v11234_v5, 9  ;;  %v11243_v57 = vrot.slane %v11235_v62, 9  ;;  %v11237_v5 = vld [vmem:[%s16313_s9 + $0x3c] sm:$0xe]  ;;  %v13579_v50 = vld [vmem:[#allocation3 + $0x88] sm:$0xff]  }
 0x352   : > { %12495 = vmatprep.mubr.bf16.mxu1 %v11119_v26  ;;  %v8483_v16 = vsel %vm16583_vm4, %v8481_v48, %v17538_v11  ;;  %v8495_v23 = vrot.slane %v8493_v60, 4  ;;  %v8496_v8 = vrot.slane %v16404_v17, 5  ;;  %v7512_v14 = vrot.slane %v16322_v58, 5 }
 0x353   : > { %v8234_v36 = vsel %vm16343_vm1, %v8229_v49, %v8233_v4  ;;  %v11249_v43 = vcombine.low %v8480_v63, %v8483_v16  ;;  %v7519_v31 = vrot.slane %v16356_v34, 5  ;;  %v11120_v33 = vcombine.low %v16339_v39, %v16349_v37  ;;  %v13585_v16 = vld [vmem:[#allocation3 + $0x98] sm:$0xff]  }
 0x354   : > { %v11224_v18 = vcombine.low %v8224_v41, %v8234_v36  ;;  %v8490_v54 = vsel %vm16583_vm4, %v8488_v40, %v8489_v46  ;;  %v11121_v26 = vcombine.low %v16379_v55, %v16387_v6  ;;  %v17539_v62 = vmov %v17537_v10  ;;  %v16630_v6 = vld [vmem:[%s16313_s9 + $0x48] sm:$0xe]  ;;  %v16637_v41 = vld [vmem:[%s16313_s9 + $0x54] sm:$0xe]  ;;  %v16640_v40 = vld [vmem:[%s16313_s9 + $0x60] sm:$0xe] }
 0x355   : > { %v8487_v17 = vsel %vm16583_vm4, %v11242_v9, %v17539_v62  ;;  %v11244_v35 = vrot.slane %v11236_v45, 9  ;;  %v8500_v61 = vrot.slane %v16424_v47, 5  ;;  %v8507_v39 = vrot.slane %v16463_v3, 5  ;;  %v13580_v3 = vld [vmem:[#allocation3 + $0x188] sm:$0xff]  }
 0x356   : > { %12604 = vmatmul.mubr.bf16.gmra.mrb[12].mxu0 %v11224_v18  ;;  %v8494_v37 = vsel %vm16583_vm4, %v11243_v57, %v8493_v60  ;;  %v8497_v55 = vsel %vm16583_vm4, %v8495_v23, %v8496_v8  ;;  %v8503_v44 = vrot.slane %v16437_v38, 5  ;;  %v11245_v4 = vrot.slane %v11237_v5, 9  ;;  %v13584_v57 = vld [vmem:[#allocation3 + $0x190] sm:$0xff]   ;;  %v16658_v23 = vld [vmem:[%s16313_s9 + $0x4] sm:$0xf]  ;;  %v13589_v5 = vld [vmem:[#allocation3 + $0xa0] sm:$0xff]  }
 0x357   : > { %12623 = vmatprep.mubr.bf16.mxu0 %v11249_v43  ;;  %v8510_v63 = vrot.slane %v16469_v0, 5  ;;  %v8514_v48 = vrot.slane %v16491_v30, 5  ;;  %v11250_v47 = vcombine.low %v8487_v17, %v8490_v54  ;;  %v11251_v49 = vcombine.low %v8494_v37, %v8497_v55  ;;  %v13583_v0 = vld [vmem:[#allocation3 + $0x90] sm:$0xff]  }
 0x358   : > { %v8502_v60 = vrot.slane %v8500_v61, 4  ;;  %v8509_v10 = vrot.slane %v8507_v39, 4  ;;  %v11122_v38 = vcombine.low %v16407_v29, %v16414_v52  ;;  %v8501_v46 = vsel %vm16583_vm4, %v11244_v35, %v8500_v61  ;;  %v16675_v61 = vld [vmem:[%s16313_s9 + $0x10] sm:$0xf] }
 0x359   : > { %12496 = vmatmul.mubr.bf16.vlgmr.msra.gmra.mrb[0].mxu1 %v11120_v33  ;;  %v11246_v11 = vrot.slane %v16630_v6, 9  ;;  %v8516_v36 = vrot.slane %v8514_v48, 4  ;;  %v8517_v43 = vrot.slane %v16501_v51, 5  ;;  %v11247_v9 = vrot.slane %v16637_v41, 9  ;;  %v7480_v33 = vld [vmem:[%s16313_s9] sm:$0xe] }
 0x35a   : > { %12512 = vmatpush3.bf16.msra.mxu1 %v16503_v1  ;;  %12499 = vmatprep.mubr.bf16.mxu1 %v11121_v26  ;;  %v11123_v1 = vcombine.low %v16441_v7, %v16447_v56  ;;  %v8521_v29 = vrot.slane %v16533_v15, 5  ;;  %v8524_v45 = vrot.slane %v16538_v25, 5  ;;  %v11248_v7 = vrot.slane %v16640_v40, 9  ;;  %v13586_v26 = vld [vmem:[#allocation3 + $0x198] sm:$0xff]   ;;  %v7483_v6 = vld [vmem:[%s16313_s9 + $0x24] sm:$0xe] }
 0x35b   : > { %12513 = vmatprep.subr.bf16.mxu1 %v13579_v50  ;;  %v8528_v18 = vrot.slane %v16562_v12, 5  ;;  %v7509_v8 = vrot.slane %v16658_v23, 5  ;;  %v8504_v51 = vsel %vm16583_vm4, %v8502_v60, %v8503_v44  ;;  %v8508_v15 = vsel %vm16583_vm4, %v11245_v4, %v8507_v39  ;;  %v13590_v60 = vld [vmem:[#allocation3 + $0x1a0] sm:$0xff]  }
 0x35c   : > { %v8511_v25 = vsel %vm16583_vm4, %v8509_v10, %v8510_v63  ;;  %v11252_v54 = vcombine.low %v8501_v46, %v8504_v51  ;;  %v8523_v62 = vrot.slane %v8521_v29, 4  ;;  %v8531_v17 = vrot.slane %v16568_v24, 5  ;;  %v13591_v63 = vld [vmem:[#allocation3 + $0xa8] sm:$0xff]   ;;  %v16701_v10 = vld [vmem:[%s16313_s9 + $0x18] sm:$0xe]  ;;  %v13596_v24 = vld [vmem:[#allocation3 + $0x1b0] sm:$0xff]  }
 0x35d   : > { %v11135_v35 = vrot.slane %v7480_v33, 9  ;;  %v7516_v39 = vrot.slane %v16675_v61, 5  ;;  %v7530_v37 = vrot.slane %v16414_v52, 5  ;;  %v7511_v55 = vrot.slane %v7509_v8, 4  ;;  %v13705_v51 = vld [vmem:[%s16313_s9 + $0x1c] sm:$0xf] }
 0x35e   : > { %12624 = vmatmul.mubr.bf16.vlgmr.msra.gmra.mrb[0].mxu0 %v11250_v47  ;;  %12514 = vmatpush3.bf16.msra.mxu1 %v13579_v50  ;;  %v16672_v50 = vrot.slane %v8528_v18, 4  ;;  %v7533_v44 = vrot.slane %v16417_v53, 5  ;;  %v11124_v4 = vcombine.low %v16475_v59, %v16478_v19  ;;  %v11125_v47 = vcombine.low %v16508_v28, %v16514_v27  ;;  %v17540_v23 = vld [vmem:[#allocation21_spill] sm:$0xff] }
 0x35f   : > { %12640 = vmatpush3.bf16.msra.mxu0 %v16527_v21  ;;  %12627 = vmatprep.mubr.bf16.mxu0 %v11251_v49  ;;  %v11253_v21 = vcombine.low %v8508_v15, %v8511_v25  ;;  %v11138_v41 = vrot.slane %v7483_v6, 9  ;;  %v7532_v49 = vrot.slane %v7530_v37, 4  ;;  %v8515_v52 = vsel %vm16583_vm4, %v11246_v11, %v8514_v48  ;;  %v7485_v25 = vld [vmem:[%s16313_s9 + $0x3c] sm:$0xe] }
 0x360   : > { %12641 = vmatprep.subr.bf16.mxu0 %v13580_v3  ;;  %12515 = vmatprep.subr.bf16.mxu1 %v13583_v0  ;;  %v8518_v53 = vsel %vm16583_vm4, %v8516_v36, %v8517_v43  ;;  %v8522_v59 = vsel %vm16583_vm4, %v11247_v9, %v8521_v29  ;;  %v8525_v28 = vsel %vm16583_vm4, %v8523_v62, %v8524_v45  ;;  %v7537_v46 = vrot.slane %v16447_v56, 5  ;;  %v7484_v36 = vld [vmem:[%s16313_s9 + $0x30] sm:$0xe]  ;;  %v13592_v9 = vld [vmem:[#allocation3 + $0x1a8] sm:$0xff]  }
 0x361   : > { %12500 = vmatmul.mubr.bf16.gmra.mrb[4].mxu1 %v11122_v38  ;;  %v16705_v30 = vsel %vm16583_vm4, %v11138_v41, %v7530_v37  ;;  %v16709_v48 = vsel %vm16583_vm4, %v7532_v49, %v7533_v44  ;;  %v11126_v11 = vcombine.low %v16541_v22, %v16544_v2  ;;  %v7540_v43 = vrot.slane %v16454_v20, 5  ;;  %v13595_v22 = vld [vmem:[#allocation3 + $0xb0] sm:$0xff]   ;;  %v17541_v44 = vld [vmem:[#allocation22_spill] sm:$0xff]  ;;  %v13598_v41 = vld [vmem:[#allocation3 + $0x1b8] sm:$0xff]  }
 0x362   : > { %12516 = vmatpush3.bf16.msra.mxu1 %v13583_v0  ;;  %12503 = vmatprep.mubr.bf16.mxu1 %v11123_v1  ;;  %v11146_v0 = vcombine.low %v16705_v30, %v16709_v48  ;;  %v11254_v1 = vcombine.low %v8515_v52, %v8518_v53  ;;  %v11255_v29 = vcombine.low %v8522_v59, %v8525_v28  ;;  %v7539_v45 = vrot.slane %v7537_v46, 4  ;;  %v7487_v53 = vld [vmem:[%s16313_s9 + $0x54] sm:$0xe]  ;;  %v13612_v30 = vld [vmem:[#allocation3 + $0xe0] sm:$0xff]  }
 0x363   : > { %12642 = vmatpush3.bf16.msra.mxu0 %v13580_v3  ;;  %12517 = vmatprep.subr.bf16.mxu1 %v13585_v16  ;;  %v16688_v3 = vld [vmem:[%s16313_s9 + $0xc] sm:$0xe]  ;;  %v7510_v56 = vsel %vm16583_vm4, %v11135_v35, %v7509_v8  ;;  %v7513_v20 = vsel %vm16583_vm4, %v7511_v55, %v7512_v14  ;;  %v7523_v15 = vrot.slane %v13705_v51, 5  ;;  %v7544_v33 = vrot.slane %v16478_v19, 5  ;;  %v13597_v14 = vld [vmem:[#allocation3 + $0xb8] sm:$0xff]  }
 0x364   : > { %12643 = vmatprep.subr.bf16.mxu0 %v13584_v57  ;;  %v11136_v38 = vrot.slane %v16688_v3, 9  ;;  %v11137_v8 = vrot.slane %v16701_v10, 9  ;;  %v16740_v58 = vsel %vm16583_vm4, %v7539_v45, %v7540_v43  ;;  %v8529_v19 = vsel %vm16583_vm4, %v11248_v7, %v8528_v18  ;;  %v13600_v10 = vld [vmem:[#allocation3 + $0xc0] sm:$0xff]   ;;  %v13601_v45 = vld [vmem:[%s16313_s9 + $0x24] sm:$0xff]  }
 0x365   : > { %v7546_v37 = vrot.slane %v7544_v33, 4  ;;  %v8532_v12 = vsel %vm16583_vm4, %v16672_v50, %v8531_v17  ;;  %v11143_v40 = vcombine.low %v7510_v56, %v7513_v20  ;;  %v7525_v18 = vrot.slane %v7523_v15, 4  ;;  %v7486_v50 = vld [vmem:[%s16313_s9 + $0x48] sm:$0xe]  ;;  %v13602_v43 = vld [vmem:[#allocation3 + $0x1c0] sm:$0xff]  }
 0x366   : > { %12628 = vmatmul.mubr.bf16.gmra.mrb[4].mxu0 %v11252_v54  ;;  %12518 = vmatpush3.bf16.msra.mxu1 %v13585_v16  ;;  %v7518_v16 = vrot.slane %v7516_v39, 4  ;;  %v7547_v54 = vrot.slane %v17540_v23, 5  ;;  %v7551_v6 = vrot.slane %v16514_v27, 5  ;;  %v11141_v3 = vrot.slane %v7486_v50, 9  ;;  %v16812_v20 = vld [vmem:[%s16313_s9 + $0x20] sm:$0x1] }
 0x367   : > { %12644 = vmatpush3.bf16.msra.mxu0 %v13584_v57  ;;  %12631 = vmatprep.mubr.bf16.mxu0 %v11253_v21  ;;  %v11139_v57 = vrot.slane %v7484_v36, 9  ;;  %v11140_v21 = vrot.slane %v7485_v25, 9  ;;  %v7524_v52 = vsel %vm16583_vm4, %v11137_v8, %v7523_v15  ;;  %v7561_v61 = vrot.slane %v16553_v42, 5  ;;  %v13604_v25 = vld [vmem:[#allocation3 + $0x1c8] sm:$0xff]  }
 0x368   : > { %12645 = vmatprep.subr.bf16.mxu0 %v13586_v26  ;;  %12519 = vmatprep.subr.bf16.mxu1 %v13589_v5  ;;  %v16762_v55 = vsel %vm16583_vm4, %v7546_v37, %v7547_v54  ;;  %v7553_v27 = vrot.slane %v7551_v6, 4  ;;  %v7520_v49 = vsel %vm16583_vm4, %v7518_v16, %v7519_v31  ;;  %v16787_v34 = vsel %vm16583_vm4, %v11141_v3, %v7551_v6  ;;  %v13603_v16 = vld [vmem:[#allocation3 + $0xc8] sm:$0xff]   ;;  %v16821_v37 = vld [vmem:[%s16313_s9 + $0x28] sm:$0xf] }
 0x369   : > { %12504 = vmatmul.mubr.bf16.gmra.mrb[8].mxu1 %v11124_v4  ;;  %v16758_v7 = vsel %vm16583_vm4, %v11140_v21, %v7544_v33  ;;  %v7554_v4 = vrot.slane %v17541_v44, 5  ;;  %v11142_v28 = vrot.slane %v7487_v53, 9  ;;  %v13606_v33 = vld [vmem:[#allocation3 + $0xd0] sm:$0xff]   ;;  %v11302_v8 = vld [vmem:[%s16313_s9 + $0x24] sm:$0xf]  ;;  %v13607_v50 = vld [vmem:[%s16313_s9 + $0x3c] sm:$0xff]  }
 0x36a   : > { %12520 = vmatpush3.bf16.msra.mxu1 %v13589_v5  ;;  %12507 = vmatprep.mubr.bf16.mxu1 %v11125_v47  ;;  %v13706_v5 = vld [vmem:[%s16313_s9 + $0x20] sm:$0x1]  ;;  %v11148_v17 = vcombine.low %v16758_v7, %v16762_v55  ;;  %v7517_v47 = vsel %vm16583_vm4, %v11136_v38, %v7516_v39  ;;  %v13599_v39 = vld [vmem:[%s16313_s9 + $0x18] sm:$0xff]   ;;  %v13608_v21 = vld [vmem:[#allocation3 + $0x1d0] sm:$0xff]  }
 0x36b   : > { %12646 = vmatpush3.bf16.msra.mxu0 %v13586_v26  ;;  %12521 = vmatprep.subr.bf16.mxu1 %v13591_v63  ;;  %v16736_v26 = vsel %vm16583_vm4, %v11139_v57, %v7537_v46  ;;  %v7526_v62 = vrot.slane %v13706_v5, 5  ;;  %v16791_v31 = vsel %vm16583_vm4, %v7553_v27, %v7554_v4  ;;  %v11144_v38 = vcombine.low %v7517_v47, %v7520_v49  ;;  %v13610_v44 = vld [vmem:[#allocation3 + $0x1d8] sm:$0xff]   ;;  %v13611_v3 = vld [vmem:[%s16313_s9 + $0x48] sm:$0xff]  }
 0x36c   : > { %12647 = vmatprep.subr.bf16.mxu0 %v13590_v60  ;;  %v11147_v35 = vcombine.low %v16736_v26, %v16740_v58  ;;  %v9047_v4 = vshll.u32 %v16821_v37, 16  ;;  %v16837_v47 = vld [vmem:[%s16313_s9 + $0x34] sm:$0xf] }
 0x36d   : > { %v7527_v59 = vsel %vm16583_vm4, %v7525_v18, %v7526_v62  ;;  %v9041_v18 = vshll.u32 %v11302_v8, 16  ;;  %v9071_v53 = vshll.u32 %v16837_v47, 16 }
 0x36e   : > { %12632 = vmatmul.mubr.bf16.gmra.mrb[8].mxu0 %v11254_v1  ;;  %12522 = vmatpush3.bf16.msra.mxu1 %v13591_v63  ;;  %v11256_v63 = vcombine.low %v8529_v19, %v8532_v12  ;;  %v11145_v1 = vcombine.low %v7524_v52, %v7527_v59  ;;  %v13609_v19 = vld [vmem:[#allocation3 + $0xd8] sm:$0xff]   ;;  %v16824_v12 = vld [vmem:[%s16313_s9 + $0x2c] sm:$0x1] }
 0x36f   : > { %12648 = vmatpush3.bf16.msra.mxu0 %v13590_v60  ;;  %12635 = vmatprep.mubr.bf16.mxu0 %v11255_v29  ;;  %v7558_v60 = vrot.slane %v16544_v2, 5  ;;  %v11149_v2 = vcombine.low %v16787_v34, %v16791_v31  ;;  %v16807_v29 = vld [vmem:[%s16313_s9 + $0x1c] sm:$0xf]  ;;  %v9043_v26 = vrot.slane %v9041_v18, 5  ;;  %v9057_v58 = vshll.u32 %v16824_v12, 16  ;;  %v13623_v18 = vld [vmem:[%s16313_s9 + $0xc] sm:$0xff]  }
 0x370   : > { %12649 = vmatprep.subr.bf16.mxu0 %v13592_v9  ;;  %12523 = vmatprep.subr.bf16.mxu1 %v13595_v22  ;;  %v9023_v51 = vshll.u32 %v16807_v29, 16  ;;  %v9027_v15 = vshrl.u32 %v16807_v29, 16 }
 0x371   : > { %12508 = vmatmul.mubr.bf16.gmra.mrb[12].mxu1 %v11126_v11  ;;  %v7560_v42 = vrot.slane %v7558_v60, 4  ;;  %v16797_v46 = vsel %vm16583_vm4, %v11142_v28, %v7558_v60  ;;  %v9075_v60 = vshrl.u32 %v16837_v47, 16  ;;  %v16851_v28 = vld [vmem:[%s16313_s9 + $0x38] sm:$0x1] }
 0x372   : > { %12524 = vmatpush3.bf16.msra.mxu1 %v13595_v22  ;;  %12527 = vmatprep.mubr.bf16.mxu1 %v11143_v40  ;;  %v13605_v22 = vld [vmem:[%s16313_s9 + $0x30] sm:$0xff]   ;;  %v16818_v5 = vrot.slane %v9023_v51, 5  ;;  %v9029_v62 = vrot.slane %v9027_v15, 4  ;;  %v9038_v40 = vshrl.u32 %v11302_v8, 16  ;;  %v16889_v8 = vrot.slane %v9057_v58, 5 }
 0x373   : > { %12650 = vmatpush3.bf16.msra.mxu0 %v13592_v9  ;;  %12525 = vmatprep.subr.bf16.mxu1 %v13597_v14  ;;  %v16801_v11 = vsel %vm16583_vm4, %v7560_v42, %v7561_v61  ;;  %v11299_v9 = vld [vmem:[%s16313_s9 + $0x18] sm:$0xf] }
 0x374   : > { %12651 = vmatprep.subr.bf16.mxu0 %v13596_v24  ;;  %v11150_v36 = vcombine.low %v16797_v46, %v16801_v11  ;;  %v9014_v56 = vshrl.u32 %v11299_v9, 16  ;;  %v9017_v57 = vshll.u32 %v11299_v9, 16  ;;  %v9030_v48 = vor.u32 %v9029_v62, %v16818_v5  ;;  %v13614_v61 = vld [vmem:[#allocation3 + $0x1e0] sm:$0xff]   ;;  %v13617_v9 = vld [vmem:[%s16313_s9 + $0x60] sm:$0xff]  }
 0x376   : > { %12636 = vmatmul.mubr.bf16.gmra.mrb[12].mxu0 %v11256_v63  ;;  %12526 = vmatpush3.bf16.msra.mxu1 %v13597_v14  ;;  %v9016_v23 = vrot.slane %v9014_v56, 4  ;;  %v9019_v54 = vrot.slane %v9017_v57, 5  ;;  %v9033_v14 = vshll.u32 %v16812_v20, 16  ;;  %v9051_v63 = vshrl.u32 %v16821_v37, 16 }
 0x377   : > { %12652 = vmatpush3.bf16.msra.mxu0 %v13596_v24  ;;  %12655 = vmatprep.mubr.bf16.mxu0 %v13599_v39  ;;  %v11305_v24 = vld [vmem:[%s16313_s9 + $0x30] sm:$0xf]  ;;  %v16848_v39 = vrot.slane %v9047_v4, 5  ;;  %v16866_v57 = vrot.slane %v9071_v53, 5  ;;  %v16901_v4 = vld [vmem:[%s16313_s9 + $0x44] sm:$0x1] }
 0x378   : > { %12653 = vmatprep.subr.bf16.mxu0 %v13598_v41  ;;  %12543 = vmatprep.subr.bf16.mxu1 %v13600_v10  ;;  %v9020_v6 = vor.u32 %v9019_v54, %v9016_v23  ;;  %v16841_v27 = vrot.slane %v9033_v14, 5  ;;  %v9065_v52 = vshll.u32 %v11305_v24, 16  ;;  %v9053_v59 = vrot.slane %v9051_v63, 4  ;;  %v13616_v23 = vld [vmem:[#allocation3 + $0x1e8] sm:$0xff]   ;;  %v13618_v54 = vld [vmem:[#allocation3 + $0xf0] sm:$0xff]  }
 0x379   : > { %12528 = vmatmul.mubr.bf16.vlgmr.msra.gmra.mrb[0].mxu1 %v11144_v38  ;;  %v11308_v38 = vld [vmem:[%s16313_s9 + $0x3c] sm:$0xf] }
 0x37a   : > { %12544 = vmatpush3.bf16.msra.mxu1 %v13600_v10  ;;  %12531 = vmatprep.mubr.bf16.mxu1 %v11145_v1  ;;  %v16844_v49 = vrot.slane %v9020_v6, 4  ;;  %v16853_v10 = vrot.slane %v9030_v48, 4  ;;  %v9067_v56 = vrot.slane %v9065_v52, 5  ;;  %v9054_v51 = vor.u32 %v9053_v59, %v16848_v39 }
 0x37b   : > { %12654 = vmatpush3.bf16.msra.mxu0 %v13598_v41  ;;  %12545 = vmatprep.subr.bf16.mxu1 %v13603_v16  ;;  %v9040_v41 = vrot.slane %v9038_v40, 4  ;;  %v9086_v15 = vshrl.u32 %v11308_v38, 16  ;;  %v9089_v7 = vshll.u32 %v11308_v38, 16  ;;  %v13620_v40 = vld [vmem:[#allocation3 + $0x1f0] sm:$0xff]  }
 0x37c   : > { %12671 = vmatprep.subr.bf16.mxu0 %v13602_v43  ;;  %v9026_v34 = vsel %vm16343_vm1, %v16844_v49, %v16818_v5  ;;  %v9036_v31 = vsel %vm16343_vm1, %v16853_v10, %v16841_v27  ;;  %v13621_v5 = vld [vmem:[#allocation3 + $0xf8] sm:$0xff]   ;;  %v16894_v6 = vrot.slane %v9054_v51, 4  ;;  %v16919_v10 = vld [vmem:[%s16313_s9 + $0x58] sm:$0xf]  ;;  %v11317_v51 = vld [vmem:[%s16313_s9 + $0x60] sm:$0xf] }
 0x37d   : > { %v9044_v1 = vor.u32 %v9043_v26, %v9040_v41  ;;  %v9088_v63 = vrot.slane %v9086_v15, 4  ;;  %v16907_v27 = vld [vmem:[%s16313_s9 + $0x50] sm:$0x1]  ;;  %v11323_v52 = vcombine.low %v9026_v34, %v9036_v31  ;;  %v16933_v15 = vld [vmem:[%s16313_s9 + $0x64] sm:$0xf] }
 0x37e   : > { %12656 = vmatmul.mubr.bf16.vlgmr.msra.gmra.mrb[0].mxu0 %v13601_v45  ;;  %12546 = vmatpush3.bf16.msra.mxu1 %v13603_v16  ;;  %v16859_v16 = vld [vmem:[%s16313_s9 + $0x40] sm:$0xf]  ;;  %v9077_v45 = vrot.slane %v9075_v60, 4  ;;  %v13622_v49 = vld [vmem:[#allocation3 + $0x1f8] sm:$0xff]   ;;  %v9105_v60 = vshll.u32 %v16901_v4, 16  ;;  %v9129_v59 = vshll.u32 %v16907_v27, 16 }
 0x37f   : > { %12672 = vmatpush3.bf16.msra.mxu0 %v13602_v43  ;;  %12659 = vmatprep.mubr.bf16.mxu0 %v13605_v22  ;;  %v13613_v43 = vld [vmem:[%s16313_s9 + $0x54] sm:$0xff]   ;;  %v9081_v22 = vshll.u32 %v16851_v28, 16  ;;  %v9095_v55 = vshll.u32 %v16859_v16, 16 }
 0x380   : > { %12673 = vmatprep.subr.bf16.mxu0 %v13604_v25  ;;  %12547 = vmatprep.subr.bf16.mxu1 %v13606_v33 }
 0x381   : > { %12532 = vmatmul.mubr.bf16.gmra.mrb[4].mxu1 %v11146_v0  ;;  %v9062_v0 = vshrl.u32 %v11305_v24, 16 }
 0x382   : > { %12548 = vmatpush3.bf16.msra.mxu1 %v13606_v33  ;;  %12535 = vmatprep.mubr.bf16.mxu1 %v11147_v35  ;;  %v13615_v35 = vld [vmem:[#allocation3 + $0xe8] sm:$0xff]   ;;  %v16877_v33 = vld [vmem:[%s16313_s9 + $0x4c] sm:$0xf] }
 0x383   : > { %12674 = vmatpush3.bf16.msra.mxu0 %v13604_v25  ;;  %12549 = vmatprep.subr.bf16.mxu1 %v13609_v19  ;;  %v16855_v42 = vrot.slane %v9062_v0, 4  ;;  %v11311_v25 = vld [vmem:[%s16313_s9 + $0x48] sm:$0xf]  ;;  %v9119_v14 = vshll.u32 %v16877_v33, 16  ;;  %v9123_v62 = vshrl.u32 %v16877_v33, 16  ;;  %v13619_v0 = vld [vmem:[%s16313_s9 + $0x6c] sm:$0xff]  }
 0x384   : > { %12675 = vmatprep.subr.bf16.mxu0 %v13608_v21 }
 0x385   : > { %v9068_v24 = vor.u32 %v9067_v56, %v16855_v42  ;;  %v16912_v58 = vrot.slane %v9119_v14, 5  ;;  %v13624_v42 = vld [vmem:[%s16313_s9 + $0x18] sm:$0xff]  }
 0x386   : > { %12660 = vmatmul.mubr.bf16.gmra.mrb[4].mxu0 %v13607_v50  ;;  %12550 = vmatpush3.bf16.msra.mxu1 %v13609_v19  ;;  %v9113_v19 = vshll.u32 %v11311_v25, 16  ;;  %v9078_v50 = vor.u32 %v9077_v45, %v16866_v57 }
 0x387   : > { %12676 = vmatpush3.bf16.msra.mxu0 %v13608_v21  ;;  %12663 = vmatprep.mubr.bf16.mxu0 %v13611_v3  ;;  %v9110_v21 = vshrl.u32 %v11311_v25, 16  ;;  %v9091_v3 = vrot.slane %v9089_v7, 5  ;;  %v9069_v53 = vrot.slane %v9068_v24, 4  ;;  %v13627_v7 = vld [vmem:[%s16313_s9 + $0x24] sm:$0xff]   ;;  %v9147_v25 = vshrl.u32 %v16919_v10, 16 }
 0x388   : > { %12677 = vmatprep.subr.bf16.mxu0 %v13610_v44  ;;  %12551 = vmatprep.subr.bf16.mxu1 %v13612_v30  ;;  %v9115_v26 = vrot.slane %v9113_v19, 5  ;;  %v9079_v46 = vrot.slane %v9078_v50, 4  ;;  %v9171_v19 = vshrl.u32 %v16933_v15, 16  ;;  %v16955_v24 = vld [vmem:[%s16313_s9 + $0x5c] sm:$0x1] }
 0x389   : > { %12536 = vmatmul.mubr.bf16.gmra.mrb[8].mxu1 %v11148_v17  ;;  %v9099_v17 = vshrl.u32 %v16859_v16, 16  ;;  %v9112_v41 = vrot.slane %v9110_v21, 4  ;;  %v9092_v11 = vor.u32 %v9091_v3, %v9088_v63  ;;  %v9167_v21 = vshll.u32 %v16933_v15, 16  ;;  %v11320_v3 = vld [vmem:[%s16313_s9 + $0x6c] sm:$0xf] }
 0x38a   : > { %12552 = vmatpush3.bf16.msra.mxu1 %v13612_v30  ;;  %12539 = vmatprep.mubr.bf16.mxu1 %v11149_v2  ;;  %v16887_v2 = vrot.slane %v9044_v1, 4  ;;  %v16903_v30 = vrot.slane %v9095_v55, 5  ;;  %v9060_v1 = vsel %vm16343_vm1, %v16894_v6, %v16889_v8  ;;  %v16939_v55 = vrot.slane %v9105_v60, 5  ;;  %v16952_v6 = vld [vmem:[#allocation3 + $0x210] sm:$0xff]  }
 0x38b   : > { %12678 = vmatpush3.bf16.msra.mxu0 %v13610_v44  ;;  %12553 = vmatprep.subr.bf16.mxu1 %v13615_v35  ;;  %v16898_v44 = vrot.slane %v9081_v22, 5  ;;  %v9101_v48 = vrot.slane %v9099_v17, 4  ;;  %v9143_v17 = vshll.u32 %v16919_v10, 16  ;;  %v9093_v34 = vrot.slane %v9092_v11, 4 }
 0x38c   : > { %12679 = vmatprep.subr.bf16.mxu0 %v13614_v61  ;;  %v9050_v38 = vsel %vm16343_vm1, %v16887_v2, %v16848_v39  ;;  %v9074_v39 = vsel %vm16343_vm1, %v9069_v53, %v16866_v57  ;;  %v16948_v2 = vrot.slane %v9129_v59, 5  ;;  %v9158_v57 = vshrl.u32 %v11317_v51, 16 }
 0x38d   : > { %v9161_v8 = vshll.u32 %v11317_v51, 16  ;;  %v16957_v50 = vrot.slane %v9143_v17, 5  ;;  %v9098_v53 = vsel %vm16343_vm1, %v9093_v34, %v16903_v30  ;;  %v9182_v11 = vshrl.u32 %v11320_v3, 16 }
 0x38e   : > { %12664 = vmatmul.mubr.bf16.gmra.mrb[8].mxu0 %v13613_v43  ;;  %12554 = vmatpush3.bf16.msra.mxu1 %v13615_v35  ;;  %v9125_v35 = vrot.slane %v9123_v62, 4  ;;  %v13625_v43 = vld [vmem:[#allocation3 + $0x200] sm:$0xff]  }
 0x38f   : > { %12680 = vmatpush3.bf16.msra.mxu0 %v13614_v61  ;;  %12667 = vmatprep.mubr.bf16.mxu0 %v13617_v9  ;;  %v11314_v61 = vld [vmem:[%s16313_s9 + $0x54] sm:$0xf]  ;;  %v9116_v9 = vor.u32 %v9115_v26, %v9112_v41  ;;  %v9163_v41 = vrot.slane %v9161_v8, 5  ;;  %v16964_v26 = vrot.slane %v9167_v21, 5 }
 0x390   : > { %12681 = vmatprep.subr.bf16.mxu0 %v13616_v23  ;;  %12555 = vmatprep.subr.bf16.mxu1 %v13618_v54  ;;  %v9126_v56 = vor.u32 %v9125_v35, %v16912_v58  ;;  %v9134_v45 = vshrl.u32 %v11314_v61, 16  ;;  %v9137_v22 = vshll.u32 %v11314_v61, 16  ;;  %v9173_v35 = vrot.slane %v9171_v19, 4  ;;  %v16974_v61 = vld [vmem:[%s16313_s9 + $0x68] sm:$0x1] }
 0x391   : > { %12540 = vmatmul.mubr.bf16.gmra.mrb[12].mxu1 %v11150_v36  ;;  %v9102_v36 = vor.u32 %v9101_v48, %v16903_v30  ;;  %v9117_v14 = vrot.slane %v9116_v9, 4  ;;  %v16962_v48 = vld [vmem:[%s16313_s9 + $0x70] sm:$0xf]  ;;  %v9153_v9 = vshll.u32 %v16955_v24, 16 }
 0x392   : > { %12556 = vmatpush3.bf16.msra.mxu1 %v13618_v54  ;;  %12559 = vmatprep.mubr.bf16.mxu1 %v13623_v18  ;;  %v9084_v54 = vsel %vm16343_vm1, %v9079_v46, %v16898_v44  ;;  %v9127_v62 = vrot.slane %v9126_v56, 4  ;;  %v11324_v18 = vcombine.low %v9050_v38, %v9060_v1  ;;  %v9149_v44 = vrot.slane %v9147_v25, 4  ;;  %v13631_v46 = vld [vmem:[%s16313_s9 + $0x3c] sm:$0xff]   ;;  %v16980_v30 = vld [vmem:[#allocation3 + $0x218] sm:$0xff]  }
 0x393   : > { %12682 = vmatpush3.bf16.msra.mxu0 %v13616_v23  ;;  %12557 = vmatprep.subr.bf16.mxu1 %v13621_v5  ;;  %v16943_v23 = vld [vmem:[#allocation3 + $0x208] sm:$0xff]   ;;  %v9103_v31 = vrot.slane %v9102_v36, 4  ;;  %v11325_v63 = vcombine.low %v9074_v39, %v9084_v54  ;;  %v9185_v36 = vshll.u32 %v11320_v3, 16  ;;  %v9191_v59 = vshll.u32 %v16962_v48, 16 }
 0x394   : > { %12683 = vmatprep.subr.bf16.mxu0 %v13620_v40  ;;  %v9122_v38 = vsel %vm16343_vm1, %v9117_v14, %v16912_v58  ;;  %v9150_v1 = vor.u32 %v9149_v44, %v16957_v50  ;;  %v9132_v56 = vsel %vm16343_vm1, %v9127_v62, %v16948_v2  ;;  %v9155_v34 = vrot.slane %v9153_v9, 5  ;;  %v11343_v14 = vld [vmem:[%s16313_s9 + $0x48] sm:$0xe]  ;;  %v13634_v3 = vld [vmem:[#allocation3 + $0x228] sm:$0xff]  }
 0x395   : > { %v9187_v39 = vrot.slane %v9185_v36, 5  ;;  %v11327_v25 = vcombine.low %v9122_v38, %v9132_v56  ;;  %v9477_v2 = vrot.slane %v16877_v33, 5  ;;  %v13632_v62 = vld [vmem:[%s16313_s9 + $0x48] sm:$0xff]   ;;  %v9487_v56 = vrot.slane %v16955_v24, 5 }
 0x396   : > { %12668 = vmatmul.mubr.bf16.gmra.mrb[12].mxu0 %v13619_v0  ;;  %12558 = vmatpush3.bf16.msra.mxu1 %v13621_v5  ;;  %v9139_v5 = vrot.slane %v9137_v22, 5  ;;  %v9160_v0 = vrot.slane %v9158_v57, 4  ;;  %v9177_v22 = vshll.u32 %v16974_v61, 16  ;;  %v9151_v54 = vrot.slane %v9150_v1, 4  ;;  %v13633_v57 = vld [vmem:[#allocation3 + $0x220] sm:$0xff]   ;;  %v13637_v38 = vld [vmem:[#allocation3 + $0x230] sm:$0xff]  }
 0x397   : > { %12684 = vmatpush3.bf16.msra.mxu0 %v13620_v40  ;;  %12687 = vmatprep.mubr.bf16.mxu0 %v11323_v52  ;;  %v9136_v40 = vrot.slane %v9134_v45, 4  ;;  %v13628_v52 = vld [vmem:[%s16313_s9 + $0x30] sm:$0xff]   ;;  %v9174_v45 = vor.u32 %v9173_v35, %v16964_v26  ;;  %v9480_v35 = vrot.slane %v16907_v27, 5  ;;  %v11345_v1 = vld [vmem:[%s16313_s9 + $0x60] sm:$0xe] }
 0x398   : > { %12685 = vmatprep.subr.bf16.mxu0 %v13622_v49  ;;  %12991 = vmatprep.subr.bf16.mxu1 %v13625_v43  ;;  %v9179_v19 = vrot.slane %v9177_v22, 5 }
 0x399   : > { %12560 = vmatmul.mubr.bf16.vlgmr.msra.gmra.mrb[0].mxu1 %v13624_v42  ;;  %v9140_v60 = vor.u32 %v9139_v5, %v9136_v40  ;;  %v9195_v42 = vshrl.u32 %v16962_v48, 16  ;;  %v9175_v21 = vrot.slane %v9174_v45, 4  ;;  %v13635_v5 = vld [vmem:[%s16313_s9 + $0x54] sm:$0xff]  }
 0x39a   : > { %12999 = vmatpush3.bf16.msra.mxu1 %v13625_v43  ;;  %12563 = vmatprep.mubr.bf16.mxu1 %v13627_v7  ;;  %v9184_v7 = vrot.slane %v9182_v11, 4 }
 0x39b   : > { %12686 = vmatpush3.bf16.msra.mxu0 %v13622_v49  ;;  %12992 = vmatprep.subr.bf16.mxu1 %v16943_v23  ;;  %v9108_v49 = vsel %vm16343_vm1, %v9103_v31, %v16939_v55  ;;  %v9141_v51 = vrot.slane %v9140_v60, 4  ;;  %v16995_v55 = vrot.slane %v9191_v59, 5  ;;  %v9197_v17 = vrot.slane %v9195_v42, 4  ;;  %v17000_v31 = vld [vmem:[%s16313_s9 + $0x74] sm:$0x1] }
 0x39c   : > { %12703 = vmatprep.subr.bf16.mxu0 %v13625_v43  ;;  %v11326_v58 = vcombine.low %v9098_v53, %v9108_v49  ;;  %v9188_v33 = vor.u32 %v9187_v39, %v9184_v7  ;;  %v9201_v44 = vshll.u32 %v17000_v31, 16  ;;  %v9452_v60 = vrot.slane %v16812_v20, 5  ;;  %v11344_v20 = vld [vmem:[%s16313_s9 + $0x54] sm:$0xe] }
 0x39d   : > { %v9146_v40 = vsel %vm16343_vm1, %v9141_v51, %v16957_v50  ;;  %v9491_v42 = vrot.slane %v16933_v15, 5  ;;  %v11340_v51 = vld [vmem:[%s16313_s9 + $0x24] sm:$0xe]  ;;  %v11352_v24 = vrot.slane %v11344_v20, 9  ;;  %v13638_v7 = vld [vmem:[#allocation3 + $0x238] sm:$0xff]   ;;  %v9456_v39 = vrot.slane %v16821_v37, 5 }
 0x39e   : > { %12688 = vmatmul.mubr.bf16.vlgmr.msra.gmra.mrb[0].mxu0 %v11324_v18  ;;  %13000 = vmatpush3.bf16.msra.mxu1 %v16943_v23  ;;  %v9198_v18 = vor.u32 %v9197_v17, %v16995_v55  ;;  %v9203_v36 = vrot.slane %v9201_v44, 5  ;;  %v11353_v17 = vrot.slane %v11345_v1, 9  ;;  %v11389_v20 = vld [vmem:[%s17094_s16 + $0x48] sm:$0xf] }
 0x39f   : > { %12704 = vmatpush3.bf16.msra.mxu0 %v13625_v43  ;;  %12691 = vmatprep.mubr.bf16.mxu0 %v11325_v63  ;;  %v9164_v43 = vor.u32 %v9163_v41, %v9160_v0  ;;  %v11339_v63 = vld [vmem:[%s16313_s9 + $0x18] sm:$0xe]  ;;  %v11351_v0 = vrot.slane %v11343_v14, 9  ;;  %v9479_v41 = vrot.slane %v9477_v2, 4 }
 0x3a0   : > { %12705 = vmatprep.subr.bf16.mxu0 %v16943_v23  ;;  %12993 = vmatprep.subr.bf16.mxu1 %v16952_v6  ;;  %v11347_v53 = vrot.slane %v11339_v63, 9  ;;  %v9199_v11 = vrot.slane %v9198_v18, 4  ;;  %v9492_v14 = vsel %vm16583_vm4, %v11353_v17, %v9491_v42 }
 0x3a1   : > { %12564 = vmatmul.mubr.bf16.gmra.mrb[4].mxu1 %v13628_v52  ;;  %v9165_v8 = vrot.slane %v9164_v43, 4  ;;  %v9180_v52 = vsel %vm16343_vm1, %v9175_v21, %v9179_v19  ;;  %v9478_v59 = vsel %vm16583_vm4, %v11351_v0, %v9477_v2  ;;  %v13636_v43 = vld [vmem:[%s16313_s9 + $0x60] sm:$0xff]   ;;  %v9458_v19 = vrot.slane %v9456_v39, 4 }
 0x3a2   : > { %13001 = vmatpush3.bf16.msra.mxu1 %v16952_v6  ;;  %12567 = vmatprep.mubr.bf16.mxu1 %v13631_v46  ;;  %v9189_v46 = vrot.slane %v9188_v33, 4  ;;  %v9204_v15 = vsel %vm16343_vm1, %v9199_v11, %v9203_v36  ;;  %v9466_v33 = vrot.slane %v16851_v28, 5  ;;  %v9470_v0 = vrot.slane %v16859_v16, 5 }
 0x3a3   : > { %12706 = vmatpush3.bf16.msra.mxu0 %v16943_v23  ;;  %12994 = vmatprep.subr.bf16.mxu1 %v16980_v30  ;;  %v9449_v23 = vrot.slane %v16807_v29, 5  ;;  %v9156_v29 = vsel %vm16343_vm1, %v9151_v54, %v9155_v34  ;;  %v9170_v50 = vsel %vm16343_vm1, %v9165_v8, %v16964_v26  ;;  %v9494_v54 = vrot.slane %v16974_v61, 5  ;;  %v11341_v8 = vld [vmem:[%s16313_s9 + $0x30] sm:$0xe] }
 0x3a4   : > { %12707 = vmatprep.subr.bf16.mxu0 %v16952_v6  ;;  %v11328_v27 = vcombine.low %v9146_v40, %v9156_v29  ;;  %v11329_v26 = vcombine.low %v9170_v50, %v9180_v52  ;;  %v9194_v22 = vsel %vm16343_vm1, %v9189_v46, %v16995_v55  ;;  %v9463_v55 = vrot.slane %v16837_v47, 5 }
 0x3a5   : > { %v9451_v49 = vrot.slane %v9449_v23, 4  ;;  %v11348_v34 = vrot.slane %v11340_v51, 9  ;;  %v9498_v61 = vrot.slane %v16962_v48, 5  ;;  %v9459_v47 = vrot.slane %v16824_v12, 5 }
 0x3a6   : > { %12692 = vmatmul.mubr.bf16.gmra.mrb[4].mxu0 %v11326_v58  ;;  %13002 = vmatpush3.bf16.msra.mxu1 %v16980_v30  ;;  %v11349_v40 = vrot.slane %v11341_v8, 9  ;;  %v9501_v12 = vrot.slane %v17000_v31, 5  ;;  %v11375_v8 = vld [vmem:[%s17094_s16 + $0x10] sm:$0xf] }
 0x3a7   : > { %12708 = vmatpush3.bf16.msra.mxu0 %v16952_v6  ;;  %12695 = vmatprep.mubr.bf16.mxu0 %v11327_v25  ;;  %v9484_v6 = vrot.slane %v16919_v10, 5  ;;  %v9481_v10 = vsel %vm16583_vm4, %v9479_v41, %v9480_v35  ;;  %v9453_v45 = vsel %vm16583_vm4, %v9451_v49, %v9452_v60  ;;  %v9493_v25 = vrot.slane %v9491_v42, 4  ;;  %v11342_v35 = vld [vmem:[%s16313_s9 + $0x3c] sm:$0xe] }
 0x3a8   : > { %12709 = vmatprep.subr.bf16.mxu0 %v16980_v30  ;;  %12995 = vmatprep.subr.bf16.mxu1 %v13633_v57  ;;  %v11359_v58 = vcombine.low %v9478_v59, %v9481_v10  ;;  %v9500_v63 = vrot.slane %v9498_v61, 4  ;;  %v9457_v29 = vsel %vm16583_vm4, %v11348_v34, %v9456_v39  ;;  %v9464_v28 = vsel %vm16583_vm4, %v11349_v40, %v9463_v55 }
 0x3a9   : > { %12568 = vmatmul.mubr.bf16.gmra.mrb[8].mxu1 %v13632_v62  ;;  %v9486_v9 = vrot.slane %v9484_v6, 4  ;;  %v9485_v37 = vsel %vm16583_vm4, %v11352_v24, %v9484_v6  ;;  %v9495_v62 = vsel %vm16583_vm4, %v9493_v25, %v9494_v54  ;;  %v11350_v16 = vrot.slane %v11342_v35, 9  ;;  %v11390_v24 = vld [vmem:[%s17094_s16 + $0x4c] sm:$0xf] }
 0x3aa   : > { %13003 = vmatpush3.bf16.msra.mxu1 %v13633_v57  ;;  %12571 = vmatprep.mubr.bf16.mxu1 %v13635_v5  ;;  %v9465_v5 = vrot.slane %v9463_v55, 4  ;;  %v11361_v48 = vcombine.low %v9492_v14, %v9495_v62  ;;  %v9502_v52 = vsel %vm16583_vm4, %v9500_v63, %v9501_v12  ;;  %v9473_v49 = vrot.slane %v16901_v4, 5 }
 0x3ab   : > { %12710 = vmatpush3.bf16.msra.mxu0 %v16980_v30  ;;  %12996 = vmatprep.subr.bf16.mxu1 %v13634_v3  ;;  %v9450_v30 = vsel %vm16583_vm4, %v11347_v53, %v9449_v23  ;;  %v9488_v2 = vsel %vm16583_vm4, %v9486_v9, %v9487_v56  ;;  %v11346_v23 = vld [vmem:[%s16313_s9 + $0x6c] sm:$0xe]  ;;  %v9472_v53 = vrot.slane %v9470_v0, 4  ;;  %v9883_v9 = vshrl.u32 %v11377_v13, 16  ;;  %s17375_s9 = scalar_lea.sflag [#allocation5], %s244_s26 }
 0x3ac   : > { %12711 = vmatprep.subr.bf16.mxu0 %v13633_v57  ;;  %v11355_v21 = vcombine.low %v9450_v30, %v9453_v45  ;;  %v11360_v18 = vcombine.low %v9485_v37, %v9488_v2  ;;  %v11354_v44 = vrot.slane %v11346_v23, 9  ;;  %v9467_v41 = vsel %vm16583_vm4, %v9465_v5, %v9466_v33 }
 0x3ad   : > { %v11357_v6 = vcombine.low %v9464_v28, %v9467_v41  ;;  %v9474_v46 = vsel %vm16583_vm4, %v9472_v53, %v9473_v49  ;;  %v9886_v56 = vshll.u32 %v11377_v13, 16  ;;  %v9979_v45 = vshrl.u32 %v11389_v20, 16 }
 0x3ae   : > { %12696 = vmatmul.mubr.bf16.gmra.mrb[8].mxu0 %v11328_v27  ;;  %13004 = vmatpush3.bf16.msra.mxu1 %v13634_v3  ;;  %v9499_v50 = vsel %vm16583_vm4, %v11354_v44, %v9498_v61  ;;  %v9471_v27 = vsel %vm16583_vm4, %v11350_v16, %v9470_v0  ;;  %v9885_v17 = vrot.slane %v9883_v9, 4  ;;  %v9992_v37 = vshrl.u32 %v11390_v24, 16  ;;  %v11379_v0 = vld [vmem:[%s17094_s16 + $0x20] sm:$0x1] }
 0x3af   : > { %12712 = vmatpush3.bf16.msra.mxu0 %v13633_v57  ;;  %12699 = vmatprep.mubr.bf16.mxu0 %v11329_v26  ;;  %v11330_v57 = vcombine.low %v9194_v22, %v9204_v15  ;;  %v11362_v60 = vcombine.low %v9499_v50, %v9502_v52  ;;  %v11358_v11 = vcombine.low %v9471_v27, %v9474_v46  ;;  %v9982_v22 = vshll.u32 %v11389_v20, 16  ;;  %v11378_v15 = vld [vmem:[%s17094_s16 + $0x1c] sm:$0xf]  ;;  %v11391_v52 = vld [vmem:[%s17094_s16 + $0x50] sm:$0x1] }
 0x3b0   : > { %12713 = vmatprep.subr.bf16.mxu0 %v13634_v3  ;;  %12997 = vmatprep.subr.bf16.mxu1 %v13637_v38  ;;  %v9888_v25 = vrot.slane %v9886_v56, 5  ;;  %v9892_v54 = vshll.u32 %v11378_v15, 16  ;;  %v9896_v55 = vshrl.u32 %v11378_v15, 16  ;;  %v9981_v34 = vrot.slane %v9979_v45, 4 }
 0x3b1   : > { %12572 = vmatmul.mubr.bf16.gmra.mrb[12].mxu1 %v13636_v43  ;;  %v11386_v43 = vld [vmem:[%s17094_s16 + $0x3c] sm:$0xf]  ;;  %v9984_v2 = vrot.slane %v9982_v22, 5  ;;  %v9868_v5 = vshll.u32 %v11375_v8, 16  ;;  %v9872_v33 = vshrl.u32 %v11375_v8, 16  ;;  %v9994_v28 = vrot.slane %v9992_v37, 4 }
 0x3b2   : > { %13005 = vmatpush3.bf16.msra.mxu1 %v13637_v38  ;;  %12727 = vmatprep.mubr.bf16.mxu1 %v11359_v58  ;;  %v9958_v39 = vshll.u32 %v11386_v43, 16  ;;  %v9889_v40 = vor.u32 %v9888_v25, %v9885_v17  ;;  %v9894_v44 = vrot.slane %v9892_v54, 5  ;;  %v9898_v12 = vrot.slane %v9896_v55, 4  ;;  %v11388_v55 = vld [vmem:[%s17094_s16 + $0x44] sm:$0x1] }
 0x3b3   : > { %12714 = vmatpush3.bf16.msra.mxu0 %v13634_v3  ;;  %12998 = vmatprep.subr.bf16.mxu1 %v13638_v7  ;;  %v9460_v3 = vsel %vm16583_vm4, %v9458_v19, %v9459_v47  ;;  %v9985_v63 = vor.u32 %v9984_v2, %v9981_v34  ;;  %v9870_v49 = vrot.slane %v9868_v5, 5  ;;  %v9902_v20 = vshll.u32 %v11379_v0, 16 }
 0x3b4   : > { %12715 = vmatprep.subr.bf16.mxu0 %v13637_v38  ;;  %v11356_v31 = vcombine.low %v9457_v29, %v9460_v3  ;;  %v9960_v62 = vrot.slane %v9958_v39, 5  ;;  %v9890_v53 = vrot.slane %v9889_v40, 4  ;;  %v9899_v13 = vor.u32 %v9898_v12, %v9894_v44  ;;  %v11383_v40 = vld [vmem:[%s17094_s16 + $0x30] sm:$0xf] }
 0x3b5   : > { %v9998_v15 = vshll.u32 %v11391_v52, 16 }
 0x3b6   : > { %12700 = vmatmul.mubr.bf16.gmra.mrb[12].mxu0 %v11330_v57  ;;  %13006 = vmatpush3.bf16.msra.mxu1 %v13638_v7  ;;  %v9895_v2 = vsel %vm16343_vm1, %v9890_v53, %v9894_v44  ;;  %v9900_v8 = vrot.slane %v9899_v13, 4  ;;  %v9931_v53 = vshrl.u32 %v11383_v40, 16 }
 0x3b7   : > { %12716 = vmatpush3.bf16.msra.mxu0 %v13637_v38  ;;  %12719 = vmatprep.mubr.bf16.mxu0 %v11355_v21  ;;  %v11374_v38 = vld [vmem:[%s17094_s16 + $0xc] sm:$0xf]  ;;  %v9988_v21 = vshll.u32 %v11390_v24, 16 }
 0x3b8   : > { %12717 = vmatprep.subr.bf16.mxu0 %v13638_v7  ;;  %v9859_v58 = vshrl.u32 %v11374_v38, 16  ;;  %v9862_v51 = vshll.u32 %v11374_v38, 16  ;;  %v11376_v38 = vld [vmem:[%s17094_s16 + $0x14] sm:$0x1] }
 0x3b9   : > { %12728 = vmatmul.mubr.bf16.vlgmr.msra.gmra.mrb[16].mxu1 %v11360_v18  ;;  %v11387_v18 = vld [vmem:[%s17094_s16 + $0x40] sm:$0xf]  ;;  %v9990_v29 = vrot.slane %v9988_v21, 5  ;;  %v9878_v54 = vshll.u32 %v11376_v38, 16 }
 0x3ba   : > { %12731 = vmatprep.mubr.bf16.mxu1 %v11361_v48  ;;  %v9861_v61 = vrot.slane %v9859_v58, 4  ;;  %v9864_v19 = vrot.slane %v9862_v51, 5  ;;  %v9968_v50 = vshrl.u32 %v11387_v18, 16 }
 0x3bb   : > { %12718 = vmatpush3.bf16.msra.mxu0 %v13638_v7  ;;  %v9955_v7 = vshrl.u32 %v11386_v43, 16  ;;  %v9995_v22 = vor.u32 %v9994_v28, %v9990_v29  ;;  %v9880_v44 = vrot.slane %v9878_v54, 5 }
 0x3bc   : > { %v9865_v3 = vor.u32 %v9864_v19, %v9861_v61  ;;  %v9970_v39 = vrot.slane %v9968_v50, 4  ;;  %v10000_v19 = vrot.slane %v9998_v15, 5 }
 0x3bd   : > { %v9957_v14 = vrot.slane %v9955_v7, 4  ;;  %v9996_v61 = vrot.slane %v9995_v22, 4 }
 0x3be   : > { %12720 = vmatmul.mubr.bf16.vlgmr.msra.gmra.mrb[0].mxu0 %v11356_v31  ;;  %v9964_v31 = vshll.u32 %v11387_v18, 16  ;;  %v9866_v45 = vrot.slane %v9865_v3, 4  ;;  %v17127_v18 = vunpack.c.l.bf16 %v9895_v2 }
 0x3bf   : > { %12723 = vmatprep.mubr.bf16.mxu0 %v11357_v6  ;;  %v9961_v35 = vor.u32 %v9960_v62, %v9957_v14  ;;  %v10001_v52 = vsel %vm16343_vm1, %v9996_v61, %v10000_v19 }
 0x3c0   : > { %v9966_v7 = vrot.slane %v9964_v31, 5  ;;  %v9871_v37 = vsel %vm16343_vm1, %v9866_v45, %v9870_v49  ;;  %v9934_v45 = vshll.u32 %v11383_v40, 16 }
 0x3c1   : > { %12732 = vmatmul.mubr.bf16.gmra.mrb[20].mxu1 %v11362_v60  ;;  %v9874_v60 = vrot.slane %v9872_v33, 4  ;;  %v9962_v24 = vrot.slane %v9961_v35, 4  ;;  %v17138_v0 = vunpack.c.l.bf16 %v9871_v37 }
 0x3c2   : > { %v9971_v62 = vor.u32 %v9970_v39, %v9966_v7  ;;  %v17170_v39 = vrot.slane %v9931_v53, 4 }
 0x3c3   : > { %v9875_v25 = vor.u32 %v9874_v60, %v9870_v49  ;;  %v9967_v14 = vsel %vm16343_vm1, %v9962_v24, %v9966_v7 }
 0x3c4   : > { %v17144_v50 = vunpack.c.l.bf16 %v9967_v14 }
 0x3c6   : > { %12724 = vmatmul.mubr.bf16.gmra.mrb[4].mxu0 %v11358_v11  ;;  %v9986_v11 = vrot.slane %v9985_v63, 4 }
 0x3c8   : > { %v9991_v21 = vsel %vm16343_vm1, %v9986_v11, %v9990_v29  ;;  %v17134_v29 = vld [vmem:[%s17431_s4] ss:$0 sm:$0xff]  ;;  %v17153_v11 = vrot.slane %v9971_v62, 4 }
 0x3c9   : > { %v17136_v3 = vunpack.c.l.bf16 %v9991_v21  ;;  %v17188_v21 = vrot.slane %v9934_v45, 5 }
 0x46c   : > { %v17083_v36 = vpop.f32.mrb[0].mxu1 }
 0x46d   : > { %v17085_v26 = vpop.f32.mrb[1].mxu1 }
 0x46e   : > { %v17087_v59 = vpop.f32.mrb[2].mxu1 }
 0x46f   : > { %v17089_v10 = vpop.f32.mrb[3].mxu1 }
 0x474   : > { %v17097_v4 = vpop.f32.mrb[4].mxu1 }
 0x475   : > { %v17100_v42 = vpop.f32.mrb[5].mxu1 }
 0x476   : > { %v17103_v1 = vpop.f32.mrb[6].mxu1 }
 0x477   : > { %v17106_v30 = vpop.f32.mrb[7].mxu1 }
 0x47c   : > { %v12569_v57 = vpop.f32.mrb[8].mxu1 }
 0x47d   : > { %v7972_v47 = vpop.f32.mrb[9].mxu1 }
 0x47e   : > { %v12570_v23 = vpop.f32.mrb[10].mxu1 }
 0x47f   : > { %v7975_v48 = vpop.f32.mrb[11].mxu1 }
 0x481   : > { %v12697_v41 = vpop.f32.mrb[8].mxu0 }
 0x482   : > { %v13015_v6 = vadd.f32 %v12697_v41, %v12569_v57  ;;  %v9368_v16 = vpop.f32.mrb[9].mxu0  ;;  %v9904_v57 = vrot.slane %v9902_v20, 5 }
 0x483   : > { %v13017_v27 = vadd.f32 %v9368_v16, %v7972_v47  ;;  %v12698_v46 = vpop.f32.mrb[10].mxu0  ;;  %v17149_v16 = vld [vmem:[%s17094_s16 + $0x34] sm:$0xf] }
 0x484   : > { %v13019_v9 = vadd.f32 %v12698_v46, %v12570_v23  ;;  %v9371_v56 = vpop.f32.mrb[11].mxu0  ;;  %v12573_v43 = vpop.f32.mrb[12].mxu1  ;;  %v9974_v23 = vshll.u32 %v11388_v55, 16  ;;  %v9905_v28 = vsel %vm16343_vm1, %v9900_v8, %v9904_v57  ;;  %v9940_v24 = vshll.u32 %v17149_v16, 16 }
 0x485   : > { %v13021_v58 = vadd.f32 %v9371_v56, %v7975_v48  ;;  %v7988_v51 = vpop.f32.mrb[13].mxu1  ;;  %v9876_v48 = vrot.slane %v9875_v25, 4  ;;  %v17157_v38 = vunpack.c.l.bf16 %v9905_v28 }
 0x486   : > { %v12574_v17 = vpop.f32.mrb[14].mxu1  ;;  %v17155_v13 = vrot.slane %v9974_v23, 5  ;;  %v17192_v14 = vrot.slane %v9940_v24, 5 }
 0x487   : > { %v7991_v34 = vpop.f32.mrb[15].mxu1 }
 0x489   : > { %v12701_v47 = vpop.f32.mrb[12].mxu0 }
 0x48a   : > { %v17125_v5 = vadd.f32 %v12701_v47, %v12573_v43  ;;  %v9384_v33 = vpop.f32.mrb[13].mxu0  ;;  %v9881_v43 = vsel %vm16343_vm1, %v9876_v48, %v9880_v44 }
 0x48b   : > { %v17129_v63 = vadd.f32 %v9384_v33, %v7988_v51  ;;  %v12702_v12 = vpop.f32.mrb[14].mxu0  ;;  %v17164_v51 = vunpack.c.l.bf16 %v10001_v52 }
 0x48c   : > { %v17142_v41 = vadd.f32 %v12702_v12, %v12574_v17  ;;  %v9387_v35 = vpop.f32.mrb[15].mxu0  ;;  %v12729_v31 = vpop.f32.mrb[16].mxu1  ;;  %v9944_v17 = vshrl.u32 %v17149_v16, 16 }
 0x48d   : > { %v17151_v49 = vadd.f32 %v9387_v35, %v7991_v34  ;;  %v13016_v60 = vadd.f32 %v13015_v6, %v12729_v31  ;;  %v9666_v46 = vpop.f32.mrb[17].mxu1  ;;  %v9977_v34 = vsel %vm16343_vm1, %v17153_v11, %v17155_v13 }
 0x48e   : > { %v13018_v20 = vadd.f32 %v13017_v27, %v9666_v46  ;;  %v12730_v56 = vpop.f32.mrb[18].mxu1 }
 0x48f   : > { %v17162_v22 = vadd.f32 %v13016_v60, %v17134_v29  ;;  %v13020_v15 = vadd.f32 %v13019_v9, %v12730_v56  ;;  %v9669_v6 = vpop.f32.mrb[19].mxu1  ;;  %v17177_v9 = vunpack.c.l.bf16 %v9881_v43 }
 0x490   : > { %v17168_v7 = vadd.f32 %v13018_v20, %v17134_v29  ;;  %v13022_v27 = vadd.f32 %v13021_v58, %v9669_v6 }
 0x491   : > { %v12721_v25 = vpop.f32.mrb[0].mxu0  ;;  %v9746_v54 = vsub.f32 0.0, %v17162_v22  ;;  %v17175_v55 = vadd.f32 %v13020_v15, %v17134_v29 }
 0x492   : > { %v13007_v2 = vadd.f32 %v12721_v25, %v17083_v36  ;;  %v9634_v58 = vpop.f32.mrb[1].mxu0  ;;  %v9744_v8 = vsub.f32 0.0, %v17168_v7  ;;  %v17186_v57 = vadd.f32 %v13022_v27, %v17134_v29  ;;  %v11395_v27 = vld [vmem:[%s17094_s16 + $0x60] sm:$0xf] }
 0x493   : > { %v9772_v37 = vmul.f32 1.442695, %v9746_v54  ;;  %v13008_v61 = vadd.f32 %v9634_v58, %v17085_v26  ;;  %v12722_v19 = vpop.f32.mrb[2].mxu0  ;;  %v9747_v47 = vsub.f32 0.0, %v17175_v55 }
 0x494   : > { %v17195_v62 = vadd.f32 %v13007_v2, %v17134_v29  ;;  %v9768_v36 = vmul.f32 1.442695, %v9744_v8  ;;  %v13009_v23 = vadd.f32 %v12722_v19, %v17087_v59  ;;  %v9637_v40 = vpop.f32.mrb[3].mxu0  ;;  %v9745_v33 = vsub.f32 0.0, %v17186_v57  ;;  %v12733_v48 = vpop.f32.mrb[20].mxu1 }
 0x495   : > { %13639 = vpow2.f32 %v9772_v37  ;;  %v17200_v44 = vadd.f32 %v13008_v61, %v17134_v29  ;;  %v9774_v26 = vmul.f32 1.442695, %v9747_v47  ;;  %v13010_v12 = vadd.f32 %v9637_v40, %v17089_v10  ;;  %v9682_v28 = vpop.f32.mrb[21].mxu1  ;;  %v17230_v37 = vld [vmem:[%s17094_s16 + $0x64] sm:$0xf] }
 0x496   : > { %v9738_v35 = vsub.f32 0.0, %v17195_v62  ;;  %13641 = vpow2.f32 %v9768_v36  ;;  %v17205_v31 = vadd.f32 %v13009_v23, %v17134_v29  ;;  %v9770_v52 = vmul.f32 1.442695, %v9745_v33  ;;  %v12734_v59 = vpop.f32.mrb[22].mxu1  ;;  %v17237_v40 = vld [vmem:[%s17094_s16 + $0x24] sm:$0xf] }
 0x497   : > { %v9736_v53 = vsub.f32 0.0, %v17200_v44  ;;  %13643 = vpow2.f32 %v9774_v26  ;;  %v17209_v60 = vadd.f32 %v13010_v12, %v17134_v29  ;;  %v13024_v46 = vadd.f32 %v17125_v5, %v12733_v48  ;;  %v9685_v11 = vpop.f32.mrb[23].mxu1  ;;  %v11392_v26 = vld [vmem:[%s17094_s16 + $0x54] sm:$0xf] }
 0x498   : > { %v9756_v10 = vmul.f32 1.442695, %v9738_v35  ;;  %v9739_v13 = vsub.f32 0.0, %v17205_v31  ;;  %13645 = vpow2.f32 %v9770_v52  ;;  %v13026_v20 = vadd.f32 %v17129_v63, %v9682_v28 }
 0x499   : > { %v9752_v56 = vmul.f32 1.442695, %v9736_v53  ;;  %v9737_v43 = vsub.f32 0.0, %v17209_v60  ;;  %v12725_v45 = vpop.f32.mrb[4].mxu0  ;;  %v17216_v15 = vadd.f32 %v13024_v46, %v17134_v29  ;;  %v13028_v6 = vadd.f32 %v17142_v41, %v12734_v59 }
 0x49a   : > { %13647 = vpow2.f32 %v9756_v10  ;;  %v9758_v24 = vmul.f32 1.442695, %v9739_v13  ;;  %v13011_v5 = vadd.f32 %v12725_v45, %v17097_v4  ;;  %v9650_v25 = vpop.f32.mrb[5].mxu0  ;;  %v17222_v54 = vadd.f32 %v13026_v20, %v17134_v29 }
 0x49b   : > { %13649 = vpow2.f32 %v9752_v56  ;;  %v9754_v63 = vmul.f32 1.442695, %v9737_v43  ;;  %v9750_v2 = vsub.f32 0.0, %v17216_v15  ;;  %v13012_v58 = vadd.f32 %v9650_v25, %v17100_v42  ;;  %v12726_v8 = vpop.f32.mrb[6].mxu0 }
 0x49c   : > { %13651 = vpow2.f32 %v9758_v24  ;;  %v17227_v41 = vadd.f32 %v13011_v5, %v17134_v29  ;;  %v9748_v4 = vsub.f32 0.0, %v17222_v54  ;;  %v13013_v61 = vadd.f32 %v12726_v8, %v17103_v1  ;;  %v9653_v19 = vpop.f32.mrb[7].mxu0 }
 0x49d   : > { %13653 = vpow2.f32 %v9754_v63  ;;  %v17234_v47 = vunpack.c.l.bf16 %v9977_v34  ;;  %v9780_v36 = vmul.f32 1.442695, %v9750_v2  ;;  %v10027_v23 = vshrl.u32 %v11395_v27, 16 }
 0x49e   : > { %v9742_v42 = vsub.f32 0.0, %v17227_v41  ;;  %v10030_v33 = vshll.u32 %v11395_v27, 16  ;;  %v9776_v48 = vmul.f32 1.442695, %v9748_v4  ;;  %v13014_v12 = vadd.f32 %v9653_v19, %v17106_v30 }
 0x49f   : > { %v13640_v28 = vpop.eup %13639  ;;  %13655 = vpow2.f32 %v9780_v36  ;;  %v10036_v35 = vshll.u32 %v17230_v37, 16  ;;  %v17244_v1 = vadd.f32 %v13012_v58, %v17134_v29  ;;  %v13030_v34 = vadd.f32 %v17151_v49, %v9685_v11  ;;  %v17265_v36 = vld [vmem:[%s17094_s16 + $0x28] sm:$0xf] }
 0x4a0   : > { %v13642_v52 = vpop.eup %13641  ;;  %v9794_v59 = vadd.f32 1.0, %v13640_v28  ;;  %v9937_v53 = vor.u32 %v17188_v21, %v17170_v39  ;;  %v10040_v46 = vshrl.u32 %v17230_v37, 16  ;;  %13657 = vpow2.f32 %v9776_v48  ;;  %v11382_v37 = vld [vmem:[%s17094_s16 + $0x2c] sm:$0x1] }
 0x4a1   : > { %v13644_v10 = vpop.eup %13643  ;;  %v9792_v13 = vadd.f32 1.0, %v13642_v52  ;;  %v9907_v30 = vshrl.u32 %v17237_v40, 16  ;;  %v10003_v20 = vshrl.u32 %v11392_v26, 16  ;;  %v10006_v56 = vshll.u32 %v11392_v26, 16 }
 0x4a2   : > { %v13646_v43 = vpop.eup %13645  ;;  %13659 = vrcp.f32 %v9794_v59  ;;  %v9795_v45 = vadd.f32 1.0, %v13644_v10  ;;  %v9764_v24 = vmul.f32 1.442695, %v9742_v42  ;;  %v17252_v49 = vadd.f32 %v13013_v61, %v17134_v29 }
 0x4a3   : > { %13661 = vrcp.f32 %v9792_v13  ;;  %v9793_v11 = vadd.f32 1.0, %v13646_v43  ;;  %v9740_v39 = vsub.f32 0.0, %v17244_v1  ;;  %v17256_v21 = vadd.f32 %v13028_v6, %v17134_v29  ;;  %v17276_v43 = vld [vmem:[%s17094_s16 + $0x58] sm:$0xf] }
 0x4a4   : > { %v13648_v5 = vpop.eup %13647  ;;  %13663 = vrcp.f32 %v9795_v45  ;;  %v10029_v27 = vrot.slane %v10027_v23, 4  ;;  %v10032_v25 = vrot.slane %v10030_v33, 5  ;;  %v17259_v63 = vadd.f32 %v13014_v12, %v17134_v29 }
 0x4a5   : > { %v13650_v2 = vpop.eup %13649  ;;  %v9786_v58 = vadd.f32 1.0, %v13648_v5  ;;  %13665 = vrcp.f32 %v9793_v11  ;;  %v10005_v8 = vrot.slane %v10003_v20, 4  ;;  %v17262_v4 = vadd.f32 %v13030_v34, %v17134_v29 }
 0x4a6   : > { %v13652_v61 = vpop.eup %13651  ;;  %v9784_v19 = vadd.f32 1.0, %v13650_v2  ;;  %13667 = vpow2.f32 %v9764_v24  ;;  %v10008_v6 = vrot.slane %v10006_v56, 5  ;;  %v9743_v42 = vsub.f32 0.0, %v17252_v49 }
 0x4a7   : > { %v13654_v23 = vpop.eup %13653  ;;  %13669 = vrcp.f32 %v9786_v58  ;;  %v9787_v33 = vadd.f32 1.0, %v13652_v61  ;;  %v9760_v48 = vmul.f32 1.442695, %v9740_v39  ;;  %v9751_v26 = vsub.f32 0.0, %v17256_v21 }
 0x4a8   : > { %13671 = vrcp.f32 %v9784_v19  ;;  %v9785_v12 = vadd.f32 1.0, %v13654_v23  ;;  %v9910_v29 = vshll.u32 %v17237_v40, 16  ;;  %v9741_v28 = vsub.f32 0.0, %v17259_v63 }
 0x4a9   : > { %v13656_v34 = vpop.eup %13655  ;;  %13673 = vrcp.f32 %v9787_v33  ;;  %v17271_v52 = vrot.slane %v10036_v35, 5  ;;  %v9916_v59 = vshll.u32 %v17265_v36, 16  ;;  %v9749_v10 = vsub.f32 0.0, %v17262_v4 }
 0x4aa   : > { %v13658_v13 = vpop.eup %13657  ;;  %13675 = vrcp.f32 %v9785_v12  ;;  %v9798_v20 = vadd.f32 1.0, %v13656_v34  ;;  %v10033_v56 = vor.u32 %v10032_v25, %v10029_v27  ;;  %v9766_v45 = vmul.f32 1.442695, %v9743_v42 }
 0x4ab   : > { %13677 = vpow2.f32 %v9760_v48  ;;  %v9796_v24 = vadd.f32 1.0, %v13658_v13  ;;  %v10009_v40 = vor.u32 %v10008_v6, %v10005_v8  ;;  %v9782_v11 = vmul.f32 1.442695, %v9751_v26 }
 0x4ac   : > { %v13660_v39 = vpop.eup %13659  ;;  %v17278_v5 = vrot.slane %v9937_v53, 4  ;;  %13679 = vrcp.f32 %v9798_v20  ;;  %v17280_v35 = vrot.slane %v9907_v30, 4  ;;  %v9762_v2 = vmul.f32 1.442695, %v9741_v28 }
 0x4ad   : > { %v13662_v58 = vpop.eup %13661  ;;  %v9826_v61 = vmul.f32 %v13660_v39, %v17162_v22  ;;  %13681 = vrcp.f32 %v9796_v24  ;;  %v10012_v27 = vshll.u32 %v17276_v43, 16  ;;  %v9778_v25 = vmul.f32 1.442695, %v9749_v10 }
 0x4ae   : > { %v13664_v19 = vpop.eup %13663  ;;  %v9824_v42 = vmul.f32 %v13662_v58, %v17168_v7  ;;  %v10034_v8 = vrot.slane %v10033_v56, 4  ;;  %v9912_v6 = vrot.slane %v9910_v29, 5  ;;  %13683 = vpow2.f32 %v9766_v45 }
 0x4af   : > { %v13666_v53 = vpop.eup %13665  ;;  %v10092_v23 = vadd.f32 %v17136_v3, %v9826_v61  ;;  %v9827_v30 = vmul.f32 %v13664_v19, %v17175_v55  ;;  %v10010_v33 = vrot.slane %v10009_v40, 4  ;;  %13685 = vpow2.f32 %v9782_v11 }
 0x4b0   : > { %v13668_v22 = vpop.eup %13667  ;;  %v10090_v48 = vadd.f32 %v17144_v50, %v9824_v42  ;;  %v9825_v26 = vmul.f32 %v13666_v53, %v17186_v57  ;;  %v9920_v12 = vshrl.u32 %v17265_v36, 16  ;;  %13687 = vpow2.f32 %v9762_v2  ;;  %v11385_v2 = vld [vmem:[%s17094_s16 + $0x38] sm:$0x1] }
 0x4b1   : > { %v13670_v7 = vpop.eup %13669  ;;  %10108 = vst [vmem:[%s13991_s17 + $0x50] sm:$0xff] %v10092_v23  ;;  %v10093_v29 = vadd.f32 %v17164_v51, %v9827_v30  ;;  %v9790_v28 = vadd.f32 1.0, %v13668_v22  ;;  %v17292_v3 = vrot.slane %v10012_v27, 5  ;;  %13689 = vpow2.f32 %v9778_v25 }
 0x4b2   : > { %v13672_v55 = vpop.eup %13671  ;;  %v9818_v34 = vmul.f32 %v13670_v7, %v17195_v62  ;;  %10106 = vst [vmem:[%s13991_s17 + $0x40] sm:$0xff] %v10090_v48  ;;  %v10091_v50 = vadd.f32 %v17234_v47, %v9825_v26  ;;  %v10039_v57 = vsel %vm16343_vm1, %v10034_v8, %v17271_v52  ;;  %v17300_v36 = vrot.slane %v9916_v59, 5 }
 0x4b3   : > { %v13674_v10 = vpop.eup %13673  ;;  %v9816_v51 = vmul.f32 %v13672_v55, %v17200_v44  ;;  %10109 = vst [vmem:[%s13991_s17 + $0x58] sm:$0xff] %v10093_v29  ;;  %13691 = vrcp.f32 %v9790_v28  ;;  %v9943_v62 = vsel %vm16343_vm1, %v17278_v5, %v17192_v14  ;;  %v10015_v47 = vsel %vm16343_vm1, %v10010_v33, %v17292_v3 }
 0x4b4   : > { %v13676_v13 = vpop.eup %13675  ;;  %v10084_v59 = vadd.f32 %v17127_v18, %v9818_v34  ;;  %v9819_v20 = vmul.f32 %v13674_v10, %v17205_v31  ;;  %10107 = vst [vmem:[%s13991_s17 + $0x48] sm:$0xff] %v10091_v50  ;;  %v9913_v44 = vor.u32 %v9912_v6, %v17280_v35  ;;  %v10016_v56 = vshrl.u32 %v17276_v43, 16  ;;  %v11394_v6 = vld [vmem:[%s17094_s16 + $0x5c] sm:$0x1] }
 0x4b5   : > { %v13678_v45 = vpop.eup %13677  ;;  %v10082_v24 = vadd.f32 %v17138_v0, %v9816_v51  ;;  %v9817_v40 = vmul.f32 %v13676_v13, %v17209_v60  ;;  %v10080_v11 = vunpack.c.l.bf16 %v10039_v57  ;;  %v9946_v39 = vrot.slane %v9944_v17, 4  ;;  %v11397_v17 = vld [vmem:[%s17094_s16 + $0x68] sm:$0x1]  ;;  %s13735_s16 = scalar_lea.vmem %s17368_s22, 2048 }
 0x4b6   : > { %v13680_v18 = vpop.eup %13679  ;;  %10100 = vst [vmem:[%s13991_s17 + $0x10] sm:$0xff] %v10084_v59  ;;  %v10085_v31 = vadd.f32 %v17157_v38, %v9819_v20  ;;  %v9788_v5 = vadd.f32 1.0, %v13678_v45  ;;  %v10078_v35 = vunpack.c.l.bf16 %v10015_v47  ;;  %v10042_v43 = vrot.slane %v10040_v46, 4  ;;  %p13736_p10 = scmp.ne.s32.totalorder %s17368_s22, %s13735_s16  ;;  %p13743_p6 = scmp.lt.s32.totalorder %s13741_s10, %s13735_s16 }
 0x4b7   : > { %v13682_v0 = vpop.eup %13681  ;;  %10098 = vst [vmem:[%s13991_s17] sm:$0xff] %v10082_v24  ;;  %v10083_v60 = vadd.f32 %v17177_v9, %v9817_v40  ;;  %v10072_v58 = vunpack.c.l.bf16 %v9943_v62  ;;  %v9830_v16 = vmul.f32 %v13680_v18, %v17216_v15  ;;  %v9922_v61 = vrot.slane %v9920_v12, 4 }
 0x4b8   : > { %v13684_v27 = vpop.eup %13683  ;;  %10101 = vst [vmem:[%s13991_s17 + $0x18] sm:$0xff] %v10085_v31  ;;  %13693 = vrcp.f32 %v9788_v5  ;;  %v9914_v38 = vrot.slane %v9913_v44, 4  ;;  %v9828_v25 = vmul.f32 %v13682_v0, %v17222_v54  ;;  %v10018_v46 = vrot.slane %v10016_v56, 4  ;;  %p13737_p0 = pnand %p13736_p10, %p17542_p12  ;;  %p13744_p7 = por %p13743_p6, %p13742_p5 }
 0x4b9   : > { %v13686_v19 = vpop.eup %13685  ;;  %10099 = vst [vmem:[%s13991_s17 + $0x8] sm:$0xff] %v10083_v60  ;;  %v10096_v42 = vadd.f32 %v10080_v11, %v9830_v16  ;;  %v9791_v9 = vadd.f32 1.0, %v13684_v27  ;;  %v9947_v8 = vor.u32 %v9946_v39, %v17192_v14  ;;  %v9950_v15 = vshll.u32 %v11385_v2, 16 }
 0x4ba   : > { %v13688_v53 = vpop.eup %13687  ;;  %v10094_v23 = vadd.f32 %v10078_v35, %v9828_v25  ;;  %v9799_v30 = vadd.f32 1.0, %v13686_v19  ;;  %v10043_v33 = vor.u32 %v10042_v43, %v17271_v52  ;;  %v10046_v22 = vshll.u32 %v11397_v17, 16  ;;  %p13738_p2 = pneg %p13737_p0 }
 0x4bb   : > { %v13690_v48 = vpop.eup %13689  ;;  %10112 = vst [vmem:[%s13991_s17 + $0x70] sm:$0xff] %v10096_v42  ;;  %13695 = vrcp.f32 %v9791_v9  ;;  %v9789_v54 = vadd.f32 1.0, %v13688_v53  ;;  %v9923_v26 = vor.u32 %v9922_v61, %v17300_v36  ;;  %v9926_v12 = vshll.u32 %v11382_v37, 16 }
 0x4bc   : > { %10110 = vst [vmem:[%s13991_s17 + $0x60] sm:$0xff] %v10094_v23  ;;  %13697 = vrcp.f32 %v9799_v30  ;;  %v9797_v7 = vadd.f32 1.0, %v13690_v48  ;;  %v10019_v14 = vor.u32 %v10018_v46, %v17292_v3  ;;  %v10022_v29 = vshll.u32 %v11394_v6, 16  ;;  %p13745_p9 = pnand %p13744_p7, %p13738_p2 }
 0x4bd   : > { %v13692_v28 = vpop.eup %13691  ;;  %v9919_v52 = vsel %vm16343_vm1, %v9914_v38, %v17300_v36  ;;  %v9948_v55 = vrot.slane %v9947_v8, 4  ;;  %v9952_v34 = vrot.slane %v9950_v15, 5  ;;  %13699 = vrcp.f32 %v9789_v54 }
 0x4be   : > { %v9822_v50 = vmul.f32 %v13692_v28, %v17227_v41  ;;  %v10044_v57 = vrot.slane %v10043_v33, 4  ;;  %v10048_v10 = vrot.slane %v10046_v22, 5  ;;  %13701 = vrcp.f32 %v9797_v7 }
 0x4bf   : > { %v9924_v51 = vrot.slane %v9923_v26, 4  ;;  %v9928_v62 = vrot.slane %v9926_v12, 5  ;;  %v10020_v47 = vrot.slane %v10019_v14, 4  ;;  %v10024_v13 = vrot.slane %v10022_v29, 5 }
 0x4c0   : > { %v10088_v3 = vadd.f32 %v10072_v58, %v9822_v50  ;;  %v10070_v59 = vunpack.c.l.bf16 %v9919_v52  ;;  %v9953_v20 = vsel %vm16343_vm1, %v9948_v55, %v9952_v34  ;;  %v10049_v41 = vsel %vm16343_vm1, %v10044_v57, %v10048_v10 }
 0x4c1   : > { %v9929_v56 = vsel %vm16343_vm1, %v9924_v51, %v9928_v62  ;;  %v10073_v45 = vunpack.c.l.bf16 %v9953_v20  ;;  %v10025_v24 = vsel %vm16343_vm1, %v10020_v47, %v10024_v13  ;;  %v10081_v39 = vunpack.c.l.bf16 %v10049_v41 }
 0x4c2   : > { %v13694_v36 = vpop.eup %13693  ;;  %10104 = vst [vmem:[%s13991_s17 + $0x30] sm:$0xff] %v10088_v3  ;;  %v10071_v5 = vunpack.c.l.bf16 %v9929_v56  ;;  %v10079_v2 = vunpack.c.l.bf16 %v10025_v24 }
 0x4c3   : > { %v9820_v44 = vmul.f32 %v13694_v36, %v17244_v1 }
 0x4c5   : > { %v13696_v40 = vpop.eup %13695  ;;  %v10086_v11 = vadd.f32 %v10070_v59, %v9820_v44 }
 0x4c6   : > { %v13698_v18 = vpop.eup %13697  ;;  %v9823_v31 = vmul.f32 %v13696_v40, %v17252_v49 }
 0x4c7   : > { %v13700_v35 = vpop.eup %13699  ;;  %10102 = vst [vmem:[%s13991_s17 + $0x20] sm:$0xff] %v10086_v11  ;;  %v9831_v1 = vmul.f32 %v13698_v18, %v17256_v21 }
 0x4c8   : > { %v13702_v32 = vpop.eup %13701  ;;  %v10089_v43 = vadd.f32 %v10073_v45, %v9823_v31  ;;  %v9821_v0 = vmul.f32 %v13700_v35, %v17259_v63 }
 0x4c9   : > { %v10097_v60 = vadd.f32 %v10081_v39, %v9831_v1  ;;  %v9829_v49 = vmul.f32 %v13702_v32, %v17262_v4 }
 0x4ca   : > { %10105 = vst [vmem:[%s13991_s17 + $0x38] sm:$0xff] %v10089_v43  ;;  %v10087_v58 = vadd.f32 %v10071_v5, %v9821_v0 }
 0x4cb   : > { %10113 = vst [vmem:[%s13991_s17 + $0x78] sm:$0xff] %v10097_v60  ;;  %v10095_v21 = vadd.f32 %v10079_v2, %v9829_v49 }
 0x4cc   : > { %10103 = vst [vmem:[%s13991_s17 + $0x28] sm:$0xff] %v10087_v58 }
 0x4cd   : > { %10111 = vst [vmem:[%s13991_s17 + $0x68] sm:$0xff] %v10095_v21 }
 0x4ce   : > { %13748 = shalt.err (!%p13745_p9)
}
 0x4cf   : > { %s13749_s26 = scalar_lea.hbm %s17366_s6, 2048  ;;  %s13753_s14 = scalar_lea.hbm %s17432_s5, 8192 }
 0x4d0   : > { %p13750_p11 = scmp.ne.s32.totalorder %s17366_s6, %s13749_s26  ;;  %p13754_p4 = scmp.lt.u32.totalorder %s17366_s6, %s17432_s5 }
 0x4d1   : > { %p13755_p3 = scmp.lt.u32.totalorder %s13753_s14, %s13749_s26  ;;  %p13757_p10 = scmp.lt.u32.totalorder %s13749_s26, %s17366_s6 }
 0x4d2   : > { %p13751_p13 = pnand %p13750_p11, %p17542_p12 }
 0x4d3   : > { %p13756_p8 = por %p13755_p3, %p13754_p4 }
 0x4d4   : > { %p13752_p1 = pneg %p13751_p13 }
 0x4d5   : > { %p13758_p0 = por %p13757_p10, %p13756_p8 }
 0x4d7   : > { %p13759_p2 = pnand %p13758_p0, %p13752_p1 }
 0x4d9   : > { %13762 = shalt.err (!%p13759_p2)
}
 0x4da   : > { %s13840_s27 = smov 128   ;;  %s13841_s16 = smov 8  }
 0x4db   : > { %13140 = dma.vmem_to_hbm [thread:$0]  (%p17542_p12), %s17368_s22, 2048, %s17366_s6, %s17375_s9, %s13840_s27, %s13840_s27, %s13841_s16  }
 0x4dc PF: > { %p13152_p5 = scmp.ge.s32.totalorder %s13833_s25, 2  ;;  %s10146_s11 = sand.u32 1, %s13805_s18  }
 0x4dd   : > { %p17543_p6 = scmp.ne.s32.totalorder %s17459_s8, 0  ;;  %s10147_s30 = scalar_lea.sflag [#allocation5], %s10146_s11 }
 0x4df   : > { %p13147_p7 = pnand %p13152_p5, %p17543_p6 }
 0x4e1   : > { %13800 = dma.done.wait (!%p13147_p7), %s10147_s30, 2048  }
 0x4e2   : > { %13802 = vsyncadd (!%p13147_p7), %s10147_s30, 4294965248  ;;  %s19_s25 = sadd.s32 1, %s13833_s25   ;;  %s17544_s18 = smov %s13809_s19 }
 0x4e3   : > { %p16_p9 = scmp.ge.s32.totalorder %s19_s25, 6   ;;  %s17545_s19 = smov %s13813_s20 }
 0x4e4   : > { %s17546_s20 = smov %s13951_s13  ;;  %s17547_s21 = smov %s13825_s23 }
 0x4e5   : > { %s17548_s22 = smov %s13829_s24  ;;  %s17549_s23 = smov %s17552_s28 }
 0x4e6   : > { %s17550_s24 = smov %s17556_s29  ;;  %18 = sbr.rel (!%p16_p9) target bundleno = 6 (0x6), region = 113 }
 0x4ed   :  { %10152 = vsyncpa [#allocation4], 1 }
 0x4ee   :  { %10154 = vsyncpa [#allocation4 + $0x1], 1 }
 0x4ef   :  { %10155 = vsyncpa [#allocation5], 1 }
 0x4f0   :  { %10157 = vsyncpa [#allocation5 + $0x1], 1 }

</bundles_post_ra>
